<compile_context>
chip_gen: v6e
topology: v6e:2x2x1
jax: 0.10.0
libtpu: 0.0.40
codegen_flags: <defaults>
</compile_context>

<pallas_src>
import jax
import jax.numpy as jnp
from jax.experimental import pallas as pl
from jax.experimental.pallas import tpu as pltpu

# ---------------- small model config ----------------
IMG = 32          # H = W
PATCH = 16        # patch size
IN_C = 3          # per-frame channels (C)
T_FRAMES = 3      # frames (T); patch_embed in_c = in_c*3 == T*C == 9
OUT_CHANS = 3
EMBED = 32
DEPTH = 2
HEADS = 4
MLP_RATIO = 4.0
EPS = 1e-6

H_GRID = IMG // PATCH          # 2
W_GRID = IMG // PATCH          # 2
NPATCH = H_GRID * W_GRID       # 4
HEAD_DIM = EMBED // HEADS      # 8
SCALE = HEAD_DIM ** -0.5
MLP_HIDDEN = int(EMBED * MLP_RATIO)   # 128
INV_SQRT2 = 0.7071067811865476

TC = T_FRAMES * IN_C           # 9
K_PATCH = TC * PATCH * PATCH   # 2304

# decoder (ConvTranspose2d, stride == kernel)
C1 = OUT_CHANS * 16            # 48
C2 = OUT_CHANS * 4             # 12
C3 = OUT_CHANS * 3             # 9
K1, K2, K3 = 2, 2, 4
DEC_COLS = (K1 * K1) * (K2 * K2) * (K3 * K3) * C3   # 2304 (= 18 * 128, lane dense)


# ---------------- fused forward kernel (one grid step == one batch element) ----------------
def _vit_kernel(patches_ref, wpatch_ref, biaspos_ref,
                g1_ref, bt1_ref, wqkv_ref, bqkv_ref, wp_ref, bp_ref,
                g2_ref, bt2_ref, w1_ref, bb1_ref, w2_ref, bb2_ref,
                ng_ref, nb_ref,
                w1f_ref, b1f_ref, w2bd_ref, b2bd_ref, w3bd_ref, b3bd_ref,
                out_ref):
    f32 = jnp.float32

    def ln(x, g, b):
        # one-pass stats: var = E[x^2] - mu^2 (single dependent lane-reduce chain)
        mu = jnp.mean(x, axis=-1, keepdims=True)
        ms = jnp.mean(x * x, axis=-1, keepdims=True)
        var = ms - mu * mu
        return (x - mu) * jax.lax.rsqrt(var + EPS) * g + b

    def gelu(x):                      # nn.GELU() default (exact erf form)
        return 0.5 * x * (1.0 + jax.lax.erf(x * INV_SQRT2))

    # ---- patch embed (+ bias + pos): [N, D] ----
    tok = jnp.dot(patches_ref[0], wpatch_ref[...],
                  preferred_element_type=f32) + biaspos_ref[...]

    def split_heads(m, base):
        # lane block of [N, H*d] starting at `base` -> [H, N, d]
        # (stack of static lane slices; avoids a 3-D lax.transpose)
        return jnp.stack(
            [m[:, base + h * HEAD_DIM: base + (h + 1) * HEAD_DIM]
             for h in range(HEADS)], axis=0)

    def block(x, l):
        xn = ln(x, g1_ref[l], bt1_ref[l])
        # fused QKV: one [N,D]x[D,3D] MXU push per layer
        qkv = jnp.dot(xn, wqkv_ref[l], preferred_element_type=f32) + bqkv_ref[l]
        q = split_heads(qkv, 0)
        k = split_heads(qkv, EMBED)
        v = split_heads(qkv, 2 * EMBED)
        s = jnp.einsum('hnd,hmd->hnm', q, k, preferred_element_type=f32) * SCALE
        p = jax.nn.softmax(s, axis=-1)
        o = jnp.einsum('hnm,hmd->hnd', p, v, preferred_element_type=f32)   # [H, N, d]
        # merge heads back into (h, d) lane order, then ONE [N,D]x[D,D] projection
        om = jnp.concatenate([o[h] for h in range(HEADS)], axis=-1)        # [N, D]
        attn_out = jnp.dot(om, wp_ref[l], preferred_element_type=f32) + bp_ref[l]

        x1 = x + attn_out                                                  # residual 1
        xn2 = ln(x1, g2_ref[l], bt2_ref[l])
        h1 = gelu(jnp.dot(xn2, w1_ref[l], preferred_element_type=f32) + bb1_ref[l])
        return x1 + jnp.dot(h1, w2_ref[l], preferred_element_type=f32) + bb2_ref[l]

    # blocks -> norm -> blocks -> norm, reusing the same weights: mirrors the
    # reference forward_features exactly (it re-iterates self.blocks after norm).
    for _pass in range(2):
        for l in range(DEPTH):
            tok = block(tok, l)
        tok = ln(tok, ng_ref[...], nb_ref[...])

    # ---- fused decoder: three stride==kernel ConvTranspose2d (+tanh, +tanh) ----
    # rows of `tok` are the (i, j) feature-map pixels, so the PyTorch
    # "transpose(1,2).reshape" is a no-op on this layout.  Layers 2 & 3 are
    # block-diagonal matmuls, so the whole decoder is 3 lane-dense MXU pushes.
    a1 = jnp.tanh(jnp.dot(tok, w1f_ref[...],
                          preferred_element_type=f32) + b1f_ref[...])       # [N, 192]
    a2 = jnp.tanh(jnp.dot(a1, w2bd_ref[...],
                          preferred_element_type=f32) + b2bd_ref[...])      # [N, 192]
    out_ref[0] = jnp.dot(a2, w3bd_ref[...],
                         preferred_element_type=f32) + b3bd_ref[...]        # [N, 2304]


# ---------------- host-side parameter re-layout ----------------
def _block_diag(w, n):
    # kron(I_n, w) == block-diagonal with n copies of w
    return jnp.kron(jnp.eye(n, dtype=w.dtype), w)


def _prep_inputs(params):
    # patch-embed bias + pos fused once (identical for every batch element)
    biaspos = params["b_patch"] + params["pos"]                            # [N, D]

    def st(name):
        return jnp.stack([blk[name] for blk in params["blocks"]], axis=0)  # leading depth axis

    # ConvTranspose2d weights [Cin, Cout, k, k]: reorder output columns to
    # (u, v, cout) so each spatial sub-position is a contiguous lane slab.
    # NOTE: if real PyTorch weights are ever loaded they use this same
    # [Cin, Cout, kH, kW] layout, the Conv2d patch-embed weight must be
    # flattened in (T*C, p, p) order then transposed to [K, D], and all
    # nn.Linear weights transposed to (in, out).
    w1f = params["w_ct1"].transpose(0, 2, 3, 1).reshape(EMBED, K1 * K1 * C1)   # [32, 192]
    b1f = jnp.tile(params["b_ct1"], K1 * K1).reshape(1, -1)                    # [1, 192]

    w2f = params["w_ct2"].transpose(0, 2, 3, 1).reshape(C1, K2 * K2 * C2)      # [48, 48]
    w2bd = _block_diag(w2f, K1 * K1)                                            # [192, 192]
    b2bd = jnp.tile(jnp.tile(params["b_ct2"], K2 * K2), K1 * K1).reshape(1, -1)  # [1, 192]

    w3f = params["w_head"].transpose(0, 2, 3, 1).reshape(C2, K3 * K3 * C3)     # [12, 144]
    w3bd = _block_diag(w3f, K1 * K1 * K2 * K2)                                  # [192, 2304]
    b3bd = jnp.tile(jnp.tile(params["b_head"], K3 * K3),
                    K1 * K1 * K2 * K2).reshape(1, -1)                           # [1, 2304]

    return [params["w_patch"], biaspos,
            st("g1"), st("b1"), st("wqkv"), st("bqkv"), st("wproj"), st("bproj"),
            st("g2"), st("b2"), st("w1"), st("bb1"), st("w2"), st("bb2"),
            params["norm_g"], params["norm_b"],
            w1f, b1f, w2bd, b2bd, w3bd, b3bd]


# ---------------- full forward ----------------
def vit_forward(x, params):
    B, T, C, H, W = x.shape
    # ---- patch extraction (layout plumbing, XLA): rows (b, i, j), cols (c, u, v)
    x4 = x.reshape(B, T * C, H, W)
    p = x4.reshape(B, T * C, H_GRID, PATCH, W_GRID, PATCH)
    p = p.transpose(0, 2, 4, 1, 3, 5).reshape(B, NPATCH, K_PATCH)

    inputs = [p] + _prep_inputs(params)

    def bcast_spec(a):
        n = a.ndim
        return pl.BlockSpec(a.shape, lambda b, _n=n: (0,) * _n)

    in_specs = [pl.BlockSpec((1, NPATCH, K_PATCH), lambda b: (b, 0, 0))]
    in_specs += [bcast_spec(a) for a in inputs[1:]]

    dec = pl.pallas_call(
        _vit_kernel,
        out_shape=jax.ShapeDtypeStruct((B, NPATCH, DEC_COLS), jnp.float32),
        grid=(B,),   # batch is independent end-to-end -> parallel over TCs on v7x
        in_specs=in_specs,
        out_specs=pl.BlockSpec((1, NPATCH, DEC_COLS), lambda b: (b, 0, 0)),
        compiler_params=pltpu.CompilerParams(dimension_semantics=("parallel",)),
    )(*inputs)

    # ---- final pixel reassembly (layout plumbing, XLA) ----
    # dec[b, n=(i,j), col=(u1,v1,u2,v2,u3,v3,co)]
    #   -> out[b, co, 16i+8u1+4u2+u3, 16j+8v1+4v2+v3]
    y = dec.reshape(B, H_GRID, W_GRID, K1, K1, K2, K2, K3, K3, C3)
    y = y.transpose(0, 9, 1, 3, 5, 7, 2, 4, 6, 8)
    y = y.reshape(B, C3, IMG, IMG)
    return y.reshape(B, T, C, H, W)


# ---------------- parameter init (deterministic, synthetic) ----------------
def init_params(key):
    keys = list(jax.random.split(key, 8 + DEPTH * 8))
    kit = iter(keys)

    def nrm(shape, std):
        return std * jax.random.normal(next(kit), shape, dtype=jnp.float32)

    params = {
        "w_patch": nrm((K_PATCH, EMBED), 0.02),        # patch-embed conv as [K, D] matmul
        "b_patch": jnp.zeros((1, EMBED), jnp.float32),
        "pos": nrm((NPATCH, EMBED), 0.02),
        "norm_g": jnp.ones((1, EMBED), jnp.float32),
        "norm_b": jnp.zeros((1, EMBED), jnp.float32),
        "blocks": [],
        # ConvTranspose2d weights: [Cin, Cout, k, k]
        "w_ct1": nrm((EMBED, C1, 2, 2), 0.05),
        "b_ct1": nrm((C1,), 0.05),
        "w_ct2": nrm((C1, C2, 2, 2), 0.05),
        "b_ct2": nrm((C2,), 0.05),
        "w_head": nrm((C2, C3, 4, 4), 0.05),
        "b_head": nrm((C3,), 0.05),
    }
    for _ in range(DEPTH):
        params["blocks"].append({
            "g1": jnp.ones((1, EMBED), jnp.float32),
            "b1": jnp.zeros((1, EMBED), jnp.float32),
            "wqkv": nrm((EMBED, 3 * EMBED), 0.01),     # (in, out) layout, [q|k|v] columns
            "bqkv": jnp.zeros((1, 3 * EMBED), jnp.float32),
            "wproj": nrm((EMBED, EMBED), 0.01),        # (in, out); rows in (head, d) order
            "bproj": jnp.zeros((1, EMBED), jnp.float32),
            "g2": jnp.ones((1, EMBED), jnp.float32),
            "b2": jnp.zeros((1, EMBED), jnp.float32),
            "w1": nrm((EMBED, MLP_HIDDEN), 0.01),
            "bb1": jnp.zeros((1, MLP_HIDDEN), jnp.float32),
            "w2": nrm((MLP_HIDDEN, EMBED), 0.01),
            "bb2": jnp.zeros((1, EMBED), jnp.float32),
        })
    return params


if __name__ == "__main__":
    key = jax.random.PRNGKey(0)
    k_x, k_p = jax.random.split(key)
    B = 2
    x = jax.random.normal(k_x, (B, T_FRAMES, IN_C, IMG, IMG), dtype=jnp.float32)
    params = init_params(k_p)
    fwd = jax.jit(vit_forward)
    out = jax.block_until_ready(fwd(x, params))
    assert out.shape == (B, T_FRAMES, IN_C, IMG, IMG)
    assert bool(jnp.all(jnp.isfinite(out)))
    print("KERNEL_OK")
</pallas_src>

<mosaic_0001>
module attributes {stable_mosaic.version = 11 : i64} {
  func.func @_vit_kernel(%arg0: i32, %arg1: memref<1x4x2304xf32, #tpu.memory_space<vmem>>, %arg2: memref<2304x32xf32, #tpu.memory_space<vmem>>, %arg3: memref<4x32xf32, #tpu.memory_space<vmem>>, %arg4: memref<2x1x32xf32, #tpu.memory_space<vmem>>, %arg5: memref<2x1x32xf32, #tpu.memory_space<vmem>>, %arg6: memref<2x32x96xf32, #tpu.memory_space<vmem>>, %arg7: memref<2x1x96xf32, #tpu.memory_space<vmem>>, %arg8: memref<2x32x32xf32, #tpu.memory_space<vmem>>, %arg9: memref<2x1x32xf32, #tpu.memory_space<vmem>>, %arg10: memref<2x1x32xf32, #tpu.memory_space<vmem>>, %arg11: memref<2x1x32xf32, #tpu.memory_space<vmem>>, %arg12: memref<2x32x128xf32, #tpu.memory_space<vmem>>, %arg13: memref<2x1x128xf32, #tpu.memory_space<vmem>>, %arg14: memref<2x128x32xf32, #tpu.memory_space<vmem>>, %arg15: memref<2x1x32xf32, #tpu.memory_space<vmem>>, %arg16: memref<1x32xf32, #tpu.memory_space<vmem>>, %arg17: memref<1x32xf32, #tpu.memory_space<vmem>>, %arg18: memref<32x192xf32, #tpu.memory_space<vmem>>, %arg19: memref<1x192xf32, #tpu.memory_space<vmem>>, %arg20: memref<192x192xf32, #tpu.memory_space<vmem>>, %arg21: memref<1x192xf32, #tpu.memory_space<vmem>>, %arg22: memref<192x2304xf32, #tpu.memory_space<vmem>>, %arg23: memref<1x2304xf32, #tpu.memory_space<vmem>>, %arg24: memref<1x4x2304xf32, #tpu.memory_space<vmem>>) attributes {dimension_semantics = [#tpu.dimension_semantics<parallel>], iteration_bounds = array<i64: 2>, scalar_prefetch = 0 : i64, scratch_operands = 0 : i64, tpu.core_type = #tpu.core_type<tc>, window_params = [{transform_indices = @transform_0, window_bounds = array<i64: 1, 4, 2304>}, {pipeline_mode = #tpu.pipeline_mode<synchronous>, transform_indices = @transform_1, window_bounds = array<i64: 2304, 32>}, {pipeline_mode = #tpu.pipeline_mode<synchronous>, transform_indices = @transform_2, window_bounds = array<i64: 4, 32>}, {pipeline_mode = #tpu.pipeline_mode<synchronous>, transform_indices = @transform_3, window_bounds = array<i64: 2, 1, 32>}, {pipeline_mode = #tpu.pipeline_mode<synchronous>, transform_indices = @transform_4, window_bounds = array<i64: 2, 1, 32>}, {pipeline_mode = #tpu.pipeline_mode<synchronous>, transform_indices = @transform_5, window_bounds = array<i64: 2, 32, 96>}, {pipeline_mode = #tpu.pipeline_mode<synchronous>, transform_indices = @transform_6, window_bounds = array<i64: 2, 1, 96>}, {pipeline_mode = #tpu.pipeline_mode<synchronous>, transform_indices = @transform_7, window_bounds = array<i64: 2, 32, 32>}, {pipeline_mode = #tpu.pipeline_mode<synchronous>, transform_indices = @transform_8, window_bounds = array<i64: 2, 1, 32>}, {pipeline_mode = #tpu.pipeline_mode<synchronous>, transform_indices = @transform_9, window_bounds = array<i64: 2, 1, 32>}, {pipeline_mode = #tpu.pipeline_mode<synchronous>, transform_indices = @transform_10, window_bounds = array<i64: 2, 1, 32>}, {pipeline_mode = #tpu.pipeline_mode<synchronous>, transform_indices = @transform_11, window_bounds = array<i64: 2, 32, 128>}, {pipeline_mode = #tpu.pipeline_mode<synchronous>, transform_indices = @transform_12, window_bounds = array<i64: 2, 1, 128>}, {pipeline_mode = #tpu.pipeline_mode<synchronous>, transform_indices = @transform_13, window_bounds = array<i64: 2, 128, 32>}, {pipeline_mode = #tpu.pipeline_mode<synchronous>, transform_indices = @transform_14, window_bounds = array<i64: 2, 1, 32>}, {pipeline_mode = #tpu.pipeline_mode<synchronous>, transform_indices = @transform_15, window_bounds = array<i64: 1, 32>}, {pipeline_mode = #tpu.pipeline_mode<synchronous>, transform_indices = @transform_16, window_bounds = array<i64: 1, 32>}, {pipeline_mode = #tpu.pipeline_mode<synchronous>, transform_indices = @transform_17, window_bounds = array<i64: 32, 192>}, {pipeline_mode = #tpu.pipeline_mode<synchronous>, transform_indices = @transform_18, window_bounds = array<i64: 1, 192>}, {pipeline_mode = #tpu.pipeline_mode<synchronous>, transform_indices = @transform_19, window_bounds = array<i64: 192, 192>}, {pipeline_mode = #tpu.pipeline_mode<synchronous>, transform_indices = @transform_20, window_bounds = array<i64: 1, 192>}, {pipeline_mode = #tpu.pipeline_mode<synchronous>, transform_indices = @transform_21, window_bounds = array<i64: 192, 2304>}, {pipeline_mode = #tpu.pipeline_mode<synchronous>, transform_indices = @transform_22, window_bounds = array<i64: 1, 2304>}, {transform_indices = @transform_23, window_bounds = array<i64: 1, 4, 2304>}]} {
    %c0 = arith.constant 0 : index
    %c0_0 = arith.constant 0 : index
    %c0_1 = arith.constant 0 : index
    %0 = vector.load %arg1[%c0, %c0_0, %c0_1] : memref<1x4x2304xf32, #tpu.memory_space<vmem>>, vector<1x4x2304xf32>
    %1 = vector.shape_cast %0 : vector<1x4x2304xf32> to vector<4x2304xf32>
    %c0_2 = arith.constant 0 : index
    %c0_3 = arith.constant 0 : index
    %2 = vector.load %arg2[%c0_2, %c0_3] : memref<2304x32xf32, #tpu.memory_space<vmem>>, vector<2304x32xf32>
    %cst = arith.constant dense<0.000000e+00> : vector<4x32xf32>
    %3 = tpu.matmul %1, %2, %cst {dimension_numbers = #tpu.dot_dimension_numbers<[1], [0], [0], [1], [0, 0, 1, 1], [], []>} : vector<4x2304xf32>, vector<2304x32xf32>, vector<4x32xf32> -> vector<4x32xf32>
    %c0_4 = arith.constant 0 : index
    %c0_5 = arith.constant 0 : index
    %4 = vector.load %arg3[%c0_4, %c0_5] : memref<4x32xf32, #tpu.memory_space<vmem>>, vector<4x32xf32>
    %5 = arith.addf %3, %4 : vector<4x32xf32>
    %c0_6 = arith.constant 0 : index
    %c0_7 = arith.constant 0 : index
    %c0_8 = arith.constant 0 : index
    %6 = vector.load %arg4[%c0_6, %c0_7, %c0_8] : memref<2x1x32xf32, #tpu.memory_space<vmem>>, vector<1x1x32xf32>
    %7 = vector.shape_cast %6 : vector<1x1x32xf32> to vector<1x32xf32>
    %c0_9 = arith.constant 0 : index
    %c0_10 = arith.constant 0 : index
    %c0_11 = arith.constant 0 : index
    %8 = vector.load %arg5[%c0_9, %c0_10, %c0_11] : memref<2x1x32xf32, #tpu.memory_space<vmem>>, vector<1x1x32xf32>
    %9 = vector.shape_cast %8 : vector<1x1x32xf32> to vector<1x32xf32>
    %cst_12 = arith.constant dense<0.000000e+00> : vector<4xf32>
    %10 = vector.multi_reduction <add>, %5, %cst_12 [1] : vector<4x32xf32> to vector<4xf32>
    %11 = vector.shape_cast %10 : vector<4xf32> to vector<4x1xf32>
    %cst_13 = arith.constant 3.200000e+01 : f32
    %12 = vector.broadcast %cst_13 : f32 to vector<4x1xf32>
    %13 = arith.divf %11, %12 : vector<4x1xf32>
    %14 = arith.mulf %5, %5 : vector<4x32xf32>
    %cst_14 = arith.constant dense<0.000000e+00> : vector<4xf32>
    %15 = vector.multi_reduction <add>, %14, %cst_14 [1] : vector<4x32xf32> to vector<4xf32>
    %16 = vector.shape_cast %15 : vector<4xf32> to vector<4x1xf32>
    %cst_15 = arith.constant 3.200000e+01 : f32
    %17 = vector.broadcast %cst_15 : f32 to vector<4x1xf32>
    %18 = arith.divf %16, %17 : vector<4x1xf32>
    %19 = arith.mulf %13, %13 : vector<4x1xf32>
    %20 = arith.subf %18, %19 : vector<4x1xf32>
    %21 = vector.broadcast %13 : vector<4x1xf32> to vector<4x32xf32>
    %22 = arith.subf %5, %21 : vector<4x32xf32>
    %cst_16 = arith.constant 9.99999997E-7 : f32
    %23 = vector.broadcast %cst_16 : f32 to vector<4x1xf32>
    %24 = arith.addf %20, %23 : vector<4x1xf32>
    %25 = math.rsqrt %24 : vector<4x1xf32>
    %26 = vector.broadcast %25 : vector<4x1xf32> to vector<4x32xf32>
    %27 = arith.mulf %22, %26 : vector<4x32xf32>
    %28 = vector.broadcast %7 : vector<1x32xf32> to vector<4x32xf32>
    %29 = arith.mulf %27, %28 : vector<4x32xf32>
    %30 = vector.broadcast %9 : vector<1x32xf32> to vector<4x32xf32>
    %31 = arith.addf %29, %30 : vector<4x32xf32>
    %c0_17 = arith.constant 0 : index
    %c0_18 = arith.constant 0 : index
    %c0_19 = arith.constant 0 : index
    %32 = vector.load %arg6[%c0_17, %c0_18, %c0_19] : memref<2x32x96xf32, #tpu.memory_space<vmem>>, vector<1x32x96xf32>
    %33 = vector.shape_cast %32 : vector<1x32x96xf32> to vector<32x96xf32>
    %cst_20 = arith.constant dense<0.000000e+00> : vector<4x96xf32>
    %34 = tpu.matmul %31, %33, %cst_20 {dimension_numbers = #tpu.dot_dimension_numbers<[1], [0], [0], [1], [0, 0, 1, 1], [], []>} : vector<4x32xf32>, vector<32x96xf32>, vector<4x96xf32> -> vector<4x96xf32>
    %c0_21 = arith.constant 0 : index
    %c0_22 = arith.constant 0 : index
    %c0_23 = arith.constant 0 : index
    %35 = vector.load %arg7[%c0_21, %c0_22, %c0_23] : memref<2x1x96xf32, #tpu.memory_space<vmem>>, vector<1x1x96xf32>
    %36 = vector.shape_cast %35 : vector<1x1x96xf32> to vector<1x96xf32>
    %37 = vector.broadcast %36 : vector<1x96xf32> to vector<4x96xf32>
    %38 = arith.addf %34, %37 : vector<4x96xf32>
    %39 = vector.extract_strided_slice %38 {offsets = [0, 0], sizes = [4, 8], strides = [1, 1]} : vector<4x96xf32> to vector<4x8xf32>
    %40 = vector.extract_strided_slice %38 {offsets = [0, 8], sizes = [4, 8], strides = [1, 1]} : vector<4x96xf32> to vector<4x8xf32>
    %41 = vector.extract_strided_slice %38 {offsets = [0, 16], sizes = [4, 8], strides = [1, 1]} : vector<4x96xf32> to vector<4x8xf32>
    %42 = vector.extract_strided_slice %38 {offsets = [0, 24], sizes = [4, 8], strides = [1, 1]} : vector<4x96xf32> to vector<4x8xf32>
    %43 = vector.shape_cast %39 : vector<4x8xf32> to vector<1x4x8xf32>
    %44 = vector.shape_cast %40 : vector<4x8xf32> to vector<1x4x8xf32>
    %45 = vector.shape_cast %41 : vector<4x8xf32> to vector<1x4x8xf32>
    %46 = vector.shape_cast %42 : vector<4x8xf32> to vector<1x4x8xf32>
    %47 = tpu.concatenate %43, %44, %45, %46 in 0 : vector<1x4x8xf32>, vector<1x4x8xf32>, vector<1x4x8xf32>, vector<1x4x8xf32> -> vector<4x4x8xf32>
    %48 = vector.extract_strided_slice %38 {offsets = [0, 32], sizes = [4, 8], strides = [1, 1]} : vector<4x96xf32> to vector<4x8xf32>
    %49 = vector.extract_strided_slice %38 {offsets = [0, 40], sizes = [4, 8], strides = [1, 1]} : vector<4x96xf32> to vector<4x8xf32>
    %50 = vector.extract_strided_slice %38 {offsets = [0, 48], sizes = [4, 8], strides = [1, 1]} : vector<4x96xf32> to vector<4x8xf32>
    %51 = vector.extract_strided_slice %38 {offsets = [0, 56], sizes = [4, 8], strides = [1, 1]} : vector<4x96xf32> to vector<4x8xf32>
    %52 = vector.shape_cast %48 : vector<4x8xf32> to vector<1x4x8xf32>
    %53 = vector.shape_cast %49 : vector<4x8xf32> to vector<1x4x8xf32>
    %54 = vector.shape_cast %50 : vector<4x8xf32> to vector<1x4x8xf32>
    %55 = vector.shape_cast %51 : vector<4x8xf32> to vector<1x4x8xf32>
    %56 = tpu.concatenate %52, %53, %54, %55 in 0 : vector<1x4x8xf32>, vector<1x4x8xf32>, vector<1x4x8xf32>, vector<1x4x8xf32> -> vector<4x4x8xf32>
    %57 = vector.extract_strided_slice %38 {offsets = [0, 64], sizes = [4, 8], strides = [1, 1]} : vector<4x96xf32> to vector<4x8xf32>
    %58 = vector.extract_strided_slice %38 {offsets = [0, 72], sizes = [4, 8], strides = [1, 1]} : vector<4x96xf32> to vector<4x8xf32>
    %59 = vector.extract_strided_slice %38 {offsets = [0, 80], sizes = [4, 8], strides = [1, 1]} : vector<4x96xf32> to vector<4x8xf32>
    %60 = vector.extract_strided_slice %38 {offsets = [0, 88], sizes = [4, 8], strides = [1, 1]} : vector<4x96xf32> to vector<4x8xf32>
    %61 = vector.shape_cast %57 : vector<4x8xf32> to vector<1x4x8xf32>
    %62 = vector.shape_cast %58 : vector<4x8xf32> to vector<1x4x8xf32>
    %63 = vector.shape_cast %59 : vector<4x8xf32> to vector<1x4x8xf32>
    %64 = vector.shape_cast %60 : vector<4x8xf32> to vector<1x4x8xf32>
    %65 = tpu.concatenate %61, %62, %63, %64 in 0 : vector<1x4x8xf32>, vector<1x4x8xf32>, vector<1x4x8xf32>, vector<1x4x8xf32> -> vector<4x4x8xf32>
    "tpu.trace_start"() <{level = 10 : i32, message = "hnd,hmd->hnm"}> : () -> ()
    %cst_24 = arith.constant dense<0.000000e+00> : vector<4x4x4xf32>
    %66 = tpu.matmul %47, %56, %cst_24 {dimension_numbers = #tpu.dot_dimension_numbers<[2], [2], [1], [1], [0, 0, 0, 1, 1, 1], [0], [0]>} : vector<4x4x8xf32>, vector<4x4x8xf32>, vector<4x4x4xf32> -> vector<4x4x4xf32>
    "tpu.trace_stop"() : () -> ()
    %cst_25 = arith.constant 0.353553385 : f32
    %67 = vector.broadcast %cst_25 : f32 to vector<4x4x4xf32>
    %68 = arith.mulf %66, %67 : vector<4x4x4xf32>
    %cst_26 = arith.constant dense<0xFF800000> : vector<4x4xf32>
    %69 = vector.multi_reduction <maximumf>, %68, %cst_26 [2] : vector<4x4x4xf32> to vector<4x4xf32>
    %cst_27 = arith.constant 0xFF800000 : f32
    %70 = vector.broadcast %cst_27 : f32 to vector<4x4xf32>
    %71 = arith.maximumf %70, %69 : vector<4x4xf32>
    %72 = vector.shape_cast %71 : vector<4x4xf32> to vector<4x4x1xf32>
    %73 = vector.broadcast %72 : vector<4x4x1xf32> to vector<4x4x4xf32>
    %74 = arith.subf %68, %73 : vector<4x4x4xf32>
    %75 = math.exp %74 : vector<4x4x4xf32>
    %cst_28 = arith.constant dense<0.000000e+00> : vector<4x4xf32>
    %76 = vector.multi_reduction <add>, %75, %cst_28 [2] : vector<4x4x4xf32> to vector<4x4xf32>
    %77 = vector.shape_cast %76 : vector<4x4xf32> to vector<4x4x1xf32>
    %78 = vector.broadcast %77 : vector<4x4x1xf32> to vector<4x4x4xf32>
    %79 = arith.divf %75, %78 : vector<4x4x4xf32>
    "tpu.trace_start"() <{level = 10 : i32, message = "hnm,hmd->hnd"}> : () -> ()
    %cst_29 = arith.constant dense<0.000000e+00> : vector<4x4x8xf32>
    %80 = tpu.matmul %79, %65, %cst_29 {dimension_numbers = #tpu.dot_dimension_numbers<[2], [1], [1], [2], [0, 0, 0, 1, 1, 2], [0], [0]>} : vector<4x4x4xf32>, vector<4x4x8xf32>, vector<4x4x8xf32> -> vector<4x4x8xf32>
    "tpu.trace_stop"() : () -> ()
    %81 = vector.extract_strided_slice %80 {offsets = [0, 0, 0], sizes = [1, 4, 8], strides = [1, 1, 1]} : vector<4x4x8xf32> to vector<1x4x8xf32>
    %82 = vector.shape_cast %81 : vector<1x4x8xf32> to vector<4x8xf32>
    %83 = vector.extract_strided_slice %80 {offsets = [1, 0, 0], sizes = [1, 4, 8], strides = [1, 1, 1]} : vector<4x4x8xf32> to vector<1x4x8xf32>
    %84 = vector.shape_cast %83 : vector<1x4x8xf32> to vector<4x8xf32>
    %85 = vector.extract_strided_slice %80 {offsets = [2, 0, 0], sizes = [1, 4, 8], strides = [1, 1, 1]} : vector<4x4x8xf32> to vector<1x4x8xf32>
    %86 = vector.shape_cast %85 : vector<1x4x8xf32> to vector<4x8xf32>
    %87 = vector.extract_strided_slice %80 {offsets = [3, 0, 0], sizes = [1, 4, 8], strides = [1, 1, 1]} : vector<4x4x8xf32> to vector<1x4x8xf32>
    %88 = vector.shape_cast %87 : vector<1x4x8xf32> to vector<4x8xf32>
    %89 = tpu.concatenate %82, %84, %86, %88 in 1 : vector<4x8xf32>, vector<4x8xf32>, vector<4x8xf32>, vector<4x8xf32> -> vector<4x32xf32>
    %c0_30 = arith.constant 0 : index
    %c0_31 = arith.constant 0 : index
    %c0_32 = arith.constant 0 : index
    %90 = vector.load %arg8[%c0_30, %c0_31, %c0_32] : memref<2x32x32xf32, #tpu.memory_space<vmem>>, vector<1x32x32xf32>
    %91 = vector.shape_cast %90 : vector<1x32x32xf32> to vector<32x32xf32>
    %cst_33 = arith.constant dense<0.000000e+00> : vector<4x32xf32>
    %92 = tpu.matmul %89, %91, %cst_33 {dimension_numbers = #tpu.dot_dimension_numbers<[1], [0], [0], [1], [0, 0, 1, 1], [], []>} : vector<4x32xf32>, vector<32x32xf32>, vector<4x32xf32> -> vector<4x32xf32>
    %c0_34 = arith.constant 0 : index
    %c0_35 = arith.constant 0 : index
    %c0_36 = arith.constant 0 : index
    %93 = vector.load %arg9[%c0_34, %c0_35, %c0_36] : memref<2x1x32xf32, #tpu.memory_space<vmem>>, vector<1x1x32xf32>
    %94 = vector.shape_cast %93 : vector<1x1x32xf32> to vector<1x32xf32>
    %95 = vector.broadcast %94 : vector<1x32xf32> to vector<4x32xf32>
    %96 = arith.addf %92, %95 : vector<4x32xf32>
    %97 = arith.addf %5, %96 : vector<4x32xf32>
    %c0_37 = arith.constant 0 : index
    %c0_38 = arith.constant 0 : index
    %c0_39 = arith.constant 0 : index
    %98 = vector.load %arg10[%c0_37, %c0_38, %c0_39] : memref<2x1x32xf32, #tpu.memory_space<vmem>>, vector<1x1x32xf32>
    %99 = vector.shape_cast %98 : vector<1x1x32xf32> to vector<1x32xf32>
    %c0_40 = arith.constant 0 : index
    %c0_41 = arith.constant 0 : index
    %c0_42 = arith.constant 0 : index
    %100 = vector.load %arg11[%c0_40, %c0_41, %c0_42] : memref<2x1x32xf32, #tpu.memory_space<vmem>>, vector<1x1x32xf32>
    %101 = vector.shape_cast %100 : vector<1x1x32xf32> to vector<1x32xf32>
    %cst_43 = arith.constant dense<0.000000e+00> : vector<4xf32>
    %102 = vector.multi_reduction <add>, %97, %cst_43 [1] : vector<4x32xf32> to vector<4xf32>
    %103 = vector.shape_cast %102 : vector<4xf32> to vector<4x1xf32>
    %cst_44 = arith.constant 3.200000e+01 : f32
    %104 = vector.broadcast %cst_44 : f32 to vector<4x1xf32>
    %105 = arith.divf %103, %104 : vector<4x1xf32>
    %106 = arith.mulf %97, %97 : vector<4x32xf32>
    %cst_45 = arith.constant dense<0.000000e+00> : vector<4xf32>
    %107 = vector.multi_reduction <add>, %106, %cst_45 [1] : vector<4x32xf32> to vector<4xf32>
    %108 = vector.shape_cast %107 : vector<4xf32> to vector<4x1xf32>
    %cst_46 = arith.constant 3.200000e+01 : f32
    %109 = vector.broadcast %cst_46 : f32 to vector<4x1xf32>
    %110 = arith.divf %108, %109 : vector<4x1xf32>
    %111 = arith.mulf %105, %105 : vector<4x1xf32>
    %112 = arith.subf %110, %111 : vector<4x1xf32>
    %113 = vector.broadcast %105 : vector<4x1xf32> to vector<4x32xf32>
    %114 = arith.subf %97, %113 : vector<4x32xf32>
    %cst_47 = arith.constant 9.99999997E-7 : f32
    %115 = vector.broadcast %cst_47 : f32 to vector<4x1xf32>
    %116 = arith.addf %112, %115 : vector<4x1xf32>
    %117 = math.rsqrt %116 : vector<4x1xf32>
    %118 = vector.broadcast %117 : vector<4x1xf32> to vector<4x32xf32>
    %119 = arith.mulf %114, %118 : vector<4x32xf32>
    %120 = vector.broadcast %99 : vector<1x32xf32> to vector<4x32xf32>
    %121 = arith.mulf %119, %120 : vector<4x32xf32>
    %122 = vector.broadcast %101 : vector<1x32xf32> to vector<4x32xf32>
    %123 = arith.addf %121, %122 : vector<4x32xf32>
    %c0_48 = arith.constant 0 : index
    %c0_49 = arith.constant 0 : index
    %c0_50 = arith.constant 0 : index
    %124 = vector.load %arg12[%c0_48, %c0_49, %c0_50] : memref<2x32x128xf32, #tpu.memory_space<vmem>>, vector<1x32x128xf32>
    %125 = vector.shape_cast %124 : vector<1x32x128xf32> to vector<32x128xf32>
    %cst_51 = arith.constant dense<0.000000e+00> : vector<4x128xf32>
    %126 = tpu.matmul %123, %125, %cst_51 {dimension_numbers = #tpu.dot_dimension_numbers<[1], [0], [0], [1], [0, 0, 1, 1], [], []>} : vector<4x32xf32>, vector<32x128xf32>, vector<4x128xf32> -> vector<4x128xf32>
    %c0_52 = arith.constant 0 : index
    %c0_53 = arith.constant 0 : index
    %c0_54 = arith.constant 0 : index
    %127 = vector.load %arg13[%c0_52, %c0_53, %c0_54] : memref<2x1x128xf32, #tpu.memory_space<vmem>>, vector<1x1x128xf32>
    %128 = vector.shape_cast %127 : vector<1x1x128xf32> to vector<1x128xf32>
    %129 = vector.broadcast %128 : vector<1x128xf32> to vector<4x128xf32>
    %130 = arith.addf %126, %129 : vector<4x128xf32>
    %cst_55 = arith.constant 5.000000e-01 : f32
    %131 = vector.broadcast %cst_55 : f32 to vector<4x128xf32>
    %132 = arith.mulf %131, %130 : vector<4x128xf32>
    %cst_56 = arith.constant 0.707106769 : f32
    %133 = vector.broadcast %cst_56 : f32 to vector<4x128xf32>
    %134 = arith.mulf %130, %133 : vector<4x128xf32>
    %135 = math.erf %134 : vector<4x128xf32>
    %cst_57 = arith.constant 1.000000e+00 : f32
    %136 = vector.broadcast %cst_57 : f32 to vector<4x128xf32>
    %137 = arith.addf %136, %135 : vector<4x128xf32>
    %138 = arith.mulf %132, %137 : vector<4x128xf32>
    %c0_58 = arith.constant 0 : index
    %c0_59 = arith.constant 0 : index
    %c0_60 = arith.constant 0 : index
    %139 = vector.load %arg14[%c0_58, %c0_59, %c0_60] : memref<2x128x32xf32, #tpu.memory_space<vmem>>, vector<1x128x32xf32>
    %140 = vector.shape_cast %139 : vector<1x128x32xf32> to vector<128x32xf32>
    %cst_61 = arith.constant dense<0.000000e+00> : vector<4x32xf32>
    %141 = tpu.matmul %138, %140, %cst_61 {dimension_numbers = #tpu.dot_dimension_numbers<[1], [0], [0], [1], [0, 0, 1, 1], [], []>} : vector<4x128xf32>, vector<128x32xf32>, vector<4x32xf32> -> vector<4x32xf32>
    %142 = arith.addf %97, %141 : vector<4x32xf32>
    %c0_62 = arith.constant 0 : index
    %c0_63 = arith.constant 0 : index
    %c0_64 = arith.constant 0 : index
    %143 = vector.load %arg15[%c0_62, %c0_63, %c0_64] : memref<2x1x32xf32, #tpu.memory_space<vmem>>, vector<1x1x32xf32>
    %144 = vector.shape_cast %143 : vector<1x1x32xf32> to vector<1x32xf32>
    %145 = vector.broadcast %144 : vector<1x32xf32> to vector<4x32xf32>
    %146 = arith.addf %142, %145 : vector<4x32xf32>
    %c1 = arith.constant 1 : index
    %c0_65 = arith.constant 0 : index
    %c0_66 = arith.constant 0 : index
    %147 = vector.load %arg4[%c1, %c0_65, %c0_66] : memref<2x1x32xf32, #tpu.memory_space<vmem>>, vector<1x1x32xf32>
    %148 = vector.shape_cast %147 : vector<1x1x32xf32> to vector<1x32xf32>
    %c1_67 = arith.constant 1 : index
    %c0_68 = arith.constant 0 : index
    %c0_69 = arith.constant 0 : index
    %149 = vector.load %arg5[%c1_67, %c0_68, %c0_69] : memref<2x1x32xf32, #tpu.memory_space<vmem>>, vector<1x1x32xf32>
    %150 = vector.shape_cast %149 : vector<1x1x32xf32> to vector<1x32xf32>
    %cst_70 = arith.constant dense<0.000000e+00> : vector<4xf32>
    %151 = vector.multi_reduction <add>, %146, %cst_70 [1] : vector<4x32xf32> to vector<4xf32>
    %152 = vector.shape_cast %151 : vector<4xf32> to vector<4x1xf32>
    %cst_71 = arith.constant 3.200000e+01 : f32
    %153 = vector.broadcast %cst_71 : f32 to vector<4x1xf32>
    %154 = arith.divf %152, %153 : vector<4x1xf32>
    %155 = arith.mulf %146, %146 : vector<4x32xf32>
    %cst_72 = arith.constant dense<0.000000e+00> : vector<4xf32>
    %156 = vector.multi_reduction <add>, %155, %cst_72 [1] : vector<4x32xf32> to vector<4xf32>
    %157 = vector.shape_cast %156 : vector<4xf32> to vector<4x1xf32>
    %cst_73 = arith.constant 3.200000e+01 : f32
    %158 = vector.broadcast %cst_73 : f32 to vector<4x1xf32>
    %159 = arith.divf %157, %158 : vector<4x1xf32>
    %160 = arith.mulf %154, %154 : vector<4x1xf32>
    %161 = arith.subf %159, %160 : vector<4x1xf32>
    %162 = vector.broadcast %154 : vector<4x1xf32> to vector<4x32xf32>
    %163 = arith.subf %146, %162 : vector<4x32xf32>
    %cst_74 = arith.constant 9.99999997E-7 : f32
    %164 = vector.broadcast %cst_74 : f32 to vector<4x1xf32>
    %165 = arith.addf %161, %164 : vector<4x1xf32>
    %166 = math.rsqrt %165 : vector<4x1xf32>
    %167 = vector.broadcast %166 : vector<4x1xf32> to vector<4x32xf32>
    %168 = arith.mulf %163, %167 : vector<4x32xf32>
    %169 = vector.broadcast %148 : vector<1x32xf32> to vector<4x32xf32>
    %170 = arith.mulf %168, %169 : vector<4x32xf32>
    %171 = vector.broadcast %150 : vector<1x32xf32> to vector<4x32xf32>
    %172 = arith.addf %170, %171 : vector<4x32xf32>
    %c1_75 = arith.constant 1 : index
    %c0_76 = arith.constant 0 : index
    %c0_77 = arith.constant 0 : index
    %173 = vector.load %arg6[%c1_75, %c0_76, %c0_77] : memref<2x32x96xf32, #tpu.memory_space<vmem>>, vector<1x32x96xf32>
    %174 = vector.shape_cast %173 : vector<1x32x96xf32> to vector<32x96xf32>
    %cst_78 = arith.constant dense<0.000000e+00> : vector<4x96xf32>
    %175 = tpu.matmul %172, %174, %cst_78 {dimension_numbers = #tpu.dot_dimension_numbers<[1], [0], [0], [1], [0, 0, 1, 1], [], []>} : vector<4x32xf32>, vector<32x96xf32>, vector<4x96xf32> -> vector<4x96xf32>
    %c1_79 = arith.constant 1 : index
    %c0_80 = arith.constant 0 : index
    %c0_81 = arith.constant 0 : index
    %176 = vector.load %arg7[%c1_79, %c0_80, %c0_81] : memref<2x1x96xf32, #tpu.memory_space<vmem>>, vector<1x1x96xf32>
    %177 = vector.shape_cast %176 : vector<1x1x96xf32> to vector<1x96xf32>
    %178 = vector.broadcast %177 : vector<1x96xf32> to vector<4x96xf32>
    %179 = arith.addf %175, %178 : vector<4x96xf32>
    %180 = vector.extract_strided_slice %179 {offsets = [0, 0], sizes = [4, 8], strides = [1, 1]} : vector<4x96xf32> to vector<4x8xf32>
    %181 = vector.extract_strided_slice %179 {offsets = [0, 8], sizes = [4, 8], strides = [1, 1]} : vector<4x96xf32> to vector<4x8xf32>
    %182 = vector.extract_strided_slice %179 {offsets = [0, 16], sizes = [4, 8], strides = [1, 1]} : vector<4x96xf32> to vector<4x8xf32>
    %183 = vector.extract_strided_slice %179 {offsets = [0, 24], sizes = [4, 8], strides = [1, 1]} : vector<4x96xf32> to vector<4x8xf32>
    %184 = vector.shape_cast %180 : vector<4x8xf32> to vector<1x4x8xf32>
    %185 = vector.shape_cast %181 : vector<4x8xf32> to vector<1x4x8xf32>
    %186 = vector.shape_cast %182 : vector<4x8xf32> to vector<1x4x8xf32>
    %187 = vector.shape_cast %183 : vector<4x8xf32> to vector<1x4x8xf32>
    %188 = tpu.concatenate %184, %185, %186, %187 in 0 : vector<1x4x8xf32>, vector<1x4x8xf32>, vector<1x4x8xf32>, vector<1x4x8xf32> -> vector<4x4x8xf32>
    %189 = vector.extract_strided_slice %179 {offsets = [0, 32], sizes = [4, 8], strides = [1, 1]} : vector<4x96xf32> to vector<4x8xf32>
    %190 = vector.extract_strided_slice %179 {offsets = [0, 40], sizes = [4, 8], strides = [1, 1]} : vector<4x96xf32> to vector<4x8xf32>
    %191 = vector.extract_strided_slice %179 {offsets = [0, 48], sizes = [4, 8], strides = [1, 1]} : vector<4x96xf32> to vector<4x8xf32>
    %192 = vector.extract_strided_slice %179 {offsets = [0, 56], sizes = [4, 8], strides = [1, 1]} : vector<4x96xf32> to vector<4x8xf32>
    %193 = vector.shape_cast %189 : vector<4x8xf32> to vector<1x4x8xf32>
    %194 = vector.shape_cast %190 : vector<4x8xf32> to vector<1x4x8xf32>
    %195 = vector.shape_cast %191 : vector<4x8xf32> to vector<1x4x8xf32>
    %196 = vector.shape_cast %192 : vector<4x8xf32> to vector<1x4x8xf32>
    %197 = tpu.concatenate %193, %194, %195, %196 in 0 : vector<1x4x8xf32>, vector<1x4x8xf32>, vector<1x4x8xf32>, vector<1x4x8xf32> -> vector<4x4x8xf32>
    %198 = vector.extract_strided_slice %179 {offsets = [0, 64], sizes = [4, 8], strides = [1, 1]} : vector<4x96xf32> to vector<4x8xf32>
    %199 = vector.extract_strided_slice %179 {offsets = [0, 72], sizes = [4, 8], strides = [1, 1]} : vector<4x96xf32> to vector<4x8xf32>
    %200 = vector.extract_strided_slice %179 {offsets = [0, 80], sizes = [4, 8], strides = [1, 1]} : vector<4x96xf32> to vector<4x8xf32>
    %201 = vector.extract_strided_slice %179 {offsets = [0, 88], sizes = [4, 8], strides = [1, 1]} : vector<4x96xf32> to vector<4x8xf32>
    %202 = vector.shape_cast %198 : vector<4x8xf32> to vector<1x4x8xf32>
    %203 = vector.shape_cast %199 : vector<4x8xf32> to vector<1x4x8xf32>
    %204 = vector.shape_cast %200 : vector<4x8xf32> to vector<1x4x8xf32>
    %205 = vector.shape_cast %201 : vector<4x8xf32> to vector<1x4x8xf32>
    %206 = tpu.concatenate %202, %203, %204, %205 in 0 : vector<1x4x8xf32>, vector<1x4x8xf32>, vector<1x4x8xf32>, vector<1x4x8xf32> -> vector<4x4x8xf32>
    "tpu.trace_start"() <{level = 10 : i32, message = "hnd,hmd->hnm"}> : () -> ()
    %cst_82 = arith.constant dense<0.000000e+00> : vector<4x4x4xf32>
    %207 = tpu.matmul %188, %197, %cst_82 {dimension_numbers = #tpu.dot_dimension_numbers<[2], [2], [1], [1], [0, 0, 0, 1, 1, 1], [0], [0]>} : vector<4x4x8xf32>, vector<4x4x8xf32>, vector<4x4x4xf32> -> vector<4x4x4xf32>
    "tpu.trace_stop"() : () -> ()
    %cst_83 = arith.constant 0.353553385 : f32
    %208 = vector.broadcast %cst_83 : f32 to vector<4x4x4xf32>
    %209 = arith.mulf %207, %208 : vector<4x4x4xf32>
    %cst_84 = arith.constant dense<0xFF800000> : vector<4x4xf32>
    %210 = vector.multi_reduction <maximumf>, %209, %cst_84 [2] : vector<4x4x4xf32> to vector<4x4xf32>
    %cst_85 = arith.constant 0xFF800000 : f32
    %211 = vector.broadcast %cst_85 : f32 to vector<4x4xf32>
    %212 = arith.maximumf %211, %210 : vector<4x4xf32>
    %213 = vector.shape_cast %212 : vector<4x4xf32> to vector<4x4x1xf32>
    %214 = vector.broadcast %213 : vector<4x4x1xf32> to vector<4x4x4xf32>
    %215 = arith.subf %209, %214 : vector<4x4x4xf32>
    %216 = math.exp %215 : vector<4x4x4xf32>
    %cst_86 = arith.constant dense<0.000000e+00> : vector<4x4xf32>
    %217 = vector.multi_reduction <add>, %216, %cst_86 [2] : vector<4x4x4xf32> to vector<4x4xf32>
    %218 = vector.shape_cast %217 : vector<4x4xf32> to vector<4x4x1xf32>
    %219 = vector.broadcast %218 : vector<4x4x1xf32> to vector<4x4x4xf32>
    %220 = arith.divf %216, %219 : vector<4x4x4xf32>
    "tpu.trace_start"() <{level = 10 : i32, message = "hnm,hmd->hnd"}> : () -> ()
    %cst_87 = arith.constant dense<0.000000e+00> : vector<4x4x8xf32>
    %221 = tpu.matmul %220, %206, %cst_87 {dimension_numbers = #tpu.dot_dimension_numbers<[2], [1], [1], [2], [0, 0, 0, 1, 1, 2], [0], [0]>} : vector<4x4x4xf32>, vector<4x4x8xf32>, vector<4x4x8xf32> -> vector<4x4x8xf32>
    "tpu.trace_stop"() : () -> ()
    %222 = vector.extract_strided_slice %221 {offsets = [0, 0, 0], sizes = [1, 4, 8], strides = [1, 1, 1]} : vector<4x4x8xf32> to vector<1x4x8xf32>
    %223 = vector.shape_cast %222 : vector<1x4x8xf32> to vector<4x8xf32>
    %224 = vector.extract_strided_slice %221 {offsets = [1, 0, 0], sizes = [1, 4, 8], strides = [1, 1, 1]} : vector<4x4x8xf32> to vector<1x4x8xf32>
    %225 = vector.shape_cast %224 : vector<1x4x8xf32> to vector<4x8xf32>
    %226 = vector.extract_strided_slice %221 {offsets = [2, 0, 0], sizes = [1, 4, 8], strides = [1, 1, 1]} : vector<4x4x8xf32> to vector<1x4x8xf32>
    %227 = vector.shape_cast %226 : vector<1x4x8xf32> to vector<4x8xf32>
    %228 = vector.extract_strided_slice %221 {offsets = [3, 0, 0], sizes = [1, 4, 8], strides = [1, 1, 1]} : vector<4x4x8xf32> to vector<1x4x8xf32>
    %229 = vector.shape_cast %228 : vector<1x4x8xf32> to vector<4x8xf32>
    %230 = tpu.concatenate %223, %225, %227, %229 in 1 : vector<4x8xf32>, vector<4x8xf32>, vector<4x8xf32>, vector<4x8xf32> -> vector<4x32xf32>
    %c1_88 = arith.constant 1 : index
    %c0_89 = arith.constant 0 : index
    %c0_90 = arith.constant 0 : index
    %231 = vector.load %arg8[%c1_88, %c0_89, %c0_90] : memref<2x32x32xf32, #tpu.memory_space<vmem>>, vector<1x32x32xf32>
    %232 = vector.shape_cast %231 : vector<1x32x32xf32> to vector<32x32xf32>
    %cst_91 = arith.constant dense<0.000000e+00> : vector<4x32xf32>
    %233 = tpu.matmul %230, %232, %cst_91 {dimension_numbers = #tpu.dot_dimension_numbers<[1], [0], [0], [1], [0, 0, 1, 1], [], []>} : vector<4x32xf32>, vector<32x32xf32>, vector<4x32xf32> -> vector<4x32xf32>
    %c1_92 = arith.constant 1 : index
    %c0_93 = arith.constant 0 : index
    %c0_94 = arith.constant 0 : index
    %234 = vector.load %arg9[%c1_92, %c0_93, %c0_94] : memref<2x1x32xf32, #tpu.memory_space<vmem>>, vector<1x1x32xf32>
    %235 = vector.shape_cast %234 : vector<1x1x32xf32> to vector<1x32xf32>
    %236 = vector.broadcast %235 : vector<1x32xf32> to vector<4x32xf32>
    %237 = arith.addf %233, %236 : vector<4x32xf32>
    %238 = arith.addf %146, %237 : vector<4x32xf32>
    %c1_95 = arith.constant 1 : index
    %c0_96 = arith.constant 0 : index
    %c0_97 = arith.constant 0 : index
    %239 = vector.load %arg10[%c1_95, %c0_96, %c0_97] : memref<2x1x32xf32, #tpu.memory_space<vmem>>, vector<1x1x32xf32>
    %240 = vector.shape_cast %239 : vector<1x1x32xf32> to vector<1x32xf32>
    %c1_98 = arith.constant 1 : index
    %c0_99 = arith.constant 0 : index
    %c0_100 = arith.constant 0 : index
    %241 = vector.load %arg11[%c1_98, %c0_99, %c0_100] : memref<2x1x32xf32, #tpu.memory_space<vmem>>, vector<1x1x32xf32>
    %242 = vector.shape_cast %241 : vector<1x1x32xf32> to vector<1x32xf32>
    %cst_101 = arith.constant dense<0.000000e+00> : vector<4xf32>
    %243 = vector.multi_reduction <add>, %238, %cst_101 [1] : vector<4x32xf32> to vector<4xf32>
    %244 = vector.shape_cast %243 : vector<4xf32> to vector<4x1xf32>
    %cst_102 = arith.constant 3.200000e+01 : f32
    %245 = vector.broadcast %cst_102 : f32 to vector<4x1xf32>
    %246 = arith.divf %244, %245 : vector<4x1xf32>
    %247 = arith.mulf %238, %238 : vector<4x32xf32>
    %cst_103 = arith.constant dense<0.000000e+00> : vector<4xf32>
    %248 = vector.multi_reduction <add>, %247, %cst_103 [1] : vector<4x32xf32> to vector<4xf32>
    %249 = vector.shape_cast %248 : vector<4xf32> to vector<4x1xf32>
    %cst_104 = arith.constant 3.200000e+01 : f32
    %250 = vector.broadcast %cst_104 : f32 to vector<4x1xf32>
    %251 = arith.divf %249, %250 : vector<4x1xf32>
    %252 = arith.mulf %246, %246 : vector<4x1xf32>
    %253 = arith.subf %251, %252 : vector<4x1xf32>
    %254 = vector.broadcast %246 : vector<4x1xf32> to vector<4x32xf32>
    %255 = arith.subf %238, %254 : vector<4x32xf32>
    %cst_105 = arith.constant 9.99999997E-7 : f32
    %256 = vector.broadcast %cst_105 : f32 to vector<4x1xf32>
    %257 = arith.addf %253, %256 : vector<4x1xf32>
    %258 = math.rsqrt %257 : vector<4x1xf32>
    %259 = vector.broadcast %258 : vector<4x1xf32> to vector<4x32xf32>
    %260 = arith.mulf %255, %259 : vector<4x32xf32>
    %261 = vector.broadcast %240 : vector<1x32xf32> to vector<4x32xf32>
    %262 = arith.mulf %260, %261 : vector<4x32xf32>
    %263 = vector.broadcast %242 : vector<1x32xf32> to vector<4x32xf32>
    %264 = arith.addf %262, %263 : vector<4x32xf32>
    %c1_106 = arith.constant 1 : index
    %c0_107 = arith.constant 0 : index
    %c0_108 = arith.constant 0 : index
    %265 = vector.load %arg12[%c1_106, %c0_107, %c0_108] : memref<2x32x128xf32, #tpu.memory_space<vmem>>, vector<1x32x128xf32>
    %266 = vector.shape_cast %265 : vector<1x32x128xf32> to vector<32x128xf32>
    %cst_109 = arith.constant dense<0.000000e+00> : vector<4x128xf32>
    %267 = tpu.matmul %264, %266, %cst_109 {dimension_numbers = #tpu.dot_dimension_numbers<[1], [0], [0], [1], [0, 0, 1, 1], [], []>} : vector<4x32xf32>, vector<32x128xf32>, vector<4x128xf32> -> vector<4x128xf32>
    %c1_110 = arith.constant 1 : index
    %c0_111 = arith.constant 0 : index
    %c0_112 = arith.constant 0 : index
    %268 = vector.load %arg13[%c1_110, %c0_111, %c0_112] : memref<2x1x128xf32, #tpu.memory_space<vmem>>, vector<1x1x128xf32>
    %269 = vector.shape_cast %268 : vector<1x1x128xf32> to vector<1x128xf32>
    %270 = vector.broadcast %269 : vector<1x128xf32> to vector<4x128xf32>
    %271 = arith.addf %267, %270 : vector<4x128xf32>
    %cst_113 = arith.constant 5.000000e-01 : f32
    %272 = vector.broadcast %cst_113 : f32 to vector<4x128xf32>
    %273 = arith.mulf %272, %271 : vector<4x128xf32>
    %cst_114 = arith.constant 0.707106769 : f32
    %274 = vector.broadcast %cst_114 : f32 to vector<4x128xf32>
    %275 = arith.mulf %271, %274 : vector<4x128xf32>
    %276 = math.erf %275 : vector<4x128xf32>
    %cst_115 = arith.constant 1.000000e+00 : f32
    %277 = vector.broadcast %cst_115 : f32 to vector<4x128xf32>
    %278 = arith.addf %277, %276 : vector<4x128xf32>
    %279 = arith.mulf %273, %278 : vector<4x128xf32>
    %c1_116 = arith.constant 1 : index
    %c0_117 = arith.constant 0 : index
    %c0_118 = arith.constant 0 : index
    %280 = vector.load %arg14[%c1_116, %c0_117, %c0_118] : memref<2x128x32xf32, #tpu.memory_space<vmem>>, vector<1x128x32xf32>
    %281 = vector.shape_cast %280 : vector<1x128x32xf32> to vector<128x32xf32>
    %cst_119 = arith.constant dense<0.000000e+00> : vector<4x32xf32>
    %282 = tpu.matmul %279, %281, %cst_119 {dimension_numbers = #tpu.dot_dimension_numbers<[1], [0], [0], [1], [0, 0, 1, 1], [], []>} : vector<4x128xf32>, vector<128x32xf32>, vector<4x32xf32> -> vector<4x32xf32>
    %283 = arith.addf %238, %282 : vector<4x32xf32>
    %c1_120 = arith.constant 1 : index
    %c0_121 = arith.constant 0 : index
    %c0_122 = arith.constant 0 : index
    %284 = vector.load %arg15[%c1_120, %c0_121, %c0_122] : memref<2x1x32xf32, #tpu.memory_space<vmem>>, vector<1x1x32xf32>
    %285 = vector.shape_cast %284 : vector<1x1x32xf32> to vector<1x32xf32>
    %286 = vector.broadcast %285 : vector<1x32xf32> to vector<4x32xf32>
    %287 = arith.addf %283, %286 : vector<4x32xf32>
    %c0_123 = arith.constant 0 : index
    %c0_124 = arith.constant 0 : index
    %288 = vector.load %arg16[%c0_123, %c0_124] : memref<1x32xf32, #tpu.memory_space<vmem>>, vector<1x32xf32>
    %c0_125 = arith.constant 0 : index
    %c0_126 = arith.constant 0 : index
    %289 = vector.load %arg17[%c0_125, %c0_126] : memref<1x32xf32, #tpu.memory_space<vmem>>, vector<1x32xf32>
    %cst_127 = arith.constant dense<0.000000e+00> : vector<4xf32>
    %290 = vector.multi_reduction <add>, %287, %cst_127 [1] : vector<4x32xf32> to vector<4xf32>
    %291 = vector.shape_cast %290 : vector<4xf32> to vector<4x1xf32>
    %cst_128 = arith.constant 3.200000e+01 : f32
    %292 = vector.broadcast %cst_128 : f32 to vector<4x1xf32>
    %293 = arith.divf %291, %292 : vector<4x1xf32>
    %294 = arith.mulf %287, %287 : vector<4x32xf32>
    %cst_129 = arith.constant dense<0.000000e+00> : vector<4xf32>
    %295 = vector.multi_reduction <add>, %294, %cst_129 [1] : vector<4x32xf32> to vector<4xf32>
    %296 = vector.shape_cast %295 : vector<4xf32> to vector<4x1xf32>
    %cst_130 = arith.constant 3.200000e+01 : f32
    %297 = vector.broadcast %cst_130 : f32 to vector<4x1xf32>
    %298 = arith.divf %296, %297 : vector<4x1xf32>
    %299 = arith.mulf %293, %293 : vector<4x1xf32>
    %300 = arith.subf %298, %299 : vector<4x1xf32>
    %301 = vector.broadcast %293 : vector<4x1xf32> to vector<4x32xf32>
    %302 = arith.subf %287, %301 : vector<4x32xf32>
    %cst_131 = arith.constant 9.99999997E-7 : f32
    %303 = vector.broadcast %cst_131 : f32 to vector<4x1xf32>
    %304 = arith.addf %300, %303 : vector<4x1xf32>
    %305 = math.rsqrt %304 : vector<4x1xf32>
    %306 = vector.broadcast %305 : vector<4x1xf32> to vector<4x32xf32>
    %307 = arith.mulf %302, %306 : vector<4x32xf32>
    %308 = vector.broadcast %288 : vector<1x32xf32> to vector<4x32xf32>
    %309 = arith.mulf %307, %308 : vector<4x32xf32>
    %310 = vector.broadcast %289 : vector<1x32xf32> to vector<4x32xf32>
    %311 = arith.addf %309, %310 : vector<4x32xf32>
    %c0_132 = arith.constant 0 : index
    %c0_133 = arith.constant 0 : index
    %c0_134 = arith.constant 0 : index
    %312 = vector.load %arg4[%c0_132, %c0_133, %c0_134] : memref<2x1x32xf32, #tpu.memory_space<vmem>>, vector<1x1x32xf32>
    %313 = vector.shape_cast %312 : vector<1x1x32xf32> to vector<1x32xf32>
    %c0_135 = arith.constant 0 : index
    %c0_136 = arith.constant 0 : index
    %c0_137 = arith.constant 0 : index
    %314 = vector.load %arg5[%c0_135, %c0_136, %c0_137] : memref<2x1x32xf32, #tpu.memory_space<vmem>>, vector<1x1x32xf32>
    %315 = vector.shape_cast %314 : vector<1x1x32xf32> to vector<1x32xf32>
    %cst_138 = arith.constant dense<0.000000e+00> : vector<4xf32>
    %316 = vector.multi_reduction <add>, %311, %cst_138 [1] : vector<4x32xf32> to vector<4xf32>
    %317 = vector.shape_cast %316 : vector<4xf32> to vector<4x1xf32>
    %cst_139 = arith.constant 3.200000e+01 : f32
    %318 = vector.broadcast %cst_139 : f32 to vector<4x1xf32>
    %319 = arith.divf %317, %318 : vector<4x1xf32>
    %320 = arith.mulf %311, %311 : vector<4x32xf32>
    %cst_140 = arith.constant dense<0.000000e+00> : vector<4xf32>
    %321 = vector.multi_reduction <add>, %320, %cst_140 [1] : vector<4x32xf32> to vector<4xf32>
    %322 = vector.shape_cast %321 : vector<4xf32> to vector<4x1xf32>
    %cst_141 = arith.constant 3.200000e+01 : f32
    %323 = vector.broadcast %cst_141 : f32 to vector<4x1xf32>
    %324 = arith.divf %322, %323 : vector<4x1xf32>
    %325 = arith.mulf %319, %319 : vector<4x1xf32>
    %326 = arith.subf %324, %325 : vector<4x1xf32>
    %327 = vector.broadcast %319 : vector<4x1xf32> to vector<4x32xf32>
    %328 = arith.subf %311, %327 : vector<4x32xf32>
    %cst_142 = arith.constant 9.99999997E-7 : f32
    %329 = vector.broadcast %cst_142 : f32 to vector<4x1xf32>
    %330 = arith.addf %326, %329 : vector<4x1xf32>
    %331 = math.rsqrt %330 : vector<4x1xf32>
    %332 = vector.broadcast %331 : vector<4x1xf32> to vector<4x32xf32>
    %333 = arith.mulf %328, %332 : vector<4x32xf32>
    %334 = vector.broadcast %313 : vector<1x32xf32> to vector<4x32xf32>
    %335 = arith.mulf %333, %334 : vector<4x32xf32>
    %336 = vector.broadcast %315 : vector<1x32xf32> to vector<4x32xf32>
    %337 = arith.addf %335, %336 : vector<4x32xf32>
    %c0_143 = arith.constant 0 : index
    %c0_144 = arith.constant 0 : index
    %c0_145 = arith.constant 0 : index
    %338 = vector.load %arg6[%c0_143, %c0_144, %c0_145] : memref<2x32x96xf32, #tpu.memory_space<vmem>>, vector<1x32x96xf32>
    %339 = vector.shape_cast %338 : vector<1x32x96xf32> to vector<32x96xf32>
    %cst_146 = arith.constant dense<0.000000e+00> : vector<4x96xf32>
    %340 = tpu.matmul %337, %339, %cst_146 {dimension_numbers = #tpu.dot_dimension_numbers<[1], [0], [0], [1], [0, 0, 1, 1], [], []>} : vector<4x32xf32>, vector<32x96xf32>, vector<4x96xf32> -> vector<4x96xf32>
    %c0_147 = arith.constant 0 : index
    %c0_148 = arith.constant 0 : index
    %c0_149 = arith.constant 0 : index
    %341 = vector.load %arg7[%c0_147, %c0_148, %c0_149] : memref<2x1x96xf32, #tpu.memory_space<vmem>>, vector<1x1x96xf32>
    %342 = vector.shape_cast %341 : vector<1x1x96xf32> to vector<1x96xf32>
    %343 = vector.broadcast %342 : vector<1x96xf32> to vector<4x96xf32>
    %344 = arith.addf %340, %343 : vector<4x96xf32>
    %345 = vector.extract_strided_slice %344 {offsets = [0, 0], sizes = [4, 8], strides = [1, 1]} : vector<4x96xf32> to vector<4x8xf32>
    %346 = vector.extract_strided_slice %344 {offsets = [0, 8], sizes = [4, 8], strides = [1, 1]} : vector<4x96xf32> to vector<4x8xf32>
    %347 = vector.extract_strided_slice %344 {offsets = [0, 16], sizes = [4, 8], strides = [1, 1]} : vector<4x96xf32> to vector<4x8xf32>
    %348 = vector.extract_strided_slice %344 {offsets = [0, 24], sizes = [4, 8], strides = [1, 1]} : vector<4x96xf32> to vector<4x8xf32>
    %349 = vector.shape_cast %345 : vector<4x8xf32> to vector<1x4x8xf32>
    %350 = vector.shape_cast %346 : vector<4x8xf32> to vector<1x4x8xf32>
    %351 = vector.shape_cast %347 : vector<4x8xf32> to vector<1x4x8xf32>
    %352 = vector.shape_cast %348 : vector<4x8xf32> to vector<1x4x8xf32>
    %353 = tpu.concatenate %349, %350, %351, %352 in 0 : vector<1x4x8xf32>, vector<1x4x8xf32>, vector<1x4x8xf32>, vector<1x4x8xf32> -> vector<4x4x8xf32>
    %354 = vector.extract_strided_slice %344 {offsets = [0, 32], sizes = [4, 8], strides = [1, 1]} : vector<4x96xf32> to vector<4x8xf32>
    %355 = vector.extract_strided_slice %344 {offsets = [0, 40], sizes = [4, 8], strides = [1, 1]} : vector<4x96xf32> to vector<4x8xf32>
    %356 = vector.extract_strided_slice %344 {offsets = [0, 48], sizes = [4, 8], strides = [1, 1]} : vector<4x96xf32> to vector<4x8xf32>
    %357 = vector.extract_strided_slice %344 {offsets = [0, 56], sizes = [4, 8], strides = [1, 1]} : vector<4x96xf32> to vector<4x8xf32>
    %358 = vector.shape_cast %354 : vector<4x8xf32> to vector<1x4x8xf32>
    %359 = vector.shape_cast %355 : vector<4x8xf32> to vector<1x4x8xf32>
    %360 = vector.shape_cast %356 : vector<4x8xf32> to vector<1x4x8xf32>
    %361 = vector.shape_cast %357 : vector<4x8xf32> to vector<1x4x8xf32>
    %362 = tpu.concatenate %358, %359, %360, %361 in 0 : vector<1x4x8xf32>, vector<1x4x8xf32>, vector<1x4x8xf32>, vector<1x4x8xf32> -> vector<4x4x8xf32>
    %363 = vector.extract_strided_slice %344 {offsets = [0, 64], sizes = [4, 8], strides = [1, 1]} : vector<4x96xf32> to vector<4x8xf32>
    %364 = vector.extract_strided_slice %344 {offsets = [0, 72], sizes = [4, 8], strides = [1, 1]} : vector<4x96xf32> to vector<4x8xf32>
    %365 = vector.extract_strided_slice %344 {offsets = [0, 80], sizes = [4, 8], strides = [1, 1]} : vector<4x96xf32> to vector<4x8xf32>
    %366 = vector.extract_strided_slice %344 {offsets = [0, 88], sizes = [4, 8], strides = [1, 1]} : vector<4x96xf32> to vector<4x8xf32>
    %367 = vector.shape_cast %363 : vector<4x8xf32> to vector<1x4x8xf32>
    %368 = vector.shape_cast %364 : vector<4x8xf32> to vector<1x4x8xf32>
    %369 = vector.shape_cast %365 : vector<4x8xf32> to vector<1x4x8xf32>
    %370 = vector.shape_cast %366 : vector<4x8xf32> to vector<1x4x8xf32>
    %371 = tpu.concatenate %367, %368, %369, %370 in 0 : vector<1x4x8xf32>, vector<1x4x8xf32>, vector<1x4x8xf32>, vector<1x4x8xf32> -> vector<4x4x8xf32>
    "tpu.trace_start"() <{level = 10 : i32, message = "hnd,hmd->hnm"}> : () -> ()
    %cst_150 = arith.constant dense<0.000000e+00> : vector<4x4x4xf32>
    %372 = tpu.matmul %353, %362, %cst_150 {dimension_numbers = #tpu.dot_dimension_numbers<[2], [2], [1], [1], [0, 0, 0, 1, 1, 1], [0], [0]>} : vector<4x4x8xf32>, vector<4x4x8xf32>, vector<4x4x4xf32> -> vector<4x4x4xf32>
    "tpu.trace_stop"() : () -> ()
    %cst_151 = arith.constant 0.353553385 : f32
    %373 = vector.broadcast %cst_151 : f32 to vector<4x4x4xf32>
    %374 = arith.mulf %372, %373 : vector<4x4x4xf32>
    %cst_152 = arith.constant dense<0xFF800000> : vector<4x4xf32>
    %375 = vector.multi_reduction <maximumf>, %374, %cst_152 [2] : vector<4x4x4xf32> to vector<4x4xf32>
    %cst_153 = arith.constant 0xFF800000 : f32
    %376 = vector.broadcast %cst_153 : f32 to vector<4x4xf32>
    %377 = arith.maximumf %376, %375 : vector<4x4xf32>
    %378 = vector.shape_cast %377 : vector<4x4xf32> to vector<4x4x1xf32>
    %379 = vector.broadcast %378 : vector<4x4x1xf32> to vector<4x4x4xf32>
    %380 = arith.subf %374, %379 : vector<4x4x4xf32>
    %381 = math.exp %380 : vector<4x4x4xf32>
    %cst_154 = arith.constant dense<0.000000e+00> : vector<4x4xf32>
    %382 = vector.multi_reduction <add>, %381, %cst_154 [2] : vector<4x4x4xf32> to vector<4x4xf32>
    %383 = vector.shape_cast %382 : vector<4x4xf32> to vector<4x4x1xf32>
    %384 = vector.broadcast %383 : vector<4x4x1xf32> to vector<4x4x4xf32>
    %385 = arith.divf %381, %384 : vector<4x4x4xf32>
    "tpu.trace_start"() <{level = 10 : i32, message = "hnm,hmd->hnd"}> : () -> ()
    %cst_155 = arith.constant dense<0.000000e+00> : vector<4x4x8xf32>
    %386 = tpu.matmul %385, %371, %cst_155 {dimension_numbers = #tpu.dot_dimension_numbers<[2], [1], [1], [2], [0, 0, 0, 1, 1, 2], [0], [0]>} : vector<4x4x4xf32>, vector<4x4x8xf32>, vector<4x4x8xf32> -> vector<4x4x8xf32>
    "tpu.trace_stop"() : () -> ()
    %387 = vector.extract_strided_slice %386 {offsets = [0, 0, 0], sizes = [1, 4, 8], strides = [1, 1, 1]} : vector<4x4x8xf32> to vector<1x4x8xf32>
    %388 = vector.shape_cast %387 : vector<1x4x8xf32> to vector<4x8xf32>
    %389 = vector.extract_strided_slice %386 {offsets = [1, 0, 0], sizes = [1, 4, 8], strides = [1, 1, 1]} : vector<4x4x8xf32> to vector<1x4x8xf32>
    %390 = vector.shape_cast %389 : vector<1x4x8xf32> to vector<4x8xf32>
    %391 = vector.extract_strided_slice %386 {offsets = [2, 0, 0], sizes = [1, 4, 8], strides = [1, 1, 1]} : vector<4x4x8xf32> to vector<1x4x8xf32>
    %392 = vector.shape_cast %391 : vector<1x4x8xf32> to vector<4x8xf32>
    %393 = vector.extract_strided_slice %386 {offsets = [3, 0, 0], sizes = [1, 4, 8], strides = [1, 1, 1]} : vector<4x4x8xf32> to vector<1x4x8xf32>
    %394 = vector.shape_cast %393 : vector<1x4x8xf32> to vector<4x8xf32>
    %395 = tpu.concatenate %388, %390, %392, %394 in 1 : vector<4x8xf32>, vector<4x8xf32>, vector<4x8xf32>, vector<4x8xf32> -> vector<4x32xf32>
    %c0_156 = arith.constant 0 : index
    %c0_157 = arith.constant 0 : index
    %c0_158 = arith.constant 0 : index
    %396 = vector.load %arg8[%c0_156, %c0_157, %c0_158] : memref<2x32x32xf32, #tpu.memory_space<vmem>>, vector<1x32x32xf32>
    %397 = vector.shape_cast %396 : vector<1x32x32xf32> to vector<32x32xf32>
    %cst_159 = arith.constant dense<0.000000e+00> : vector<4x32xf32>
    %398 = tpu.matmul %395, %397, %cst_159 {dimension_numbers = #tpu.dot_dimension_numbers<[1], [0], [0], [1], [0, 0, 1, 1], [], []>} : vector<4x32xf32>, vector<32x32xf32>, vector<4x32xf32> -> vector<4x32xf32>
    %c0_160 = arith.constant 0 : index
    %c0_161 = arith.constant 0 : index
    %c0_162 = arith.constant 0 : index
    %399 = vector.load %arg9[%c0_160, %c0_161, %c0_162] : memref<2x1x32xf32, #tpu.memory_space<vmem>>, vector<1x1x32xf32>
    %400 = vector.shape_cast %399 : vector<1x1x32xf32> to vector<1x32xf32>
    %401 = vector.broadcast %400 : vector<1x32xf32> to vector<4x32xf32>
    %402 = arith.addf %398, %401 : vector<4x32xf32>
    %403 = arith.addf %311, %402 : vector<4x32xf32>
    %c0_163 = arith.constant 0 : index
    %c0_164 = arith.constant 0 : index
    %c0_165 = arith.constant 0 : index
    %404 = vector.load %arg10[%c0_163, %c0_164, %c0_165] : memref<2x1x32xf32, #tpu.memory_space<vmem>>, vector<1x1x32xf32>
    %405 = vector.shape_cast %404 : vector<1x1x32xf32> to vector<1x32xf32>
    %c0_166 = arith.constant 0 : index
    %c0_167 = arith.constant 0 : index
    %c0_168 = arith.constant 0 : index
    %406 = vector.load %arg11[%c0_166, %c0_167, %c0_168] : memref<2x1x32xf32, #tpu.memory_space<vmem>>, vector<1x1x32xf32>
    %407 = vector.shape_cast %406 : vector<1x1x32xf32> to vector<1x32xf32>
    %cst_169 = arith.constant dense<0.000000e+00> : vector<4xf32>
    %408 = vector.multi_reduction <add>, %403, %cst_169 [1] : vector<4x32xf32> to vector<4xf32>
    %409 = vector.shape_cast %408 : vector<4xf32> to vector<4x1xf32>
    %cst_170 = arith.constant 3.200000e+01 : f32
    %410 = vector.broadcast %cst_170 : f32 to vector<4x1xf32>
    %411 = arith.divf %409, %410 : vector<4x1xf32>
    %412 = arith.mulf %403, %403 : vector<4x32xf32>
    %cst_171 = arith.constant dense<0.000000e+00> : vector<4xf32>
    %413 = vector.multi_reduction <add>, %412, %cst_171 [1] : vector<4x32xf32> to vector<4xf32>
    %414 = vector.shape_cast %413 : vector<4xf32> to vector<4x1xf32>
    %cst_172 = arith.constant 3.200000e+01 : f32
    %415 = vector.broadcast %cst_172 : f32 to vector<4x1xf32>
    %416 = arith.divf %414, %415 : vector<4x1xf32>
    %417 = arith.mulf %411, %411 : vector<4x1xf32>
    %418 = arith.subf %416, %417 : vector<4x1xf32>
    %419 = vector.broadcast %411 : vector<4x1xf32> to vector<4x32xf32>
    %420 = arith.subf %403, %419 : vector<4x32xf32>
    %cst_173 = arith.constant 9.99999997E-7 : f32
    %421 = vector.broadcast %cst_173 : f32 to vector<4x1xf32>
    %422 = arith.addf %418, %421 : vector<4x1xf32>
    %423 = math.rsqrt %422 : vector<4x1xf32>
    %424 = vector.broadcast %423 : vector<4x1xf32> to vector<4x32xf32>
    %425 = arith.mulf %420, %424 : vector<4x32xf32>
    %426 = vector.broadcast %405 : vector<1x32xf32> to vector<4x32xf32>
    %427 = arith.mulf %425, %426 : vector<4x32xf32>
    %428 = vector.broadcast %407 : vector<1x32xf32> to vector<4x32xf32>
    %429 = arith.addf %427, %428 : vector<4x32xf32>
    %c0_174 = arith.constant 0 : index
    %c0_175 = arith.constant 0 : index
    %c0_176 = arith.constant 0 : index
    %430 = vector.load %arg12[%c0_174, %c0_175, %c0_176] : memref<2x32x128xf32, #tpu.memory_space<vmem>>, vector<1x32x128xf32>
    %431 = vector.shape_cast %430 : vector<1x32x128xf32> to vector<32x128xf32>
    %cst_177 = arith.constant dense<0.000000e+00> : vector<4x128xf32>
    %432 = tpu.matmul %429, %431, %cst_177 {dimension_numbers = #tpu.dot_dimension_numbers<[1], [0], [0], [1], [0, 0, 1, 1], [], []>} : vector<4x32xf32>, vector<32x128xf32>, vector<4x128xf32> -> vector<4x128xf32>
    %c0_178 = arith.constant 0 : index
    %c0_179 = arith.constant 0 : index
    %c0_180 = arith.constant 0 : index
    %433 = vector.load %arg13[%c0_178, %c0_179, %c0_180] : memref<2x1x128xf32, #tpu.memory_space<vmem>>, vector<1x1x128xf32>
    %434 = vector.shape_cast %433 : vector<1x1x128xf32> to vector<1x128xf32>
    %435 = vector.broadcast %434 : vector<1x128xf32> to vector<4x128xf32>
    %436 = arith.addf %432, %435 : vector<4x128xf32>
    %cst_181 = arith.constant 5.000000e-01 : f32
    %437 = vector.broadcast %cst_181 : f32 to vector<4x128xf32>
    %438 = arith.mulf %437, %436 : vector<4x128xf32>
    %cst_182 = arith.constant 0.707106769 : f32
    %439 = vector.broadcast %cst_182 : f32 to vector<4x128xf32>
    %440 = arith.mulf %436, %439 : vector<4x128xf32>
    %441 = math.erf %440 : vector<4x128xf32>
    %cst_183 = arith.constant 1.000000e+00 : f32
    %442 = vector.broadcast %cst_183 : f32 to vector<4x128xf32>
    %443 = arith.addf %442, %441 : vector<4x128xf32>
    %444 = arith.mulf %438, %443 : vector<4x128xf32>
    %c0_184 = arith.constant 0 : index
    %c0_185 = arith.constant 0 : index
    %c0_186 = arith.constant 0 : index
    %445 = vector.load %arg14[%c0_184, %c0_185, %c0_186] : memref<2x128x32xf32, #tpu.memory_space<vmem>>, vector<1x128x32xf32>
    %446 = vector.shape_cast %445 : vector<1x128x32xf32> to vector<128x32xf32>
    %cst_187 = arith.constant dense<0.000000e+00> : vector<4x32xf32>
    %447 = tpu.matmul %444, %446, %cst_187 {dimension_numbers = #tpu.dot_dimension_numbers<[1], [0], [0], [1], [0, 0, 1, 1], [], []>} : vector<4x128xf32>, vector<128x32xf32>, vector<4x32xf32> -> vector<4x32xf32>
    %448 = arith.addf %403, %447 : vector<4x32xf32>
    %c0_188 = arith.constant 0 : index
    %c0_189 = arith.constant 0 : index
    %c0_190 = arith.constant 0 : index
    %449 = vector.load %arg15[%c0_188, %c0_189, %c0_190] : memref<2x1x32xf32, #tpu.memory_space<vmem>>, vector<1x1x32xf32>
    %450 = vector.shape_cast %449 : vector<1x1x32xf32> to vector<1x32xf32>
    %451 = vector.broadcast %450 : vector<1x32xf32> to vector<4x32xf32>
    %452 = arith.addf %448, %451 : vector<4x32xf32>
    %c1_191 = arith.constant 1 : index
    %c0_192 = arith.constant 0 : index
    %c0_193 = arith.constant 0 : index
    %453 = vector.load %arg4[%c1_191, %c0_192, %c0_193] : memref<2x1x32xf32, #tpu.memory_space<vmem>>, vector<1x1x32xf32>
    %454 = vector.shape_cast %453 : vector<1x1x32xf32> to vector<1x32xf32>
    %c1_194 = arith.constant 1 : index
    %c0_195 = arith.constant 0 : index
    %c0_196 = arith.constant 0 : index
    %455 = vector.load %arg5[%c1_194, %c0_195, %c0_196] : memref<2x1x32xf32, #tpu.memory_space<vmem>>, vector<1x1x32xf32>
    %456 = vector.shape_cast %455 : vector<1x1x32xf32> to vector<1x32xf32>
    %cst_197 = arith.constant dense<0.000000e+00> : vector<4xf32>
    %457 = vector.multi_reduction <add>, %452, %cst_197 [1] : vector<4x32xf32> to vector<4xf32>
    %458 = vector.shape_cast %457 : vector<4xf32> to vector<4x1xf32>
    %cst_198 = arith.constant 3.200000e+01 : f32
    %459 = vector.broadcast %cst_198 : f32 to vector<4x1xf32>
    %460 = arith.divf %458, %459 : vector<4x1xf32>
    %461 = arith.mulf %452, %452 : vector<4x32xf32>
    %cst_199 = arith.constant dense<0.000000e+00> : vector<4xf32>
    %462 = vector.multi_reduction <add>, %461, %cst_199 [1] : vector<4x32xf32> to vector<4xf32>
    %463 = vector.shape_cast %462 : vector<4xf32> to vector<4x1xf32>
    %cst_200 = arith.constant 3.200000e+01 : f32
    %464 = vector.broadcast %cst_200 : f32 to vector<4x1xf32>
    %465 = arith.divf %463, %464 : vector<4x1xf32>
    %466 = arith.mulf %460, %460 : vector<4x1xf32>
    %467 = arith.subf %465, %466 : vector<4x1xf32>
    %468 = vector.broadcast %460 : vector<4x1xf32> to vector<4x32xf32>
    %469 = arith.subf %452, %468 : vector<4x32xf32>
    %cst_201 = arith.constant 9.99999997E-7 : f32
    %470 = vector.broadcast %cst_201 : f32 to vector<4x1xf32>
    %471 = arith.addf %467, %470 : vector<4x1xf32>
    %472 = math.rsqrt %471 : vector<4x1xf32>
    %473 = vector.broadcast %472 : vector<4x1xf32> to vector<4x32xf32>
    %474 = arith.mulf %469, %473 : vector<4x32xf32>
    %475 = vector.broadcast %454 : vector<1x32xf32> to vector<4x32xf32>
    %476 = arith.mulf %474, %475 : vector<4x32xf32>
    %477 = vector.broadcast %456 : vector<1x32xf32> to vector<4x32xf32>
    %478 = arith.addf %476, %477 : vector<4x32xf32>
    %c1_202 = arith.constant 1 : index
    %c0_203 = arith.constant 0 : index
    %c0_204 = arith.constant 0 : index
    %479 = vector.load %arg6[%c1_202, %c0_203, %c0_204] : memref<2x32x96xf32, #tpu.memory_space<vmem>>, vector<1x32x96xf32>
    %480 = vector.shape_cast %479 : vector<1x32x96xf32> to vector<32x96xf32>
    %cst_205 = arith.constant dense<0.000000e+00> : vector<4x96xf32>
    %481 = tpu.matmul %478, %480, %cst_205 {dimension_numbers = #tpu.dot_dimension_numbers<[1], [0], [0], [1], [0, 0, 1, 1], [], []>} : vector<4x32xf32>, vector<32x96xf32>, vector<4x96xf32> -> vector<4x96xf32>
    %c1_206 = arith.constant 1 : index
    %c0_207 = arith.constant 0 : index
    %c0_208 = arith.constant 0 : index
    %482 = vector.load %arg7[%c1_206, %c0_207, %c0_208] : memref<2x1x96xf32, #tpu.memory_space<vmem>>, vector<1x1x96xf32>
    %483 = vector.shape_cast %482 : vector<1x1x96xf32> to vector<1x96xf32>
    %484 = vector.broadcast %483 : vector<1x96xf32> to vector<4x96xf32>
    %485 = arith.addf %481, %484 : vector<4x96xf32>
    %486 = vector.extract_strided_slice %485 {offsets = [0, 0], sizes = [4, 8], strides = [1, 1]} : vector<4x96xf32> to vector<4x8xf32>
    %487 = vector.extract_strided_slice %485 {offsets = [0, 8], sizes = [4, 8], strides = [1, 1]} : vector<4x96xf32> to vector<4x8xf32>
    %488 = vector.extract_strided_slice %485 {offsets = [0, 16], sizes = [4, 8], strides = [1, 1]} : vector<4x96xf32> to vector<4x8xf32>
    %489 = vector.extract_strided_slice %485 {offsets = [0, 24], sizes = [4, 8], strides = [1, 1]} : vector<4x96xf32> to vector<4x8xf32>
    %490 = vector.shape_cast %486 : vector<4x8xf32> to vector<1x4x8xf32>
    %491 = vector.shape_cast %487 : vector<4x8xf32> to vector<1x4x8xf32>
    %492 = vector.shape_cast %488 : vector<4x8xf32> to vector<1x4x8xf32>
    %493 = vector.shape_cast %489 : vector<4x8xf32> to vector<1x4x8xf32>
    %494 = tpu.concatenate %490, %491, %492, %493 in 0 : vector<1x4x8xf32>, vector<1x4x8xf32>, vector<1x4x8xf32>, vector<1x4x8xf32> -> vector<4x4x8xf32>
    %495 = vector.extract_strided_slice %485 {offsets = [0, 32], sizes = [4, 8], strides = [1, 1]} : vector<4x96xf32> to vector<4x8xf32>
    %496 = vector.extract_strided_slice %485 {offsets = [0, 40], sizes = [4, 8], strides = [1, 1]} : vector<4x96xf32> to vector<4x8xf32>
    %497 = vector.extract_strided_slice %485 {offsets = [0, 48], sizes = [4, 8], strides = [1, 1]} : vector<4x96xf32> to vector<4x8xf32>
    %498 = vector.extract_strided_slice %485 {offsets = [0, 56], sizes = [4, 8], strides = [1, 1]} : vector<4x96xf32> to vector<4x8xf32>
    %499 = vector.shape_cast %495 : vector<4x8xf32> to vector<1x4x8xf32>
    %500 = vector.shape_cast %496 : vector<4x8xf32> to vector<1x4x8xf32>
    %501 = vector.shape_cast %497 : vector<4x8xf32> to vector<1x4x8xf32>
    %502 = vector.shape_cast %498 : vector<4x8xf32> to vector<1x4x8xf32>
    %503 = tpu.concatenate %499, %500, %501, %502 in 0 : vector<1x4x8xf32>, vector<1x4x8xf32>, vector<1x4x8xf32>, vector<1x4x8xf32> -> vector<4x4x8xf32>
    %504 = vector.extract_strided_slice %485 {offsets = [0, 64], sizes = [4, 8], strides = [1, 1]} : vector<4x96xf32> to vector<4x8xf32>
    %505 = vector.extract_strided_slice %485 {offsets = [0, 72], sizes = [4, 8], strides = [1, 1]} : vector<4x96xf32> to vector<4x8xf32>
    %506 = vector.extract_strided_slice %485 {offsets = [0, 80], sizes = [4, 8], strides = [1, 1]} : vector<4x96xf32> to vector<4x8xf32>
    %507 = vector.extract_strided_slice %485 {offsets = [0, 88], sizes = [4, 8], strides = [1, 1]} : vector<4x96xf32> to vector<4x8xf32>
    %508 = vector.shape_cast %504 : vector<4x8xf32> to vector<1x4x8xf32>
    %509 = vector.shape_cast %505 : vector<4x8xf32> to vector<1x4x8xf32>
    %510 = vector.shape_cast %506 : vector<4x8xf32> to vector<1x4x8xf32>
    %511 = vector.shape_cast %507 : vector<4x8xf32> to vector<1x4x8xf32>
    %512 = tpu.concatenate %508, %509, %510, %511 in 0 : vector<1x4x8xf32>, vector<1x4x8xf32>, vector<1x4x8xf32>, vector<1x4x8xf32> -> vector<4x4x8xf32>
    "tpu.trace_start"() <{level = 10 : i32, message = "hnd,hmd->hnm"}> : () -> ()
    %cst_209 = arith.constant dense<0.000000e+00> : vector<4x4x4xf32>
    %513 = tpu.matmul %494, %503, %cst_209 {dimension_numbers = #tpu.dot_dimension_numbers<[2], [2], [1], [1], [0, 0, 0, 1, 1, 1], [0], [0]>} : vector<4x4x8xf32>, vector<4x4x8xf32>, vector<4x4x4xf32> -> vector<4x4x4xf32>
    "tpu.trace_stop"() : () -> ()
    %cst_210 = arith.constant 0.353553385 : f32
    %514 = vector.broadcast %cst_210 : f32 to vector<4x4x4xf32>
    %515 = arith.mulf %513, %514 : vector<4x4x4xf32>
    %cst_211 = arith.constant dense<0xFF800000> : vector<4x4xf32>
    %516 = vector.multi_reduction <maximumf>, %515, %cst_211 [2] : vector<4x4x4xf32> to vector<4x4xf32>
    %cst_212 = arith.constant 0xFF800000 : f32
    %517 = vector.broadcast %cst_212 : f32 to vector<4x4xf32>
    %518 = arith.maximumf %517, %516 : vector<4x4xf32>
    %519 = vector.shape_cast %518 : vector<4x4xf32> to vector<4x4x1xf32>
    %520 = vector.broadcast %519 : vector<4x4x1xf32> to vector<4x4x4xf32>
    %521 = arith.subf %515, %520 : vector<4x4x4xf32>
    %522 = math.exp %521 : vector<4x4x4xf32>
    %cst_213 = arith.constant dense<0.000000e+00> : vector<4x4xf32>
    %523 = vector.multi_reduction <add>, %522, %cst_213 [2] : vector<4x4x4xf32> to vector<4x4xf32>
    %524 = vector.shape_cast %523 : vector<4x4xf32> to vector<4x4x1xf32>
    %525 = vector.broadcast %524 : vector<4x4x1xf32> to vector<4x4x4xf32>
    %526 = arith.divf %522, %525 : vector<4x4x4xf32>
    "tpu.trace_start"() <{level = 10 : i32, message = "hnm,hmd->hnd"}> : () -> ()
    %cst_214 = arith.constant dense<0.000000e+00> : vector<4x4x8xf32>
    %527 = tpu.matmul %526, %512, %cst_214 {dimension_numbers = #tpu.dot_dimension_numbers<[2], [1], [1], [2], [0, 0, 0, 1, 1, 2], [0], [0]>} : vector<4x4x4xf32>, vector<4x4x8xf32>, vector<4x4x8xf32> -> vector<4x4x8xf32>
    "tpu.trace_stop"() : () -> ()
    %528 = vector.extract_strided_slice %527 {offsets = [0, 0, 0], sizes = [1, 4, 8], strides = [1, 1, 1]} : vector<4x4x8xf32> to vector<1x4x8xf32>
    %529 = vector.shape_cast %528 : vector<1x4x8xf32> to vector<4x8xf32>
    %530 = vector.extract_strided_slice %527 {offsets = [1, 0, 0], sizes = [1, 4, 8], strides = [1, 1, 1]} : vector<4x4x8xf32> to vector<1x4x8xf32>
    %531 = vector.shape_cast %530 : vector<1x4x8xf32> to vector<4x8xf32>
    %532 = vector.extract_strided_slice %527 {offsets = [2, 0, 0], sizes = [1, 4, 8], strides = [1, 1, 1]} : vector<4x4x8xf32> to vector<1x4x8xf32>
    %533 = vector.shape_cast %532 : vector<1x4x8xf32> to vector<4x8xf32>
    %534 = vector.extract_strided_slice %527 {offsets = [3, 0, 0], sizes = [1, 4, 8], strides = [1, 1, 1]} : vector<4x4x8xf32> to vector<1x4x8xf32>
    %535 = vector.shape_cast %534 : vector<1x4x8xf32> to vector<4x8xf32>
    %536 = tpu.concatenate %529, %531, %533, %535 in 1 : vector<4x8xf32>, vector<4x8xf32>, vector<4x8xf32>, vector<4x8xf32> -> vector<4x32xf32>
    %c1_215 = arith.constant 1 : index
    %c0_216 = arith.constant 0 : index
    %c0_217 = arith.constant 0 : index
    %537 = vector.load %arg8[%c1_215, %c0_216, %c0_217] : memref<2x32x32xf32, #tpu.memory_space<vmem>>, vector<1x32x32xf32>
    %538 = vector.shape_cast %537 : vector<1x32x32xf32> to vector<32x32xf32>
    %cst_218 = arith.constant dense<0.000000e+00> : vector<4x32xf32>
    %539 = tpu.matmul %536, %538, %cst_218 {dimension_numbers = #tpu.dot_dimension_numbers<[1], [0], [0], [1], [0, 0, 1, 1], [], []>} : vector<4x32xf32>, vector<32x32xf32>, vector<4x32xf32> -> vector<4x32xf32>
    %c1_219 = arith.constant 1 : index
    %c0_220 = arith.constant 0 : index
    %c0_221 = arith.constant 0 : index
    %540 = vector.load %arg9[%c1_219, %c0_220, %c0_221] : memref<2x1x32xf32, #tpu.memory_space<vmem>>, vector<1x1x32xf32>
    %541 = vector.shape_cast %540 : vector<1x1x32xf32> to vector<1x32xf32>
    %542 = vector.broadcast %541 : vector<1x32xf32> to vector<4x32xf32>
    %543 = arith.addf %539, %542 : vector<4x32xf32>
    %544 = arith.addf %452, %543 : vector<4x32xf32>
    %c1_222 = arith.constant 1 : index
    %c0_223 = arith.constant 0 : index
    %c0_224 = arith.constant 0 : index
    %545 = vector.load %arg10[%c1_222, %c0_223, %c0_224] : memref<2x1x32xf32, #tpu.memory_space<vmem>>, vector<1x1x32xf32>
    %546 = vector.shape_cast %545 : vector<1x1x32xf32> to vector<1x32xf32>
    %c1_225 = arith.constant 1 : index
    %c0_226 = arith.constant 0 : index
    %c0_227 = arith.constant 0 : index
    %547 = vector.load %arg11[%c1_225, %c0_226, %c0_227] : memref<2x1x32xf32, #tpu.memory_space<vmem>>, vector<1x1x32xf32>
    %548 = vector.shape_cast %547 : vector<1x1x32xf32> to vector<1x32xf32>
    %cst_228 = arith.constant dense<0.000000e+00> : vector<4xf32>
    %549 = vector.multi_reduction <add>, %544, %cst_228 [1] : vector<4x32xf32> to vector<4xf32>
    %550 = vector.shape_cast %549 : vector<4xf32> to vector<4x1xf32>
    %cst_229 = arith.constant 3.200000e+01 : f32
    %551 = vector.broadcast %cst_229 : f32 to vector<4x1xf32>
    %552 = arith.divf %550, %551 : vector<4x1xf32>
    %553 = arith.mulf %544, %544 : vector<4x32xf32>
    %cst_230 = arith.constant dense<0.000000e+00> : vector<4xf32>
    %554 = vector.multi_reduction <add>, %553, %cst_230 [1] : vector<4x32xf32> to vector<4xf32>
    %555 = vector.shape_cast %554 : vector<4xf32> to vector<4x1xf32>
    %cst_231 = arith.constant 3.200000e+01 : f32
    %556 = vector.broadcast %cst_231 : f32 to vector<4x1xf32>
    %557 = arith.divf %555, %556 : vector<4x1xf32>
    %558 = arith.mulf %552, %552 : vector<4x1xf32>
    %559 = arith.subf %557, %558 : vector<4x1xf32>
    %560 = vector.broadcast %552 : vector<4x1xf32> to vector<4x32xf32>
    %561 = arith.subf %544, %560 : vector<4x32xf32>
    %cst_232 = arith.constant 9.99999997E-7 : f32
    %562 = vector.broadcast %cst_232 : f32 to vector<4x1xf32>
    %563 = arith.addf %559, %562 : vector<4x1xf32>
    %564 = math.rsqrt %563 : vector<4x1xf32>
    %565 = vector.broadcast %564 : vector<4x1xf32> to vector<4x32xf32>
    %566 = arith.mulf %561, %565 : vector<4x32xf32>
    %567 = vector.broadcast %546 : vector<1x32xf32> to vector<4x32xf32>
    %568 = arith.mulf %566, %567 : vector<4x32xf32>
    %569 = vector.broadcast %548 : vector<1x32xf32> to vector<4x32xf32>
    %570 = arith.addf %568, %569 : vector<4x32xf32>
    %c1_233 = arith.constant 1 : index
    %c0_234 = arith.constant 0 : index
    %c0_235 = arith.constant 0 : index
    %571 = vector.load %arg12[%c1_233, %c0_234, %c0_235] : memref<2x32x128xf32, #tpu.memory_space<vmem>>, vector<1x32x128xf32>
    %572 = vector.shape_cast %571 : vector<1x32x128xf32> to vector<32x128xf32>
    %cst_236 = arith.constant dense<0.000000e+00> : vector<4x128xf32>
    %573 = tpu.matmul %570, %572, %cst_236 {dimension_numbers = #tpu.dot_dimension_numbers<[1], [0], [0], [1], [0, 0, 1, 1], [], []>} : vector<4x32xf32>, vector<32x128xf32>, vector<4x128xf32> -> vector<4x128xf32>
    %c1_237 = arith.constant 1 : index
    %c0_238 = arith.constant 0 : index
    %c0_239 = arith.constant 0 : index
    %574 = vector.load %arg13[%c1_237, %c0_238, %c0_239] : memref<2x1x128xf32, #tpu.memory_space<vmem>>, vector<1x1x128xf32>
    %575 = vector.shape_cast %574 : vector<1x1x128xf32> to vector<1x128xf32>
    %576 = vector.broadcast %575 : vector<1x128xf32> to vector<4x128xf32>
    %577 = arith.addf %573, %576 : vector<4x128xf32>
    %cst_240 = arith.constant 5.000000e-01 : f32
    %578 = vector.broadcast %cst_240 : f32 to vector<4x128xf32>
    %579 = arith.mulf %578, %577 : vector<4x128xf32>
    %cst_241 = arith.constant 0.707106769 : f32
    %580 = vector.broadcast %cst_241 : f32 to vector<4x128xf32>
    %581 = arith.mulf %577, %580 : vector<4x128xf32>
    %582 = math.erf %581 : vector<4x128xf32>
    %cst_242 = arith.constant 1.000000e+00 : f32
    %583 = vector.broadcast %cst_242 : f32 to vector<4x128xf32>
    %584 = arith.addf %583, %582 : vector<4x128xf32>
    %585 = arith.mulf %579, %584 : vector<4x128xf32>
    %c1_243 = arith.constant 1 : index
    %c0_244 = arith.constant 0 : index
    %c0_245 = arith.constant 0 : index
    %586 = vector.load %arg14[%c1_243, %c0_244, %c0_245] : memref<2x128x32xf32, #tpu.memory_space<vmem>>, vector<1x128x32xf32>
    %587 = vector.shape_cast %586 : vector<1x128x32xf32> to vector<128x32xf32>
    %cst_246 = arith.constant dense<0.000000e+00> : vector<4x32xf32>
    %588 = tpu.matmul %585, %587, %cst_246 {dimension_numbers = #tpu.dot_dimension_numbers<[1], [0], [0], [1], [0, 0, 1, 1], [], []>} : vector<4x128xf32>, vector<128x32xf32>, vector<4x32xf32> -> vector<4x32xf32>
    %589 = arith.addf %544, %588 : vector<4x32xf32>
    %c1_247 = arith.constant 1 : index
    %c0_248 = arith.constant 0 : index
    %c0_249 = arith.constant 0 : index
    %590 = vector.load %arg15[%c1_247, %c0_248, %c0_249] : memref<2x1x32xf32, #tpu.memory_space<vmem>>, vector<1x1x32xf32>
    %591 = vector.shape_cast %590 : vector<1x1x32xf32> to vector<1x32xf32>
    %592 = vector.broadcast %591 : vector<1x32xf32> to vector<4x32xf32>
    %593 = arith.addf %589, %592 : vector<4x32xf32>
    %c0_250 = arith.constant 0 : index
    %c0_251 = arith.constant 0 : index
    %594 = vector.load %arg16[%c0_250, %c0_251] : memref<1x32xf32, #tpu.memory_space<vmem>>, vector<1x32xf32>
    %c0_252 = arith.constant 0 : index
    %c0_253 = arith.constant 0 : index
    %595 = vector.load %arg17[%c0_252, %c0_253] : memref<1x32xf32, #tpu.memory_space<vmem>>, vector<1x32xf32>
    %cst_254 = arith.constant dense<0.000000e+00> : vector<4xf32>
    %596 = vector.multi_reduction <add>, %593, %cst_254 [1] : vector<4x32xf32> to vector<4xf32>
    %597 = vector.shape_cast %596 : vector<4xf32> to vector<4x1xf32>
    %cst_255 = arith.constant 3.200000e+01 : f32
    %598 = vector.broadcast %cst_255 : f32 to vector<4x1xf32>
    %599 = arith.divf %597, %598 : vector<4x1xf32>
    %600 = arith.mulf %593, %593 : vector<4x32xf32>
    %cst_256 = arith.constant dense<0.000000e+00> : vector<4xf32>
    %601 = vector.multi_reduction <add>, %600, %cst_256 [1] : vector<4x32xf32> to vector<4xf32>
    %602 = vector.shape_cast %601 : vector<4xf32> to vector<4x1xf32>
    %cst_257 = arith.constant 3.200000e+01 : f32
    %603 = vector.broadcast %cst_257 : f32 to vector<4x1xf32>
    %604 = arith.divf %602, %603 : vector<4x1xf32>
    %605 = arith.mulf %599, %599 : vector<4x1xf32>
    %606 = arith.subf %604, %605 : vector<4x1xf32>
    %607 = vector.broadcast %599 : vector<4x1xf32> to vector<4x32xf32>
    %608 = arith.subf %593, %607 : vector<4x32xf32>
    %cst_258 = arith.constant 9.99999997E-7 : f32
    %609 = vector.broadcast %cst_258 : f32 to vector<4x1xf32>
    %610 = arith.addf %606, %609 : vector<4x1xf32>
    %611 = math.rsqrt %610 : vector<4x1xf32>
    %612 = vector.broadcast %611 : vector<4x1xf32> to vector<4x32xf32>
    %613 = arith.mulf %608, %612 : vector<4x32xf32>
    %614 = vector.broadcast %594 : vector<1x32xf32> to vector<4x32xf32>
    %615 = arith.mulf %613, %614 : vector<4x32xf32>
    %616 = vector.broadcast %595 : vector<1x32xf32> to vector<4x32xf32>
    %617 = arith.addf %615, %616 : vector<4x32xf32>
    %c0_259 = arith.constant 0 : index
    %c0_260 = arith.constant 0 : index
    %618 = vector.load %arg18[%c0_259, %c0_260] : memref<32x192xf32, #tpu.memory_space<vmem>>, vector<32x192xf32>
    %cst_261 = arith.constant dense<0.000000e+00> : vector<4x192xf32>
    %619 = tpu.matmul %617, %618, %cst_261 {dimension_numbers = #tpu.dot_dimension_numbers<[1], [0], [0], [1], [0, 0, 1, 1], [], []>} : vector<4x32xf32>, vector<32x192xf32>, vector<4x192xf32> -> vector<4x192xf32>
    %c0_262 = arith.constant 0 : index
    %c0_263 = arith.constant 0 : index
    %620 = vector.load %arg19[%c0_262, %c0_263] : memref<1x192xf32, #tpu.memory_space<vmem>>, vector<1x192xf32>
    %621 = vector.broadcast %620 : vector<1x192xf32> to vector<4x192xf32>
    %622 = arith.addf %619, %621 : vector<4x192xf32>
    %623 = math.tanh %622 : vector<4x192xf32>
    %c0_264 = arith.constant 0 : index
    %c0_265 = arith.constant 0 : index
    %624 = vector.load %arg20[%c0_264, %c0_265] : memref<192x192xf32, #tpu.memory_space<vmem>>, vector<192x192xf32>
    %cst_266 = arith.constant dense<0.000000e+00> : vector<4x192xf32>
    %625 = tpu.matmul %623, %624, %cst_266 {dimension_numbers = #tpu.dot_dimension_numbers<[1], [0], [0], [1], [0, 0, 1, 1], [], []>} : vector<4x192xf32>, vector<192x192xf32>, vector<4x192xf32> -> vector<4x192xf32>
    %c0_267 = arith.constant 0 : index
    %c0_268 = arith.constant 0 : index
    %626 = vector.load %arg21[%c0_267, %c0_268] : memref<1x192xf32, #tpu.memory_space<vmem>>, vector<1x192xf32>
    %627 = vector.broadcast %626 : vector<1x192xf32> to vector<4x192xf32>
    %628 = arith.addf %625, %627 : vector<4x192xf32>
    %629 = math.tanh %628 : vector<4x192xf32>
    %c0_269 = arith.constant 0 : index
    %c0_270 = arith.constant 0 : index
    %630 = vector.load %arg22[%c0_269, %c0_270] : memref<192x2304xf32, #tpu.memory_space<vmem>>, vector<192x2304xf32>
    %cst_271 = arith.constant dense<0.000000e+00> : vector<4x2304xf32>
    %631 = tpu.matmul %629, %630, %cst_271 {dimension_numbers = #tpu.dot_dimension_numbers<[1], [0], [0], [1], [0, 0, 1, 1], [], []>} : vector<4x192xf32>, vector<192x2304xf32>, vector<4x2304xf32> -> vector<4x2304xf32>
    %c0_272 = arith.constant 0 : index
    %c0_273 = arith.constant 0 : index
    %632 = vector.load %arg23[%c0_272, %c0_273] : memref<1x2304xf32, #tpu.memory_space<vmem>>, vector<1x2304xf32>
    %633 = vector.broadcast %632 : vector<1x2304xf32> to vector<4x2304xf32>
    %634 = arith.addf %631, %633 : vector<4x2304xf32>
    %c0_274 = arith.constant 0 : index
    %c0_275 = arith.constant 0 : index
    %c0_276 = arith.constant 0 : index
    %635 = vector.load %arg24[%c0_274, %c0_275, %c0_276] : memref<1x4x2304xf32, #tpu.memory_space<vmem>>, vector<1x4x2304xf32>
    %636 = vector.shape_cast %635 : vector<1x4x2304xf32> to vector<4x2304xf32>
    %637 = vector.shape_cast %634 : vector<4x2304xf32> to vector<1x4x2304xf32>
    tpu.vector_store %arg24[%c0_274, %c0_275, %c0_276], %637 {strides = array<i32>} : memref<1x4x2304xf32, #tpu.memory_space<vmem>>, vector<1x4x2304xf32>,
    return
  }
  func.func @transform_0(%arg0: i32) -> (i32, i32, i32) {
    %c0_i32 = arith.constant 0 : i32
    %c0_i32_0 = arith.constant 0 : i32
    %c0_i32_1 = arith.constant 0 : i32
    return %arg0, %c0_i32, %c0_i32_0 : i32, i32, i32
  }
  func.func @transform_1(%arg0: i32) -> (i32, i32) {
    %c0_i32 = arith.constant 0 : i32
    %c0_i32_0 = arith.constant 0 : i32
    %c0_i32_1 = arith.constant 0 : i32
    return %c0_i32, %c0_i32_0 : i32, i32
  }
  func.func @transform_2(%arg0: i32) -> (i32, i32) {
    %c0_i32 = arith.constant 0 : i32
    %c0_i32_0 = arith.constant 0 : i32
    %c0_i32_1 = arith.constant 0 : i32
    return %c0_i32, %c0_i32_0 : i32, i32
  }
  func.func @transform_3(%arg0: i32) -> (i32, i32, i32) {
    %c0_i32 = arith.constant 0 : i32
    %c0_i32_0 = arith.constant 0 : i32
    %c0_i32_1 = arith.constant 0 : i32
    %c0_i32_2 = arith.constant 0 : i32
    return %c0_i32, %c0_i32_0, %c0_i32_1 : i32, i32, i32
  }
  func.func @transform_4(%arg0: i32) -> (i32, i32, i32) {
    %c0_i32 = arith.constant 0 : i32
    %c0_i32_0 = arith.constant 0 : i32
    %c0_i32_1 = arith.constant 0 : i32
    %c0_i32_2 = arith.constant 0 : i32
    return %c0_i32, %c0_i32_0, %c0_i32_1 : i32, i32, i32
  }
  func.func @transform_5(%arg0: i32) -> (i32, i32, i32) {
    %c0_i32 = arith.constant 0 : i32
    %c0_i32_0 = arith.constant 0 : i32
    %c0_i32_1 = arith.constant 0 : i32
    %c0_i32_2 = arith.constant 0 : i32
    return %c0_i32, %c0_i32_0, %c0_i32_1 : i32, i32, i32
  }
  func.func @transform_6(%arg0: i32) -> (i32, i32, i32) {
    %c0_i32 = arith.constant 0 : i32
    %c0_i32_0 = arith.constant 0 : i32
    %c0_i32_1 = arith.constant 0 : i32
    %c0_i32_2 = arith.constant 0 : i32
    return %c0_i32, %c0_i32_0, %c0_i32_1 : i32, i32, i32
  }
  func.func @transform_7(%arg0: i32) -> (i32, i32, i32) {
    %c0_i32 = arith.constant 0 : i32
    %c0_i32_0 = arith.constant 0 : i32
    %c0_i32_1 = arith.constant 0 : i32
    %c0_i32_2 = arith.constant 0 : i32
    return %c0_i32, %c0_i32_0, %c0_i32_1 : i32, i32, i32
  }
  func.func @transform_8(%arg0: i32) -> (i32, i32, i32) {
    %c0_i32 = arith.constant 0 : i32
    %c0_i32_0 = arith.constant 0 : i32
    %c0_i32_1 = arith.constant 0 : i32
    %c0_i32_2 = arith.constant 0 : i32
    return %c0_i32, %c0_i32_0, %c0_i32_1 : i32, i32, i32
  }
  func.func @transform_9(%arg0: i32) -> (i32, i32, i32) {
    %c0_i32 = arith.constant 0 : i32
    %c0_i32_0 = arith.constant 0 : i32
    %c0_i32_1 = arith.constant 0 : i32
    %c0_i32_2 = arith.constant 0 : i32
    return %c0_i32, %c0_i32_0, %c0_i32_1 : i32, i32, i32
  }
  func.func @transform_10(%arg0: i32) -> (i32, i32, i32) {
    %c0_i32 = arith.constant 0 : i32
    %c0_i32_0 = arith.constant 0 : i32
    %c0_i32_1 = arith.constant 0 : i32
    %c0_i32_2 = arith.constant 0 : i32
    return %c0_i32, %c0_i32_0, %c0_i32_1 : i32, i32, i32
  }
  func.func @transform_11(%arg0: i32) -> (i32, i32, i32) {
    %c0_i32 = arith.constant 0 : i32
    %c0_i32_0 = arith.constant 0 : i32
    %c0_i32_1 = arith.constant 0 : i32
    %c0_i32_2 = arith.constant 0 : i32
    return %c0_i32, %c0_i32_0, %c0_i32_1 : i32, i32, i32
  }
  func.func @transform_12(%arg0: i32) -> (i32, i32, i32) {
    %c0_i32 = arith.constant 0 : i32
    %c0_i32_0 = arith.constant 0 : i32
    %c0_i32_1 = arith.constant 0 : i32
    %c0_i32_2 = arith.constant 0 : i32
    return %c0_i32, %c0_i32_0, %c0_i32_1 : i32, i32, i32
  }
  func.func @transform_13(%arg0: i32) -> (i32, i32, i32) {
    %c0_i32 = arith.constant 0 : i32
    %c0_i32_0 = arith.constant 0 : i32
    %c0_i32_1 = arith.constant 0 : i32
    %c0_i32_2 = arith.constant 0 : i32
    return %c0_i32, %c0_i32_0, %c0_i32_1 : i32, i32, i32
  }
  func.func @transform_14(%arg0: i32) -> (i32, i32, i32) {
    %c0_i32 = arith.constant 0 : i32
    %c0_i32_0 = arith.constant 0 : i32
    %c0_i32_1 = arith.constant 0 : i32
    %c0_i32_2 = arith.constant 0 : i32
    return %c0_i32, %c0_i32_0, %c0_i32_1 : i32, i32, i32
  }
  func.func @transform_15(%arg0: i32) -> (i32, i32) {
    %c0_i32 = arith.constant 0 : i32
    %c0_i32_0 = arith.constant 0 : i32
    %c0_i32_1 = arith.constant 0 : i32
    return %c0_i32, %c0_i32_0 : i32, i32
  }
  func.func @transform_16(%arg0: i32) -> (i32, i32) {
    %c0_i32 = arith.constant 0 : i32
    %c0_i32_0 = arith.constant 0 : i32
    %c0_i32_1 = arith.constant 0 : i32
    return %c0_i32, %c0_i32_0 : i32, i32
  }
  func.func @transform_17(%arg0: i32) -> (i32, i32) {
    %c0_i32 = arith.constant 0 : i32
    %c0_i32_0 = arith.constant 0 : i32
    %c0_i32_1 = arith.constant 0 : i32
    return %c0_i32, %c0_i32_0 : i32, i32
  }
  func.func @transform_18(%arg0: i32) -> (i32, i32) {
    %c0_i32 = arith.constant 0 : i32
    %c0_i32_0 = arith.constant 0 : i32
    %c0_i32_1 = arith.constant 0 : i32
    return %c0_i32, %c0_i32_0 : i32, i32
  }
  func.func @transform_19(%arg0: i32) -> (i32, i32) {
    %c0_i32 = arith.constant 0 : i32
    %c0_i32_0 = arith.constant 0 : i32
    %c0_i32_1 = arith.constant 0 : i32
    return %c0_i32, %c0_i32_0 : i32, i32
  }
  func.func @transform_20(%arg0: i32) -> (i32, i32) {
    %c0_i32 = arith.constant 0 : i32
    %c0_i32_0 = arith.constant 0 : i32
    %c0_i32_1 = arith.constant 0 : i32
    return %c0_i32, %c0_i32_0 : i32, i32
  }
  func.func @transform_21(%arg0: i32) -> (i32, i32) {
    %c0_i32 = arith.constant 0 : i32
    %c0_i32_0 = arith.constant 0 : i32
    %c0_i32_1 = arith.constant 0 : i32
    return %c0_i32, %c0_i32_0 : i32, i32
  }
  func.func @transform_22(%arg0: i32) -> (i32, i32) {
    %c0_i32 = arith.constant 0 : i32
    %c0_i32_0 = arith.constant 0 : i32
    %c0_i32_1 = arith.constant 0 : i32
    return %c0_i32, %c0_i32_0 : i32, i32
  }
  func.func @transform_23(%arg0: i32) -> (i32, i32, i32) {
    %c0_i32 = arith.constant 0 : i32
    %c0_i32_0 = arith.constant 0 : i32
    %c0_i32_1 = arith.constant 0 : i32
    return %arg0, %c0_i32, %c0_i32_0 : i32, i32, i32
  }
}

</mosaic_0001>

<bundles_post_ra>
// kernel: mul.18
= control target key start
LH: loop header
LB: loop body
LE: loop exit
PB: predicated region body
PF: predicated region fallthrough
CT: control target
= control target key end

     0   :  { %vm244_vm0 = vcmask 1041409   ;;  %vm248_vm1 = vcmask 1042434   ;;  %vm252_vm2 = vcmask 1043459   ;;  %vm386_vm3 = vcmask 15360   ;;  %s1266_s11 = smov 117   ;;  %s1267_s12 = smov 126   ;;  %s1735_s0 = inlined_call_operand.vmem [shape: f32[12,4,4,9], index: 0, kind: input, shape index: {}]   ;;  %s1736_s1 = inlined_call_operand.vmem [shape: f32[12,144], index: 1, kind: output, shape index: {}]  }
   0x1   :  { %v1185_v0 = vld [vmem:[%s1735_s0 + $0xbc] sm:$0xf]  ;;  %v1189_v1 = vld [vmem:[%s1735_s0 + $0xac] sm:$0xf]  ;;  %vm256_vm4 = vcmask 1044484   ;;  %vm260_vm5 = vcmask 1045509  }
   0x2   :  { %v1193_v2 = vld [vmem:[%s1735_s0 + $0x9c] sm:$0xf]  ;;  %9 = vst [vmem:[#allocation0 + $0x178] sm:$0xf] %v1185_v0  ;;  %29 = vst [vmem:[#allocation0 + $0x158] sm:$0xf] %v1189_v1 }
   0x3   :  { %49 = vst [vmem:[#allocation0 + $0x138] sm:$0xf] %v1193_v2  ;;  %v1197_v3 = vld [vmem:[%s1735_s0 + $0x8c] sm:$0xf]  ;;  %v1201_v4 = vld [vmem:[%s1735_s0 + $0x7c] sm:$0xf] }
   0x4   :  { %69 = vst [vmem:[#allocation0 + $0x118] sm:$0xf] %v1197_v3  ;;  %89 = vst [vmem:[#allocation0 + $0xf8] sm:$0xf] %v1201_v4  ;;  %v1205_v5 = vld [vmem:[%s1735_s0 + $0x6c] sm:$0xf] }
   0x5   :  { %v1209_v6 = vld [vmem:[%s1735_s0 + $0x5c] sm:$0xf]  ;;  %v1213_v7 = vld [vmem:[%s1735_s0 + $0x4c] sm:$0xf]  ;;  %109 = vst [vmem:[#allocation0 + $0xd8] sm:$0xf] %v1205_v5 }
   0x6   :  { %129 = vst [vmem:[#allocation0 + $0xb8] sm:$0xf] %v1209_v6  ;;  %149 = vst [vmem:[#allocation0 + $0x98] sm:$0xf] %v1213_v7  ;;  %v1217_v8 = vld [vmem:[%s1735_s0 + $0x3c] sm:$0xf] }
   0x7   :  { %v1221_v9 = vld [vmem:[%s1735_s0 + $0x2c] sm:$0xf]  ;;  %v1225_v10 = vld [vmem:[%s1735_s0 + $0x1c] sm:$0xf]  ;;  %169 = vst [vmem:[#allocation0 + $0x78] sm:$0xf] %v1217_v8 }
   0x8   :  { %189 = vst [vmem:[#allocation0 + $0x58] sm:$0xf] %v1221_v9  ;;  %209 = vst [vmem:[#allocation0 + $0x38] sm:$0xf] %v1225_v10  ;;  %v1229_v11 = vld [vmem:[%s1735_s0 + $0xc] sm:$0xf] }
   0x9   :  { %229 = vst [vmem:[#allocation0 + $0x18] sm:$0xf] %v1229_v11  ;;  %v1186_v12 = vld [vmem:[%s1735_s0 + $0xb8] sm:$0xf]  ;;  %v1190_v13 = vld [vmem:[%s1735_s0 + $0xa8] sm:$0xf] }
   0xa   :  { %v1194_v14 = vld [vmem:[%s1735_s0 + $0x98] sm:$0xf]  ;;  %14 = vst [vmem:[#allocation0 + $0x170] sm:$0xf] %v1186_v12  ;;  %34 = vst [vmem:[#allocation0 + $0x150] sm:$0xf] %v1190_v13 }
   0xb   :  { %54 = vst [vmem:[#allocation0 + $0x130] sm:$0xf] %v1194_v14  ;;  %v1198_v15 = vld [vmem:[%s1735_s0 + $0x88] sm:$0xf]  ;;  %v1202_v16 = vld [vmem:[%s1735_s0 + $0x78] sm:$0xf] }
   0xc   :  { %v433_v17 = vld [vmem:[#allocation0 + $0x138] sm:$0x2]   ;;  %vm264_vm6 = vcmask 1046534   ;;  %74 = vst [vmem:[#allocation0 + $0x110] sm:$0xf] %v1198_v15  ;;  %vm268_vm7 = vcmask 1047559  }
   0xd   :  { %v437_v18 = vld [vmem:[#allocation0 + $0x157] sm:$0x4]   ;;  %94 = vst [vmem:[#allocation0 + $0xf0] sm:$0xf] %v1202_v16  ;;  %v359_v21 = vld [vmem:[#allocation0 + $0x11a] sm:$0x1]  }
   0xe   :  { %v441_v19 = vld [vmem:[#allocation0 + $0x176] sm:$0x8]   ;;  %v361_v22 = vld [vmem:[#allocation0 + $0x139] sm:$0x2]   ;;  %v484_v36 = vld [vmem:[#allocation0 + $0x118] sm:$0x1]  }
   0xf   :  { %v431_v20 = vld [vmem:[#allocation0 + $0x119] sm:$0x1]   ;;  %v363_v24 = vsel %vm244_vm0, %v361_v22, %v359_v21  ;;  %v365_v25 = vld [vmem:[#allocation0 + $0x158] sm:$0x4]   ;;  %v486_v37 = vld [vmem:[#allocation0 + $0x137] sm:$0x2]  }
  0x10   :  { %v435_v23 = vsel %vm244_vm0, %v433_v17, %v431_v20  ;;  %v369_v26 = vld [vmem:[#allocation0 + $0x177] sm:$0x8]   ;;  %v367_v29 = vsel %vm248_vm1, %v365_v25, %v363_v24  ;;  %v490_v38 = vld [vmem:[#allocation0 + $0x156] sm:$0x4]   ;;  %v488_v40 = vsel %vm244_vm0, %v486_v37, %v484_v36  ;;  %s1268_s13 = smov 108   ;;  %s1269_s14 = smov 99  }
  0x11   :  { %v373_v27 = vld [vmem:[#allocation0 + $0x11a] sm:$0x1]   ;;  %v439_v28 = vsel %vm248_vm1, %v437_v18, %v435_v23  ;;  %v371_v34 = vsel %vm252_vm2, %v369_v26, %v367_v29  ;;  %v494_v41 = vld [vmem:[#allocation0 + $0x175] sm:$0x8]   ;;  %v492_v45 = vsel %vm248_vm1, %v490_v38, %v488_v40  ;;  %v543_v59 = vld [vmem:[#allocation0 + $0x151] sm:$0x4]  }
  0x12   :  { %v375_v30 = vld [vmem:[#allocation0 + $0x139] sm:$0x2]   ;;  %v443_v33 = vsel %vm252_vm2, %v441_v19, %v439_v28  ;;  %v496_v51 = vsel %vm252_vm2, %v494_v41, %v492_v45  ;;  %v539_v58 = vld [vmem:[#allocation0 + $0x132] sm:$0x2]   ;;  %v450_v63 = vld [vmem:[#allocation0 + $0x18] sm:$0x1]  }
  0x13   :  { %v379_v31 = vld [vmem:[#allocation0 + $0x158] sm:$0x4]   ;;  %v377_v35 = vsel %vm244_vm0, %v375_v30, %v373_v27  ;;  %444 = vrot.lane.b32.xlu1 %v443_v33, %s1266_s11  ;;  %v537_v57 = vld [vmem:[#allocation0 + $0x113] sm:$0x1]   ;;  %v452_v0 = vld [vmem:[#allocation0 + $0x37] sm:$0x2]  }
  0x14   :  { %v383_v32 = vld [vmem:[#allocation0 + $0x177] sm:$0x8]   ;;  %v381_v39 = vsel %vm248_vm1, %v379_v31, %v377_v35  ;;  %v541_v61 = vsel %vm244_vm0, %v539_v58, %v537_v57  ;;  %v547_v62 = vld [vmem:[#allocation0 + $0x170] sm:$0x8]   ;;  %v454_v3 = vsel %vm244_vm0, %v452_v0, %v450_v63  ;;  %v456_v4 = vld [vmem:[#allocation0 + $0x56] sm:$0x4]  }
  0x15   :  { %v325_v42 = vld [vmem:[#allocation0 + $0x1a] sm:$0x1]   ;;  %v385_v44 = vsel %vm252_vm2, %v383_v32, %v381_v39  ;;  %v545_v2 = vsel %vm248_vm1, %v543_v59, %v541_v61  ;;  %v460_v5 = vld [vmem:[#allocation0 + $0x75] sm:$0x8]   ;;  %v458_v9 = vsel %vm248_vm1, %v456_v4, %v454_v3  ;;  %v590_v15 = vld [vmem:[#allocation0 + $0x112] sm:$0x1]  }
  0x16   :  { %v327_v43 = vld [vmem:[#allocation0 + $0x39] sm:$0x2]   ;;  %v387_v50 = vsel %vm386_vm3, %v385_v44, %v371_v34  ;;  %v464_v6 = vld [vmem:[#allocation0 + $0x94] sm:$0x10]   ;;  %v549_v8 = vsel %vm252_vm2, %v547_v62, %v545_v2  ;;  %v462_v14 = vsel %vm252_vm2, %v460_v5, %v458_v9  ;;  %v592_v16 = vld [vmem:[#allocation0 + $0x131] sm:$0x2]  }
  0x17   :  { %v329_v46 = vsel %vm244_vm0, %v327_v43, %v325_v42  ;;  %v331_v47 = vld [vmem:[#allocation0 + $0x58] sm:$0x4]   ;;  %388 = vrot.lane.b32.xlu0 %v387_v50, %s1267_s12  ;;  %497 = vrot.lane.b32.xlu1 %v496_v51, %s1268_s13  ;;  %v468_v10 = vld [vmem:[#allocation0 + $0xb3] sm:$0x20]   ;;  %v596_v17 = vld [vmem:[#allocation0 + $0x150] sm:$0x4]   ;;  %v466_v18 = vsel %vm256_vm4, %v464_v6, %v462_v14  ;;  %v594_v19 = vsel %vm244_vm0, %v592_v16, %v590_v15 }
  0x18   :  { %v335_v48 = vld [vmem:[#allocation0 + $0x77] sm:$0x8]   ;;  %v333_v52 = vsel %vm248_vm1, %v331_v47, %v329_v46  ;;  %v472_v11 = vld [vmem:[#allocation0 + $0xd2] sm:$0x40]   ;;  %v600_v20 = vld [vmem:[#allocation0 + $0x16f] sm:$0x8]   ;;  %v470_v23 = vsel %vm260_vm5, %v468_v10, %v466_v18  ;;  %v598_v24 = vsel %vm248_vm1, %v596_v17, %v594_v19 }
  0x19   :  { %v339_v49 = vld [vmem:[#allocation0 + $0x96] sm:$0x10]   ;;  %v337_v56 = vsel %vm252_vm2, %v335_v48, %v333_v52  ;;  %v476_v12 = vld [vmem:[#allocation0 + $0xf1] sm:$0x80]   ;;  %v1206_v21 = vld [vmem:[%s1735_s0 + $0x68] sm:$0xf]  ;;  %v474_v28 = vsel %vm264_vm6, %v472_v11, %v470_v23  ;;  %v602_v29 = vsel %vm252_vm2, %v600_v20, %v598_v24 }
  0x1a   :  { %v343_v53 = vld [vmem:[#allocation0 + $0xb5] sm:$0x20]   ;;  %v341_v60 = vsel %vm256_vm4, %v339_v49, %v337_v56  ;;  %114 = vst [vmem:[#allocation0 + $0xd0] sm:$0xf] %v1206_v21  ;;  %v1214_v25 = vld [vmem:[%s1735_s0 + $0x48] sm:$0xf]  ;;  %v478_v32 = vsel %vm268_vm7, %v476_v12, %v474_v28 }
  0x1b   :  { %v347_v54 = vld [vmem:[#allocation0 + $0xd4] sm:$0x40]   ;;  %v345_v1 = vsel %vm260_vm5, %v343_v53, %v341_v60  ;;  %550 = vrot.lane.b32.xlu1 %v549_v8, %s1269_s14  ;;  %v1222_v27 = vld [vmem:[%s1735_s0 + $0x28] sm:$0xf]  ;;  %154 = vst [vmem:[#allocation0 + $0x90] sm:$0xf] %v1214_v25 }
  0x1c   :  { %v351_v55 = vld [vmem:[#allocation0 + $0xf3] sm:$0x80]   ;;  %v349_v7 = vsel %vm264_vm6, %v347_v54, %v345_v1  ;;  %194 = vst [vmem:[#allocation0 + $0x50] sm:$0xf] %v1222_v27  ;;  %v1230_v31 = vld [vmem:[%s1735_s0 + $0x8] sm:$0xf] }
  0x1d   :  { %v353_v13 = vsel %vm268_vm7, %v351_v55, %v349_v7  ;;  %v1210_v22 = vld [vmem:[%s1735_s0 + $0x58] sm:$0xf]  ;;  %234 = vst [vmem:[#allocation0 + $0x10] sm:$0xf] %v1230_v31  ;;  %s1270_s29 = smov 90   ;;  %s1271_s30 = smov 81  }
  0x1e   :  { %354 = vrot.lane.b32.xlu0 %v353_v13, %s1267_s12  ;;  %134 = vst [vmem:[#allocation0 + $0xb0] sm:$0xf] %v1210_v22  ;;  %v1218_v26 = vld [vmem:[%s1735_s0 + $0x38] sm:$0xf]  ;;  %v643_v43 = vld [vmem:[#allocation0 + $0x111] sm:$0x1]  }
  0x1f   :  { %174 = vst [vmem:[#allocation0 + $0x70] sm:$0xf] %v1218_v26  ;;  %v1226_v30 = vld [vmem:[%s1735_s0 + $0x18] sm:$0xf]  ;;  %603 = vrot.lane.b32.xlu1 %v602_v29, %s1270_s29  ;;  %v645_v44 = vld [vmem:[#allocation0 + $0x130] sm:$0x2]  }
  0x20   :  { %214 = vst [vmem:[#allocation0 + $0x30] sm:$0xf] %v1226_v30  ;;  %v397_v33 = vld [vmem:[#allocation0 + $0x19] sm:$0x1]   ;;  %v647_v47 = vsel %vm244_vm0, %v645_v44, %v643_v43  ;;  %v649_v48 = vld [vmem:[#allocation0 + $0x14f] sm:$0x4]  }
  0x21   :  { %v399_v34 = vld [vmem:[#allocation0 + $0x38] sm:$0x2]   ;;  %v653_v50 = vld [vmem:[#allocation0 + $0x16e] sm:$0x8]   ;;  %v651_v55 = vsel %vm248_vm1, %v649_v48, %v647_v47  ;;  %v525_v62 = vld [vmem:[#allocation0 + $0xcd] sm:$0x40]  }
  0x22   :  { %v403_v35 = vld [vmem:[#allocation0 + $0x57] sm:$0x4]   ;;  %479 = vrot.lane.b32.xlu0 %v478_v32, %s1268_s13  ;;  %v401_v36 = vsel %vm244_vm0, %v399_v34, %v397_v33  ;;  %v517_v53 = vld [vmem:[#allocation0 + $0x8f] sm:$0x10]   ;;  %v570_v5 = vld [vmem:[#allocation0 + $0x8e] sm:$0x10]   ;;  %v655_v8 = vsel %vm252_vm2, %v653_v50, %v651_v55 }
  0x23   :  { %v407_v37 = vld [vmem:[#allocation0 + $0x76] sm:$0x8]   ;;  %v405_v39 = vsel %vm248_vm1, %v403_v35, %v401_v36  ;;  %v509_v51 = vld [vmem:[#allocation0 + $0x51] sm:$0x4]   ;;  %v562_v0 = vld [vmem:[#allocation0 + $0x50] sm:$0x4]  }
  0x24   :  { %v411_v38 = vld [vmem:[#allocation0 + $0x95] sm:$0x10]   ;;  %v409_v41 = vsel %vm252_vm2, %v407_v37, %v405_v39  ;;  %v503_v56 = vld [vmem:[#allocation0 + $0x13] sm:$0x1]   ;;  %v556_v60 = vld [vmem:[#allocation0 + $0x12] sm:$0x1]  }
  0x25   :  { %v415_v40 = vld [vmem:[#allocation0 + $0xb4] sm:$0x20]   ;;  %v413_v45 = vsel %vm256_vm4, %v411_v38, %v409_v41  ;;  %v521_v58 = vld [vmem:[#allocation0 + $0xae] sm:$0x20]   ;;  %v574_v6 = vld [vmem:[#allocation0 + $0xad] sm:$0x20]  }
  0x26   :  { %v419_v42 = vld [vmem:[#allocation0 + $0xd3] sm:$0x40]   ;;  %v417_v49 = vsel %vm260_vm5, %v415_v40, %v413_v45  ;;  %v513_v52 = vld [vmem:[#allocation0 + $0x70] sm:$0x8]   ;;  %v566_v1 = vld [vmem:[#allocation0 + $0x6f] sm:$0x8]  }
  0x27   :  { %v423_v46 = vld [vmem:[#allocation0 + $0xf2] sm:$0x80]   ;;  %v421_v54 = vsel %vm264_vm6, %v419_v42, %v417_v49  ;;  %v505_v57 = vld [vmem:[#allocation0 + $0x32] sm:$0x2]   ;;  %v558_v63 = vld [vmem:[#allocation0 + $0x31] sm:$0x2]  }
  0x28   :  { %v425_v59 = vsel %vm268_vm7, %v423_v46, %v421_v54  ;;  %v507_v61 = vsel %vm244_vm0, %v505_v57, %v503_v56  ;;  %v529_v3 = vld [vmem:[#allocation0 + $0xec] sm:$0x80]   ;;  %v560_v4 = vsel %vm244_vm0, %v558_v63, %v556_v60  ;;  %v609_v7 = vld [vmem:[#allocation0 + $0x11] sm:$0x1]   ;;  %v578_v16 = vld [vmem:[#allocation0 + $0xcc] sm:$0x40]  }
  0x29   :  { %426 = vrot.lane.b32.xlu1 %v425_v59, %s1266_s11  ;;  %v511_v2 = vsel %vm248_vm1, %v509_v51, %v507_v61  ;;  %v564_v10 = vsel %vm248_vm1, %v562_v0, %v560_v4  ;;  %v611_v11 = vld [vmem:[#allocation0 + $0x30] sm:$0x2]   ;;  %v582_v17 = vld [vmem:[#allocation0 + $0xeb] sm:$0x80]   ;;  %v662_v24 = vld [vmem:[#allocation0 + $0x10] sm:$0x1]  }
  0x2a   :  { %v515_v9 = vsel %vm252_vm2, %v513_v52, %v511_v2  ;;  %v615_v12 = vld [vmem:[#allocation0 + $0x4f] sm:$0x4]   ;;  %v568_v15 = vsel %vm252_vm2, %v566_v1, %v564_v10  ;;  %v613_v18 = vsel %vm244_vm0, %v611_v11, %v609_v7  ;;  %v664_v25 = vld [vmem:[#allocation0 + $0x2f] sm:$0x2]   ;;  %v1203_v50 = vld [vmem:[%s1735_s0 + $0x74] sm:$0xf] }
  0x2b   :  { %v619_v13 = vld [vmem:[#allocation0 + $0x6e] sm:$0x8]   ;;  %v519_v14 = vsel %vm256_vm4, %v517_v53, %v515_v9  ;;  %v572_v22 = vsel %vm256_vm4, %v570_v5, %v568_v15  ;;  %v617_v23 = vsel %vm248_vm1, %v615_v12, %v613_v18  ;;  %v668_v26 = vld [vmem:[#allocation0 + $0x4e] sm:$0x4]   ;;  %v666_v31 = vsel %vm244_vm0, %v664_v25, %v662_v24  ;;  %v1207_v51 = vld [vmem:[%s1735_s0 + $0x64] sm:$0xf] }
  0x2c   :  { %v623_v19 = vld [vmem:[#allocation0 + $0x8d] sm:$0x10]   ;;  %v523_v21 = vsel %vm260_vm5, %v521_v58, %v519_v14  ;;  %v576_v28 = vsel %vm260_vm5, %v574_v6, %v572_v22  ;;  %v621_v29 = vsel %vm252_vm2, %v619_v13, %v617_v23  ;;  %v672_v32 = vld [vmem:[#allocation0 + $0x6d] sm:$0x8]   ;;  %v670_v37 = vsel %vm248_vm1, %v668_v26, %v666_v31  ;;  %v1211_v52 = vld [vmem:[%s1735_s0 + $0x54] sm:$0xf] }
  0x2d   :  { %v627_v20 = vld [vmem:[#allocation0 + $0xac] sm:$0x20]   ;;  %656 = vrot.lane.b32.xlu1 %v655_v8, %s1271_s30  ;;  %v527_v27 = vsel %vm264_vm6, %v525_v62, %v523_v21  ;;  %v676_v33 = vld [vmem:[#allocation0 + $0x8c] sm:$0x10]   ;;  %v580_v35 = vsel %vm264_vm6, %v578_v16, %v576_v28  ;;  %v625_v36 = vsel %vm256_vm4, %v623_v19, %v621_v29  ;;  %v674_v42 = vsel %vm252_vm2, %v672_v32, %v670_v37  ;;  %v1215_v55 = vld [vmem:[%s1735_s0 + $0x44] sm:$0xf] }
  0x2e   :  { %v631_v30 = vld [vmem:[#allocation0 + $0xcb] sm:$0x40]   ;;  %v531_v34 = vsel %vm268_vm7, %v529_v3, %v527_v27  ;;  %v680_v38 = vld [vmem:[#allocation0 + $0xab] sm:$0x20]   ;;  %v629_v40 = vsel %vm260_vm5, %v627_v20, %v625_v36  ;;  %v584_v46 = vsel %vm268_vm7, %v582_v17, %v580_v35  ;;  %v678_v47 = vsel %vm256_vm4, %v676_v33, %v674_v42  ;;  %99 = vst [vmem:[#allocation0 + $0xe8] sm:$0xf] %v1203_v50 }
  0x2f   :  { %v696_v39 = vld [vmem:[#allocation0 + $0x110] sm:$0x1]   ;;  %532 = vrot.lane.b32.xlu0 %v531_v34, %s1269_s14  ;;  %v635_v41 = vld [vmem:[#allocation0 + $0xea] sm:$0x80]   ;;  %v633_v53 = vsel %vm264_vm6, %v631_v30, %v629_v40  ;;  %119 = vst [vmem:[#allocation0 + $0xc8] sm:$0xf] %v1207_v51  ;;  %v682_v58 = vsel %vm260_vm5, %v680_v38, %v678_v47 }
  0x30   :  { %v698_v43 = vld [vmem:[#allocation0 + $0x12f] sm:$0x2]   ;;  %139 = vst [vmem:[#allocation0 + $0xa8] sm:$0xf] %v1211_v52  ;;  %v1219_v56 = vld [vmem:[%s1735_s0 + $0x34] sm:$0xf]  ;;  %v637_v2 = vsel %vm268_vm7, %v635_v41, %v633_v53 }
  0x31   :  { %v702_v44 = vld [vmem:[#allocation0 + $0x14e] sm:$0x4]   ;;  %v700_v49 = vsel %vm244_vm0, %v698_v43, %v696_v39  ;;  %v1223_v57 = vld [vmem:[%s1735_s0 + $0x24] sm:$0xf]  ;;  %159 = vst [vmem:[#allocation0 + $0x88] sm:$0xf] %v1215_v55 }
  0x32   :  { %v706_v45 = vld [vmem:[#allocation0 + $0x16d] sm:$0x8]   ;;  %v704_v54 = vsel %vm248_vm1, %v702_v44, %v700_v49  ;;  %179 = vst [vmem:[#allocation0 + $0x68] sm:$0xf] %v1219_v56  ;;  %199 = vst [vmem:[#allocation0 + $0x48] sm:$0xf] %v1223_v57 }
  0x33   :  { %v684_v48 = vld [vmem:[#allocation0 + $0xca] sm:$0x40]   ;;  %v708_v59 = vsel %vm252_vm2, %v706_v45, %v704_v54  ;;  %v1227_v60 = vld [vmem:[%s1735_s0 + $0x14] sm:$0xf]  ;;  %v1231_v61 = vld [vmem:[%s1735_s0 + $0x4] sm:$0xf]  ;;  %585 = vrot.lane.b32.xlu0 %v584_v46, %s1270_s29 }
  0x34   :  { %v1187_v62 = vld [vmem:[%s1735_s0 + $0xb4] sm:$0xf]  ;;  %v688_v63 = vld [vmem:[#allocation0 + $0xe9] sm:$0x80]   ;;  %s1272_s21 = smov 72   ;;  %v686_v5 = vsel %vm264_vm6, %v684_v48, %v682_v58  ;;  %s1273_s20 = smov 63  }
  0x35   :  { %709 = vrot.lane.b32.xlu1 %v708_v59, %s1272_s21  ;;  %219 = vst [vmem:[#allocation0 + $0x28] sm:$0xf] %v1227_v60  ;;  %238 = vst [vmem:[#allocation0 + $0x8] sm:$0xf] %v1231_v61  ;;  %v1191_v0 = vld [vmem:[%s1735_s0 + $0xa4] sm:$0xf]  ;;  %v690_v15 = vsel %vm268_vm7, %v688_v63, %v686_v5 }
  0x36   :  { %19 = vst [vmem:[#allocation0 + $0x168] sm:$0xf] %v1187_v62  ;;  %v1195_v1 = vld [vmem:[%s1735_s0 + $0x94] sm:$0xf]  ;;  %39 = vst [vmem:[#allocation0 + $0x148] sm:$0xf] %v1191_v0 }
  0x37   :  { %59 = vst [vmem:[#allocation0 + $0x128] sm:$0xf] %v1195_v1  ;;  %v1199_v3 = vld [vmem:[%s1735_s0 + $0x84] sm:$0xf]  ;;  %v1204_v4 = vld [vmem:[%s1735_s0 + $0x70] sm:$0xf]  ;;  %638 = vrot.lane.b32.xlu0 %v637_v2, %s1271_s30 }
  0x38   :  { %79 = vst [vmem:[#allocation0 + $0x108] sm:$0xf] %v1199_v3  ;;  %104 = vst [vmem:[#allocation0 + $0xe0] sm:$0xf] %v1204_v4  ;;  %v1208_v6 = vld [vmem:[%s1735_s0 + $0x60] sm:$0xf] }
  0x39   :  { %v1212_v7 = vld [vmem:[%s1735_s0 + $0x50] sm:$0xf]  ;;  %v1216_v8 = vld [vmem:[%s1735_s0 + $0x40] sm:$0xf]  ;;  %124 = vst [vmem:[#allocation0 + $0xc0] sm:$0xf] %v1208_v6 }
  0x3a   :  { %144 = vst [vmem:[#allocation0 + $0xa0] sm:$0xf] %v1212_v7  ;;  %164 = vst [vmem:[#allocation0 + $0x80] sm:$0xf] %v1216_v8  ;;  %v1220_v9 = vld [vmem:[%s1735_s0 + $0x30] sm:$0xf] }
  0x3b   :  { %v1224_v10 = vld [vmem:[%s1735_s0 + $0x20] sm:$0xf]  ;;  %v1228_v11 = vld [vmem:[%s1735_s0 + $0x10] sm:$0xf]  ;;  %184 = vst [vmem:[#allocation0 + $0x60] sm:$0xf] %v1220_v9  ;;  %691 = vrot.lane.b32.xlu0 %v690_v15, %s1272_s21 }
  0x3c   :  { %204 = vst [vmem:[#allocation0 + $0x40] sm:$0xf] %v1224_v10  ;;  %224 = vst [vmem:[#allocation0 + $0x20] sm:$0xf] %v1228_v11  ;;  %v239_v12 = vld [vmem:[%s1735_s0] sm:$0xf] }
  0x3d   :  { %v1188_v13 = vld [vmem:[%s1735_s0 + $0xb0] sm:$0xf]  ;;  %v1192_v14 = vld [vmem:[%s1735_s0 + $0xa0] sm:$0xf]  ;;  %240 = vst [vmem:[#allocation0] sm:$0xf] %v239_v12 }
  0x3e   :  { %24 = vst [vmem:[#allocation0 + $0x160] sm:$0xf] %v1188_v13  ;;  %44 = vst [vmem:[#allocation0 + $0x140] sm:$0xf] %v1192_v14  ;;  %v721_v16 = vld [vmem:[#allocation0 + $0x49] sm:$0x4]  }
  0x3f   :  { %v725_v17 = vld [vmem:[#allocation0 + $0x68] sm:$0x8]   ;;  %v768_v27 = vld [vmem:[#allocation0 + $0xa] sm:$0x1]   ;;  %v821_v54 = vld [vmem:[#allocation0 + $0x9] sm:$0x1]  }
  0x40   :  { %v729_v18 = vld [vmem:[#allocation0 + $0x87] sm:$0x10]   ;;  %v770_v31 = vld [vmem:[#allocation0 + $0x29] sm:$0x2]   ;;  %v823_v55 = vld [vmem:[#allocation0 + $0x28] sm:$0x2]  }
  0x41   :  { %v715_v19 = vld [vmem:[#allocation0 + $0xb] sm:$0x1]   ;;  %v774_v32 = vld [vmem:[#allocation0 + $0x48] sm:$0x4]   ;;  %v772_v35 = vsel %vm244_vm0, %v770_v31, %v768_v27  ;;  %v827_v56 = vld [vmem:[#allocation0 + $0x47] sm:$0x4]   ;;  %v825_v60 = vsel %vm244_vm0, %v823_v55, %v821_v54 }
  0x42   :  { %v717_v20 = vld [vmem:[#allocation0 + $0x2a] sm:$0x2]   ;;  %v778_v36 = vld [vmem:[#allocation0 + $0x67] sm:$0x8]   ;;  %v776_v41 = vsel %vm248_vm1, %v774_v32, %v772_v35  ;;  %v831_v61 = vld [vmem:[#allocation0 + $0x66] sm:$0x8]   ;;  %v829_v2 = vsel %vm248_vm1, %v827_v56, %v825_v60 }
  0x43   :  { %v733_v21 = vld [vmem:[#allocation0 + $0xa6] sm:$0x20]   ;;  %v719_v23 = vsel %vm244_vm0, %v717_v20, %v715_v19  ;;  %v782_v37 = vld [vmem:[#allocation0 + $0x86] sm:$0x10]   ;;  %v780_v47 = vsel %vm252_vm2, %v778_v36, %v776_v41  ;;  %v835_v62 = vld [vmem:[#allocation0 + $0x85] sm:$0x10]   ;;  %v833_v7 = vsel %vm252_vm2, %v831_v61, %v829_v2 }
  0x44   :  { %v759_v22 = vld [vmem:[#allocation0 + $0x168] sm:$0x8]   ;;  %v723_v28 = vsel %vm248_vm1, %v721_v16, %v719_v23  ;;  %v786_v38 = vld [vmem:[#allocation0 + $0xa5] sm:$0x20]   ;;  %v784_v52 = vsel %vm256_vm4, %v782_v37, %v780_v47  ;;  %v839_v63 = vld [vmem:[#allocation0 + $0xa4] sm:$0x20]   ;;  %v837_v11 = vsel %vm256_vm4, %v835_v62, %v833_v7 }
  0x45   :  { %v737_v24 = vld [vmem:[#allocation0 + $0xc5] sm:$0x40]   ;;  %v727_v33 = vsel %vm252_vm2, %v725_v17, %v723_v28  ;;  %v790_v42 = vld [vmem:[#allocation0 + $0xc4] sm:$0x40]   ;;  %v788_v58 = vsel %vm260_vm5, %v786_v38, %v784_v52  ;;  %v843_v3 = vld [vmem:[#allocation0 + $0xc3] sm:$0x40]   ;;  %v841_v16 = vsel %vm260_vm5, %v839_v63, %v837_v11 }
  0x46   :  { %v751_v25 = vld [vmem:[#allocation0 + $0x12a] sm:$0x2]   ;;  %v731_v39 = vsel %vm256_vm4, %v729_v18, %v727_v33  ;;  %v794_v43 = vld [vmem:[#allocation0 + $0xe3] sm:$0x80]   ;;  %v792_v0 = vsel %vm264_vm6, %v790_v42, %v788_v58  ;;  %v847_v4 = vld [vmem:[#allocation0 + $0xe2] sm:$0x80]  }
  0x47   :  { %v755_v26 = vld [vmem:[#allocation0 + $0x149] sm:$0x4]   ;;  %v802_v44 = vld [vmem:[#allocation0 + $0x10a] sm:$0x1]   ;;  %v735_v45 = vsel %vm260_vm5, %v733_v21, %v731_v39  ;;  %v855_v5 = vld [vmem:[#allocation0 + $0x109] sm:$0x1]   ;;  %v796_v6 = vsel %vm268_vm7, %v794_v43, %v792_v0 }
  0x48   :  { %v741_v29 = vld [vmem:[#allocation0 + $0xe4] sm:$0x80]   ;;  %v804_v48 = vld [vmem:[#allocation0 + $0x129] sm:$0x2]   ;;  %v739_v51 = vsel %vm264_vm6, %v737_v24, %v735_v45  ;;  %v857_v8 = vld [vmem:[#allocation0 + $0x128] sm:$0x2]  }
  0x49   :  { %v749_v30 = vld [vmem:[#allocation0 + $0x10b] sm:$0x1]   ;;  %v808_v49 = vld [vmem:[#allocation0 + $0x148] sm:$0x4]   ;;  %v806_v53 = vsel %vm244_vm0, %v804_v48, %v802_v44  ;;  %v743_v57 = vsel %vm268_vm7, %v741_v29, %v739_v51  ;;  %v861_v9 = vld [vmem:[#allocation0 + $0x147] sm:$0x4]   ;;  %v859_v12 = vsel %vm244_vm0, %v857_v8, %v855_v5 }
  0x4a   :  { %v753_v34 = vsel %vm244_vm0, %v751_v25, %v749_v30  ;;  %v812_v50 = vld [vmem:[#allocation0 + $0x167] sm:$0x8]   ;;  %v810_v59 = vsel %vm248_vm1, %v808_v49, %v806_v53  ;;  %744 = vrot.lane.b32.xlu0 %v743_v57, %s1273_s20  ;;  %v865_v10 = vld [vmem:[#allocation0 + $0x166] sm:$0x8]   ;;  %s1274_s21 = smov 54   ;;  %v863_v17 = vsel %vm248_vm1, %v861_v9, %v859_v12  ;;  %s1275_s22 = smov 45  }
  0x4b   :  { %v757_v40 = vsel %vm248_vm1, %v755_v26, %v753_v34  ;;  %v814_v1 = vsel %vm252_vm2, %v812_v50, %v810_v59  ;;  %v874_v13 = vld [vmem:[#allocation0 + $0x8] sm:$0x1]   ;;  %v867_v23 = vsel %vm252_vm2, %v865_v10, %v863_v17  ;;  %v927_v35 = vld [vmem:[#allocation0 + $0x3] sm:$0x1]   ;;  %v1196_v47 = vld [vmem:[%s1735_s0 + $0x90] sm:$0xf] }
  0x4c   :  { %v761_v46 = vsel %vm252_vm2, %v759_v22, %v757_v40  ;;  %v876_v14 = vld [vmem:[#allocation0 + $0x27] sm:$0x2]   ;;  %v845_v22 = vsel %vm264_vm6, %v843_v3, %v841_v16  ;;  %v929_v36 = vld [vmem:[#allocation0 + $0x22] sm:$0x2]   ;;  %64 = vst [vmem:[#allocation0 + $0x120] sm:$0xf] %v1196_v47 }
  0x4d   :  { %762 = vrot.lane.b32.xlu1 %v761_v46, %s1273_s20  ;;  %v880_v15 = vld [vmem:[#allocation0 + $0x46] sm:$0x4]   ;;  %v878_v18 = vsel %vm244_vm0, %v876_v14, %v874_v13  ;;  %v849_v28 = vsel %vm268_vm7, %v847_v4, %v845_v22  ;;  %v933_v37 = vld [vmem:[#allocation0 + $0x41] sm:$0x4]   ;;  %v931_v40 = vsel %vm244_vm0, %v929_v36, %v927_v35  ;;  %v290_v54 = vld [vmem:[#allocation0 + $0x1a] sm:$0x1]  }
  0x4e   :  { %v884_v19 = vld [vmem:[#allocation0 + $0x65] sm:$0x8]   ;;  %797 = vrot.lane.b32.xlu0 %v796_v6, %s1274_s21  ;;  %v882_v24 = vsel %vm248_vm1, %v880_v15, %v878_v18  ;;  %v937_v41 = vld [vmem:[#allocation0 + $0x60] sm:$0x8]   ;;  %v935_v45 = vsel %vm248_vm1, %v933_v37, %v931_v40  ;;  %v292_v55 = vld [vmem:[#allocation0 + $0x39] sm:$0x2]  }
  0x4f   :  { %v888_v20 = vld [vmem:[#allocation0 + $0x84] sm:$0x10]   ;;  %v886_v29 = vsel %vm252_vm2, %v884_v19, %v882_v24  ;;  %v941_v42 = vld [vmem:[#allocation0 + $0x7f] sm:$0x10]   ;;  %v939_v49 = vsel %vm252_vm2, %v937_v41, %v935_v45  ;;  %v296_v56 = vld [vmem:[#allocation0 + $0x58] sm:$0x4]   ;;  %v294_v58 = vsel %vm244_vm0, %v292_v55, %v290_v54 }
  0x50   :  { %v892_v21 = vld [vmem:[#allocation0 + $0xa3] sm:$0x20]   ;;  %v890_v33 = vsel %vm256_vm4, %v888_v20, %v886_v29  ;;  %v945_v46 = vld [vmem:[#allocation0 + $0x9e] sm:$0x20]   ;;  %v943_v53 = vsel %vm256_vm4, %v941_v42, %v939_v49  ;;  %v300_v59 = vld [vmem:[#allocation0 + $0x77] sm:$0x8]   ;;  %v298_v62 = vsel %vm248_vm1, %v296_v56, %v294_v58 }
  0x51   :  { %815 = vrot.lane.b32.xlu1 %v814_v1, %s1274_s21  ;;  %v896_v25 = vld [vmem:[#allocation0 + $0xc2] sm:$0x40]   ;;  %v894_v38 = vsel %vm260_vm5, %v892_v21, %v890_v33  ;;  %v949_v50 = vld [vmem:[#allocation0 + $0xbd] sm:$0x40]   ;;  %v947_v57 = vsel %vm260_vm5, %v945_v46, %v943_v53  ;;  %v304_v60 = vld [vmem:[#allocation0 + $0x96] sm:$0x10]   ;;  %v302_v3 = vsel %vm252_vm2, %v300_v59, %v298_v62 }
  0x52   :  { %v900_v26 = vld [vmem:[#allocation0 + $0xe1] sm:$0x80]   ;;  %850 = vrot.lane.b32.xlu0 %v849_v28, %s1275_s22  ;;  %v898_v43 = vsel %vm264_vm6, %v896_v25, %v894_v38  ;;  %v953_v51 = vld [vmem:[#allocation0 + $0xdc] sm:$0x80]   ;;  %v951_v61 = vsel %vm264_vm6, %v949_v50, %v947_v57  ;;  %v308_v63 = vld [vmem:[#allocation0 + $0xb5] sm:$0x20]   ;;  %v306_v8 = vsel %vm256_vm4, %v304_v60, %v302_v3 }
  0x53   :  { %v908_v27 = vld [vmem:[#allocation0 + $0x108] sm:$0x1]   ;;  %v902_v48 = vsel %vm268_vm7, %v900_v26, %v898_v43  ;;  %v1200_v52 = vld [vmem:[%s1735_s0 + $0x80] sm:$0xf]  ;;  %s1276_s0 = smov 36   ;;  %v955_v2 = vsel %vm268_vm7, %v953_v51, %v951_v61  ;;  %v310_v13 = vsel %vm260_vm5, %v308_v63, %v306_v8  ;;  %s1277_s27 = smov 27  }
  0x54   :  { %v910_v30 = vld [vmem:[#allocation0 + $0x127] sm:$0x2]   ;;  %84 = vst [vmem:[#allocation0 + $0x100] sm:$0xf] %v1200_v52  ;;  %v312_v0 = vld [vmem:[#allocation0 + $0xd4] sm:$0x40]  }
  0x55   :  { %v914_v31 = vld [vmem:[#allocation0 + $0x146] sm:$0x4]   ;;  %868 = vrot.lane.b32.xlu1 %v867_v23, %s1275_s22  ;;  %v912_v34 = vsel %vm244_vm0, %v910_v30, %v908_v27  ;;  %v980_v1 = vld [vmem:[#allocation0 + $0x2] sm:$0x1]   ;;  %v967_v7 = vld [vmem:[#allocation0 + $0x141] sm:$0x4]   ;;  %v314_v19 = vsel %vm264_vm6, %v312_v0, %v310_v13 }
  0x56   :  { %v918_v32 = vld [vmem:[#allocation0 + $0x165] sm:$0x8]   ;;  %v916_v39 = vsel %vm248_vm1, %v914_v31, %v912_v34  ;;  %903 = vrot.lane.b32.xlu0 %v902_v48, %s1276_s0  ;;  %v982_v4 = vld [vmem:[#allocation0 + $0x21] sm:$0x2]   ;;  %v316_v9 = vld [vmem:[#allocation0 + $0xf3] sm:$0x80]  }
  0x57   :  { %v920_v44 = vsel %vm252_vm2, %v918_v32, %v916_v39  ;;  %v986_v5 = vld [vmem:[#allocation0 + $0x40] sm:$0x4]   ;;  %v984_v10 = vsel %vm244_vm0, %v982_v4, %v980_v1  ;;  %v971_v12 = vld [vmem:[#allocation0 + $0x160] sm:$0x8]   ;;  %v318_v24 = vsel %vm268_vm7, %v316_v9, %v314_v19  ;;  %v1033_v28 = vld [vmem:[#allocation0 + $0x1] sm:$0x1]  }
  0x58   :  { %v990_v6 = vld [vmem:[#allocation0 + $0x5f] sm:$0x8]   ;;  %v988_v14 = vsel %vm248_vm1, %v986_v5, %v984_v10  ;;  %v963_v18 = vld [vmem:[#allocation0 + $0x122] sm:$0x2]   ;;  %v1035_v32 = vld [vmem:[#allocation0 + $0x20] sm:$0x2]  }
  0x59   :  { %921 = vrot.lane.b32.xlu1 %v920_v44, %s1276_s0  ;;  %v994_v11 = vld [vmem:[#allocation0 + $0x7e] sm:$0x10]   ;;  %v992_v20 = vsel %vm252_vm2, %v990_v6, %v988_v14  ;;  %v1039_v33 = vld [vmem:[#allocation0 + $0x3f] sm:$0x4]   ;;  %v1037_v38 = vsel %vm244_vm0, %v1035_v32, %v1033_v28  ;;  %v1086_v51 = vld [vmem:[#allocation0 + $0x1b] sm:$0x1]  }
  0x5a   :  { %v998_v15 = vld [vmem:[#allocation0 + $0x9d] sm:$0x20]   ;;  %956 = vrot.lane.b32.xlu0 %v955_v2, %s1277_s27  ;;  %v996_v25 = vsel %vm256_vm4, %v994_v11, %v992_v20  ;;  %v1043_v34 = vld [vmem:[#allocation0 + $0x5e] sm:$0x8]   ;;  %v1041_v42 = vsel %vm248_vm1, %v1039_v33, %v1037_v38  ;;  %v1088_v55 = vld [vmem:[#allocation0 + $0x3a] sm:$0x2]  }
  0x5b   :  { %v1002_v16 = vld [vmem:[#allocation0 + $0xbc] sm:$0x40]   ;;  %v961_v23 = vld [vmem:[#allocation0 + $0x103] sm:$0x1]   ;;  %v1000_v30 = vsel %vm260_vm5, %v998_v15, %v996_v25  ;;  %v1047_v39 = vld [vmem:[#allocation0 + $0x7d] sm:$0x10]   ;;  %v1045_v47 = vsel %vm252_vm2, %v1043_v34, %v1041_v42  ;;  %v1090_v60 = vsel %vm244_vm0, %v1088_v55, %v1086_v51 }
  0x5c   :  { %v1020_v17 = vld [vmem:[#allocation0 + $0x140] sm:$0x4]   ;;  %v965_v29 = vsel %vm244_vm0, %v963_v18, %v961_v23  ;;  %v1004_v36 = vsel %vm264_vm6, %v1002_v16, %v1000_v30  ;;  %v1051_v40 = vld [vmem:[#allocation0 + $0x9c] sm:$0x20]   ;;  %v1049_v53 = vsel %vm256_vm4, %v1047_v39, %v1045_v47  ;;  %v1092_v56 = vld [vmem:[#allocation0 + $0x59] sm:$0x4]  }
  0x5d   :  { %v1016_v21 = vld [vmem:[#allocation0 + $0x121] sm:$0x2]   ;;  %v969_v35 = vsel %vm248_vm1, %v967_v7, %v965_v29  ;;  %v1055_v43 = vld [vmem:[#allocation0 + $0xbb] sm:$0x40]   ;;  %v1096_v57 = vld [vmem:[#allocation0 + $0x78] sm:$0x8]   ;;  %v1053_v58 = vsel %vm260_vm5, %v1051_v40, %v1049_v53  ;;  %v1094_v63 = vsel %vm248_vm1, %v1092_v56, %v1090_v60 }
  0x5e   :  { %v1024_v22 = vld [vmem:[#allocation0 + $0x15f] sm:$0x8]   ;;  %v973_v41 = vsel %vm252_vm2, %v971_v12, %v969_v35  ;;  %319 = vrot.lane.b32.xlu0 %v318_v24, %s1267_s12  ;;  %v1067_v44 = vld [vmem:[#allocation0 + $0x101] sm:$0x1]   ;;  %v1100_v61 = vld [vmem:[#allocation0 + $0x97] sm:$0x10]   ;;  %v1057_v62 = vsel %vm264_vm6, %v1055_v43, %v1053_v58  ;;  %v1098_v4 = vsel %vm252_vm2, %v1096_v57, %v1094_v63 }
  0x5f   :  { %v1006_v26 = vld [vmem:[#allocation0 + $0xdb] sm:$0x80]   ;;  %v1069_v45 = vld [vmem:[#allocation0 + $0x120] sm:$0x2]   ;;  %974 = vrot.lane.b32.xlu1 %v973_v41, %s1277_s27  ;;  %s1278_s12 = smov 18   ;;  %v1102_v9 = vsel %vm256_vm4, %v1100_v61, %v1098_v4  ;;  %vm270_vm8 = vcmask 72704  }
  0x60   :  { %v1014_v27 = vld [vmem:[#allocation0 + $0x102] sm:$0x1]   ;;  %v1071_v48 = vsel %vm244_vm0, %v1069_v45, %v1067_v44  ;;  %v1073_v49 = vld [vmem:[#allocation0 + $0x13f] sm:$0x4]   ;;  %v1008_v52 = vsel %vm268_vm7, %v1006_v26, %v1004_v36  ;;  %v1104_v0 = vld [vmem:[#allocation0 + $0xb6] sm:$0x20]  }
  0x61   :  { %v1018_v31 = vsel %vm244_vm0, %v1016_v21, %v1014_v27  ;;  %v1077_v50 = vld [vmem:[#allocation0 + $0x15e] sm:$0x8]   ;;  %v1075_v54 = vsel %vm248_vm1, %v1073_v49, %v1071_v48  ;;  %v1108_v1 = vld [vmem:[#allocation0 + $0xd5] sm:$0x40]   ;;  %v273_v12 = vld [vmem:[#allocation0 + $0x100] sm:$0x1]   ;;  %v1106_v14 = vsel %vm260_vm5, %v1104_v0, %v1102_v9 }
  0x62   :  { %v1022_v37 = vsel %vm248_vm1, %v1020_v17, %v1018_v31  ;;  %v1059_v59 = vld [vmem:[#allocation0 + $0xda] sm:$0x80]   ;;  %v1121_v2 = vld [vmem:[#allocation0 + $0x11b] sm:$0x1]   ;;  %v1079_v3 = vsel %vm252_vm2, %v1077_v50, %v1075_v54  ;;  %v275_v13 = vld [vmem:[#allocation0 + $0x11f] sm:$0x2]   ;;  %v1110_v19 = vsel %vm264_vm6, %v1108_v1, %v1106_v14 }
  0x63   :  { %v1026_v46 = vsel %vm252_vm2, %v1024_v22, %v1022_v37  ;;  %1009 = vrot.lane.b32.xlu1 %v1008_v52, %s1278_s12  ;;  %v1112_v5 = vld [vmem:[#allocation0 + $0xf4] sm:$0x80]   ;;  %v1061_v8 = vsel %vm268_vm7, %v1059_v59, %v1057_v62  ;;  %v277_v16 = vsel %vm244_vm0, %v275_v13, %v273_v12  ;;  %v279_v17 = vld [vmem:[#allocation0 + $0x13e] sm:$0x4]   ;;  %s1279_s28 = smov 9   ;;  %s1280_s3 = smov 7  }
  0x64   :  { %1027 = vrot.lane.b32.xlu0 %v1026_v46, %s1278_s12  ;;  %v1123_v6 = vld [vmem:[#allocation0 + $0x13a] sm:$0x2]   ;;  %v283_v18 = vld [vmem:[#allocation0 + $0x15d] sm:$0x8]   ;;  %v281_v20 = vsel %vm248_vm1, %v279_v17, %v277_v16  ;;  %v1114_v29 = vsel %vm268_vm7, %v1112_v5, %v1110_v19  ;;  %vm321_vm9 = vcmask 56320   ;;  %vm356_vm10 = vcmask 1048560  }
  0x65   :  { %v1127_v7 = vld [vmem:[#allocation0 + $0x159] sm:$0x4]   ;;  %v1125_v10 = vsel %vm244_vm0, %v1123_v6, %v1121_v2  ;;  %v241_v21 = vld [vmem:[#allocation0] sm:$0x1]   ;;  %v285_v24 = vsel %vm252_vm2, %v283_v18, %v281_v20  ;;  %vm428_vm11 = vcmask 1032104   ;;  %vm481_vm12 = vcmask 958304  }
  0x66   :  { %v1131_v11 = vld [vmem:[#allocation0 + $0x178] sm:$0x8]   ;;  %v1129_v15 = vsel %vm248_vm1, %v1127_v7, %v1125_v10  ;;  %v243_v22 = vld [vmem:[#allocation0 + $0x1f] sm:$0x2]   ;;  %1232 = vst.msk [vmem:[%s1736_s1 + $0x10] sm:$0xf] %vm270_vm8, %v285_v24  }
  0x67   :  { %1062 = vrot.lane.b32.xlu1 %v1061_v8, %s1279_s28  ;;  %v1133_v23 = vsel %vm252_vm2, %v1131_v11, %v1129_v15  ;;  %v245_v25 = vsel %vm244_vm0, %v243_v22, %v241_v21  ;;  %v247_v26 = vld [vmem:[#allocation0 + $0x3e] sm:$0x4]   ;;  %vm534_vm13 = vcmask 884504   ;;  %vm587_vm14 = vcmask 810704  }
  0x68   :  { %1080 = vrot.lane.b32.xlu0 %v1079_v3, %s1279_s28  ;;  %v251_v27 = vld [vmem:[#allocation0 + $0x5d] sm:$0x8]   ;;  %v249_v30 = vsel %vm248_vm1, %v247_v26, %v245_v25  ;;  %vm640_vm15 = vcmask 736904   ;;  %vm693_vm0 = vcmask 663104   ;;  %vm746_vm1 = vcmask 589304  }
  0x69   :  { %v255_v28 = vld [vmem:[#allocation0 + $0x7c] sm:$0x10]   ;;  %v253_v32 = vsel %vm252_vm2, %v251_v27, %v249_v30  ;;  %vm799_vm2 = vcmask 515504   ;;  %vm852_vm3 = vcmask 441704  }
  0x6a   :  { %v259_v31 = vld [vmem:[#allocation0 + $0x9b] sm:$0x20]   ;;  %v257_v34 = vsel %vm256_vm4, %v255_v28, %v253_v32  ;;  %vm905_vm4 = vcmask 367904  }
  0x6b   :  { %v263_v33 = vld [vmem:[#allocation0 + $0xba] sm:$0x40]   ;;  %1115 = vrot.lane.b32.xlu1 %v1114_v29, %s1280_s3  ;;  %v261_v36 = vsel %vm260_vm5, %v259_v31, %v257_v34  ;;  %vm958_vm5 = vcmask 294104  }
  0x6c   :  { %1134 = vrot.lane.b32.xlu0 %v1133_v23, %s1280_s3  ;;  %v267_v35 = vld [vmem:[#allocation0 + $0xd9] sm:$0x80]   ;;  %v265_v37 = vsel %vm264_vm6, %v263_v33, %v261_v36  ;;  %vm1011_vm6 = vcmask 220304  }
  0x6d   :  { %v269_v38 = vsel %vm268_vm7, %v267_v35, %v265_v37  ;;  %vm1064_vm7 = vcmask 146504  }
  0x6e   :  { %271 = vst.msk [vmem:[%s1736_s1] sm:$0xff] %vm270_vm8, %v269_v38   ;;  %vm1117_vm8 = vcmask 130104  }
  0x85   :  { %v445_v39 = vpop.permute.xlu1 %444  }
  0x89   :  { %v389_v40 = vpop.permute.xlu0 %388   ;;  %v498_v41 = vpop.permute.xlu1 %497  }
  0x8a   :  { %1234 = vst.msk [vmem:[%s1736_s1 + $0x18] sm:$0xf] %vm321_vm9, %v389_v40  }
  0x8b   :  { %1235 = vst.msk [vmem:[%s1736_s1 + $0x10] sm:$0xf] %vm356_vm10, %v389_v40  }
  0x8c   :  { %1236 = vst.msk [vmem:[%s1736_s1 + $0x10] sm:$0xf] %vm428_vm11, %v445_v39  }
  0x8d   :  { %1237 = vst.msk [vmem:[%s1736_s1 + $0x10] sm:$0xf] %vm481_vm12, %v498_v41   ;;  %v551_v43 = vpop.permute.xlu1 %550  }
  0x8e   :  { %1238 = vst.msk [vmem:[%s1736_s1 + $0x10] sm:$0xf] %vm534_vm13, %v551_v43  }
  0x90   :  { %v355_v42 = vpop.permute.xlu0 %354  }
  0x91   :  { %357 = vst.msk [vmem:[%s1736_s1] sm:$0xff] %vm356_vm10, %v355_v42   ;;  %v604_v45 = vpop.permute.xlu1 %603  }
  0x92   :  { %1239 = vst.msk [vmem:[%s1736_s1 + $0x10] sm:$0xf] %vm587_vm14, %v604_v45  }
  0x94   :  { %v480_v44 = vpop.permute.xlu0 %479  }
  0x9b   :  { %v427_v46 = vpop.permute.xlu1 %426  }
  0x9c   :  { %429 = vst.msk [vmem:[%s1736_s1] sm:$0xff] %vm428_vm11, %v427_v46  }
  0x9d   :  { %482 = vst.msk [vmem:[%s1736_s1] sm:$0xff] %vm481_vm12, %v480_v44  }
  0x9f   :  { %v657_v47 = vpop.permute.xlu1 %656  }
  0xa0   :  { %1240 = vst.msk [vmem:[%s1736_s1 + $0x10] sm:$0xf] %vm640_vm15, %v657_v47  }
  0xa1   :  { %v533_v48 = vpop.permute.xlu0 %532  }
  0xa2   :  { %535 = vst.msk [vmem:[%s1736_s1] sm:$0xff] %vm534_vm13, %v533_v48  }
  0xa5   :  { %v586_v49 = vpop.permute.xlu0 %585  }
  0xa6   :  { %588 = vst.msk [vmem:[%s1736_s1] sm:$0xff] %vm587_vm14, %v586_v49  }
  0xa7   :  { %v710_v50 = vpop.permute.xlu1 %709  }
  0xa8   :  { %1241 = vst.msk [vmem:[%s1736_s1 + $0x10] sm:$0xf] %vm693_vm0, %v710_v50  }
  0xa9   :  { %v639_v51 = vpop.permute.xlu0 %638  }
  0xaa   :  { %641 = vst.msk [vmem:[%s1736_s1] sm:$0xff] %vm640_vm15, %v639_v51  }
  0xad   :  { %v692_v52 = vpop.permute.xlu0 %691  }
  0xae   :  { %694 = vst.msk [vmem:[%s1736_s1] sm:$0xff] %vm693_vm0, %v692_v52  }
  0xbc   :  { %v745_v54 = vpop.permute.xlu0 %744  }
  0xbd   :  { %747 = vst.msk [vmem:[%s1736_s1] sm:$0xff] %vm746_vm1, %v745_v54  }
  0xbf   :  { %v763_v53 = vpop.permute.xlu1 %762  }
  0xc0   :  { %1242 = vst.msk [vmem:[%s1736_s1 + $0x10] sm:$0xf] %vm746_vm1, %v763_v53   ;;  %v798_v56 = vpop.permute.xlu0 %797  }
  0xc1   :  { %800 = vst.msk [vmem:[%s1736_s1] sm:$0xff] %vm799_vm2, %v798_v56  }
  0xc3   :  { %v816_v55 = vpop.permute.xlu1 %815  }
  0xc4   :  { %1243 = vst.msk [vmem:[%s1736_s1 + $0x10] sm:$0xf] %vm799_vm2, %v816_v55   ;;  %v851_v58 = vpop.permute.xlu0 %850  }
  0xc5   :  { %853 = vst.msk [vmem:[%s1736_s1] sm:$0xff] %vm852_vm3, %v851_v58  }
  0xc7   :  { %v869_v57 = vpop.permute.xlu1 %868  }
  0xc8   :  { %1244 = vst.msk [vmem:[%s1736_s1 + $0x10] sm:$0xf] %vm852_vm3, %v869_v57   ;;  %v904_v60 = vpop.permute.xlu0 %903  }
  0xc9   :  { %906 = vst.msk [vmem:[%s1736_s1] sm:$0xff] %vm905_vm4, %v904_v60  }
  0xcb   :  { %v922_v59 = vpop.permute.xlu1 %921  }
  0xcc   :  { %1245 = vst.msk [vmem:[%s1736_s1 + $0x10] sm:$0xf] %vm905_vm4, %v922_v59   ;;  %v957_v61 = vpop.permute.xlu0 %956  }
  0xcd   :  { %959 = vst.msk [vmem:[%s1736_s1] sm:$0xff] %vm958_vm5, %v957_v61  }
  0xd0   :  { %v320_v62 = vpop.permute.xlu0 %319  }
  0xd1   :  { %v975_v63 = vpop.permute.xlu1 %974   ;;  %1233 = vst.msk [vmem:[%s1736_s1 + $0x8] sm:$0xff] %vm321_vm9, %v320_v62  }
  0xd2   :  { %1246 = vst.msk [vmem:[%s1736_s1 + $0x10] sm:$0xf] %vm958_vm5, %v975_v63  }
  0xd5   :  { %v1010_v1 = vpop.permute.xlu1 %1009  }
  0xd6   :  { %v1028_v0 = vpop.permute.xlu0 %1027   ;;  %1012 = vst.msk [vmem:[%s1736_s1] sm:$0xff] %vm1011_vm6, %v1010_v1  }
  0xd7   :  { %1247 = vst.msk [vmem:[%s1736_s1 + $0x10] sm:$0xf] %vm1011_vm6, %v1028_v0  }
  0xd9   :  { %v1063_v3 = vpop.permute.xlu1 %1062  }
  0xda   :  { %v1081_v2 = vpop.permute.xlu0 %1080   ;;  %1065 = vst.msk [vmem:[%s1736_s1] sm:$0xff] %vm1064_vm7, %v1063_v3  }
  0xdb   :  { %1248 = vst.msk [vmem:[%s1736_s1 + $0x10] sm:$0xf] %vm1064_vm7, %v1081_v2  }
  0xdd   :  { %v1116_v5 = vpop.permute.xlu1 %1115  }
  0xde   :  { %v1135_v4 = vpop.permute.xlu0 %1134   ;;  %1249 = vst.msk [vmem:[%s1736_s1 + $0x8] sm:$0xff] %vm1117_vm8, %v1116_v5  }
  0xdf   :  { %1250 = vst.msk [vmem:[%s1736_s1 + $0x18] sm:$0xf] %vm1117_vm8, %v1135_v4  }

// kernel: mul.4
= control target key start
LH: loop header
LB: loop body
LE: loop exit
PB: predicated region body
PF: predicated region fallthrough
CT: control target
= control target key end

     0   :  { %vm3_vm0 = vcmask 392192   ;;  %s120_s0 = inlined_call_operand.vmem [shape: f32[48,2,2,12], index: 0, kind: input, shape index: {}]   ;;  %s121_s1 = inlined_call_operand.vmem [shape: f32[48,48], index: 1, kind: output, shape index: {}]  }
   0x1   :  { %v2_v0 = vld [vmem:[%s120_s0] sm:$0xff]   ;;  %v40_v1 = vld [vmem:[%s120_s0 + $0x8] sm:$0xf]   ;;  %v42_v2 = vld [vmem:[%s120_s0 + $0x10] sm:$0xff]  }
   0x2   :  { %4 = vst.msk [vmem:[%s121_s1] sm:$0xff] %vm3_vm0, %v2_v0   ;;  %41 = vst.msk [vmem:[%s121_s1 + $0x8] sm:$0xf] %vm3_vm0, %v40_v1   ;;  %v44_v3 = vld [vmem:[%s120_s0 + $0x18] sm:$0xf]   ;;  %v46_v4 = vld [vmem:[%s120_s0 + $0x20] sm:$0xff]  }
   0x3   :  { %43 = vst.msk [vmem:[%s121_s1 + $0xc] sm:$0xff] %vm3_vm0, %v42_v2   ;;  %v48_v5 = vld [vmem:[%s120_s0 + $0x28] sm:$0xf]   ;;  %45 = vst.msk [vmem:[%s121_s1 + $0x14] sm:$0xf] %vm3_vm0, %v44_v3   ;;  %v50_v6 = vld [vmem:[%s120_s0 + $0x30] sm:$0xff]  }
   0x4   :  { %47 = vst.msk [vmem:[%s121_s1 + $0x18] sm:$0xff] %vm3_vm0, %v46_v4   ;;  %49 = vst.msk [vmem:[%s121_s1 + $0x20] sm:$0xf] %vm3_vm0, %v48_v5   ;;  %v52_v7 = vld [vmem:[%s120_s0 + $0x38] sm:$0xf]  }
   0x5   :  { %51 = vst.msk [vmem:[%s121_s1 + $0x24] sm:$0xff] %vm3_vm0, %v50_v6   ;;  %53 = vst.msk [vmem:[%s121_s1 + $0x2c] sm:$0xf] %vm3_vm0, %v52_v7  }

// kernel: tile.40
= control target key start
LH: loop header
LB: loop body
LE: loop exit
PB: predicated region body
PF: predicated region fallthrough
CT: control target
= control target key end

     0   :  { %s28_s0 = inlined_call_operand.vmem [shape: f32[9], index: 0, kind: input, shape index: {}]   ;;  %s29_s1 = inlined_call_operand.vmem [shape: f32[16,9], index: 1, kind: output, shape index: {}]  }
   0x1   :  { %v4_v0 = vld [vmem:[%s28_s0] ss:$0 sm:$0xff] }
   0x2   :  { %5 = vst [vmem:[%s29_s1] sm:$0xff] %v4_v0  ;;  %8 = vst [vmem:[%s29_s1 + $0x8] sm:$0xff] %v4_v0 }

// kernel: tile.43
= control target key start
LH: loop header
LB: loop body
LE: loop exit
PB: predicated region body
PF: predicated region fallthrough
CT: control target
= control target key end

     0   :  { %vm9_vm0 = vcmask 15360   ;;  %s142_s12 = smov 126   ;;  %s143_s13 = smov 108   ;;  %vm3_vm1 = vcmask 72704   ;;  %vm13_vm2 = vcmask 56320   ;;  %vm16_vm3 = vcmask 1048560   ;;  %s221_s0 = inlined_call_operand.vmem [shape: f32[16,9], index: 0, kind: input, shape index: {}]   ;;  %s222_s1 = inlined_call_operand.vmem [shape: f32[144], index: 1, kind: output, shape index: {}]  }
   0x1   :  { %v111_v0 = vld [vmem:[%s221_s0 + $0xe] sm:$0x1]   ;;  %v114_v3 = vld [vmem:[%s221_s0 + $0xc] sm:$0x1]   ;;  %v113_v4 = vld [vmem:[%s221_s0 + $0xd] sm:$0x1]  }
   0x2   :  { %v112_v1 = vld [vmem:[%s221_s0 + $0xe] sm:$0x1]   ;;  %26 = vrot.lane.b32.xlu1 %v114_v3, %s143_s13  ;;  %v115_v5 = vld [vmem:[%s221_s0 + $0xb] sm:$0x1]   ;;  %s144_s18 = smov 117   ;;  %s145_s19 = smov 99  }
   0x3   :  { %v10_v2 = vsel %vm9_vm0, %v112_v1, %v111_v0  ;;  %v116_v6 = vld [vmem:[%s221_s0 + $0xa] sm:$0x1]   ;;  %v117_v7 = vld [vmem:[%s221_s0 + $0x9] sm:$0x1]   ;;  %v2_v8 = vld [vmem:[%s221_s0] sm:$0x1]  }
   0x4   :  { %11 = vrot.lane.b32.xlu0 %v10_v2, %s142_s12  ;;  %4 = vst.msk [vmem:[#allocation0] sm:$0x1] %vm3_vm1, %v2_v8   ;;  %s146_s26 = smov 90   ;;  %s147_s27 = smov 81   ;;  %v118_v9 = vld [vmem:[%s221_s0 + $0x8] sm:$0x1]  }
   0x5   :  { %v119_v10 = vld [vmem:[%s221_s0 + $0x7] sm:$0x1]   ;;  %s148_s3 = smov 72   ;;  %s149_s4 = smov 63   ;;  %v120_v11 = vld [vmem:[%s221_s0 + $0x6] sm:$0x1]  }
   0x6   :  { %32 = vrot.lane.b32.xlu1 %v115_v5, %s145_s19  ;;  %v121_v12 = vld [vmem:[%s221_s0 + $0x5] sm:$0x1]   ;;  %s150_s9 = smov 54   ;;  %s151_s10 = smov 45   ;;  %v122_v13 = vld [vmem:[%s221_s0 + $0x4] sm:$0x1]  }
   0x7   :  { %v123_v14 = vld [vmem:[%s221_s0 + $0x3] sm:$0x1]   ;;  %s152_s15 = smov 36   ;;  %s153_s16 = smov 27   ;;  %v124_v15 = vld [vmem:[%s221_s0 + $0x2] sm:$0x1]  }
   0x8   :  { %20 = vrot.lane.b32.xlu0 %v113_v4, %s144_s18  ;;  %v125_v16 = vld [vmem:[%s221_s0 + $0x1] sm:$0x1]   ;;  %s154_s21 = smov 18   ;;  %s155_s22 = smov 9   ;;  %v126_v17 = vld [vmem:[%s221_s0 + $0xf] sm:$0x1]  }
   0x9   :  { %s156_s0 = smov 7   ;;  %vm22_vm4 = vcmask 1032104   ;;  %vm28_vm5 = vcmask 958304   ;;  %vm34_vm6 = vcmask 884504   ;;  %vm40_vm7 = vcmask 810704  }
   0xa   :  { %44 = vrot.lane.b32.xlu1 %v117_v7, %s147_s27  ;;  %vm46_vm8 = vcmask 736904   ;;  %vm52_vm9 = vcmask 663104   ;;  %vm58_vm10 = vcmask 589304   ;;  %vm64_vm11 = vcmask 515504  }
   0xb   :  { %vm70_vm12 = vcmask 441704   ;;  %vm76_vm13 = vcmask 367904   ;;  %vm82_vm14 = vcmask 294104   ;;  %vm88_vm15 = vcmask 220304  }
   0xc   :  { %38 = vrot.lane.b32.xlu0 %v116_v6, %s146_s26  ;;  %vm94_vm0 = vcmask 146504   ;;  %vm100_vm1 = vcmask 130104  }
   0xe   :  { %56 = vrot.lane.b32.xlu1 %v119_v10, %s149_s4 }
  0x10   :  { %50 = vrot.lane.b32.xlu0 %v118_v9, %s148_s3 }
  0x12   :  { %68 = vrot.lane.b32.xlu1 %v121_v12, %s151_s10 }
  0x14   :  { %62 = vrot.lane.b32.xlu0 %v120_v11, %s150_s9 }
  0x16   :  { %80 = vrot.lane.b32.xlu1 %v123_v14, %s153_s16 }
  0x18   :  { %74 = vrot.lane.b32.xlu0 %v122_v13, %s152_s15 }
  0x1a   :  { %92 = vrot.lane.b32.xlu1 %v125_v16, %s155_s22 }
  0x1c   :  { %86 = vrot.lane.b32.xlu0 %v124_v15, %s154_s21 }
  0x20   :  { %98 = vrot.lane.b32.xlu0 %v126_v17, %s156_s0 }
  0x74   :  { %v27_v19 = vpop.permute.xlu1 %26  }
  0x76   :  { %v12_v18 = vpop.permute.xlu0 %11  }
  0x77   :  { %15 = vst.msk [vmem:[#allocation0 + $0x1] sm:$0x1] %vm13_vm2, %v12_v18  }
  0x78   :  { %17 = vst.msk [vmem:[#allocation0] sm:$0x1] %vm16_vm3, %v12_v18   ;;  %v33_v21 = vpop.permute.xlu1 %32  }
  0x7a   :  { %v21_v20 = vpop.permute.xlu0 %20  }
  0x7b   :  { %23 = vst.msk [vmem:[#allocation0] sm:$0x1] %vm22_vm4, %v21_v20  }
  0x7c   :  { %29 = vst.msk [vmem:[#allocation0] sm:$0x1] %vm28_vm5, %v27_v19   ;;  %v45_v23 = vpop.permute.xlu1 %44  }
  0x7d   :  { %35 = vst.msk [vmem:[#allocation0] sm:$0x1] %vm34_vm6, %v33_v21  }
  0x7e   :  { %v39_v22 = vpop.permute.xlu0 %38  }
  0x7f   :  { %41 = vst.msk [vmem:[#allocation0] sm:$0x1] %vm40_vm7, %v39_v22  }
  0x80   :  { %47 = vst.msk [vmem:[#allocation0] sm:$0x1] %vm46_vm8, %v45_v23   ;;  %v57_v25 = vpop.permute.xlu1 %56  }
  0x82   :  { %v51_v24 = vpop.permute.xlu0 %50  }
  0x83   :  { %53 = vst.msk [vmem:[#allocation0] sm:$0x1] %vm52_vm9, %v51_v24  }
  0x84   :  { %59 = vst.msk [vmem:[#allocation0] sm:$0x1] %vm58_vm10, %v57_v25   ;;  %v69_v27 = vpop.permute.xlu1 %68  }
  0x86   :  { %v63_v26 = vpop.permute.xlu0 %62  }
  0x87   :  { %65 = vst.msk [vmem:[#allocation0] sm:$0x1] %vm64_vm11, %v63_v26  }
  0x88   :  { %71 = vst.msk [vmem:[#allocation0] sm:$0x1] %vm70_vm12, %v69_v27   ;;  %v81_v29 = vpop.permute.xlu1 %80  }
  0x8a   :  { %v75_v28 = vpop.permute.xlu0 %74  }
  0x8b   :  { %77 = vst.msk [vmem:[#allocation0] sm:$0x1] %vm76_vm13, %v75_v28  }
  0x8c   :  { %83 = vst.msk [vmem:[#allocation0] sm:$0x1] %vm82_vm14, %v81_v29   ;;  %v93_v31 = vpop.permute.xlu1 %92  }
  0x8e   :  { %v87_v30 = vpop.permute.xlu0 %86  }
  0x8f   :  { %89 = vst.msk [vmem:[#allocation0] sm:$0x1] %vm88_vm15, %v87_v30  }
  0x90   :  { %95 = vst.msk [vmem:[#allocation0] sm:$0x1] %vm94_vm0, %v93_v31  }
  0x92   :  { %v99_v32 = vpop.permute.xlu0 %98  }
  0x93   :  { %102 = vst.msk [vmem:[#allocation0 + $0x1] sm:$0x1] %vm100_vm1, %v99_v32  }
  0x9a   :  { %v107_v33 = vld [vmem:[#allocation0] sm:$0x3] }
  0x9b   :  { %110 = vst [vmem:[%s222_s1] sm:$0x3] %v107_v33 }

// kernel: tile.44
= control target key start
LH: loop header
LB: loop body
LE: loop exit
PB: predicated region body
PF: predicated region fallthrough
CT: control target
= control target key end

     0   :  { %s46_s0 = inlined_call_operand.vmem [shape: f32[144], index: 0, kind: input, shape index: {}]   ;;  %s47_s1 = inlined_call_operand.vmem [shape: f32[16,144], index: 1, kind: output, shape index: {}]  }
   0x1   :  { %v4_v0 = vld [vmem:[%s46_s0] ss:$0 sm:$0xff]  ;;  %v15_v1 = vld [vmem:[%s46_s0 + $0x1] ss:$0 sm:$0xff] }
   0x2   :  { %5 = vst [vmem:[%s47_s1] sm:$0xff] %v4_v0  ;;  %14 = vst [vmem:[%s47_s1 + $0x10] sm:$0xff] %v4_v0 }
   0x3   :  { %16 = vst [vmem:[%s47_s1 + $0x8] sm:$0xff] %v15_v1  ;;  %17 = vst [vmem:[%s47_s1 + $0x18] sm:$0xff] %v15_v1 }

// kernel: tile.45
= control target key start
LH: loop header
LB: loop body
LE: loop exit
PB: predicated region body
PF: predicated region fallthrough
CT: control target
= control target key end

     0   :  { %s51_s6 = smov 3  ;;  %s75_s9 = smov 3  ;;  %vm20_vm0 = vcmask 1043458   ;;  %vm5_vm1 = vcmask 130048   ;;  %vm40_vm2 = vcmask 261120   ;;  %vm64_vm3 = vcmask 392192   ;;  %s531_s0 = inlined_call_operand.vmem [shape: f32[16,144], index: 0, kind: input, shape index: {}]   ;;  %s532_s1 = inlined_call_operand.vmem [shape: f32[1,2304], index: 1, kind: output, shape index: {}]  }
   0x1   :  { %v326_v0 = vld [vmem:[%s531_s0 + $0x6] ss:$16 sm:%s51_s6]   ;;  %s366_s10 = smov 96   ;;  %v329_v1 = vld [vmem:[%s531_s0 + $0x5] ss:$16 sm:%s75_s9]   ;;  %s12_s13 = smov 3 }
   0x2   :  { %53 = vrot.lane.b32.xlu0 %v326_v0, %s366_s10  ;;  %s15_s14 = smov 3  ;;  %s367_s15 = smov 80   ;;  %v321_v2 = vld [vmem:[%s531_s0 + $0x7] ss:$16 sm:%s12_s13]   ;;  %vm88_vm4 = vcmask 523264   ;;  %vm68_vm5 = vcmask 654336  }
   0x3   :  { %77 = vrot.lane.b32.xlu1 %v329_v1, %s367_s15  ;;  %s18_s18 = smov 12  ;;  %v322_v3 = vld [vmem:[%s531_s0 + $0xf] ss:$16 sm:%s15_s14]   ;;  %s99_s23 = smov 3  ;;  %vm44_vm6 = vcmask 785408   ;;  %vm26_vm7 = vcmask 916480  }
   0x4   :  { %v323_v4 = vld [vmem:[%s531_s0 - $0x19] ss:$16 sm:%s18_s18]   ;;  %v332_v6 = vld [vmem:[%s531_s0 + $0x4] ss:$16 sm:%s99_s23]   ;;  %s123_s26 = smov 3  ;;  %s147_s29 = smov 3 }
   0x5   :  { %v21_v5 = vsel %vm20_vm0, %v323_v4, %v322_v3  ;;  %v335_v8 = vld [vmem:[%s531_s0 + $0x13] ss:$-16 sm:%s123_s26]   ;;  %s368_s30 = smov 112   ;;  %s369_s2 = smov 64   ;;  %v338_v9 = vld [vmem:[%s531_s0 + $0x2] ss:$16 sm:%s147_s29]  }
   0x6   :  { %v23_v7 = vsel %vm5_vm1, %v21_v5, %v321_v2  ;;  %s35_s5 = smov 3  ;;  %s38_s6 = smov 3  ;;  %vm55_vm8 = vcmask 1048320   ;;  %vm79_vm9 = vcmask 1048192   ;;  %vm29_vm10 = vcmask 1048448  }
   0x7   :  { %24 = vrot.lane.b32.xlu0 %v23_v7, %s368_s30  ;;  %101 = vrot.lane.b32.xlu1 %v332_v6, %s369_s2  ;;  %v324_v10 = vld [vmem:[%s531_s0 + $0x16] ss:$-16 sm:%s35_s5]   ;;  %s59_s12 = smov 3  ;;  %s62_s13 = smov 3  ;;  %vm103_vm11 = vcmask 1048064   ;;  %vm127_vm12 = vcmask 1047936  }
   0x8   :  { %v325_v11 = vld [vmem:[%s531_s0 + $0x1e] ss:$-16 sm:%s38_s6]   ;;  %v327_v12 = vld [vmem:[%s531_s0 + $0x5] ss:$16 sm:%s59_s12]   ;;  %s83_s19 = smov 3  ;;  %s86_s20 = smov 3 }
   0x9   :  { %v328_v13 = vld [vmem:[%s531_s0 + $0xd] ss:$16 sm:%s62_s13]   ;;  %s107_s21 = smov 3  ;;  %s110_s22 = smov 3  ;;  %v41_v14 = vsel %vm40_vm2, %v325_v11, %v324_v10  ;;  %v330_v16 = vld [vmem:[%s531_s0 + $0x4] ss:$16 sm:%s83_s19]  }
   0xa   :  { %s370_s23 = smov 48   ;;  %s371_s24 = smov 32   ;;  %v65_v15 = vsel %vm64_vm3, %v328_v13, %v327_v12  ;;  %v331_v17 = vld [vmem:[%s531_s0 + $0xc] ss:$16 sm:%s86_s20]   ;;  %v333_v18 = vld [vmem:[%s531_s0 + $0x3] ss:$16 sm:%s107_s21]  }
   0xb   :  { %125 = vrot.lane.b32.xlu0 %v335_v8, %s370_s23  ;;  %149 = vrot.lane.b32.xlu1 %v338_v9, %s371_s24  ;;  %s131_s29 = smov 3  ;;  %s134_s30 = smov 3  ;;  %v334_v19 = vld [vmem:[%s531_s0 + $0xb] ss:$16 sm:%s110_s22]   ;;  %v89_v22 = vsel %vm88_vm4, %v331_v17, %v330_v16  ;;  %vm151_vm13 = vcmask 1047808   ;;  %vm47_vm14 = vcmask 917248  }
   0xc   :  { %s155_s7 = smov 3  ;;  %s158_s8 = smov 3  ;;  %v336_v20 = vld [vmem:[%s531_s0 + $0x12] ss:$-16 sm:%s131_s29]   ;;  %v337_v21 = vld [vmem:[%s531_s0 + $0x1a] ss:$-16 sm:%s134_s30]   ;;  %v113_v23 = vsel %vm68_vm5, %v334_v19, %v333_v18 }
   0xd   :  { %s3_s12 = smov 3  ;;  %s8_s13 = smov 3  ;;  %v339_v26 = vld [vmem:[%s531_s0 + $0x1] ss:$16 sm:%s155_s7]   ;;  %v340_v27 = vld [vmem:[%s531_s0 + $0x9] ss:$16 sm:%s158_s8]   ;;  %v137_v28 = vsel %vm44_vm6, %v337_v21, %v336_v20 }
   0xe   :  { %v320_v24 = vld [vmem:[%s531_s0 + $0x8] ss:$16 sm:%s3_s12]   ;;  %v9_v25 = vld [vmem:[%s531_s0] ss:$16 sm:%s8_s13]   ;;  %v161_v29 = vsel %vm26_vm7, %v340_v27, %v339_v26  ;;  %vm71_vm15 = vcmask 786048   ;;  %vm95_vm0 = vcmask 654848  }
   0xf   :  { %42 = vrot.lane.b32.xlu0 %v41_v14, %s366_s10  ;;  %66 = vrot.lane.b32.xlu1 %v65_v15, %s367_s15  ;;  %7 = vst.msk [vmem:[#allocation0 + $0x8] ss:$72 sm:$0x3] %vm5_vm1, %v320_v24   ;;  %10 = vst [vmem:[#allocation0] ss:$72 sm:$0x3] %v9_v25  }
  0x13   :  { %90 = vrot.lane.b32.xlu0 %v89_v22, %s369_s2  ;;  %114 = vrot.lane.b32.xlu1 %v113_v23, %s370_s23  ;;  %s171_s2 = smov 3  ;;  %s372_s23 = smov 16  }
  0x14   :  { %v341_v30 = vld [vmem:[%s531_s0 + $0x1] ss:$16 sm:%s171_s2]  }
  0x16   :  { %v182_v31 = vld [vmem:[#allocation0] sm:$0x1]  ;;  %v242_v32 = vld [vmem:[#allocation0 + $0x48] sm:$0x1] }
  0x17   :  { %138 = vrot.lane.b32.xlu0 %v137_v28, %s371_s24  ;;  %162 = vrot.lane.b32.xlu1 %v161_v29, %s372_s23  ;;  %185 = vst [vmem:[%s532_s1] sm:$0x1] %v182_v31  ;;  %350 = vst [vmem:[%s532_s1 + $0x9] sm:$0x1] %v242_v32 }
  0x1b   :  { %173 = vrot.lane.b32.xlu0 %v341_v30, %s372_s23 }
  0x74   :  { %v54_v33 = vpop.permute.xlu0 %53  }
  0x75   :  { %57 = vst.msk [vmem:[#allocation0 + $0x30] ss:$72 sm:$0x3] %vm55_vm8, %v54_v33   ;;  %v78_v34 = vpop.permute.xlu1 %77  }
  0x76   :  { %81 = vst.msk [vmem:[#allocation0 + $0x28] ss:$72 sm:$0x3] %vm79_vm9, %v78_v34  }
  0x79   :  { %v25_v35 = vpop.permute.xlu0 %24   ;;  %v102_v36 = vpop.permute.xlu1 %101  }
  0x7a   :  { %28 = vst.msk [vmem:[#allocation0 + $0x40] ss:$72 sm:$0x3] %vm26_vm7, %v25_v35  }
  0x7b   :  { %33 = vst.msk [vmem:[#allocation0 - $0x58] ss:$72 sm:$0xc] %vm29_vm10, %v25_v35   ;;  %31 = vst.msk [vmem:[#allocation0 + $0x40] ss:$72 sm:$0x3] %vm29_vm10, %v25_v35  }
  0x7c   :  { %105 = vst.msk [vmem:[#allocation0 + $0x20] ss:$72 sm:$0x3] %vm103_vm11, %v102_v36  }
  0x7d   :  { %v126_v37 = vpop.permute.xlu0 %125   ;;  %v150_v38 = vpop.permute.xlu1 %149  }
  0x7e   :  { %129 = vst.msk [vmem:[#allocation0 + $0x60] ss:$-72 sm:$0x3] %vm127_vm12, %v126_v37  }
  0x7f   :  { %153 = vst.msk [vmem:[#allocation0 + $0x10] ss:$72 sm:$0x3] %vm151_vm13, %v150_v38  }
  0x81   :  { %v43_v39 = vpop.permute.xlu0 %42   ;;  %v67_v40 = vpop.permute.xlu1 %66  }
  0x82   :  { %v235_v41 = vld [vmem:[#allocation0 + $0x40] sm:$0x1]  ;;  %v298_v42 = vld [vmem:[#allocation0 + $0x88] sm:$0x1] }
  0x83   :  { %46 = vst.msk [vmem:[#allocation0 + $0x80] ss:$-72 sm:$0x3] %vm44_vm6, %v43_v39   ;;  %349 = vst [vmem:[%s532_s1 + $0x8] sm:$0x1] %v235_v41 }
  0x84   :  { %70 = vst.msk [vmem:[#allocation0 + $0x30] ss:$72 sm:$0x3] %vm68_vm5, %v67_v40   ;;  %358 = vst [vmem:[%s532_s1 + $0x11] sm:$0x1] %v298_v42  ;;  %vm119_vm5 = vcmask 523648  }
  0x85   :  { %49 = vst.msk [vmem:[#allocation0 + $0x80] ss:$-72 sm:$0x3] %vm47_vm14, %v43_v39   ;;  %v91_v43 = vpop.permute.xlu0 %90   ;;  %v115_v44 = vpop.permute.xlu1 %114  }
  0x86   :  { %73 = vst.msk [vmem:[#allocation0 + $0x30] ss:$72 sm:$0x3] %vm71_vm15, %v67_v40  }
  0x87   :  { %94 = vst.msk [vmem:[#allocation0 + $0x28] ss:$72 sm:$0x3] %vm88_vm4, %v91_v43   ;;  %vm167_vm4 = vcmask 261248  }
  0x88   :  { %118 = vst.msk [vmem:[#allocation0 + $0x20] ss:$72 sm:$0x3] %vm64_vm3, %v115_v44   ;;  %vm143_vm3 = vcmask 392448  }
  0x89   :  { %97 = vst.msk [vmem:[#allocation0 + $0x28] ss:$72 sm:$0x3] %vm95_vm0, %v91_v43   ;;  %v139_v45 = vpop.permute.xlu0 %138   ;;  %v163_v46 = vpop.permute.xlu1 %162  }
  0x8a   :  { %121 = vst.msk [vmem:[#allocation0 + $0x20] ss:$72 sm:$0x3] %vm119_vm5, %v115_v44  }
  0x8b   :  { %142 = vst.msk [vmem:[#allocation0 + $0x60] ss:$-72 sm:$0x3] %vm40_vm2, %v139_v45  }
  0x8c   :  { %v228_v47 = vld [vmem:[#allocation0 + $0x38] sm:$0x1]  ;;  %v291_v48 = vld [vmem:[#allocation0 + $0x80] sm:$0x1] }
  0x8d   :  { %v221_v49 = vld [vmem:[#allocation0 + $0x30] sm:$0x1]  ;;  %166 = vst.msk [vmem:[#allocation0 + $0x10] ss:$72 sm:$0x3] %vm5_vm1, %v163_v46   ;;  %vm175_vm1 = vcmask 1047680   ;;  %v174_v51 = vpop.permute.xlu0 %173  }
  0x8e   :  { %348 = vst [vmem:[%s532_s1 + $0x7] sm:$0x1] %v228_v47  ;;  %357 = vst [vmem:[%s532_s1 + $0x10] sm:$0x1] %v291_v48  ;;  %v284_v50 = vld [vmem:[#allocation0 + $0x78] sm:$0x1] }
  0x8f   :  { %347 = vst [vmem:[%s532_s1 + $0x6] sm:$0x1] %v221_v49  ;;  %145 = vst.msk [vmem:[#allocation0 + $0x60] ss:$-72 sm:$0x3] %vm143_vm3, %v139_v45  }
  0x90   :  { %169 = vst.msk [vmem:[#allocation0 + $0x10] ss:$72 sm:$0x3] %vm167_vm4, %v163_v46   ;;  %356 = vst [vmem:[%s532_s1 + $0xf] sm:$0x1] %v284_v50 }
  0x91   :  { %v214_v52 = vld [vmem:[#allocation0 + $0x28] sm:$0x1]  ;;  %v277_v53 = vld [vmem:[#allocation0 + $0x70] sm:$0x1]  ;;  %v207_v54 = vld [vmem:[#allocation0 + $0x20] sm:$0x1] }
  0x92   :  { %177 = vst.msk [vmem:[#allocation0 + $0x8] ss:$72 sm:$0x3] %vm175_vm1, %v174_v51   ;;  %346 = vst [vmem:[%s532_s1 + $0x5] sm:$0x1] %v214_v52 }
  0x93   :  { %355 = vst [vmem:[%s532_s1 + $0xe] sm:$0x1] %v277_v53  ;;  %345 = vst [vmem:[%s532_s1 + $0x4] sm:$0x1] %v207_v54  ;;  %v270_v55 = vld [vmem:[#allocation0 + $0x68] sm:$0x1] }
  0x94   :  { %354 = vst [vmem:[%s532_s1 + $0xd] sm:$0x1] %v270_v55 }
  0x96   :  { %v200_v56 = vld [vmem:[#allocation0 + $0x18] sm:$0x1]  ;;  %v263_v57 = vld [vmem:[#allocation0 + $0x60] sm:$0x1] }
  0x97   :  { %v193_v58 = vld [vmem:[#allocation0 + $0x10] sm:$0x1]  ;;  %344 = vst [vmem:[%s532_s1 + $0x3] sm:$0x1] %v200_v56  ;;  %353 = vst [vmem:[%s532_s1 + $0xc] sm:$0x1] %v263_v57 }
  0x98   :  { %343 = vst [vmem:[%s532_s1 + $0x2] sm:$0x1] %v193_v58  ;;  %v256_v59 = vld [vmem:[#allocation0 + $0x58] sm:$0x1] }
  0x99   :  { %352 = vst [vmem:[%s532_s1 + $0xb] sm:$0x1] %v256_v59  ;;  %v187_v60 = vld [vmem:[#allocation0 + $0x8] sm:$0x1]  ;;  %v249_v61 = vld [vmem:[#allocation0 + $0x50] sm:$0x1] }
  0x9a   :  { %342 = vst [vmem:[%s532_s1 + $0x1] sm:$0x1] %v187_v60  ;;  %351 = vst [vmem:[%s532_s1 + $0xa] sm:$0x1] %v249_v61 }

// kernel: tile.31
= control target key start
LH: loop header
LB: loop body
LE: loop exit
PB: predicated region body
PF: predicated region fallthrough
CT: control target
= control target key end

     0   :  { %s22_s0 = inlined_call_operand.vmem [shape: f32[12], index: 0, kind: input, shape index: {}]   ;;  %s23_s1 = inlined_call_operand.vmem [shape: f32[4,12], index: 1, kind: output, shape index: {}]  }
   0x1   :  { %v4_v0 = vld [vmem:[%s22_s0] ss:$0 sm:$0xff] }
   0x2   :  { %5 = vst [vmem:[%s23_s1] sm:$0xf] %v4_v0 }

// kernel: tile.34
= control target key start
LH: loop header
LB: loop body
LE: loop exit
PB: predicated region body
PF: predicated region fallthrough
CT: control target
= control target key end

     0   :  { %vm8_vm0 = vcmask 97280   ;;  %s40_s8 = smov 12   ;;  %s41_s9 = smov 24   ;;  %vm14_vm1 = vcmask 392480   ;;  %vm20_vm2 = vcmask 294080   ;;  %vm26_vm3 = vcmask 195680   ;;  %s58_s0 = inlined_call_operand.vmem [shape: f32[4,12], index: 0, kind: input, shape index: {}]   ;;  %s59_s1 = inlined_call_operand.vmem [shape: f32[48], index: 1, kind: output, shape index: {}]  }
   0x1   :  { %v5_v0 = vld [vmem:[%s58_s0] sm:$0xf]  ;;  %s39_s0 = smov 36  }
   0x2   :  { %6 = vst [vmem:[#allocation1] sm:$0xf] %v5_v0 }
   0x9   :  { %v11_v1 = vld [vmem:[#allocation1 + $0x3] sm:$0x1]   ;;  %v23_v2 = vld [vmem:[#allocation1 + $0x1] sm:$0x1]   ;;  %v7_v3 = vld [vmem:[#allocation1] sm:$0x1]  }
   0xa   :  { %12 = vrot.lane.b32.xlu0 %v11_v1, %s39_s0  ;;  %24 = vrot.lane.b32.xlu1 %v23_v2, %s40_s8  ;;  %v17_v4 = vld [vmem:[#allocation1 + $0x2] sm:$0x1]   ;;  %9 = vst.msk [vmem:[#allocation0] sm:$0x1] %vm8_vm0, %v7_v3  }
   0xe   :  { %18 = vrot.lane.b32.xlu0 %v17_v4, %s41_s9 }
  0x7c   :  { %v13_v5 = vpop.permute.xlu0 %12   ;;  %v25_v6 = vpop.permute.xlu1 %24  }
  0x7d   :  { %15 = vst.msk [vmem:[#allocation0] sm:$0x1] %vm14_vm1, %v13_v5  }
  0x80   :  { %v19_v7 = vpop.permute.xlu0 %18  }
  0x81   :  { %21 = vst.msk [vmem:[#allocation0] sm:$0x1] %vm20_vm2, %v19_v7  }
  0x82   :  { %27 = vst.msk [vmem:[#allocation0] sm:$0x1] %vm26_vm3, %v25_v6  }
  0x89   :  { %v32_v8 = vld [vmem:[#allocation0] sm:$0x1] }
  0x8a   :  { %35 = vst [vmem:[%s59_s1] sm:$0x1] %v32_v8 }

// kernel: tile.35
= control target key start
LH: loop header
LB: loop body
LE: loop exit
PB: predicated region body
PF: predicated region fallthrough
CT: control target
= control target key end

     0   :  { %s22_s0 = inlined_call_operand.vmem [shape: f32[48], index: 0, kind: input, shape index: {}]   ;;  %s23_s1 = inlined_call_operand.vmem [shape: f32[4,48], index: 1, kind: output, shape index: {}]  }
   0x1   :  { %v4_v0 = vld [vmem:[%s22_s0] ss:$0 sm:$0xff] }
   0x2   :  { %5 = vst [vmem:[%s23_s1] sm:$0xf] %v4_v0 }

// kernel: tile.36
= control target key start
LH: loop header
LB: loop body
LE: loop exit
PB: predicated region body
PF: predicated region fallthrough
CT: control target
= control target key end

     0   :  { %vm14_vm0 = vcmask 261120   ;;  %vm8_vm1 = vcmask 392192   ;;  %s55_s8 = smov 96   ;;  %s56_s9 = smov 48   ;;  %vm18_vm2 = vcmask 130048   ;;  %vm21_vm3 = vcmask 1048320   ;;  %s76_s0 = inlined_call_operand.vmem [shape: f32[4,48], index: 0, kind: input, shape index: {}]   ;;  %s77_s1 = inlined_call_operand.vmem [shape: f32[1,192], index: 1, kind: output, shape index: {}]  }
   0x1   :  { %v5_v0 = vld [vmem:[%s76_s0] sm:$0xf]  ;;  %s54_s0 = smov 16   ;;  %vm33_vm4 = vcmask 523392   ;;  %vm27_vm5 = vcmask 785792  }
   0x2   :  { %6 = vst [vmem:[#allocation1] sm:$0xf] %v5_v0 }
   0x9   :  { %v11_v1 = vld [vmem:[#allocation1 + $0x2] sm:$0x1]   ;;  %v30_v3 = vld [vmem:[#allocation1 + $0x3] sm:$0x1]   ;;  %v7_v5 = vld [vmem:[#allocation1] sm:$0x1]  }
   0xa   :  { %v13_v2 = vld [vmem:[#allocation1 + $0x2] sm:$0x1]   ;;  %31 = vrot.lane.b32.xlu1 %v30_v3, %s54_s0  ;;  %9 = vst.msk [vmem:[#allocation0] sm:$0x1] %vm8_vm1, %v7_v5   ;;  %v24_v6 = vld [vmem:[#allocation1 + $0x1] sm:$0x1]  }
   0xb   :  { %v15_v4 = vsel %vm14_vm0, %v13_v2, %v11_v1 }
   0xc   :  { %16 = vrot.lane.b32.xlu0 %v15_v4, %s55_s8 }
  0x10   :  { %25 = vrot.lane.b32.xlu0 %v24_v6, %s56_s9 }
  0x7c   :  { %v32_v7 = vpop.permute.xlu1 %31  }
  0x7e   :  { %v17_v8 = vpop.permute.xlu0 %16  }
  0x7f   :  { %20 = vst.msk [vmem:[#allocation0 + $0x8] sm:$0x1] %vm18_vm2, %v17_v8  }
  0x80   :  { %22 = vst.msk [vmem:[#allocation0] sm:$0x1] %vm21_vm3, %v17_v8  }
  0x81   :  { %35 = vst.msk [vmem:[#allocation0 + $0x8] sm:$0x1] %vm33_vm4, %v32_v7  }
  0x82   :  { %v26_v9 = vpop.permute.xlu0 %25  }
  0x83   :  { %28 = vst.msk [vmem:[#allocation0] sm:$0x1] %vm27_vm5, %v26_v9  }
  0x88   :  { %v45_v10 = vld [vmem:[#allocation0 + $0x8] sm:$0x1] }
  0x89   :  { %50 = vst [vmem:[%s77_s1 + $0x1] sm:$0x1] %v45_v10 }
  0x8a   :  { %v40_v11 = vld [vmem:[#allocation0] sm:$0x1] }
  0x8b   :  { %43 = vst [vmem:[%s77_s1] sm:$0x1] %v40_v11 }

// kernel: vit_forward.1
= control target key start
LH: loop header
LB: loop body
LE: loop exit
PB: predicated region body
PF: predicated region fallthrough
CT: control target
= control target key end

     0   :  { %s12510_s0 = inlined_call_operand.vmem [shape: f32[2,4,2304], index: 0, kind: input, shape index: {}]   ;;  %s12511_s1 = inlined_call_operand.vmem [shape: f32[2304,32], index: 1, kind: input, shape index: {}]   ;;  %s12512_s2 = inlined_call_operand.vmem [shape: f32[4,32], index: 2, kind: input, shape index: {}]   ;;  %s12513_s3 = inlined_call_operand.vmem [shape: f32[2,1,32], index: 3, kind: input, shape index: {}]   ;;  %s12514_s4 = inlined_call_operand.vmem [shape: f32[2,1,32], index: 4, kind: input, shape index: {}]   ;;  %s12515_s5 = inlined_call_operand.vmem [shape: f32[2,32,96], index: 5, kind: input, shape index: {}]   ;;  %s12516_s6 = inlined_call_operand.vmem [shape: f32[2,1,96], index: 6, kind: input, shape index: {}]   ;;  %s12517_s7 = inlined_call_operand.vmem [shape: f32[2,32,32], index: 7, kind: input, shape index: {}]   ;;  %s12518_s8 = inlined_call_operand.vmem [shape: f32[2,1,32], index: 8, kind: input, shape index: {}]   ;;  %s12519_s9 = inlined_call_operand.vmem [shape: f32[2,1,32], index: 9, kind: input, shape index: {}]   ;;  %s12520_s10 = inlined_call_operand.vmem [shape: f32[2,1,32], index: 10, kind: input, shape index: {}]   ;;  %s12521_s11 = inlined_call_operand.vmem [shape: f32[2,32,128], index: 11, kind: input, shape index: {}]   ;;  %s12522_s12 = inlined_call_operand.vmem [shape: f32[2,1,128], index: 12, kind: input, shape index: {}]   ;;  %s12523_s13 = inlined_call_operand.vmem [shape: f32[2,128,32], index: 13, kind: input, shape index: {}]   ;;  %s12524_s14 = inlined_call_operand.vmem [shape: f32[2,1,32], index: 14, kind: input, shape index: {}]   ;;  %s12525_s15 = inlined_call_operand.vmem [shape: f32[1,32], index: 15, kind: input, shape index: {}]   ;;  %s12526_s16 = inlined_call_operand.vmem [shape: f32[1,32], index: 16, kind: input, shape index: {}]   ;;  %s12527_s17 = inlined_call_operand.vmem [shape: f32[32,192], index: 17, kind: input, shape index: {}]   ;;  %s12528_s18 = inlined_call_operand.vmem [shape: f32[1,192], index: 18, kind: input, shape index: {}]   ;;  %s12529_s19 = inlined_call_operand.vmem [shape: f32[192,192], index: 19, kind: input, shape index: {}]   ;;  %s12530_s20 = inlined_call_operand.vmem [shape: f32[1,192], index: 20, kind: input, shape index: {}]   ;;  %s12531_s21 = inlined_call_operand.vmem [shape: f32[192,2304], index: 21, kind: input, shape index: {}]   ;;  %s12532_s22 = inlined_call_operand.vmem [shape: f32[1,2304], index: 22, kind: input, shape index: {}]   ;;  %s12533_s23 = inlined_call_operand.vmem [shape: f32[2,4,2304], index: 23, kind: output, shape index: {}]  }
   0x1   :  { %12563 = sst [smem:[#allocation4_spill]] %s12510_s0 }
   0x2   :  { %12564 = sst [smem:[#allocation5_spill]] %s12511_s1 }
   0x3   :  { %12565 = sst [smem:[#allocation6_spill]] %s12512_s2 }
   0x4   :  { %12566 = sst [smem:[#allocation7_spill]] %s12513_s3 }
   0x5   :  { %12567 = sst [smem:[#allocation8_spill]] %s12514_s4  ;;  %s9049_s4 = smov 0  }
   0x6   :  { %12568 = sst [smem:[#allocation9_spill]] %s12515_s5 }
   0x7   :  { %12569 = sst [smem:[#allocation10_spill]] %s12516_s6 }
   0x8   :  { %12570 = sst [smem:[#allocation11_spill]] %s12517_s7 }
   0x9   :  { %12571 = sst [smem:[#allocation12_spill]] %s12528_s18 }
   0xa   :  { %12572 = sst [smem:[#allocation13_spill]] %s12529_s19 }
   0xb   :  { %12573 = sst [smem:[#allocation14_spill]] %s12530_s20 }
   0xc   :  { %12574 = sst [smem:[#allocation15_spill]] %s12531_s21 }
   0xd   :  { %12575 = sst [smem:[#allocation16_spill]] %s12532_s22 }
   0xe   :  { %12576 = sst [smem:[#allocation17_spill]] %s12533_s23 }
   0xf LB: > { %12577 = sst [smem:[#allocation2_spill]] %s8917_s4  ;;  %s7640_s30 = sadd.s32 4294967295, %s8917_s4   ;;  %s8917_s4 = sphi %s9049_s4, %s33_s4  }
  0x10   : > { %p7644_p0 = scmp.ge.s32.totalorder %s8917_s4, 1  ;;  %p637_p1 = scmp.lt.s32.totalorder %s8917_s4, 3 }
  0x12   : > { %p638_p2 = pnand %p7644_p0, %p637_p1 }
  0x14   : > { %641 = sbr.rel (%p638_p2) target bundleno = 10337 (0x2861), region = 112 }
  0x19   : > { %s12578_s5 = sld [smem:[#allocation5_spill]]  ;;  %p9128_p3 = scmp.lt.s32.totalorder %s7640_s30, 1  ;;  %vm1668_vm0 = vcmask 257024   ;;  %vm8920_vm1 = vmmov 0   ;;  %vm1710_vm2 = vcmask 261120   ;;  %vm1793_vm3 = vcmask 64512  }
  0x1a   : > { %s12581_s2 = sld [smem:[#allocation4_spill]]  ;;  %s12545_s25 = smov 104   ;;  %vm2100_vm4 = vcmask 27648   ;;  %vm2151_vm5 = vcmask 1043456   ;;  %vm2147_vm6 = vcmask 31744   ;;  %vm2468_vm7 = vcmask 130048  }
  0x1b   : > { %s12606_s30 = smov (!%p9128_p3, %s7640_s30), 1  ;;  %s12582_s26 = sld [smem:[#allocation6_spill]]  ;;  %vm2470_vm8 = vcmask 195584   ;;  %vm6293_vm9 = vcmask 523264  }
  0x1c   : > { %12580 = sst [smem:[#allocation3_spill]] %s12606_s30  ;;  %s12540_s28 = smul.u32 72, %s12606_s30 }
  0x1d   : > { %s12583_s7 = sld [smem:[#allocation9_spill]]  ;;  %s12547_s1 = smov 120  }
  0x1e   : > { %s12585_s29 = sld [smem:[#allocation8_spill]]  ;;  %s12543_s27 = smov 96  }
  0x1f   : > { %v751_v0 = vld [vmem:[%s12578_s5 + $0xf8] sm:$0xff]  ;;  %v750_v2 = vld [vmem:[%s12578_s5 + $0xf0] sm:$0xff]  ;;  %v749_v6 = vld [vmem:[%s12578_s5 + $0xe8] sm:$0xff]  ;;  %s12586_s24 = sld [smem:[#allocation10_spill]]  ;;  %s12590_s0 = smov 104  }
  0x20   : > { %v735_v1 = vld [vmem:[%s12578_s5 + $0x78] sm:$0xff]  ;;  %7844 = vmatprep.subr.mxu0 %v751_v0  ;;  %v734_v4 = vld [vmem:[%s12578_s5 + $0x70] sm:$0xff]  ;;  %v733_v8 = vld [vmem:[%s12578_s5 + $0x68] sm:$0xff]  ;;  %s9216_s6 = scalar_lea.vmem %s12581_s2, %s12540_s28  ;;  %s12584_s2 = sld [smem:[#allocation7_spill]] }
  0x21   : > { %v783_v3 = vld [vmem:[%s12578_s5 + $0x1f8] sm:$0xff]  ;;  %7845 = vmatpush3.msra.mxu0 %v735_v1  ;;  %v782_v7 = vld [vmem:[%s12578_s5 + $0x1f0] sm:$0xff]  ;;  %v781_v10 = vld [vmem:[%s12578_s5 + $0x1e8] sm:$0xff]  ;;  %s12587_s28 = sld [smem:[#allocation11_spill]]  ;;  %s12591_s3 = smov 96  }
  0x22   : > { %v767_v5 = vld [vmem:[%s12578_s5 + $0x178] sm:$0xff]  ;;  %7879 = vmatprep.subr.mxu1 %v783_v3  ;;  %7846 = vmatprep.subr.mxu0 %v750_v2  ;;  %v766_v9 = vld [vmem:[%s12578_s5 + $0x170] sm:$0xff]  ;;  %v748_v11 = vld [vmem:[%s12578_s5 + $0xe0] sm:$0xff]  ;;  %s12593_s4 = smov 8   ;;  %s12594_s23 = smov 16  }
  0x23   : > { %7880 = vmatpush3.msra.mxu1 %v767_v5  ;;  %7847 = vmatpush3.msra.mxu0 %v734_v4  ;;  %v765_v12 = vld [vmem:[%s12578_s5 + $0x168] sm:$0xff]  ;;  %v732_v13 = vld [vmem:[%s12578_s5 + $0x60] sm:$0xff]  ;;  %v747_v15 = vld [vmem:[%s12578_s5 + $0xd8] sm:$0xff]  ;;  %s12595_s30 = smov 24   ;;  %s12596_s21 = sld [smem:[#allocation13_spill]] }
  0x24   : > { %7881 = vmatprep.subr.mxu1 %v782_v7  ;;  %7848 = vmatprep.subr.mxu0 %v749_v6  ;;  %v780_v14 = vld [vmem:[%s12578_s5 + $0x1e0] sm:$0xff]  ;;  %v731_v17 = vld [vmem:[%s12578_s5 + $0x58] sm:$0xff]  ;;  %v746_v19 = vld [vmem:[%s12578_s5 + $0xd0] sm:$0xff]  ;;  %s12597_s20 = sld [smem:[#allocation15_spill]] }
  0x25   : > { %7882 = vmatpush3.msra.mxu1 %v766_v9  ;;  %7849 = vmatpush3.msra.mxu0 %v733_v8  ;;  %v764_v16 = vld [vmem:[%s12578_s5 + $0x160] sm:$0xff]  ;;  %v779_v18 = vld [vmem:[%s12578_s5 + $0x1d8] sm:$0xff]  ;;  %v730_v21 = vld [vmem:[%s12578_s5 + $0x50] sm:$0xff]  ;;  %s12599_s19 = sld [smem:[#allocation14_spill]] }
  0x26   : > { %7883 = vmatprep.subr.mxu1 %v781_v10  ;;  %7850 = vmatprep.subr.mxu0 %v748_v11  ;;  %v763_v20 = vld [vmem:[%s12578_s5 + $0x158] sm:$0xff]  ;;  %v778_v22 = vld [vmem:[%s12578_s5 + $0x1d0] sm:$0xff]  ;;  %v745_v23 = vld [vmem:[%s12578_s5 + $0xc8] sm:$0xff]  ;;  %s12601_s18 = sld [smem:[#allocation3_spill]] }
  0x27   : > { %7884 = vmatpush3.msra.mxu1 %v765_v12  ;;  %7851 = vmatpush3.msra.mxu0 %v732_v13  ;;  %v762_v24 = vld [vmem:[%s12578_s5 + $0x150] sm:$0xff]  ;;  %v729_v25 = vld [vmem:[%s12578_s5 + $0x48] sm:$0xff]  ;;  %v744_v27 = vld [vmem:[%s12578_s5 + $0xc0] sm:$0xff] }
  0x28   : > { %7885 = vmatprep.subr.mxu1 %v780_v14  ;;  %7852 = vmatprep.subr.mxu0 %v747_v15  ;;  %v777_v26 = vld [vmem:[%s12578_s5 + $0x1c8] sm:$0xff]  ;;  %v728_v29 = vld [vmem:[%s12578_s5 + $0x40] sm:$0xff]  ;;  %v743_v31 = vld [vmem:[%s12578_s5 + $0xb8] sm:$0xff] }
  0x29   : > { %7886 = vmatpush3.msra.mxu1 %v764_v16  ;;  %7853 = vmatpush3.msra.mxu0 %v731_v17  ;;  %v761_v28 = vld [vmem:[%s12578_s5 + $0x148] sm:$0xff]  ;;  %v776_v30 = vld [vmem:[%s12578_s5 + $0x1c0] sm:$0xff]  ;;  %v727_v33 = vld [vmem:[%s12578_s5 + $0x38] sm:$0xff] }
  0x2a   : > { %7887 = vmatprep.subr.mxu1 %v779_v18  ;;  %7854 = vmatprep.subr.mxu0 %v746_v19  ;;  %v760_v32 = vld [vmem:[%s12578_s5 + $0x140] sm:$0xff]  ;;  %v775_v34 = vld [vmem:[%s12578_s5 + $0x1b8] sm:$0xff]  ;;  %v742_v35 = vld [vmem:[%s12578_s5 + $0xb0] sm:$0xff] }
  0x2b   : > { %7888 = vmatpush3.msra.mxu1 %v763_v20  ;;  %7855 = vmatpush3.msra.mxu0 %v730_v21  ;;  %v759_v36 = vld [vmem:[%s12578_s5 + $0x138] sm:$0xff]  ;;  %v726_v37 = vld [vmem:[%s12578_s5 + $0x30] sm:$0xff]  ;;  %v741_v39 = vld [vmem:[%s12578_s5 + $0xa8] sm:$0xff] }
  0x2c   : > { %7889 = vmatprep.subr.mxu1 %v778_v22  ;;  %7856 = vmatprep.subr.mxu0 %v745_v23  ;;  %v774_v38 = vld [vmem:[%s12578_s5 + $0x1b0] sm:$0xff]  ;;  %v725_v41 = vld [vmem:[%s12578_s5 + $0x28] sm:$0xff]  ;;  %v740_v43 = vld [vmem:[%s12578_s5 + $0xa0] sm:$0xff] }
  0x2d   : > { %7890 = vmatpush3.msra.mxu1 %v762_v24  ;;  %7857 = vmatpush3.msra.mxu0 %v729_v25  ;;  %v758_v40 = vld [vmem:[%s12578_s5 + $0x130] sm:$0xff]  ;;  %v773_v42 = vld [vmem:[%s12578_s5 + $0x1a8] sm:$0xff]  ;;  %v724_v45 = vld [vmem:[%s12578_s5 + $0x20] sm:$0xff] }
  0x2e   : > { %7891 = vmatprep.subr.mxu1 %v777_v26  ;;  %7858 = vmatprep.subr.mxu0 %v744_v27  ;;  %v757_v44 = vld [vmem:[%s12578_s5 + $0x128] sm:$0xff]  ;;  %v772_v46 = vld [vmem:[%s12578_s5 + $0x1a0] sm:$0xff]  ;;  %v739_v47 = vld [vmem:[%s12578_s5 + $0x98] sm:$0xff] }
  0x2f   : > { %7892 = vmatpush3.msra.mxu1 %v761_v28  ;;  %7859 = vmatpush3.msra.mxu0 %v728_v29  ;;  %v756_v48 = vld [vmem:[%s12578_s5 + $0x120] sm:$0xff]  ;;  %v723_v49 = vld [vmem:[%s12578_s5 + $0x18] sm:$0xff]  ;;  %v738_v51 = vld [vmem:[%s12578_s5 + $0x90] sm:$0xff] }
  0x30   : > { %7893 = vmatprep.subr.mxu1 %v776_v30  ;;  %7860 = vmatprep.subr.mxu0 %v743_v31  ;;  %v771_v50 = vld [vmem:[%s12578_s5 + $0x198] sm:$0xff]  ;;  %v711_v53 = vld [vmem:[%s9216_s6] sm:$0xff]  ;;  %v722_v54 = vld [vmem:[%s12578_s5 + $0x10] sm:$0xff] }
  0x31   : > { %7894 = vmatpush3.msra.mxu1 %v760_v32  ;;  %7861 = vmatpush3.msra.mxu0 %v727_v33  ;;  %v755_v52 = vld [vmem:[%s12578_s5 + $0x118] sm:$0xff]  ;;  %v770_v55 = vld [vmem:[%s12578_s5 + $0x190] sm:$0xff]  ;;  %v737_v56 = vld [vmem:[%s12578_s5 + $0x88] sm:$0xff]  ;;  %v1018_v60 = vcombine.high %v711_v53, %v711_v53 }
  0x32   : > { %7895 = vmatprep.subr.mxu1 %v775_v34  ;;  %7862 = vmatprep.subr.mxu0 %v742_v35  ;;  %v754_v57 = vld [vmem:[%s12578_s5 + $0x110] sm:$0xff]  ;;  %v721_v58 = vld [vmem:[%s12578_s5 + $0x8] sm:$0xff]  ;;  %v736_v61 = vld [vmem:[%s12578_s5 + $0x80] sm:$0xff] }
  0x33   : > { %7896 = vmatpush3.msra.mxu1 %v759_v36  ;;  %7863 = vmatpush3.msra.mxu0 %v726_v37  ;;  %v769_v59 = vld [vmem:[%s12578_s5 + $0x188] sm:$0xff]  ;;  %v720_v63 = vld [vmem:[%s12578_s5] sm:$0xff]  ;;  %v815_v2 = vld [vmem:[%s12578_s5 + $0x2f8] sm:$0xff] }
  0x34   : > { %7897 = vmatprep.subr.mxu1 %v774_v38  ;;  %7864 = vmatprep.subr.mxu0 %v741_v39  ;;  %v712_v62 = vld [vmem:[%s9216_s6 + $0x8] sm:$0xff]  ;;  %v768_v1 = vld [vmem:[%s12578_s5 + $0x180] sm:$0xff]  ;;  %v799_v5 = vld [vmem:[%s12578_s5 + $0x278] sm:$0xff] }
  0x35   : > { %7898 = vmatpush3.msra.mxu1 %v758_v40  ;;  %7865 = vmatpush3.msra.mxu0 %v725_v41  ;;  %v753_v0 = vld [vmem:[%s12578_s5 + $0x108] sm:$0xff]  ;;  %v752_v3 = vld [vmem:[%s12578_s5 + $0x100] sm:$0xff]  ;;  %v1019_v4 = vcombine.high %v712_v62, %v712_v62  ;;  %v814_v6 = vld [vmem:[%s12578_s5 + $0x2f0] sm:$0xff] }
  0x36   : > { %7899 = vmatprep.subr.mxu1 %v773_v42  ;;  %7866 = vmatprep.subr.mxu0 %v740_v43  ;;  %v847_v7 = vld [vmem:[%s12578_s5 + $0x3f8] sm:$0xff]  ;;  %v798_v8 = vld [vmem:[%s12578_s5 + $0x270] sm:$0xff]  ;;  %v813_v10 = vld [vmem:[%s12578_s5 + $0x2e8] sm:$0xff] }
  0x37   : > { %7900 = vmatpush3.msra.mxu1 %v757_v44  ;;  %7867 = vmatpush3.msra.mxu0 %v724_v45  ;;  %v831_v9 = vld [vmem:[%s12578_s5 + $0x378] sm:$0xff]  ;;  %v846_v11 = vld [vmem:[%s12578_s5 + $0x3f0] sm:$0xff]  ;;  %v797_v12 = vld [vmem:[%s12578_s5 + $0x268] sm:$0xff] }
  0x38   : > { %7901 = vmatprep.subr.mxu1 %v772_v46  ;;  %7868 = vmatprep.subr.mxu0 %v739_v47  ;;  %v830_v13 = vld [vmem:[%s12578_s5 + $0x370] sm:$0xff]  ;;  %v812_v14 = vld [vmem:[%s12578_s5 + $0x2e0] sm:$0xff]  ;;  %v845_v15 = vld [vmem:[%s12578_s5 + $0x3e8] sm:$0xff] }
  0x39   : > { %7902 = vmatpush3.msra.mxu1 %v756_v48  ;;  %7869 = vmatpush3.msra.mxu0 %v723_v49  ;;  %v796_v16 = vld [vmem:[%s12578_s5 + $0x260] sm:$0xff]  ;;  %v829_v17 = vld [vmem:[%s12578_s5 + $0x368] sm:$0xff]  ;;  %v811_v18 = vld [vmem:[%s12578_s5 + $0x2d8] sm:$0xff] }
  0x3a   : > { %7903 = vmatprep.subr.mxu1 %v771_v50  ;;  %7870 = vmatprep.subr.mxu0 %v738_v51  ;;  %v844_v19 = vld [vmem:[%s12578_s5 + $0x3e0] sm:$0xff]  ;;  %v795_v20 = vld [vmem:[%s12578_s5 + $0x258] sm:$0xff]  ;;  %v810_v22 = vld [vmem:[%s12578_s5 + $0x2d0] sm:$0xff] }
  0x3b   : > { %7904 = vmatpush3.msra.mxu1 %v755_v52  ;;  %7871 = vmatpush3.msra.mxu0 %v722_v54  ;;  %v828_v21 = vld [vmem:[%s12578_s5 + $0x360] sm:$0xff]  ;;  %v843_v23 = vld [vmem:[%s12578_s5 + $0x3d8] sm:$0xff]  ;;  %v794_v24 = vld [vmem:[%s12578_s5 + $0x250] sm:$0xff] }
  0x3c   : > { %7905 = vmatprep.subr.mxu1 %v770_v55  ;;  %7872 = vmatprep.subr.mxu0 %v737_v56  ;;  %v827_v25 = vld [vmem:[%s12578_s5 + $0x358] sm:$0xff]  ;;  %v809_v26 = vld [vmem:[%s12578_s5 + $0x2c8] sm:$0xff]  ;;  %v842_v27 = vld [vmem:[%s12578_s5 + $0x3d0] sm:$0xff] }
  0x3d   : > { %7906 = vmatpush3.msra.mxu1 %v754_v57  ;;  %7873 = vmatpush3.msra.mxu0 %v721_v58  ;;  %v793_v28 = vld [vmem:[%s12578_s5 + $0x248] sm:$0xff]  ;;  %v826_v29 = vld [vmem:[%s12578_s5 + $0x350] sm:$0xff]  ;;  %v808_v30 = vld [vmem:[%s12578_s5 + $0x2c0] sm:$0xff] }
  0x3e   : > { %7907 = vmatprep.subr.mxu1 %v769_v59  ;;  %7874 = vmatprep.subr.mxu0 %v736_v61  ;;  %v841_v31 = vld [vmem:[%s12578_s5 + $0x3c8] sm:$0xff]  ;;  %v792_v32 = vld [vmem:[%s12578_s5 + $0x240] sm:$0xff]  ;;  %v807_v34 = vld [vmem:[%s12578_s5 + $0x2b8] sm:$0xff] }
  0x3f   : > { %1100 = vmatprep.mubr.f32.mxu0 %v1018_v60  ;;  %7875 = vmatpush3.msra.mxu0 %v720_v63  ;;  %v825_v33 = vld [vmem:[%s12578_s5 + $0x348] sm:$0xff]  ;;  %v840_v35 = vld [vmem:[%s12578_s5 + $0x3c0] sm:$0xff]  ;;  %v791_v36 = vld [vmem:[%s12578_s5 + $0x238] sm:$0xff] }
  0x40   : > { %7908 = vmatpush3.msra.mxu1 %v753_v0  ;;  %1101 = vmatmul.mubr.f32.vlgmr.msra.gmra.mxu0 %v711_v53  ;;  %v824_v37 = vld [vmem:[%s12578_s5 + $0x340] sm:$0xff]  ;;  %v806_v38 = vld [vmem:[%s12578_s5 + $0x2b0] sm:$0xff]  ;;  %v839_v39 = vld [vmem:[%s12578_s5 + $0x3b8] sm:$0xff] }
  0x41   : > { %7909 = vmatprep.subr.mxu1 %v768_v1  ;;  %7914 = vmatprep.subr.mxu0 %v815_v2  ;;  %v790_v40 = vld [vmem:[%s12578_s5 + $0x230] sm:$0xff]  ;;  %v823_v41 = vld [vmem:[%s12578_s5 + $0x338] sm:$0xff]  ;;  %v805_v42 = vld [vmem:[%s12578_s5 + $0x2a8] sm:$0xff] }
  0x42   : > { %7910 = vmatpush3.msra.mxu1 %v752_v3  ;;  %1170 = vmatprep.mubr.f32.mxu1 %v1019_v4  ;;  %v838_v43 = vld [vmem:[%s12578_s5 + $0x3b0] sm:$0xff]  ;;  %v789_v44 = vld [vmem:[%s12578_s5 + $0x228] sm:$0xff]  ;;  %v804_v46 = vld [vmem:[%s12578_s5 + $0x2a0] sm:$0xff] }
  0x43   : > { %7915 = vmatpush3.msra.mxu0 %v799_v5  ;;  %1171 = vmatmul.mubr.f32.vlgmr.msra.gmra.mxu1 %v712_v62  ;;  %v822_v45 = vld [vmem:[%s12578_s5 + $0x330] sm:$0xff]  ;;  %v837_v47 = vld [vmem:[%s12578_s5 + $0x3a8] sm:$0xff]  ;;  %v788_v48 = vld [vmem:[%s12578_s5 + $0x220] sm:$0xff] }
  0x44   : > { %7916 = vmatprep.subr.mxu0 %v814_v6  ;;  %7949 = vmatprep.subr.mxu1 %v847_v7  ;;  %v821_v49 = vld [vmem:[%s12578_s5 + $0x328] sm:$0xff]  ;;  %v803_v50 = vld [vmem:[%s12578_s5 + $0x298] sm:$0xff]  ;;  %v836_v51 = vld [vmem:[%s12578_s5 + $0x3a0] sm:$0xff] }
  0x45   : > { %7917 = vmatpush3.msra.mxu0 %v798_v8  ;;  %7950 = vmatpush3.msra.mxu1 %v831_v9  ;;  %v787_v52 = vld [vmem:[%s12578_s5 + $0x218] sm:$0xff]  ;;  %v820_v53 = vld [vmem:[%s12578_s5 + $0x320] sm:$0xff]  ;;  %v802_v54 = vld [vmem:[%s12578_s5 + $0x290] sm:$0xff] }
  0x46   : > { %7918 = vmatprep.subr.mxu0 %v813_v10  ;;  %7951 = vmatprep.subr.mxu1 %v846_v11  ;;  %v835_v55 = vld [vmem:[%s12578_s5 + $0x398] sm:$0xff]  ;;  %v786_v56 = vld [vmem:[%s12578_s5 + $0x210] sm:$0xff]  ;;  %v801_v58 = vld [vmem:[%s12578_s5 + $0x288] sm:$0xff] }
  0x47   : > { %7919 = vmatpush3.msra.mxu0 %v797_v12  ;;  %7952 = vmatpush3.msra.mxu1 %v830_v13  ;;  %v819_v57 = vld [vmem:[%s12578_s5 + $0x318] sm:$0xff]  ;;  %v713_v59 = vld [vmem:[%s9216_s6 + $0x10] sm:$0xff]  ;;  %v785_v61 = vld [vmem:[%s12578_s5 + $0x208] sm:$0xff] }
  0x48   : > { %7920 = vmatprep.subr.mxu0 %v812_v14  ;;  %7953 = vmatprep.subr.mxu1 %v845_v15  ;;  %v834_v60 = vld [vmem:[%s12578_s5 + $0x390] sm:$0xff]  ;;  %v800_v63 = vld [vmem:[%s12578_s5 + $0x280] sm:$0xff]  ;;  %v833_v0 = vld [vmem:[%s12578_s5 + $0x388] sm:$0xff]  ;;  %v1020_v2 = vcombine.high %v713_v59, %v713_v59 }
  0x49   : > { %7921 = vmatpush3.msra.mxu0 %v796_v16  ;;  %7954 = vmatpush3.msra.mxu1 %v829_v17  ;;  %v818_v62 = vld [vmem:[%s12578_s5 + $0x310] sm:$0xff]  ;;  %v784_v1 = vld [vmem:[%s12578_s5 + $0x200] sm:$0xff]  ;;  %v714_v3 = vld [vmem:[%s9216_s6 + $0x18] sm:$0xff] }
  0x4a   : > { %7922 = vmatprep.subr.mxu0 %v811_v18  ;;  %7955 = vmatprep.subr.mxu1 %v844_v19  ;;  %v817_v4 = vld [vmem:[%s12578_s5 + $0x308] sm:$0xff]  ;;  %v832_v5 = vld [vmem:[%s12578_s5 + $0x380] sm:$0xff]  ;;  %v879_v6 = vld [vmem:[%s12578_s5 + $0x4f8] sm:$0xff]  ;;  %v1021_v8 = vcombine.high %v714_v3, %v714_v3 }
  0x4b   : > { %7923 = vmatpush3.msra.mxu0 %v795_v20  ;;  %7956 = vmatpush3.msra.mxu1 %v828_v21  ;;  %v816_v7 = vld [vmem:[%s12578_s5 + $0x300] sm:$0xff]  ;;  %v863_v9 = vld [vmem:[%s12578_s5 + $0x478] sm:$0xff]  ;;  %v878_v10 = vld [vmem:[%s12578_s5 + $0x4f0] sm:$0xff] }
  0x4c   : > { %7924 = vmatprep.subr.mxu0 %v810_v22  ;;  %7957 = vmatprep.subr.mxu1 %v843_v23  ;;  %v911_v11 = vld [vmem:[%s12578_s5 + $0x5f8] sm:$0xff]  ;;  %v862_v12 = vld [vmem:[%s12578_s5 + $0x470] sm:$0xff]  ;;  %v877_v14 = vld [vmem:[%s12578_s5 + $0x4e8] sm:$0xff] }
  0x4d   : > { %7925 = vmatpush3.msra.mxu0 %v794_v24  ;;  %7958 = vmatpush3.msra.mxu1 %v827_v25  ;;  %v895_v13 = vld [vmem:[%s12578_s5 + $0x578] sm:$0xff]  ;;  %v910_v15 = vld [vmem:[%s12578_s5 + $0x5f0] sm:$0xff]  ;;  %v861_v16 = vld [vmem:[%s12578_s5 + $0x468] sm:$0xff] }
  0x4e   : > { %7926 = vmatprep.subr.mxu0 %v809_v26  ;;  %7959 = vmatprep.subr.mxu1 %v842_v27  ;;  %v894_v17 = vld [vmem:[%s12578_s5 + $0x570] sm:$0xff]  ;;  %v876_v18 = vld [vmem:[%s12578_s5 + $0x4e0] sm:$0xff]  ;;  %v909_v19 = vld [vmem:[%s12578_s5 + $0x5e8] sm:$0xff] }
  0x4f   : > { %7927 = vmatpush3.msra.mxu0 %v793_v28  ;;  %7960 = vmatpush3.msra.mxu1 %v826_v29  ;;  %v860_v20 = vld [vmem:[%s12578_s5 + $0x460] sm:$0xff]  ;;  %v893_v21 = vld [vmem:[%s12578_s5 + $0x568] sm:$0xff]  ;;  %v875_v22 = vld [vmem:[%s12578_s5 + $0x4d8] sm:$0xff] }
  0x50   : > { %7928 = vmatprep.subr.mxu0 %v808_v30  ;;  %7961 = vmatprep.subr.mxu1 %v841_v31  ;;  %v908_v23 = vld [vmem:[%s12578_s5 + $0x5e0] sm:$0xff]  ;;  %v859_v24 = vld [vmem:[%s12578_s5 + $0x458] sm:$0xff]  ;;  %v874_v26 = vld [vmem:[%s12578_s5 + $0x4d0] sm:$0xff] }
  0x51   : > { %7929 = vmatpush3.msra.mxu0 %v792_v32  ;;  %7962 = vmatpush3.msra.mxu1 %v825_v33  ;;  %v892_v25 = vld [vmem:[%s12578_s5 + $0x560] sm:$0xff]  ;;  %v907_v27 = vld [vmem:[%s12578_s5 + $0x5d8] sm:$0xff]  ;;  %v858_v28 = vld [vmem:[%s12578_s5 + $0x450] sm:$0xff] }
  0x52   : > { %7930 = vmatprep.subr.mxu0 %v807_v34  ;;  %7963 = vmatprep.subr.mxu1 %v840_v35  ;;  %v891_v29 = vld [vmem:[%s12578_s5 + $0x558] sm:$0xff]  ;;  %v873_v30 = vld [vmem:[%s12578_s5 + $0x4c8] sm:$0xff]  ;;  %v906_v31 = vld [vmem:[%s12578_s5 + $0x5d0] sm:$0xff] }
  0x53   : > { %7931 = vmatpush3.msra.mxu0 %v791_v36  ;;  %7964 = vmatpush3.msra.mxu1 %v824_v37  ;;  %v857_v32 = vld [vmem:[%s12578_s5 + $0x448] sm:$0xff]  ;;  %v890_v33 = vld [vmem:[%s12578_s5 + $0x550] sm:$0xff]  ;;  %v872_v34 = vld [vmem:[%s12578_s5 + $0x4c0] sm:$0xff] }
  0x54   : > { %7932 = vmatprep.subr.mxu0 %v806_v38  ;;  %7965 = vmatprep.subr.mxu1 %v839_v39  ;;  %v905_v35 = vld [vmem:[%s12578_s5 + $0x5c8] sm:$0xff]  ;;  %v856_v36 = vld [vmem:[%s12578_s5 + $0x440] sm:$0xff]  ;;  %v871_v38 = vld [vmem:[%s12578_s5 + $0x4b8] sm:$0xff] }
  0x55   : > { %7933 = vmatpush3.msra.mxu0 %v790_v40  ;;  %7966 = vmatpush3.msra.mxu1 %v823_v41  ;;  %v889_v37 = vld [vmem:[%s12578_s5 + $0x548] sm:$0xff]  ;;  %v904_v39 = vld [vmem:[%s12578_s5 + $0x5c0] sm:$0xff]  ;;  %v855_v40 = vld [vmem:[%s12578_s5 + $0x438] sm:$0xff] }
  0x56   : > { %7934 = vmatprep.subr.mxu0 %v805_v42  ;;  %7967 = vmatprep.subr.mxu1 %v838_v43  ;;  %v888_v41 = vld [vmem:[%s12578_s5 + $0x540] sm:$0xff]  ;;  %v870_v42 = vld [vmem:[%s12578_s5 + $0x4b0] sm:$0xff]  ;;  %v903_v43 = vld [vmem:[%s12578_s5 + $0x5b8] sm:$0xff] }
  0x57   : > { %7935 = vmatpush3.msra.mxu0 %v789_v44  ;;  %7968 = vmatpush3.msra.mxu1 %v822_v45  ;;  %v854_v44 = vld [vmem:[%s12578_s5 + $0x430] sm:$0xff]  ;;  %v887_v45 = vld [vmem:[%s12578_s5 + $0x538] sm:$0xff] }
  0x58   : > { %7936 = vmatprep.subr.mxu0 %v804_v46  ;;  %7969 = vmatprep.subr.mxu1 %v837_v47  ;;  %v869_v46 = vld [vmem:[%s12578_s5 + $0x4a8] sm:$0xff]  ;;  %v902_v47 = vld [vmem:[%s12578_s5 + $0x5b0] sm:$0xff] }
  0x59   : > { %7937 = vmatpush3.msra.mxu0 %v788_v48  ;;  %7970 = vmatpush3.msra.mxu1 %v821_v49  ;;  %v853_v48 = vld [vmem:[%s12578_s5 + $0x428] sm:$0xff]  ;;  %v886_v49 = vld [vmem:[%s12578_s5 + $0x530] sm:$0xff] }
  0x5a   : > { %7938 = vmatprep.subr.mxu0 %v803_v50  ;;  %7971 = vmatprep.subr.mxu1 %v836_v51  ;;  %v868_v50 = vld [vmem:[%s12578_s5 + $0x4a0] sm:$0xff]  ;;  %v901_v51 = vld [vmem:[%s12578_s5 + $0x5a8] sm:$0xff] }
  0x5b   : > { %7939 = vmatpush3.msra.mxu0 %v787_v52  ;;  %7972 = vmatpush3.msra.mxu1 %v820_v53  ;;  %v852_v52 = vld [vmem:[%s12578_s5 + $0x420] sm:$0xff]  ;;  %v885_v53 = vld [vmem:[%s12578_s5 + $0x528] sm:$0xff] }
  0x5c   : > { %7940 = vmatprep.subr.mxu0 %v802_v54  ;;  %7973 = vmatprep.subr.mxu1 %v835_v55  ;;  %v867_v54 = vld [vmem:[%s12578_s5 + $0x498] sm:$0xff]  ;;  %v900_v55 = vld [vmem:[%s12578_s5 + $0x5a0] sm:$0xff] }
  0x5d   : > { %7941 = vmatpush3.msra.mxu0 %v786_v56  ;;  %7974 = vmatpush3.msra.mxu1 %v819_v57  ;;  %v851_v56 = vld [vmem:[%s12578_s5 + $0x418] sm:$0xff]  ;;  %v884_v57 = vld [vmem:[%s12578_s5 + $0x520] sm:$0xff] }
  0x5e   : > { %7942 = vmatprep.subr.mxu0 %v801_v58  ;;  %7975 = vmatprep.subr.mxu1 %v834_v60  ;;  %v866_v58 = vld [vmem:[%s12578_s5 + $0x490] sm:$0xff] }
  0x5f   : > { %7943 = vmatpush3.msra.mxu0 %v785_v61  ;;  %7976 = vmatpush3.msra.mxu1 %v818_v62  ;;  %v850_v60 = vld [vmem:[%s12578_s5 + $0x410] sm:$0xff]  ;;  %v883_v61 = vld [vmem:[%s12578_s5 + $0x518] sm:$0xff]  ;;  %v865_v62 = vld [vmem:[%s12578_s5 + $0x488] sm:$0xff] }
  0x60   : > { %7944 = vmatprep.subr.mxu0 %v800_v63  ;;  %7977 = vmatprep.subr.mxu1 %v833_v0  ;;  %v715_v63 = vld [vmem:[%s9216_s6 + $0x20] sm:$0xff]  ;;  %v898_v0 = vld [vmem:[%s12578_s5 + $0x590] sm:$0xff] }
  0x61   : > { %7945 = vmatpush3.msra.mxu0 %v784_v1  ;;  %1240 = vmatprep.mubr.f32.mxu0 %v1020_v2  ;;  %v849_v1 = vld [vmem:[%s12578_s5 + $0x408] sm:$0xff]  ;;  %v882_v2 = vld [vmem:[%s12578_s5 + $0x510] sm:$0xff] }
  0x62   : > { %7978 = vmatpush3.msra.mxu1 %v817_v4  ;;  %1241 = vmatmul.mubr.f32.vlgmr.msra.gmra.mxu0 %v713_v59  ;;  %v899_v59 = vld [vmem:[%s12578_s5 + $0x598] sm:$0xff]  ;;  %v897_v4 = vld [vmem:[%s12578_s5 + $0x588] sm:$0xff] }
  0x63   : > { %7979 = vmatprep.subr.mxu1 %v832_v5  ;;  %7984 = vmatprep.subr.mxu0 %v879_v6  ;;  %v848_v5 = vld [vmem:[%s12578_s5 + $0x400] sm:$0xff]  ;;  %v1022_v6 = vcombine.high %v715_v63, %v715_v63 }
  0x64   : > { %7980 = vmatpush3.msra.mxu1 %v816_v7  ;;  %1310 = vmatprep.mubr.f32.mxu1 %v1021_v8  ;;  %v716_v7 = vld [vmem:[%s9216_s6 + $0x28] sm:$0xff] }
  0x65   : > { %7985 = vmatpush3.msra.mxu0 %v863_v9  ;;  %1311 = vmatmul.mubr.f32.vlgmr.msra.gmra.mxu1 %v714_v3  ;;  %v864_v3 = vld [vmem:[%s12578_s5 + $0x480] sm:$0xff]  ;;  %v881_v8 = vld [vmem:[%s12578_s5 + $0x508] sm:$0xff] }
  0x66   : > { %7986 = vmatprep.subr.mxu0 %v878_v10  ;;  %8019 = vmatprep.subr.mxu1 %v911_v11  ;;  %v896_v9 = vld [vmem:[%s12578_s5 + $0x580] sm:$0xff]  ;;  %v943_v10 = vld [vmem:[%s12578_s5 + $0x6f8] sm:$0xff] }
  0x67   : > { %7987 = vmatpush3.msra.mxu0 %v862_v12  ;;  %8020 = vmatpush3.msra.mxu1 %v895_v13  ;;  %v880_v11 = vld [vmem:[%s12578_s5 + $0x500] sm:$0xff]  ;;  %v1023_v12 = vcombine.high %v716_v7, %v716_v7  ;;  %v927_v13 = vld [vmem:[%s12578_s5 + $0x678] sm:$0xff] }
  0x68   : > { %7988 = vmatprep.subr.mxu0 %v877_v14  ;;  %8021 = vmatprep.subr.mxu1 %v910_v15  ;;  %v942_v14 = vld [vmem:[%s12578_s5 + $0x6f0] sm:$0xff]  ;;  %v975_v15 = vld [vmem:[%s12578_s5 + $0x7f8] sm:$0xff] }
  0x69   : > { %7989 = vmatpush3.msra.mxu0 %v861_v16  ;;  %8022 = vmatpush3.msra.mxu1 %v894_v17  ;;  %v926_v16 = vld [vmem:[%s12578_s5 + $0x670] sm:$0xff]  ;;  %v959_v17 = vld [vmem:[%s12578_s5 + $0x778] sm:$0xff] }
  0x6a   : > { %7990 = vmatprep.subr.mxu0 %v876_v18  ;;  %8023 = vmatprep.subr.mxu1 %v909_v19  ;;  %v941_v18 = vld [vmem:[%s12578_s5 + $0x6e8] sm:$0xff]  ;;  %v974_v19 = vld [vmem:[%s12578_s5 + $0x7f0] sm:$0xff] }
  0x6b   : > { %7991 = vmatpush3.msra.mxu0 %v860_v20  ;;  %8024 = vmatpush3.msra.mxu1 %v893_v21  ;;  %v925_v20 = vld [vmem:[%s12578_s5 + $0x668] sm:$0xff]  ;;  %v958_v21 = vld [vmem:[%s12578_s5 + $0x770] sm:$0xff] }
  0x6c   : > { %7992 = vmatprep.subr.mxu0 %v875_v22  ;;  %8025 = vmatprep.subr.mxu1 %v908_v23  ;;  %v940_v22 = vld [vmem:[%s12578_s5 + $0x6e0] sm:$0xff]  ;;  %v973_v23 = vld [vmem:[%s12578_s5 + $0x7e8] sm:$0xff] }
  0x6d   : > { %7993 = vmatpush3.msra.mxu0 %v859_v24  ;;  %8026 = vmatpush3.msra.mxu1 %v892_v25  ;;  %v924_v24 = vld [vmem:[%s12578_s5 + $0x660] sm:$0xff]  ;;  %v957_v25 = vld [vmem:[%s12578_s5 + $0x768] sm:$0xff] }
  0x6e   : > { %7994 = vmatprep.subr.mxu0 %v874_v26  ;;  %8027 = vmatprep.subr.mxu1 %v907_v27  ;;  %v939_v26 = vld [vmem:[%s12578_s5 + $0x6d8] sm:$0xff]  ;;  %v972_v27 = vld [vmem:[%s12578_s5 + $0x7e0] sm:$0xff] }
  0x6f   : > { %7995 = vmatpush3.msra.mxu0 %v858_v28  ;;  %8028 = vmatpush3.msra.mxu1 %v891_v29  ;;  %v923_v28 = vld [vmem:[%s12578_s5 + $0x658] sm:$0xff]  ;;  %v956_v29 = vld [vmem:[%s12578_s5 + $0x760] sm:$0xff] }
  0x70   : > { %7996 = vmatprep.subr.mxu0 %v873_v30  ;;  %8029 = vmatprep.subr.mxu1 %v906_v31  ;;  %v938_v30 = vld [vmem:[%s12578_s5 + $0x6d0] sm:$0xff]  ;;  %v971_v31 = vld [vmem:[%s12578_s5 + $0x7d8] sm:$0xff] }
  0x71   : > { %7997 = vmatpush3.msra.mxu0 %v857_v32  ;;  %8030 = vmatpush3.msra.mxu1 %v890_v33  ;;  %v922_v32 = vld [vmem:[%s12578_s5 + $0x650] sm:$0xff]  ;;  %v955_v33 = vld [vmem:[%s12578_s5 + $0x758] sm:$0xff] }
  0x72   : > { %7998 = vmatprep.subr.mxu0 %v872_v34  ;;  %8031 = vmatprep.subr.mxu1 %v905_v35  ;;  %v937_v34 = vld [vmem:[%s12578_s5 + $0x6c8] sm:$0xff]  ;;  %v970_v35 = vld [vmem:[%s12578_s5 + $0x7d0] sm:$0xff] }
  0x73   : > { %7999 = vmatpush3.msra.mxu0 %v856_v36  ;;  %8032 = vmatpush3.msra.mxu1 %v889_v37  ;;  %v921_v36 = vld [vmem:[%s12578_s5 + $0x648] sm:$0xff]  ;;  %v954_v37 = vld [vmem:[%s12578_s5 + $0x750] sm:$0xff] }
  0x74   : > { %8000 = vmatprep.subr.mxu0 %v871_v38  ;;  %8033 = vmatprep.subr.mxu1 %v904_v39  ;;  %v936_v38 = vld [vmem:[%s12578_s5 + $0x6c0] sm:$0xff]  ;;  %v969_v39 = vld [vmem:[%s12578_s5 + $0x7c8] sm:$0xff] }
  0x75   : > { %8001 = vmatpush3.msra.mxu0 %v855_v40  ;;  %8034 = vmatpush3.msra.mxu1 %v888_v41  ;;  %v920_v40 = vld [vmem:[%s12578_s5 + $0x640] sm:$0xff]  ;;  %v953_v41 = vld [vmem:[%s12578_s5 + $0x748] sm:$0xff] }
  0x76   : > { %8002 = vmatprep.subr.mxu0 %v870_v42  ;;  %8035 = vmatprep.subr.mxu1 %v903_v43  ;;  %v935_v42 = vld [vmem:[%s12578_s5 + $0x6b8] sm:$0xff]  ;;  %v968_v43 = vld [vmem:[%s12578_s5 + $0x7c0] sm:$0xff] }
  0x77   : > { %8003 = vmatpush3.msra.mxu0 %v854_v44  ;;  %8036 = vmatpush3.msra.mxu1 %v887_v45  ;;  %v919_v44 = vld [vmem:[%s12578_s5 + $0x638] sm:$0xff]  ;;  %v952_v45 = vld [vmem:[%s12578_s5 + $0x740] sm:$0xff] }
  0x78   : > { %8004 = vmatprep.subr.mxu0 %v869_v46  ;;  %8037 = vmatprep.subr.mxu1 %v902_v47  ;;  %v934_v46 = vld [vmem:[%s12578_s5 + $0x6b0] sm:$0xff]  ;;  %v967_v47 = vld [vmem:[%s12578_s5 + $0x7b8] sm:$0xff] }
  0x79   : > { %8005 = vmatpush3.msra.mxu0 %v853_v48  ;;  %8038 = vmatpush3.msra.mxu1 %v886_v49  ;;  %v918_v48 = vld [vmem:[%s12578_s5 + $0x630] sm:$0xff]  ;;  %v951_v49 = vld [vmem:[%s12578_s5 + $0x738] sm:$0xff] }
  0x7a   : > { %8006 = vmatprep.subr.mxu0 %v868_v50  ;;  %8039 = vmatprep.subr.mxu1 %v901_v51  ;;  %v933_v50 = vld [vmem:[%s12578_s5 + $0x6a8] sm:$0xff]  ;;  %v966_v51 = vld [vmem:[%s12578_s5 + $0x7b0] sm:$0xff] }
  0x7b   : > { %8007 = vmatpush3.msra.mxu0 %v852_v52  ;;  %8040 = vmatpush3.msra.mxu1 %v885_v53  ;;  %v917_v52 = vld [vmem:[%s12578_s5 + $0x628] sm:$0xff]  ;;  %v950_v53 = vld [vmem:[%s12578_s5 + $0x730] sm:$0xff] }
  0x7c   : > { %8008 = vmatprep.subr.mxu0 %v867_v54  ;;  %8041 = vmatprep.subr.mxu1 %v900_v55  ;;  %v932_v54 = vld [vmem:[%s12578_s5 + $0x6a0] sm:$0xff]  ;;  %v965_v55 = vld [vmem:[%s12578_s5 + $0x7a8] sm:$0xff] }
  0x7d   : > { %8009 = vmatpush3.msra.mxu0 %v851_v56  ;;  %8042 = vmatpush3.msra.mxu1 %v884_v57  ;;  %v916_v56 = vld [vmem:[%s12578_s5 + $0x620] sm:$0xff]  ;;  %v949_v57 = vld [vmem:[%s12578_s5 + $0x728] sm:$0xff] }
  0x7e   : > { %8010 = vmatprep.subr.mxu0 %v866_v58  ;;  %8043 = vmatprep.subr.mxu1 %v899_v59  ;;  %v931_v58 = vld [vmem:[%s12578_s5 + $0x698] sm:$0xff]  ;;  %v964_v59 = vld [vmem:[%s12578_s5 + $0x7a0] sm:$0xff] }
  0x7f   : > { %8011 = vmatpush3.msra.mxu0 %v850_v60  ;;  %8044 = vmatpush3.msra.mxu1 %v883_v61  ;;  %v915_v60 = vld [vmem:[%s12578_s5 + $0x618] sm:$0xff]  ;;  %v948_v61 = vld [vmem:[%s12578_s5 + $0x720] sm:$0xff] }
  0x80   : > { %8012 = vmatprep.subr.mxu0 %v865_v62  ;;  %8045 = vmatprep.subr.mxu1 %v898_v0  ;;  %v930_v62 = vld [vmem:[%s12578_s5 + $0x690] sm:$0xff] }
  0x81   : > { %8013 = vmatpush3.msra.mxu0 %v849_v1  ;;  %8046 = vmatpush3.msra.mxu1 %v882_v2  ;;  %v914_v0 = vld [vmem:[%s12578_s5 + $0x610] sm:$0xff]  ;;  %v947_v1 = vld [vmem:[%s12578_s5 + $0x718] sm:$0xff]  ;;  %v929_v2 = vld [vmem:[%s12578_s5 + $0x688] sm:$0xff] }
  0x82   : > { %8014 = vmatprep.subr.mxu0 %v864_v3  ;;  %8047 = vmatprep.subr.mxu1 %v897_v4  ;;  %v717_v3 = vld [vmem:[%s9216_s6 + $0x30] sm:$0xff] }
  0x83   : > { %8015 = vmatpush3.msra.mxu0 %v848_v5  ;;  %1380 = vmatprep.mubr.f32.mxu0 %v1022_v6  ;;  %v962_v4 = vld [vmem:[%s12578_s5 + $0x790] sm:$0xff]  ;;  %v913_v5 = vld [vmem:[%s12578_s5 + $0x608] sm:$0xff] }
  0x84   : > { %8048 = vmatpush3.msra.mxu1 %v881_v8  ;;  %1381 = vmatmul.mubr.f32.vlgmr.msra.gmra.mxu0 %v715_v63  ;;  %v963_v63 = vld [vmem:[%s12578_s5 + $0x798] sm:$0xff]  ;;  %v946_v6 = vld [vmem:[%s12578_s5 + $0x710] sm:$0xff]  ;;  %v961_v8 = vld [vmem:[%s12578_s5 + $0x788] sm:$0xff] }
  0x85   : > { %8049 = vmatprep.subr.mxu1 %v896_v9  ;;  %8054 = vmatprep.subr.mxu0 %v943_v10  ;;  %v912_v9 = vld [vmem:[%s12578_s5 + $0x600] sm:$0xff]  ;;  %v1024_v10 = vcombine.high %v717_v3, %v717_v3 }
  0x86   : > { %8050 = vmatpush3.msra.mxu1 %v880_v11  ;;  %1450 = vmatprep.mubr.f32.mxu1 %v1023_v12  ;;  %v718_v11 = vld [vmem:[%s9216_s6 + $0x38] sm:$0xff]  ;;  %v945_v12 = vld [vmem:[%s12578_s5 + $0x708] sm:$0xff] }
  0x87   : > { %8055 = vmatpush3.msra.mxu0 %v927_v13  ;;  %1451 = vmatmul.mubr.f32.vlgmr.msra.gmra.mxu1 %v716_v7  ;;  %v928_v7 = vld [vmem:[%s12578_s5 + $0x680] sm:$0xff] }
  0x88   : > { %8056 = vmatprep.subr.mxu0 %v942_v14  ;;  %8089 = vmatprep.subr.mxu1 %v975_v15  ;;  %v960_v13 = vld [vmem:[%s12578_s5 + $0x780] sm:$0xff]  ;;  %v1007_v15 = vld [vmem:[%s12578_s5 + $0x8f8] sm:$0xff] }
  0x89   : > { %8057 = vmatpush3.msra.mxu0 %v926_v16  ;;  %8090 = vmatpush3.msra.mxu1 %v959_v17  ;;  %v9851_v14 = vld [vmem:[%s9216_s6 + $0x40] sm:$0xff]  ;;  %v1025_v17 = vcombine.high %v718_v11, %v718_v11  ;;  %s12541_s6 = smov 64  }
  0x8a   : > { %8058 = vmatprep.subr.mxu0 %v941_v18  ;;  %8091 = vmatprep.subr.mxu1 %v974_v19  ;;  %v944_v16 = vld [vmem:[%s12578_s5 + $0x700] sm:$0xff]  ;;  %v991_v18 = vld [vmem:[%s12578_s5 + $0x878] sm:$0xff]  ;;  %v1006_v19 = vld [vmem:[%s12578_s5 + $0x8f0] sm:$0xff] }
  0x8b   : > { %8059 = vmatpush3.msra.mxu0 %v925_v20  ;;  %8092 = vmatpush3.msra.mxu1 %v958_v21  ;;  %v1026_v20 = vcombine.high %v9851_v14, %v9851_v14  ;;  %v990_v21 = vld [vmem:[%s12578_s5 + $0x870] sm:$0xff] }
  0x8c   : > { %8060 = vmatprep.subr.mxu0 %v940_v22  ;;  %8093 = vmatprep.subr.mxu1 %v973_v23  ;;  %v1005_v22 = vld [vmem:[%s12578_s5 + $0x8e8] sm:$0xff] }
  0x8d   : > { %8061 = vmatpush3.msra.mxu0 %v924_v24  ;;  %8094 = vmatpush3.msra.mxu1 %v957_v25  ;;  %v989_v23 = vld [vmem:[%s12578_s5 + $0x868] sm:$0xff]  ;;  %v1004_v24 = vld [vmem:[%s12578_s5 + $0x8e0] sm:$0xff] }
  0x8e   : > { %8062 = vmatprep.subr.mxu0 %v939_v26  ;;  %8095 = vmatprep.subr.mxu1 %v972_v27  ;;  %v988_v25 = vld [vmem:[%s12578_s5 + $0x860] sm:$0xff]  ;;  %v1003_v26 = vld [vmem:[%s12578_s5 + $0x8d8] sm:$0xff] }
  0x8f   : > { %8063 = vmatpush3.msra.mxu0 %v923_v28  ;;  %8096 = vmatpush3.msra.mxu1 %v956_v29  ;;  %v987_v27 = vld [vmem:[%s12578_s5 + $0x858] sm:$0xff]  ;;  %v1002_v28 = vld [vmem:[%s12578_s5 + $0x8d0] sm:$0xff] }
  0x90   : > { %8064 = vmatprep.subr.mxu0 %v938_v30  ;;  %8097 = vmatprep.subr.mxu1 %v971_v31  ;;  %v986_v29 = vld [vmem:[%s12578_s5 + $0x850] sm:$0xff]  ;;  %v1001_v30 = vld [vmem:[%s12578_s5 + $0x8c8] sm:$0xff] }
  0x91   : > { %8065 = vmatpush3.msra.mxu0 %v922_v32  ;;  %8098 = vmatpush3.msra.mxu1 %v955_v33  ;;  %v985_v31 = vld [vmem:[%s12578_s5 + $0x848] sm:$0xff]  ;;  %v1000_v32 = vld [vmem:[%s12578_s5 + $0x8c0] sm:$0xff] }
  0x92   : > { %8066 = vmatprep.subr.mxu0 %v937_v34  ;;  %8099 = vmatprep.subr.mxu1 %v970_v35  ;;  %v984_v33 = vld [vmem:[%s12578_s5 + $0x840] sm:$0xff]  ;;  %v999_v34 = vld [vmem:[%s12578_s5 + $0x8b8] sm:$0xff] }
  0x93   : > { %8067 = vmatpush3.msra.mxu0 %v921_v36  ;;  %8100 = vmatpush3.msra.mxu1 %v954_v37  ;;  %v983_v35 = vld [vmem:[%s12578_s5 + $0x838] sm:$0xff]  ;;  %v998_v36 = vld [vmem:[%s12578_s5 + $0x8b0] sm:$0xff] }
  0x94   : > { %8068 = vmatprep.subr.mxu0 %v936_v38  ;;  %8101 = vmatprep.subr.mxu1 %v969_v39  ;;  %v982_v37 = vld [vmem:[%s12578_s5 + $0x830] sm:$0xff]  ;;  %v997_v38 = vld [vmem:[%s12578_s5 + $0x8a8] sm:$0xff] }
  0x95   : > { %8069 = vmatpush3.msra.mxu0 %v920_v40  ;;  %8102 = vmatpush3.msra.mxu1 %v953_v41  ;;  %v981_v39 = vld [vmem:[%s12578_s5 + $0x828] sm:$0xff]  ;;  %v996_v40 = vld [vmem:[%s12578_s5 + $0x8a0] sm:$0xff] }
  0x96   : > { %8070 = vmatprep.subr.mxu0 %v935_v42  ;;  %8103 = vmatprep.subr.mxu1 %v968_v43  ;;  %v980_v41 = vld [vmem:[%s12578_s5 + $0x820] sm:$0xff]  ;;  %v995_v42 = vld [vmem:[%s12578_s5 + $0x898] sm:$0xff] }
  0x97   : > { %8071 = vmatpush3.msra.mxu0 %v919_v44  ;;  %8104 = vmatpush3.msra.mxu1 %v952_v45  ;;  %v979_v43 = vld [vmem:[%s12578_s5 + $0x818] sm:$0xff]  ;;  %v994_v44 = vld [vmem:[%s12578_s5 + $0x890] sm:$0xff] }
  0x98   : > { %8072 = vmatprep.subr.mxu0 %v934_v46  ;;  %8105 = vmatprep.subr.mxu1 %v967_v47  ;;  %v978_v45 = vld [vmem:[%s12578_s5 + $0x810] sm:$0xff]  ;;  %v993_v46 = vld [vmem:[%s12578_s5 + $0x888] sm:$0xff] }
  0x99   : > { %8073 = vmatpush3.msra.mxu0 %v918_v48  ;;  %8106 = vmatpush3.msra.mxu1 %v951_v49  ;;  %v977_v47 = vld [vmem:[%s12578_s5 + $0x808] sm:$0xff]  ;;  %v992_v48 = vld [vmem:[%s12578_s5 + $0x880] sm:$0xff] }
  0x9a   : > { %8074 = vmatprep.subr.mxu0 %v933_v50  ;;  %8107 = vmatprep.subr.mxu1 %v966_v51  ;;  %v976_v49 = vld [vmem:[%s12578_s5 + $0x800] sm:$0xff]  ;;  %s12602_s5 = smul.u32 72, %s12601_s18 }
  0x9b   : > { %8075 = vmatpush3.msra.mxu0 %v917_v52  ;;  %8108 = vmatpush3.msra.mxu1 %v950_v53 }
  0x9c   : > { %8076 = vmatprep.subr.mxu0 %v932_v54  ;;  %8109 = vmatprep.subr.mxu1 %v965_v55  ;;  %v1008_v55 = vld [vmem:[%s12582_s26] sm:$0xf]  ;;  %s12549_s26 = smov 112  }
  0x9d   : > { %8077 = vmatpush3.msra.mxu0 %v916_v56  ;;  %8110 = vmatpush3.msra.mxu1 %v949_v57 }
  0x9e   : > { %8078 = vmatprep.subr.mxu0 %v931_v58  ;;  %8111 = vmatprep.subr.mxu1 %v964_v59 }
  0x9f   : > { %8079 = vmatpush3.msra.mxu0 %v915_v60  ;;  %8112 = vmatpush3.msra.mxu1 %v948_v61 }
  0xa0   : > { %8080 = vmatprep.subr.mxu0 %v930_v62  ;;  %8113 = vmatprep.subr.mxu1 %v963_v63 }
  0xa1   : > { %8081 = vmatpush3.msra.mxu0 %v914_v0  ;;  %8114 = vmatpush3.msra.mxu1 %v947_v1 }
  0xa2   : > { %8082 = vmatprep.subr.mxu0 %v929_v2  ;;  %8115 = vmatprep.subr.mxu1 %v962_v4 }
  0xa3   : > { %8083 = vmatpush3.msra.mxu0 %v913_v5  ;;  %8116 = vmatpush3.msra.mxu1 %v946_v6 }
  0xa4   : > { %8084 = vmatprep.subr.mxu0 %v928_v7  ;;  %8117 = vmatprep.subr.mxu1 %v961_v8 }
  0xa5   : > { %8085 = vmatpush3.msra.mxu0 %v912_v9  ;;  %1520 = vmatprep.mubr.f32.mxu0 %v1024_v10 }
  0xa6   : > { %8118 = vmatpush3.msra.mxu1 %v945_v12  ;;  %1521 = vmatmul.mubr.f32.vlgmr.msra.gmra.mxu0 %v717_v3 }
  0xa7   : > { %8119 = vmatprep.subr.mxu1 %v960_v13  ;;  %8124 = vmatprep.subr.mxu0 %v1007_v15 }
  0xa8   : > { %8120 = vmatpush3.msra.mxu1 %v944_v16  ;;  %1590 = vmatprep.mubr.f32.mxu1 %v1025_v17 }
  0xa9   : > { %8125 = vmatpush3.msra.mxu0 %v991_v18  ;;  %1591 = vmatmul.mubr.f32.vlgmr.msra.gmra.mxu1 %v718_v11 }
  0xaa   : > { %8126 = vmatprep.subr.mxu0 %v1006_v19  ;;  %1660 = vmatprep.mubr.f32.mxu0 %v1026_v20 }
  0xab   : > { %8127 = vmatpush3.msra.mxu0 %v990_v21 }
  0xac   : > { %8128 = vmatprep.subr.mxu0 %v1005_v22 }
  0xad   : > { %8129 = vmatpush3.msra.mxu0 %v989_v23 }
  0xae   : > { %8130 = vmatprep.subr.mxu0 %v1004_v24 }
  0xaf   : > { %8131 = vmatpush3.msra.mxu0 %v988_v25 }
  0xb0   : > { %8132 = vmatprep.subr.mxu0 %v1003_v26  ;;  %v1702_v26 = vld [vmem:[%s12583_s7 + $0x18] sm:$0xff] }
  0xb1   : > { %8133 = vmatpush3.msra.mxu0 %v987_v27  ;;  %v8919_v27 = vmov 0.0  }
  0xb2   : > { %8134 = vmatprep.subr.mxu0 %v1002_v28  ;;  %8351 = vmatprep.subr.mxu1 %v8919_v27  ;;  %v1701_v28 = vld [vmem:[%s12583_s7 + $0x10] sm:$0xff] }
  0xb3   : > { %8135 = vmatpush3.msra.mxu0 %v986_v29  ;;  %8359 = vmatprep.mubr.msk.f32.mxu1 %vm8920_vm1, %v8919_v27  ;;  %v1700_v29 = vld [vmem:[%s12583_s7 + $0x8] sm:$0xff] }
  0xb4   : > { %8136 = vmatprep.subr.mxu0 %v1001_v30  ;;  %8352 = vmatpush3.msra.mxu1 %v1702_v26  ;;  %v1699_v30 = vld [vmem:[%s12583_s7] sm:$0xff] }
  0xb5   : > { %8137 = vmatpush3.msra.mxu0 %v985_v31  ;;  %8353 = vmatprep.subr.mxu1 %v8919_v27 }
  0xb6   : > { %8138 = vmatprep.subr.mxu0 %v1000_v32  ;;  %8354 = vmatpush3.msra.mxu1 %v1701_v28 }
  0xb7   : > { %8139 = vmatpush3.msra.mxu0 %v984_v33  ;;  %8355 = vmatprep.subr.mxu1 %v8919_v27 }
  0xb8   : > { %8140 = vmatprep.subr.mxu0 %v999_v34  ;;  %8356 = vmatpush3.msra.mxu1 %v1700_v29 }
  0xb9   : > { %8141 = vmatpush3.msra.mxu0 %v983_v35  ;;  %8357 = vmatprep.subr.mxu1 %v8919_v27 }
  0xba   : > { %8142 = vmatprep.subr.mxu0 %v998_v36  ;;  %8358 = vmatpush3.msra.mxu1 %v1699_v30 }
  0xbb   : > { %8143 = vmatpush3.msra.mxu0 %v982_v37  ;;  %8362 = vmatprep.subr.mxu1 %v8919_v27 }
  0xbc   : > { %8144 = vmatprep.subr.mxu0 %v997_v38 }
  0xbd   : > { %8145 = vmatpush3.msra.mxu0 %v981_v39 }
  0xbe   : > { %8146 = vmatprep.subr.mxu0 %v996_v40  ;;  %v7647_v40 = vld [vmem:[%s12584_s2] ss:$0 sm:$0xff] }
  0xbf   : > { %8147 = vmatpush3.msra.mxu0 %v980_v41 }
  0xc0   : > { %8148 = vmatprep.subr.mxu0 %v995_v42  ;;  %v7648_v42 = vld [vmem:[%s12585_s29] ss:$0 sm:$0xff] }
  0xc1   : > { %8149 = vmatpush3.msra.mxu0 %v979_v43 }
  0xc2   : > { %8150 = vmatprep.subr.mxu0 %v994_v44 }
  0xc3   : > { %8151 = vmatpush3.msra.mxu0 %v978_v45  ;;  %v7649_v45 = vld [vmem:[%s12586_s24] ss:$0 sm:$0xff] }
  0xc4   : > { %8152 = vmatprep.subr.mxu0 %v993_v46 }
  0xc5   : > { %8153 = vmatpush3.msra.mxu0 %v977_v47 }
  0xc6   : > { %8154 = vmatprep.subr.mxu0 %v992_v48 }
  0xc7   : > { %8155 = vmatpush3.msra.mxu0 %v976_v49 }
  0xc8   : > { %1661 = vmatmul.mubr.f32.vlgmr.msra.gmra.mxu0 %v9851_v14  ;;  %8424 = vmatprep.subr.mxu0 %v8919_v27 }
  0xc9   : > { %8456 = vmatprep.mubr.msk.f32.mxu0 %vm8920_vm1, %v8919_v27 }
 0x100   : > { %v7876_v50 = vpop.f32.mrf.mxu0 }
 0x102   : > { %v7877_v51 = vpop.f32.mrf.mxu0 }
 0x103   : > { %v7911_v52 = vpop.f32.mrf.mxu1  ;;  %v7878_v54 = vadd.f32 %v7877_v51, %v7876_v50 }
 0x105   : > { %v7912_v56 = vpop.f32.mrf.mxu1  ;;  %v1103_v59 = vadd.f32 %v7878_v54, %v1008_v55 }
 0x106   : > { %v7913_v60 = vadd.f32 %v7912_v56, %v7911_v52 }
 0x108   : > { %v1173_v0 = vadd.f32 %v7913_v60, %v1103_v59 }
 0x122   : > { %v7946_v53 = vpop.f32.mrf.mxu0 }
 0x124   : > { %v7947_v57 = vpop.f32.mrf.mxu0 }
 0x125   : > { %v7981_v58 = vpop.f32.mrf.mxu1  ;;  %v7948_v62 = vadd.f32 %v7947_v57, %v7946_v53 }
 0x127   : > { %v7982_v63 = vpop.f32.mrf.mxu1  ;;  %v1243_v3 = vadd.f32 %v7948_v62, %v1173_v0 }
 0x128   : > { %v7983_v4 = vadd.f32 %v7982_v63, %v7981_v58 }
 0x12a   : > { %v1313_v8 = vadd.f32 %v7983_v4, %v1243_v3 }
 0x144   : > { %v8016_v61 = vpop.f32.mrf.mxu0 }
 0x146   : > { %v8017_v1 = vpop.f32.mrf.mxu0 }
 0x147   : > { %v8051_v2 = vpop.f32.mrf.mxu1  ;;  %v8018_v6 = vadd.f32 %v8017_v1, %v8016_v61 }
 0x149   : > { %v8052_v7 = vpop.f32.mrf.mxu1  ;;  %v1383_v11 = vadd.f32 %v8018_v6, %v1313_v8 }
 0x14a   : > { %v8053_v12 = vadd.f32 %v8052_v7, %v8051_v2 }
 0x14c   : > { %v1453_v15 = vadd.f32 %v8053_v12, %v1383_v11 }
 0x166   : > { %v8086_v5 = vpop.f32.mrf.mxu0 }
 0x168   : > { %v8087_v9 = vpop.f32.mrf.mxu0 }
 0x169   : > { %v8121_v10 = vpop.f32.mrf.mxu1  ;;  %v8088_v13 = vadd.f32 %v8087_v9, %v8086_v5 }
 0x16b   : > { %v8122_v14 = vpop.f32.mrf.mxu1  ;;  %v1523_v16 = vadd.f32 %v8088_v13, %v1453_v15 }
 0x16c   : > { %v8123_v17 = vadd.f32 %v8122_v14, %v8121_v10 }
 0x16e   : > { %v1593_v20 = vadd.f32 %v8123_v17, %v1523_v16 }
 0x188   : > { %v8156_v18 = vpop.f32.mrf.mxu0 }
 0x18a   : > { %v8157_v19 = vpop.f32.mrf.mxu0 }
 0x18b   : > { %v8158_v21 = vadd.f32 %v8157_v19, %v8156_v18 }
 0x18d   : > { %v9958_v22 = vadd.f32 %v8158_v21, %v1593_v20 }
 0x18f   : > { %v1669_v23 = vsel %vm1668_vm0, %v9958_v22, 0.0  ;;  %v1674_v24 = vmul.f32 %v9958_v22, %v9958_v22 }
 0x190   : > { %1670 = vadd.xlane.f32.xlu0 %v1669_v23 }
 0x191   : > { %v1675_v25 = vsel %vm1668_vm0, %v1674_v24, 0.0 }
 0x194   : > { %1676 = vadd.xlane.f32.xlu0 %v1675_v25 }
 0x219   : > { %v1671_v31 = vpop.xlane.xlu0 %1670 }
 0x21a   : > { %v1673_v32 = vmul.f32 0.03125, %v1671_v31 }
 0x21c   : > { %v1679_v34 = vmul.f32 %v1673_v32, %v1673_v32  ;;  %v1681_v38 = vsub.f32 %v9958_v22, %v1673_v32 }
 0x21d   : > { %v1677_v33 = vpop.xlane.xlu0 %1676 }
 0x21e   : > { %v1678_v35 = vmul.f32 0.03125, %v1677_v33 }
 0x220   : > { %v1680_v36 = vsub.f32 %v1678_v35, %v1679_v34 }
 0x222   : > { %v1682_v37 = vadd.f32 1e-06, %v1680_v36 }
 0x224   : > { %8811 = vrsqrt.f32 %v1682_v37 }
 0x231   : > { %v8812_v39 = vpop.eup %8811 }
 0x232   : > { %v1684_v41 = vmul.f32 %v8812_v39, %v1681_v38 }
 0x234   : > { %v1691_v43 = vmul.f32 %v7647_v40, %v1684_v41 }
 0x236   : > { %v1698_v44 = vadd.f32 %v7648_v42, %v1691_v43 }
 0x238   : > { %8360 = vmatmul.mubr.msk.f32.vlgmr.msra.gmra.mxu1 %vm1710_vm2, %v1698_v44 }
 0x239   : > { %8364 = vmatprep.mubr.msk.f32.mxu1 %vm8920_vm1, %v8919_v27 }
 0x2f8   : > { %v1780_v46 = vpop.f32.mrf.mxu1 }
 0x2f9   : > { %v1781_v47 = vadd.f32 %v7649_v45, %v1780_v46 }
 0x2fa   : > { %v8361_v48 = vpop.f32.mrf.mxu1 }
 0x2fb   : > { %1789 = vrot.lane.b32.xlu0 %v1781_v47, %s12545_s25  ;;  %1785 = vrot.lane.b32.xlu1 %v1781_v47, %s12547_s1  ;;  %v2475_v48 = vld [vmem:[%s12587_s28 + $0x18] sm:$0xff]  ;;  %s12553_s25 = smov 16   ;;  %s12551_s1 = smov 24  }
 0x2ff   : > { %1787 = vrot.lane.b32.xlu1 %v1781_v47, %s12549_s26  ;;  %s12592_s26 = smov 64  }
 0x303   : > { %1791 = vrot.lane.b32.xlu1 %v1781_v47, %s12543_s27 }
 0x36d   : > { %v10004_v49 = vpop.permute.xlu1 %1785  ;;  %v10012_v51 = vpop.permute.xlu0 %1789 }
 0x36e   : > { %1868 = vrot.lane.b32.xlu1 %v10004_v49, %s12543_s27 }
 0x371   : > { %v10008_v50 = vpop.permute.xlu1 %1787 }
 0x372   : > { %1944 = vrot.lane.b32.xlu1 %v10008_v50, %s12543_s27 }
 0x375   : > { %v1792_v52 = vpop.permute.xlu1 %1791 }
 0x376   : > { %2020 = vrot.lane.b32.xlu1 %v10012_v51, %s12543_s27  ;;  %8363 = vmatpush3.xpose.msk.msra.mxu1 %vm1793_vm3, %v1792_v52  ;;  %s12555_s27 = smov 8  }
 0x377   : > { %8367 = vmatprep.subr.mxu1 %v8919_v27 }
 0x379   : > { %8365 = vmatmul.mubr.msk.f32.vlgmr.msra.gmra.mxu1 %vm1793_vm3, %v1781_v47 }
 0x37a   : > { %8369 = vmatprep.mubr.msk.f32.mxu1 %vm8920_vm1, %v8919_v27 }
 0x3e0   : > { %v1869_v53 = vpop.permute.xlu1 %1868 }
 0x3e1   : > { %8368 = vmatpush3.xpose.msk.msra.mxu1 %vm1793_vm3, %v1869_v53 }
 0x3e2   : > { %8372 = vmatprep.subr.mxu1 %v8919_v27 }
 0x3e4   : > { %8370 = vmatmul.mubr.msk.f32.vlgmr.msra.gmra.mxu1 %vm1793_vm3, %v10004_v49  ;;  %v1945_v54 = vpop.permute.xlu1 %1944 }
 0x3e5   : > { %8373 = vmatpush3.xpose.msk.msra.mxu1 %vm1793_vm3, %v1945_v54  ;;  %8374 = vmatprep.mubr.msk.f32.mxu1 %vm8920_vm1, %v8919_v27 }
 0x3e6   : > { %8377 = vmatprep.subr.mxu1 %v8919_v27 }
 0x3e8   : > { %8375 = vmatmul.mubr.msk.f32.vlgmr.msra.gmra.mxu1 %vm1793_vm3, %v10008_v50  ;;  %v2021_v55 = vpop.permute.xlu1 %2020 }
 0x3e9   : > { %8378 = vmatpush3.xpose.msk.msra.mxu1 %vm1793_vm3, %v2021_v55  ;;  %8379 = vmatprep.mubr.msk.f32.mxu1 %vm8920_vm1, %v8919_v27 }
 0x3ea   : > { %8382 = vmatprep.subr.mxu1 %v8919_v27 }
 0x3ec   : > { %8380 = vmatmul.mubr.msk.f32.vlgmr.msra.gmra.mxu1 %vm1793_vm3, %v10012_v51 }
 0x3ed   : > { %8384 = vmatprep.mubr.msk.f32.mxu1 %vm8920_vm1, %v8919_v27 }
 0x439   : > { %v1864_v56 = vpop.f32.mrf.mxu1 }
 0x43a   : > { %v2096_v57 = vmul.f32 0.35355338, %v1864_v56 }
 0x43b   : > { %v8366_v58 = vpop.f32.mrf.mxu1 }
 0x43c   : > { %v2101_v59 = vsel %vm2100_vm4, %v2096_v57, -inf }
 0x43d   : > { %2102 = vmax.xlane.f32.xlu1 %v2101_v59 }
 0x4a4   : > { %v1940_v60 = vpop.f32.mrf.mxu1 }
 0x4a5   : > { %v2097_v61 = vmul.f32 0.35355338, %v1940_v60 }
 0x4a6   : > { %v8371_v62 = vpop.f32.mrf.mxu1 }
 0x4a7   : > { %v2104_v63 = vsel %vm2100_vm4, %v2097_v61, -inf }
 0x4a8   : > { %2105 = vmax.xlane.f32.xlu0 %v2104_v63  ;;  %v2016_v0 = vpop.f32.mrf.mxu1 }
 0x4a9   : > { %v2098_v1 = vmul.f32 0.35355338, %v2016_v0  ;;  %v7667_v0 = vld [vmem:[%s12518_s8] ss:$0 sm:$0xff] }
 0x4aa   : > { %v8376_v2 = vpop.f32.mrf.mxu1 }
 0x4ab   : > { %v2107_v3 = vsel %vm2100_vm4, %v2098_v1, -inf }
 0x4ac   : > { %2108 = vmax.xlane.f32.xlu1 %v2107_v3  ;;  %v2092_v4 = vpop.f32.mrf.mxu1 }
 0x4ad   : > { %v2099_v5 = vmul.f32 0.35355338, %v2092_v4 }
 0x4ae   : > { %v8381_v6 = vpop.f32.mrf.mxu1 }
 0x4af   : > { %v2110_v7 = vsel %vm2100_vm4, %v2099_v5, -inf }
 0x4b0   : > { %2111 = vmax.xlane.f32.xlu0 %v2110_v7 }
 0x4bd   : > { %2145 = vrot.lane.b32.xlu1 %v1781_v47, %s12541_s6 }
 0x4c6   : > { %v2103_v8 = vpop.xlane.xlu1 %2102 }
 0x4c7   : > { %v2113_v9 = vsub.f32 %v2096_v57, %v2103_v8  ;;  %v2591_v8 = vld [vmem:[%s12521_s11 + $0x18] sm:$0xff] }
 0x4c9   : > { %v2117_v10 = vmul.f32 1.442695, %v2113_v9  ;;  %v2590_v9 = vld [vmem:[%s12521_s11 + $0x10] sm:$0xff] }
 0x4cb   : > { %8813 = vpow2.f32 %v2117_v10  ;;  %v2588_v10 = vld [vmem:[%s12521_s11] sm:$0xff] }
 0x4d8   : > { %v8814_v11 = vpop.eup %8813 }
 0x4d9   : > { %v2125_v12 = vsel %vm2100_vm4, %v8814_v11, 0.0 }
 0x4e1   : > { %2126 = vadd.xlane.f32.xlu1 %v2125_v12  ;;  %v2691_v12 = vld [vmem:[%s12523_s13 + $0x70] sm:$0xff] }
 0x531   : > { %v2106_v13 = vpop.xlane.xlu0 %2105 }
 0x532   : > { %v2114_v14 = vsub.f32 %v2097_v61, %v2106_v13  ;;  %v2690_v13 = vld [vmem:[%s12523_s13 + $0x68] sm:$0xff] }
 0x534   : > { %v2119_v15 = vmul.f32 1.442695, %v2114_v14  ;;  %v2689_v14 = vld [vmem:[%s12523_s13 + $0x60] sm:$0xff] }
 0x535   : > { %v2109_v16 = vpop.xlane.xlu1 %2108 }
 0x536   : > { %8815 = vpow2.f32 %v2119_v15  ;;  %v2115_v17 = vsub.f32 %v2098_v1, %v2109_v16 }
 0x538   : > { %v2121_v18 = vmul.f32 1.442695, %v2115_v17 }
 0x539   : > { %v2146_v19 = vpop.permute.xlu1 %2145  ;;  %v2112_v20 = vpop.xlane.xlu0 %2111 }
 0x53a   : > { %8817 = vpow2.f32 %v2121_v18  ;;  %v2116_v21 = vsub.f32 %v2099_v5, %v2112_v20  ;;  %8383 = vmatpush3.msk.msra.mxu1 %vm2151_vm5, %v2146_v19 }
 0x53b   : > { %8387 = vmatprep.subr.mxu1 %v8919_v27 }
 0x53c   : > { %v2123_v23 = vmul.f32 1.442695, %v2116_v21 }
 0x53e   : > { %8819 = vpow2.f32 %v2123_v23 }
 0x543   : > { %v8816_v24 = vpop.eup %8815 }
 0x544   : > { %v2128_v25 = vsel %vm2100_vm4, %v8816_v24, 0.0 }
 0x545   : > { %2129 = vadd.xlane.f32.xlu0 %v2128_v25  ;;  %v7669_v25 = vld [vmem:[%s12519_s9] ss:$0 sm:$0xff] }
 0x547   : > { %v8818_v26 = vpop.eup %8817 }
 0x548   : > { %v2131_v28 = vsel %vm2100_vm4, %v8818_v26, 0.0 }
 0x549   : > { %2132 = vadd.xlane.f32.xlu1 %v2131_v28  ;;  %v7670_v28 = vld [vmem:[%s12520_s10] ss:$0 sm:$0xff] }
 0x54b   : > { %v8820_v29 = vpop.eup %8819 }
 0x54c   : > { %v2134_v30 = vsel %vm2100_vm4, %v8820_v29, 0.0 }
 0x54d   : > { %2135 = vadd.xlane.f32.xlu0 %v2134_v30 }
 0x55a   : > { %2301 = vrot.lane.b32.xlu1 %v10008_v50, %s12541_s6  ;;  %v2473_v50 = vld [vmem:[%s12587_s28 + $0x8] sm:$0xff] }
 0x55e   : > { %2378 = vrot.lane.b32.xlu1 %v10012_v51, %s12541_s6  ;;  %v2472_v51 = vld [vmem:[%s12587_s28] sm:$0xff] }
 0x563   : > { %2224 = vrot.lane.b32.xlu0 %v10004_v49, %s12541_s6  ;;  %v2474_v49 = vld [vmem:[%s12587_s28 + $0x10] sm:$0xff]  ;;  %s12589_s6 = smov 120  }
 0x56a   : > { %v2127_v31 = vpop.xlane.xlu1 %2126 }
 0x56b   : > { %8821 = vrcp.f32 %v2127_v31  ;;  %v2688_v31 = vld [vmem:[%s12523_s13 + $0x58] sm:$0xff] }
 0x578   : > { %v8822_v32 = vpop.eup %8821 }
 0x579   : > { %v2138_v33 = vmul.f32 %v8822_v32, %v8814_v11  ;;  %v2692_v11 = vld [vmem:[%s12523_s13 + $0x78] sm:$0xff]  ;;  %v2687_v32 = vld [vmem:[%s12523_s13 + $0x50] sm:$0xff] }
 0x57a   : > { %8425 = vmatpush3.msra.mxu0 %v2692_v11 }
 0x57b   : > { %8385 = vmatmul.mubr.msk.f32.vlgmr.msra.gmra.mxu1 %vm2147_vm6, %v2138_v33  ;;  %8426 = vmatprep.subr.mxu0 %v8919_v27  ;;  %v2686_v33 = vld [vmem:[%s12523_s13 + $0x48] sm:$0xff] }
 0x57c   : > { %8389 = vmatprep.mubr.msk.f32.mxu1 %vm8920_vm1, %v8919_v27  ;;  %8427 = vmatpush3.msra.mxu0 %v2691_v12 }
 0x57d   : > { %8428 = vmatprep.subr.mxu0 %v8919_v27 }
 0x57e   : > { %8429 = vmatpush3.msra.mxu0 %v2690_v13  ;;  %v7683_v13 = vld [vmem:[%s12586_s24 + $0x1] ss:$0 sm:$0xff] }
 0x57f   : > { %8430 = vmatprep.subr.mxu0 %v8919_v27 }
 0x580   : > { %8431 = vmatpush3.msra.mxu0 %v2689_v14 }
 0x581   : > { %8432 = vmatprep.subr.mxu0 %v8919_v27 }
 0x582   : > { %8433 = vmatpush3.msra.mxu0 %v2688_v31 }
 0x583   : > { %8434 = vmatprep.subr.mxu0 %v8919_v27 }
 0x584   : > { %8435 = vmatpush3.msra.mxu0 %v2687_v32 }
 0x585   : > { %8436 = vmatprep.subr.mxu0 %v8919_v27 }
 0x586   : > { %8437 = vmatpush3.msra.mxu0 %v2686_v33 }
 0x587   : > { %8438 = vmatprep.subr.mxu0 %v8919_v27 }
 0x5ce   : > { %v2130_v34 = vpop.xlane.xlu0 %2129 }
 0x5cf   : > { %8823 = vrcp.f32 %v2130_v34  ;;  %v2685_v34 = vld [vmem:[%s12523_s13 + $0x40] sm:$0xff] }
 0x5d0   : > { %8439 = vmatpush3.msra.mxu0 %v2685_v34 }
 0x5d1   : > { %8440 = vmatprep.subr.mxu0 %v8919_v27 }
 0x5d2   : > { %v2133_v35 = vpop.xlane.xlu1 %2132 }
 0x5d3   : > { %8825 = vrcp.f32 %v2133_v35  ;;  %v2684_v35 = vld [vmem:[%s12523_s13 + $0x38] sm:$0xff] }
 0x5d4   : > { %8441 = vmatpush3.msra.mxu0 %v2684_v35 }
 0x5d5   : > { %8442 = vmatprep.subr.mxu0 %v8919_v27 }
 0x5d6   : > { %v2136_v36 = vpop.xlane.xlu0 %2135  ;;  %v2302_v39 = vpop.permute.xlu1 %2301 }
 0x5d7   : > { %8827 = vrcp.f32 %v2136_v36  ;;  %v2683_v36 = vld [vmem:[%s12523_s13 + $0x30] sm:$0xff] }
 0x5d8   : > { %8443 = vmatpush3.msra.mxu0 %v2683_v36 }
 0x5d9   : > { %8444 = vmatprep.subr.mxu0 %v8919_v27 }
 0x5da   : > { %v2225_v37 = vpop.permute.xlu0 %2224  ;;  %v2379_v43 = vpop.permute.xlu1 %2378 }
 0x5db   : > { %8388 = vmatpush3.msk.msra.mxu1 %vm2151_vm5, %v2225_v37  ;;  %v2682_v37 = vld [vmem:[%s12523_s13 + $0x28] sm:$0xff] }
 0x5dc   : > { %v8824_v38 = vpop.eup %8823  ;;  %8392 = vmatprep.subr.mxu1 %v8919_v27  ;;  %8445 = vmatpush3.msra.mxu0 %v2682_v37 }
 0x5dd   : > { %v2140_v40 = vmul.f32 %v8824_v38, %v8816_v24  ;;  %8446 = vmatprep.subr.mxu0 %v8919_v27  ;;  %v2681_v38 = vld [vmem:[%s12523_s13 + $0x20] sm:$0xff] }
 0x5de   : > { %8447 = vmatpush3.msra.mxu0 %v2681_v38 }
 0x5df   : > { %8390 = vmatmul.mubr.msk.f32.vlgmr.msra.gmra.mxu1 %vm2147_vm6, %v2140_v40  ;;  %8448 = vmatprep.subr.mxu0 %v8919_v27  ;;  %v2679_v40 = vld [vmem:[%s12523_s13 + $0x10] sm:$0xff] }
 0x5e0   : > { %v8826_v41 = vpop.eup %8825  ;;  %8393 = vmatpush3.msk.msra.mxu1 %vm2151_vm5, %v2302_v39  ;;  %8394 = vmatprep.mubr.msk.f32.mxu1 %vm8920_vm1, %v8919_v27  ;;  %v2680_v39 = vld [vmem:[%s12523_s13 + $0x18] sm:$0xff] }
 0x5e1   : > { %8397 = vmatprep.subr.mxu1 %v8919_v27  ;;  %v2142_v42 = vmul.f32 %v8826_v41, %v8818_v26  ;;  %8449 = vmatpush3.msra.mxu0 %v2680_v39  ;;  %v2678_v41 = vld [vmem:[%s12523_s13 + $0x8] sm:$0xff] }
 0x5e2   : > { %8450 = vmatprep.subr.mxu0 %v8919_v27 }
 0x5e3   : > { %8395 = vmatmul.mubr.msk.f32.vlgmr.msra.gmra.mxu1 %vm2147_vm6, %v2142_v42  ;;  %8451 = vmatpush3.msra.mxu0 %v2679_v40  ;;  %v2677_v42 = vld [vmem:[%s12523_s13] sm:$0xff] }
 0x5e4   : > { %v8828_v44 = vpop.eup %8827  ;;  %8398 = vmatpush3.msk.msra.mxu1 %vm2151_vm5, %v2379_v43  ;;  %8399 = vmatprep.mubr.msk.f32.mxu1 %vm8920_vm1, %v8919_v27  ;;  %v7671_v43 = vld [vmem:[%s12522_s12] ss:$0 sm:$0xff] }
 0x5e5   : > { %v2144_v45 = vmul.f32 %v8828_v44, %v8820_v29  ;;  %8402 = vmatprep.subr.mxu1 %v8919_v27  ;;  %8452 = vmatprep.subr.mxu0 %v8919_v27 }
 0x5e6   : > { %8453 = vmatpush3.msra.mxu0 %v2678_v41 }
 0x5e7   : > { %8400 = vmatmul.mubr.msk.f32.vlgmr.msra.gmra.mxu1 %vm2147_vm6, %v2144_v45  ;;  %8454 = vmatprep.subr.mxu0 %v8919_v27 }
 0x5e8   : > { %8410 = vmatprep.mubr.msk.f32.mxu1 %vm8920_vm1, %v8919_v27  ;;  %8403 = vmatpush3.msra.mxu1 %v2475_v48 }
 0x5e9   : > { %8404 = vmatprep.subr.mxu1 %v8919_v27  ;;  %8455 = vmatpush3.msra.mxu0 %v2677_v42 }
 0x5ea   : > { %8405 = vmatpush3.msra.mxu1 %v2474_v49  ;;  %8500 = vmatprep.subr.mxu0 %v8919_v27 }
 0x5eb   : > { %8406 = vmatprep.subr.mxu1 %v8919_v27 }
 0x5ec   : > { %8407 = vmatpush3.msra.mxu1 %v2473_v50 }
 0x5ed   : > { %8408 = vmatprep.subr.mxu1 %v8919_v27 }
 0x5ee   : > { %8409 = vmatpush3.msra.mxu1 %v2472_v51 }
 0x5ef   : > { %8413 = vmatprep.subr.mxu1 %v8919_v27 }
 0x63b   : > { %v2220_v46 = vpop.f32.mrf.mxu1 }
 0x63d   : > { %v8386_v47 = vpop.f32.mrf.mxu1 }
 0x69f   : > { %v2297_v52 = vpop.f32.mrf.mxu1 }
 0x6a0   : > { %2456 = vrot.lane.b32.xlu0 %v2297_v52, %s12555_s27  ;;  %s12588_s27 = smov 112  }
 0x6a1   : > { %v8391_v53 = vpop.f32.mrf.mxu1 }
 0x6a2   : > { %v7673_v53 = vld [vmem:[%s12524_s14] ss:$0 sm:$0xff] }
 0x6a3   : > { %v2374_v54 = vpop.f32.mrf.mxu1 }
 0x6a4   : > { %2460 = vrot.lane.b32.xlu1 %v2374_v54, %s12553_s25 }
 0x6a5   : > { %v8396_v55 = vpop.f32.mrf.mxu1 }
 0x6a7   : > { %v2451_v56 = vpop.f32.mrf.mxu1 }
 0x6a8   : > { %2464 = vrot.lane.b32.xlu0 %v2451_v56, %s12551_s1  ;;  %s12598_s1 = sld [smem:[#allocation12_spill]] }
 0x6a9   : > { %v8401_v57 = vpop.f32.mrf.mxu1 }
 0x712   : > { %v2457_v58 = vpop.permute.xlu0 %2456 }
 0x713   : > { %v2467_v60 = vsel %vm1793_vm3, %v2220_v46, %v2457_v58 }
 0x716   : > { %v2461_v59 = vpop.permute.xlu1 %2460 }
 0x717   : > { %v2469_v61 = vsel %vm2468_vm7, %v2467_v60, %v2461_v59  ;;  %v7681_v60 = vld [vmem:[%s12583_s7 + $0x38] sm:$0xff] }
 0x71a   : > { %v2465_v62 = vpop.permute.xlu0 %2464 }
 0x71b   : > { %v2471_v63 = vsel %vm2470_vm8, %v2469_v61, %v2465_v62  ;;  %v7680_v61 = vld [vmem:[%s12583_s7 + $0x30] sm:$0xff]  ;;  %v7679_v62 = vld [vmem:[%s12583_s7 + $0x28] sm:$0xff] }
 0x71c   : > { %8411 = vmatmul.mubr.msk.f32.vlgmr.msra.gmra.mxu1 %vm1710_vm2, %v2471_v63  ;;  %v7678_v63 = vld [vmem:[%s12583_s7 + $0x20] sm:$0xff] }
 0x71d   : > { %8421 = vmatprep.mubr.msk.f32.mxu1 %vm8920_vm1, %v8919_v27  ;;  %8414 = vmatpush3.msra.mxu1 %v2591_v8 }
 0x71e   : > { %8415 = vmatprep.subr.mxu1 %v8919_v27 }
 0x71f   : > { %8416 = vmatpush3.msra.mxu1 %v2590_v9  ;;  %v7676_v9 = vld [vmem:[%s12584_s2 + $0x1] ss:$0 sm:$0xff] }
 0x720   : > { %8417 = vmatprep.subr.mxu1 %v8919_v27 }
 0x7dc   : > { %v2552_v1 = vpop.f32.mrf.mxu1 }
 0x7dd   : > { %v2553_v2 = vadd.f32 %v7667_v0, %v2552_v1 }
 0x7de   : > { %v8412_v3 = vpop.f32.mrf.mxu1 }
 0x7df   : > { %v10103_v4 = vadd.f32 %v2553_v2, %v9958_v22  ;;  %v2589_v22 = vld [vmem:[%s12521_s11 + $0x8] sm:$0xff] }
 0x7e0   : > { %8418 = vmatpush3.msra.mxu1 %v2589_v22 }
 0x7e1   : > { %v2559_v5 = vsel %vm1668_vm0, %v10103_v4, 0.0  ;;  %v2563_v6 = vmul.f32 %v10103_v4, %v10103_v4  ;;  %8419 = vmatprep.subr.mxu1 %v8919_v27 }
 0x7e2   : > { %2560 = vadd.xlane.f32.xlu1 %v2559_v5  ;;  %8420 = vmatpush3.msra.mxu1 %v2588_v10  ;;  %v7677_v10 = vld [vmem:[%s12585_s29 + $0x1] ss:$0 sm:$0xff] }
 0x7e3   : > { %v2564_v7 = vsel %vm1668_vm0, %v2563_v6, 0.0  ;;  %8459 = vmatprep.subr.mxu1 %v8919_v27 }
 0x7e4   : > { %2565 = vadd.xlane.f32.xlu0 %v2564_v7 }
 0x86b   : > { %v2561_v15 = vpop.xlane.xlu1 %2560 }
 0x86c   : > { %v2562_v16 = vmul.f32 0.03125, %v2561_v15 }
 0x86d   : > { %v2566_v17 = vpop.xlane.xlu0 %2565 }
 0x86e   : > { %v2568_v18 = vmul.f32 %v2562_v16, %v2562_v16  ;;  %v2567_v19 = vmul.f32 0.03125, %v2566_v17  ;;  %v2570_v23 = vsub.f32 %v10103_v4, %v2562_v16 }
 0x870   : > { %v2569_v20 = vsub.f32 %v2567_v19, %v2568_v18 }
 0x872   : > { %v2571_v21 = vadd.f32 1e-06, %v2569_v20 }
 0x874   : > { %8829 = vrsqrt.f32 %v2571_v21 }
 0x881   : > { %v8830_v24 = vpop.eup %8829 }
 0x882   : > { %v2573_v26 = vmul.f32 %v8830_v24, %v2570_v23 }
 0x884   : > { %v2580_v29 = vmul.f32 %v7669_v25, %v2573_v26 }
 0x886   : > { %v2587_v30 = vadd.f32 %v7670_v28, %v2580_v29 }
 0x888   : > { %8422 = vmatmul.mubr.msk.f32.vlgmr.msra.gmra.mxu1 %vm1710_vm2, %v2587_v30 }
 0x889   : > { %8467 = vmatprep.mubr.msk.f32.mxu1 %vm8920_vm1, %v8919_v27  ;;  %8460 = vmatpush3.msra.mxu1 %v7681_v60 }
 0x88a   : > { %8461 = vmatprep.subr.mxu1 %v8919_v27 }
 0x88b   : > { %8462 = vmatpush3.msra.mxu1 %v7680_v61 }
 0x88c   : > { %8463 = vmatprep.subr.mxu1 %v8919_v27 }
 0x88d   : > { %8464 = vmatpush3.msra.mxu1 %v7679_v62 }
 0x88e   : > { %8465 = vmatprep.subr.mxu1 %v8919_v27 }
 0x88f   : > { %8466 = vmatpush3.msra.mxu1 %v7678_v63 }
 0x890   : > { %8470 = vmatprep.subr.mxu1 %v8919_v27 }
 0x948   : > { %v2668_v44 = vpop.f32.mrf.mxu1 }
 0x949   : > { %v2669_v45 = vadd.f32 %v7671_v43, %v2668_v44 }
 0x94a   : > { %v8423_v46 = vpop.f32.mrf.mxu1 }
 0x94b   : > { %v2673_v47 = vmul.f32 0.70710677, %v2669_v45  ;;  %v2672_v49 = vmul.f32 0.5, %v2669_v45 }
 0x94d   : > { %8831 = verf.f32 %v2673_v47 }
 0x95a   : > { %v8832_v48 = vpop.eup %8831 }
 0x95b   : > { %v2675_v50 = vadd.f32 1.0, %v8832_v48 }
 0x95d   : > { %v2676_v51 = vmul.f32 %v2675_v50, %v2672_v49 }
 0x95f   : > { %8457 = vmatmul.mubr.f32.vlgmr.msra.gmra.mxu0 %v2676_v51 }
 0x960   : > { %8502 = vmatprep.mubr.msk.f32.mxu0 %vm8920_vm1, %v8919_v27 }
 0xa1f   : > { %v2759_v52 = vpop.f32.mrf.mxu0 }
 0xa20   : > { %v2763_v54 = vadd.f32 %v2759_v52, %v10103_v4 }
 0xa21   : > { %v8458_v55 = vpop.f32.mrf.mxu0 }
 0xa22   : > { %v10209_v56 = vadd.f32 %v7673_v53, %v2763_v54 }
 0xa24   : > { %v2776_v57 = vsel %vm1668_vm0, %v10209_v56, 0.0  ;;  %v2780_v58 = vmul.f32 %v10209_v56, %v10209_v56 }
 0xa25   : > { %2777 = vadd.xlane.f32.xlu0 %v2776_v57 }
 0xa26   : > { %v2781_v59 = vsel %vm1668_vm0, %v2780_v58, 0.0 }
 0xa27   : > { %2782 = vadd.xlane.f32.xlu1 %v2781_v59 }
 0xaae   : > { %v2778_v0 = vpop.xlane.xlu0 %2777 }
 0xaaf   : > { %v2779_v1 = vmul.f32 0.03125, %v2778_v0 }
 0xab0   : > { %v2783_v2 = vpop.xlane.xlu1 %2782 }
 0xab1   : > { %v2785_v3 = vmul.f32 %v2779_v1, %v2779_v1  ;;  %v2784_v4 = vmul.f32 0.03125, %v2783_v2  ;;  %v2787_v7 = vsub.f32 %v10209_v56, %v2779_v1 }
 0xab3   : > { %v2786_v5 = vsub.f32 %v2784_v4, %v2785_v3 }
 0xab5   : > { %v2788_v6 = vadd.f32 1e-06, %v2786_v5 }
 0xab7   : > { %8833 = vrsqrt.f32 %v2788_v6 }
 0xac4   : > { %v8834_v8 = vpop.eup %8833 }
 0xac5   : > { %v2790_v22 = vmul.f32 %v8834_v8, %v2787_v7 }
 0xac7   : > { %v2797_v11 = vmul.f32 %v7676_v9, %v2790_v22 }
 0xac9   : > { %v2804_v12 = vadd.f32 %v7677_v10, %v2797_v11 }
 0xacb   : > { %8468 = vmatmul.mubr.msk.f32.vlgmr.msra.gmra.mxu1 %vm1710_vm2, %v2804_v12 }
 0xacc   : > { %8472 = vmatprep.mubr.msk.f32.mxu1 %vm8920_vm1, %v8919_v27 }
 0xb8b   : > { %v2887_v14 = vpop.f32.mrf.mxu1 }
 0xb8c   : > { %v2888_v15 = vadd.f32 %v7683_v13, %v2887_v14 }
 0xb8d   : > { %v8469_v16 = vpop.f32.mrf.mxu1 }
 0xb8e   : > { %2894 = vrot.lane.b32.xlu1 %v2888_v15, %s12588_s27  ;;  %2892 = vrot.lane.b32.xlu0 %v2888_v15, %s12589_s6  ;;  %v7704_v16 = vld [vmem:[%s12587_s28 + $0x38] sm:$0xff] }
 0xb92   : > { %2896 = vrot.lane.b32.xlu1 %v2888_v15, %s12590_s0  ;;  %2898 = vrot.lane.b32.xlu0 %v2888_v15, %s12591_s3 }
 0xc00   : > { %v10249_v17 = vpop.permute.xlu1 %2894  ;;  %v10251_v18 = vpop.permute.xlu0 %2892 }
 0xc01   : > { %3050 = vrot.lane.b32.xlu0 %v10249_v17, %s12591_s3  ;;  %2974 = vrot.lane.b32.xlu1 %v10251_v18, %s12591_s3 }
 0xc04   : > { %v10257_v19 = vpop.permute.xlu1 %2896  ;;  %v2899_v20 = vpop.permute.xlu0 %2898 }
 0xc05   : > { %3126 = vrot.lane.b32.xlu1 %v10257_v19, %s12591_s3  ;;  %8471 = vmatpush3.xpose.msk.msra.mxu1 %vm1793_vm3, %v2899_v20 }
 0xc06   : > { %8475 = vmatprep.subr.mxu1 %v8919_v27 }
 0xc08   : > { %8473 = vmatmul.mubr.msk.f32.vlgmr.msra.gmra.mxu1 %vm1793_vm3, %v2888_v15 }
 0xc09   : > { %8477 = vmatprep.mubr.msk.f32.mxu1 %vm8920_vm1, %v8919_v27 }
 0xc73   : > { %v2975_v21 = vpop.permute.xlu1 %2974  ;;  %v3051_v23 = vpop.permute.xlu0 %3050 }
 0xc74   : > { %8476 = vmatpush3.xpose.msk.msra.mxu1 %vm1793_vm3, %v2975_v21 }
 0xc75   : > { %8480 = vmatprep.subr.mxu1 %v8919_v27 }
 0xc77   : > { %8478 = vmatmul.mubr.msk.f32.vlgmr.msra.gmra.mxu1 %vm1793_vm3, %v10251_v18  ;;  %v3127_v24 = vpop.permute.xlu1 %3126 }
 0xc78   : > { %8481 = vmatpush3.xpose.msk.msra.mxu1 %vm1793_vm3, %v3051_v23  ;;  %8482 = vmatprep.mubr.msk.f32.mxu1 %vm8920_vm1, %v8919_v27 }
 0xc79   : > { %8485 = vmatprep.subr.mxu1 %v8919_v27 }
 0xc7b   : > { %8483 = vmatmul.mubr.msk.f32.vlgmr.msra.gmra.mxu1 %vm1793_vm3, %v10249_v17 }
 0xc7c   : > { %8486 = vmatpush3.xpose.msk.msra.mxu1 %vm1793_vm3, %v3127_v24  ;;  %8487 = vmatprep.mubr.msk.f32.mxu1 %vm8920_vm1, %v8919_v27 }
 0xc7d   : > { %8490 = vmatprep.subr.mxu1 %v8919_v27 }
 0xc7f   : > { %8488 = vmatmul.mubr.msk.f32.vlgmr.msra.gmra.mxu1 %vm1793_vm3, %v10257_v19 }
 0xc80   : > { %8492 = vmatprep.mubr.msk.f32.mxu1 %vm8920_vm1, %v8919_v27 }
 0xcc8   : > { %v2970_v25 = vpop.f32.mrf.mxu1 }
 0xcc9   : > { %v3202_v26 = vmul.f32 0.35355338, %v2970_v25 }
 0xcca   : > { %v8474_v28 = vpop.f32.mrf.mxu1 }
 0xccb   : > { %v3206_v29 = vsel %vm2100_vm4, %v3202_v26, -inf }
 0xccc   : > { %3207 = vmax.xlane.f32.xlu0 %v3206_v29 }
 0xd37   : > { %v3046_v30 = vpop.f32.mrf.mxu1 }
 0xd38   : > { %v3203_v31 = vmul.f32 0.35355338, %v3046_v30 }
 0xd39   : > { %v8479_v32 = vpop.f32.mrf.mxu1 }
 0xd3a   : > { %v3209_v33 = vsel %vm2100_vm4, %v3203_v31, -inf }
 0xd3b   : > { %3210 = vmax.xlane.f32.xlu1 %v3209_v33  ;;  %v3122_v34 = vpop.f32.mrf.mxu1 }
 0xd3c   : > { %v3204_v35 = vmul.f32 0.35355338, %v3122_v34  ;;  %v7706_v34 = vld [vmem:[%s12518_s8 + $0x1] ss:$0 sm:$0xff] }
 0xd3d   : > { %v8484_v36 = vpop.f32.mrf.mxu1 }
 0xd3e   : > { %v3212_v37 = vsel %vm2100_vm4, %v3204_v35, -inf }
 0xd3f   : > { %3213 = vmax.xlane.f32.xlu0 %v3212_v37  ;;  %v3198_v38 = vpop.f32.mrf.mxu1 }
 0xd40   : > { %v3205_v39 = vmul.f32 0.35355338, %v3198_v38 }
 0xd41   : > { %v8489_v40 = vpop.f32.mrf.mxu1 }
 0xd42   : > { %v3215_v41 = vsel %vm2100_vm4, %v3205_v39, -inf }
 0xd43   : > { %3216 = vmax.xlane.f32.xlu0 %v3215_v41 }
 0xd4c   : > { %3250 = vrot.lane.b32.xlu1 %v2888_v15, %s12592_s26 }
 0xd55   : > { %v3208_v42 = vpop.xlane.xlu0 %3207 }
 0xd56   : > { %v3218_v43 = vsub.f32 %v3202_v26, %v3208_v42  ;;  %v7715_v42 = vld [vmem:[%s12521_s11 + $0x38] sm:$0xff] }
 0xd58   : > { %v3222_v44 = vmul.f32 1.442695, %v3218_v43  ;;  %v7714_v43 = vld [vmem:[%s12521_s11 + $0x30] sm:$0xff] }
 0xd5a   : > { %8835 = vpow2.f32 %v3222_v44  ;;  %v7712_v44 = vld [vmem:[%s12521_s11 + $0x20] sm:$0xff] }
 0xd67   : > { %v8836_v45 = vpop.eup %8835 }
 0xd68   : > { %v3230_v46 = vsel %vm2100_vm4, %v8836_v45, 0.0 }
 0xd70   : > { %3231 = vadd.xlane.f32.xlu1 %v3230_v46  ;;  %v7733_v46 = vld [vmem:[%s12523_s13 + $0xf0] sm:$0xff] }
 0xdc4   : > { %v3211_v47 = vpop.xlane.xlu1 %3210 }
 0xdc5   : > { %v3219_v48 = vsub.f32 %v3203_v31, %v3211_v47  ;;  %v7732_v47 = vld [vmem:[%s12523_s13 + $0xe8] sm:$0xff] }
 0xdc7   : > { %v3224_v49 = vmul.f32 1.442695, %v3219_v48  ;;  %v7731_v48 = vld [vmem:[%s12523_s13 + $0xe0] sm:$0xff] }
 0xdc8   : > { %v3251_v50 = vpop.permute.xlu1 %3250  ;;  %v3214_v51 = vpop.xlane.xlu0 %3213 }
 0xdc9   : > { %8837 = vpow2.f32 %v3224_v49  ;;  %v3220_v52 = vsub.f32 %v3204_v35, %v3214_v51  ;;  %8491 = vmatpush3.msk.msra.mxu1 %vm2151_vm5, %v3251_v50 }
 0xdca   : > { %8495 = vmatprep.subr.mxu1 %v8919_v27 }
 0xdcb   : > { %v3226_v53 = vmul.f32 1.442695, %v3220_v52 }
 0xdcc   : > { %v3217_v54 = vpop.xlane.xlu0 %3216 }
 0xdcd   : > { %8839 = vpow2.f32 %v3226_v53  ;;  %v3221_v55 = vsub.f32 %v3205_v39, %v3217_v54 }
 0xdcf   : > { %v3228_v57 = vmul.f32 1.442695, %v3221_v55 }
 0xdd1   : > { %8841 = vpow2.f32 %v3228_v57 }
 0xdd6   : > { %v8838_v58 = vpop.eup %8837 }
 0xdd7   : > { %v3233_v59 = vsel %vm2100_vm4, %v8838_v58, 0.0 }
 0xdd8   : > { %3234 = vadd.xlane.f32.xlu0 %v3233_v59  ;;  %v7710_v59 = vld [vmem:[%s12519_s9 + $0x1] ss:$0 sm:$0xff] }
 0xdda   : > { %v8840_v60 = vpop.eup %8839 }
 0xddb   : > { %v3236_v61 = vsel %vm2100_vm4, %v8840_v60, 0.0 }
 0xddc   : > { %3237 = vadd.xlane.f32.xlu1 %v3236_v61  ;;  %v7711_v61 = vld [vmem:[%s12520_s10 + $0x1] ss:$0 sm:$0xff] }
 0xdde   : > { %v8842_v62 = vpop.eup %8841 }
 0xddf   : > { %v3239_v63 = vsel %vm2100_vm4, %v8842_v62, 0.0 }
 0xde0   : > { %3240 = vadd.xlane.f32.xlu0 %v3239_v63 }
 0xded   : > { %3404 = vrot.lane.b32.xlu1 %v10249_v17, %s12592_s26  ;;  %v7703_v17 = vld [vmem:[%s12587_s28 + $0x30] sm:$0xff] }
 0xdf1   : > { %3481 = vrot.lane.b32.xlu1 %v10257_v19, %s12592_s26  ;;  %v7701_v19 = vld [vmem:[%s12587_s28 + $0x20] sm:$0xff] }
 0xdf6   : > { %3327 = vrot.lane.b32.xlu0 %v10251_v18, %s12592_s26  ;;  %v7702_v18 = vld [vmem:[%s12587_s28 + $0x28] sm:$0xff] }
 0xdf9   : > { %v3232_v0 = vpop.xlane.xlu1 %3231 }
 0xdfa   : > { %8843 = vrcp.f32 %v3232_v0  ;;  %v7730_v0 = vld [vmem:[%s12523_s13 + $0xd8] sm:$0xff] }
 0xe07   : > { %v8844_v1 = vpop.eup %8843 }
 0xe08   : > { %v3243_v2 = vmul.f32 %v8844_v1, %v8836_v45  ;;  %v7734_v45 = vld [vmem:[%s12523_s13 + $0xf8] sm:$0xff]  ;;  %v7729_v1 = vld [vmem:[%s12523_s13 + $0xd0] sm:$0xff] }
 0xe0a   : > { %8493 = vmatmul.mubr.msk.f32.vlgmr.msra.gmra.mxu1 %vm2147_vm6, %v3243_v2  ;;  %v7728_v2 = vld [vmem:[%s12523_s13 + $0xc8] sm:$0xff] }
 0xe0b   : > { %8497 = vmatprep.mubr.msk.f32.mxu1 %vm8920_vm1, %v8919_v27 }
 0xe61   : > { %v3235_v3 = vpop.xlane.xlu0 %3234 }
 0xe62   : > { %8845 = vrcp.f32 %v3235_v3  ;;  %v7727_v3 = vld [vmem:[%s12523_s13 + $0xc0] sm:$0xff] }
 0xe65   : > { %v3238_v4 = vpop.xlane.xlu1 %3237 }
 0xe66   : > { %8847 = vrcp.f32 %v3238_v4  ;;  %v7726_v4 = vld [vmem:[%s12523_s13 + $0xb8] sm:$0xff] }
 0xe69   : > { %v3405_v5 = vpop.permute.xlu1 %3404  ;;  %v3241_v6 = vpop.xlane.xlu0 %3240 }
 0xe6a   : > { %8849 = vrcp.f32 %v3241_v6  ;;  %8501 = vmatpush3.msk.msra.mxu0 %vm2151_vm5, %v3405_v5  ;;  %v7725_v5 = vld [vmem:[%s12523_s13 + $0xb0] sm:$0xff]  ;;  %v7724_v6 = vld [vmem:[%s12523_s13 + $0xa8] sm:$0xff] }
 0xe6b   : > { %8510 = vmatprep.subr.mxu0 %v8919_v27 }
 0xe6d   : > { %v3328_v7 = vpop.permute.xlu0 %3327  ;;  %v3482_v22 = vpop.permute.xlu1 %3481 }
 0xe6e   : > { %8496 = vmatpush3.msk.msra.mxu1 %vm2151_vm5, %v3328_v7  ;;  %v7723_v7 = vld [vmem:[%s12523_s13 + $0xa0] sm:$0xff] }
 0xe6f   : > { %v8846_v8 = vpop.eup %8845  ;;  %8505 = vmatprep.subr.mxu1 %v8919_v27 }
 0xe70   : > { %v3245_v9 = vmul.f32 %v8846_v8, %v8838_v58  ;;  %v7722_v8 = vld [vmem:[%s12523_s13 + $0x98] sm:$0xff] }
 0xe72   : > { %8498 = vmatmul.mubr.msk.f32.vlgmr.msra.gmra.mxu1 %vm2147_vm6, %v3245_v9  ;;  %v7721_v9 = vld [vmem:[%s12523_s13 + $0x90] sm:$0xff] }
 0xe73   : > { %v8848_v10 = vpop.eup %8847  ;;  %8506 = vmatpush3.msk.msra.mxu1 %vm2151_vm5, %v3482_v22  ;;  %8507 = vmatprep.mubr.msk.f32.mxu1 %vm8920_vm1, %v8919_v27  ;;  %v7720_v22 = vld [vmem:[%s12523_s13 + $0x88] sm:$0xff] }
 0xe74   : > { %v3247_v11 = vmul.f32 %v8848_v10, %v8840_v60  ;;  %8521 = vmatprep.subr.mxu1 %v8919_v27  ;;  %v7719_v10 = vld [vmem:[%s12523_s13 + $0x80] sm:$0xff] }
 0xe76   : > { %8503 = vmatmul.mubr.msk.f32.vlgmr.msra.gmra.mxu0 %vm2147_vm6, %v3247_v11  ;;  %v7717_v11 = vld [vmem:[%s12522_s12 + $0x1] ss:$0 sm:$0xff] }
 0xe77   : > { %v8850_v12 = vpop.eup %8849  ;;  %8518 = vmatprep.mubr.msk.f32.mxu0 %vm8920_vm1, %v8919_v27  ;;  %8511 = vmatpush3.msra.mxu0 %v7704_v16 }
 0xe78   : > { %v3249_v13 = vmul.f32 %v8850_v12, %v8842_v62  ;;  %8512 = vmatprep.subr.mxu0 %v8919_v27 }
 0xe79   : > { %8513 = vmatpush3.msra.mxu0 %v7703_v17 }
 0xe7a   : > { %8508 = vmatmul.mubr.msk.f32.vlgmr.msra.gmra.mxu1 %vm2147_vm6, %v3249_v13  ;;  %8514 = vmatprep.subr.mxu0 %v8919_v27 }
 0xe7b   : > { %8529 = vmatprep.mubr.msk.f32.mxu1 %vm8920_vm1, %v8919_v27  ;;  %8515 = vmatpush3.msra.mxu0 %v7702_v18 }
 0xe7c   : > { %8516 = vmatprep.subr.mxu0 %v8919_v27  ;;  %8522 = vmatpush3.msra.mxu1 %v7715_v42 }
 0xe7d   : > { %8517 = vmatpush3.msra.mxu0 %v7701_v19  ;;  %8523 = vmatprep.subr.mxu1 %v8919_v27 }
 0xe7e   : > { %8532 = vmatprep.subr.mxu0 %v8919_v27  ;;  %8524 = vmatpush3.msra.mxu1 %v7714_v43 }
 0xe7f   : > { %8525 = vmatprep.subr.mxu1 %v8919_v27 }
 0xeca   : > { %v3323_v14 = vpop.f32.mrf.mxu1 }
 0xecc   : > { %v8494_v15 = vpop.f32.mrf.mxu1 }
 0xf32   : > { %v3400_v20 = vpop.f32.mrf.mxu1 }
 0xf33   : > { %3559 = vrot.lane.b32.xlu0 %v3400_v20, %s12593_s4 }
 0xf34   : > { %v8499_v21 = vpop.f32.mrf.mxu1 }
 0xf35   : > { %v7736_v21 = vld [vmem:[%s12524_s14 + $0x1] ss:$0 sm:$0xff] }
 0xf36   : > { %v3477_v23 = vpop.f32.mrf.mxu0 }
 0xf37   : > { %3563 = vrot.lane.b32.xlu1 %v3477_v23, %s12594_s23 }
 0xf38   : > { %v8504_v24 = vpop.f32.mrf.mxu0 }
 0xf3a   : > { %v3554_v25 = vpop.f32.mrf.mxu1 }
 0xf3b   : > { %3567 = vrot.lane.b32.xlu0 %v3554_v25, %s12595_s30 }
 0xf3c   : > { %v8509_v26 = vpop.f32.mrf.mxu1 }
 0xfa5   : > { %v3560_v28 = vpop.permute.xlu0 %3559 }
 0xfa6   : > { %v3570_v30 = vsel %vm1793_vm3, %v3323_v14, %v3560_v28 }
 0xfa9   : > { %v3564_v29 = vpop.permute.xlu1 %3563 }
 0xfaa   : > { %v3571_v31 = vsel %vm2468_vm7, %v3570_v30, %v3564_v29 }
 0xfad   : > { %v3568_v32 = vpop.permute.xlu0 %3567 }
 0xfae   : > { %v3572_v33 = vsel %vm2470_vm8, %v3571_v31, %v3568_v32 }
 0xfaf   : > { %8519 = vmatmul.mubr.msk.f32.vlgmr.msra.gmra.mxu0 %vm1710_vm2, %v3572_v33 }
 0xfb0   : > { %8564 = vmatprep.mubr.msk.f32.mxu0 %vm8920_vm1, %v8919_v27  ;;  %8533 = vmatpush3.msra.mxu0 %v7734_v45 }
 0xfb1   : > { %8534 = vmatprep.subr.mxu0 %v8919_v27 }
 0xfb2   : > { %8535 = vmatpush3.msra.mxu0 %v7733_v46  ;;  %v3946_v46 = vld [vmem:[%s12583_s7 + $0x18] sm:$0xff] }
 0xfb3   : > { %8536 = vmatprep.subr.mxu0 %v8919_v27 }
 0xfb4   : > { %8537 = vmatpush3.msra.mxu0 %v7732_v47  ;;  %v3945_v47 = vld [vmem:[%s12583_s7 + $0x10] sm:$0xff] }
 0xfb5   : > { %8538 = vmatprep.subr.mxu0 %v8919_v27 }
 0xfb6   : > { %8539 = vmatpush3.msra.mxu0 %v7731_v48  ;;  %v3944_v48 = vld [vmem:[%s12583_s7 + $0x8] sm:$0xff] }
 0xfb7   : > { %8540 = vmatprep.subr.mxu0 %v8919_v27 }
 0xfb8   : > { %8541 = vmatpush3.msra.mxu0 %v7730_v0 }
 0xfb9   : > { %8542 = vmatprep.subr.mxu0 %v8919_v27 }
 0xfba   : > { %8543 = vmatpush3.msra.mxu0 %v7729_v1  ;;  %v7741_v1 = vld [vmem:[%s12586_s24] ss:$0 sm:$0xff] }
 0xfbb   : > { %8544 = vmatprep.subr.mxu0 %v8919_v27 }
 0xfbc   : > { %8545 = vmatpush3.msra.mxu0 %v7728_v2 }
 0xfbd   : > { %8546 = vmatprep.subr.mxu0 %v8919_v27 }
 0xfbe   : > { %8547 = vmatpush3.msra.mxu0 %v7727_v3 }
 0xfbf   : > { %8548 = vmatprep.subr.mxu0 %v8919_v27 }
 0xfc0   : > { %8549 = vmatpush3.msra.mxu0 %v7726_v4 }
 0xfc1   : > { %8550 = vmatprep.subr.mxu0 %v8919_v27 }
 0xfc2   : > { %8551 = vmatpush3.msra.mxu0 %v7725_v5 }
 0xfc3   : > { %8552 = vmatprep.subr.mxu0 %v8919_v27 }
 0xfc4   : > { %8553 = vmatpush3.msra.mxu0 %v7724_v6 }
 0xfc5   : > { %8554 = vmatprep.subr.mxu0 %v8919_v27 }
 0xfc6   : > { %8555 = vmatpush3.msra.mxu0 %v7723_v7 }
 0xfc7   : > { %8556 = vmatprep.subr.mxu0 %v8919_v27 }
 0xfc8   : > { %8557 = vmatpush3.msra.mxu0 %v7722_v8 }
 0xfc9   : > { %8558 = vmatprep.subr.mxu0 %v8919_v27 }
 0xfca   : > { %8559 = vmatpush3.msra.mxu0 %v7721_v9 }
 0xfcb   : > { %8560 = vmatprep.subr.mxu0 %v8919_v27 }
 0xfcc   : > { %8561 = vmatpush3.msra.mxu0 %v7720_v22 }
 0xfcd   : > { %8562 = vmatprep.subr.mxu0 %v8919_v27 }
 0xfce   : > { %8563 = vmatpush3.msra.mxu0 %v7719_v10 }
 0xfcf   : > { %8608 = vmatprep.subr.mxu0 %v8919_v27 }
0x106f   : > { %v3655_v35 = vpop.f32.mrf.mxu0 }
0x1070   : > { %v3656_v36 = vadd.f32 %v7706_v34, %v3655_v35 }
0x1071   : > { %v8520_v37 = vpop.f32.mrf.mxu0 }
0x1072   : > { %v10348_v38 = vadd.f32 %v3656_v36, %v10209_v56  ;;  %v7713_v56 = vld [vmem:[%s12521_s11 + $0x28] sm:$0xff] }
0x1073   : > { %8526 = vmatpush3.msra.mxu1 %v7713_v56 }
0x1074   : > { %v3664_v39 = vsel %vm1668_vm0, %v10348_v38, 0.0  ;;  %v3668_v40 = vmul.f32 %v10348_v38, %v10348_v38  ;;  %8527 = vmatprep.subr.mxu1 %v8919_v27 }
0x1075   : > { %3665 = vadd.xlane.f32.xlu1 %v3664_v39  ;;  %8528 = vmatpush3.msra.mxu1 %v7712_v44 }
0x1076   : > { %v3669_v41 = vsel %vm1668_vm0, %v3668_v40, 0.0  ;;  %8567 = vmatprep.subr.mxu1 %v8919_v27 }
0x1077   : > { %3670 = vadd.xlane.f32.xlu0 %v3669_v41  ;;  %v7738_v41 = vld [vmem:[%s12526_s16] ss:$0 sm:$0xff] }
0x10fe   : > { %v3666_v49 = vpop.xlane.xlu1 %3665 }
0x10ff   : > { %v3667_v50 = vmul.f32 0.03125, %v3666_v49  ;;  %v3943_v49 = vld [vmem:[%s12583_s7] sm:$0xff] }
0x1100   : > { %v3671_v51 = vpop.xlane.xlu0 %3670 }
0x1101   : > { %v3673_v52 = vmul.f32 %v3667_v50, %v3667_v50  ;;  %v3672_v53 = vmul.f32 0.03125, %v3671_v51  ;;  %v3675_v57 = vsub.f32 %v10348_v38, %v3667_v50 }
0x1103   : > { %v3674_v54 = vsub.f32 %v3672_v53, %v3673_v52 }
0x1105   : > { %v3676_v55 = vadd.f32 1e-06, %v3674_v54 }
0x1107   : > { %8851 = vrsqrt.f32 %v3676_v55 }
0x1114   : > { %v8852_v58 = vpop.eup %8851 }
0x1115   : > { %v3678_v60 = vmul.f32 %v8852_v58, %v3675_v57 }
0x1117   : > { %v3685_v62 = vmul.f32 %v7710_v59, %v3678_v60  ;;  %v7739_v60 = vld [vmem:[%s12584_s2] ss:$0 sm:$0xff] }
0x1119   : > { %v3692_v63 = vadd.f32 %v7711_v61, %v3685_v62  ;;  %v7740_v62 = vld [vmem:[%s12585_s29] ss:$0 sm:$0xff] }
0x111b   : > { %8530 = vmatmul.mubr.msk.f32.vlgmr.msra.gmra.mxu1 %vm1710_vm2, %v3692_v63 }
0x111c   : > { %8575 = vmatprep.mubr.msk.f32.mxu1 %vm8920_vm1, %v8919_v27  ;;  %8568 = vmatpush3.msra.mxu1 %v3946_v46 }
0x111d   : > { %8569 = vmatprep.subr.mxu1 %v8919_v27 }
0x111e   : > { %8570 = vmatpush3.msra.mxu1 %v3945_v47 }
0x111f   : > { %8571 = vmatprep.subr.mxu1 %v8919_v27 }
0x1120   : > { %8572 = vmatpush3.msra.mxu1 %v3944_v48 }
0x1121   : > { %8573 = vmatprep.subr.mxu1 %v8919_v27 }
0x1122   : > { %8574 = vmatpush3.msra.mxu1 %v3943_v49 }
0x1123   : > { %8578 = vmatprep.subr.mxu1 %v8919_v27 }
0x11db   : > { %v3775_v12 = vpop.f32.mrf.mxu1 }
0x11dc   : > { %v3776_v13 = vadd.f32 %v7717_v11, %v3775_v12 }
0x11dd   : > { %v8531_v14 = vpop.f32.mrf.mxu1 }
0x11de   : > { %v3780_v15 = vmul.f32 0.70710677, %v3776_v13  ;;  %v3779_v17 = vmul.f32 0.5, %v3776_v13 }
0x11e0   : > { %8853 = verf.f32 %v3780_v15 }
0x11ed   : > { %v8854_v16 = vpop.eup %8853 }
0x11ee   : > { %v3782_v18 = vadd.f32 1.0, %v8854_v16 }
0x11f0   : > { %v3783_v19 = vmul.f32 %v3782_v18, %v3779_v17 }
0x11f2   : > { %8565 = vmatmul.mubr.f32.vlgmr.msra.gmra.mxu0 %v3783_v19 }
0x11f3   : > { %8610 = vmatprep.mubr.msk.f32.mxu0 %vm8920_vm1, %v8919_v27 }
0x12b2   : > { %v3867_v20 = vpop.f32.mrf.mxu0 }
0x12b3   : > { %v3871_v23 = vadd.f32 %v3867_v20, %v10348_v38  ;;  %v7737_v38 = vld [vmem:[%s12525_s15] ss:$0 sm:$0xff] }
0x12b4   : > { %v8566_v24 = vpop.f32.mrf.mxu0 }
0x12b5   : > { %v3880_v25 = vadd.f32 %v7736_v21, %v3871_v23 }
0x12b7   : > { %v3883_v26 = vsel %vm1668_vm0, %v3880_v25, 0.0  ;;  %v3887_v28 = vmul.f32 %v3880_v25, %v3880_v25 }
0x12b8   : > { %3884 = vadd.xlane.f32.xlu0 %v3883_v26 }
0x12b9   : > { %v3888_v29 = vsel %vm1668_vm0, %v3887_v28, 0.0 }
0x12ba   : > { %3889 = vadd.xlane.f32.xlu1 %v3888_v29 }
0x1341   : > { %v3885_v30 = vpop.xlane.xlu0 %3884 }
0x1342   : > { %v3886_v31 = vmul.f32 0.03125, %v3885_v30 }
0x1343   : > { %v3890_v32 = vpop.xlane.xlu1 %3889 }
0x1344   : > { %v3892_v33 = vmul.f32 %v3886_v31, %v3886_v31  ;;  %v3891_v34 = vmul.f32 0.03125, %v3890_v32  ;;  %v3894_v37 = vsub.f32 %v3880_v25, %v3886_v31 }
0x1346   : > { %v3893_v35 = vsub.f32 %v3891_v34, %v3892_v33 }
0x1348   : > { %v3895_v36 = vadd.f32 1e-06, %v3893_v35 }
0x134a   : > { %8855 = vrsqrt.f32 %v3895_v36 }
0x1357   : > { %v8856_v39 = vpop.eup %8855 }
0x1358   : > { %v3897_v40 = vmul.f32 %v8856_v39, %v3894_v37 }
0x135a   : > { %v3904_v42 = vmul.f32 %v7737_v38, %v3897_v40 }
0x135c   : > { %v10462_v43 = vadd.f32 %v7738_v41, %v3904_v42 }
0x135e   : > { %v3914_v56 = vsel %vm1668_vm0, %v10462_v43, 0.0  ;;  %v3918_v44 = vmul.f32 %v10462_v43, %v10462_v43 }
0x135f   : > { %3915 = vadd.xlane.f32.xlu0 %v3914_v56 }
0x1360   : > { %v3919_v45 = vsel %vm1668_vm0, %v3918_v44, 0.0 }
0x1361   : > { %3920 = vadd.xlane.f32.xlu1 %v3919_v45 }
0x13e8   : > { %v3916_v50 = vpop.xlane.xlu0 %3915 }
0x13e9   : > { %v3917_v51 = vmul.f32 0.03125, %v3916_v50 }
0x13ea   : > { %v3921_v52 = vpop.xlane.xlu1 %3920 }
0x13eb   : > { %v3923_v53 = vmul.f32 %v3917_v51, %v3917_v51  ;;  %v3922_v54 = vmul.f32 0.03125, %v3921_v52  ;;  %v3925_v58 = vsub.f32 %v10462_v43, %v3917_v51 }
0x13ed   : > { %v3924_v55 = vsub.f32 %v3922_v54, %v3923_v53 }
0x13ef   : > { %v3926_v57 = vadd.f32 1e-06, %v3924_v55 }
0x13f1   : > { %8857 = vrsqrt.f32 %v3926_v57 }
0x13fe   : > { %v8858_v59 = vpop.eup %8857 }
0x13ff   : > { %v3928_v61 = vmul.f32 %v8858_v59, %v3925_v58 }
0x1401   : > { %v3935_v63 = vmul.f32 %v7739_v60, %v3928_v61 }
0x1403   : > { %v3942_v0 = vadd.f32 %v7740_v62, %v3935_v63 }
0x1405   : > { %8576 = vmatmul.mubr.msk.f32.vlgmr.msra.gmra.mxu1 %vm1710_vm2, %v3942_v0 }
0x1406   : > { %8580 = vmatprep.mubr.msk.f32.mxu1 %vm8920_vm1, %v8919_v27 }
0x14c5   : > { %v4023_v2 = vpop.f32.mrf.mxu1 }
0x14c6   : > { %v4024_v3 = vadd.f32 %v7741_v1, %v4023_v2 }
0x14c7   : > { %v8577_v4 = vpop.f32.mrf.mxu1 }
0x14c8   : > { %4030 = vrot.lane.b32.xlu1 %v4024_v3, %s12588_s27  ;;  %4028 = vrot.lane.b32.xlu0 %v4024_v3, %s12589_s6  ;;  %v4712_v4 = vld [vmem:[%s12587_s28 + $0x18] sm:$0xff] }
0x14cc   : > { %4032 = vrot.lane.b32.xlu1 %v4024_v3, %s12590_s0  ;;  %4034 = vrot.lane.b32.xlu0 %v4024_v3, %s12591_s3 }
0x153a   : > { %v10502_v5 = vpop.permute.xlu1 %4030  ;;  %v10504_v6 = vpop.permute.xlu0 %4028 }
0x153b   : > { %4186 = vrot.lane.b32.xlu0 %v10502_v5, %s12591_s3  ;;  %4110 = vrot.lane.b32.xlu1 %v10504_v6, %s12591_s3 }
0x153e   : > { %v10510_v7 = vpop.permute.xlu1 %4032  ;;  %v4035_v8 = vpop.permute.xlu0 %4034 }
0x153f   : > { %4262 = vrot.lane.b32.xlu1 %v10510_v7, %s12591_s3  ;;  %8579 = vmatpush3.xpose.msk.msra.mxu1 %vm1793_vm3, %v4035_v8 }
0x1540   : > { %8583 = vmatprep.subr.mxu1 %v8919_v27 }
0x1542   : > { %8581 = vmatmul.mubr.msk.f32.vlgmr.msra.gmra.mxu1 %vm1793_vm3, %v4024_v3 }
0x1543   : > { %8585 = vmatprep.mubr.msk.f32.mxu1 %vm8920_vm1, %v8919_v27 }
0x15ad   : > { %v4111_v9 = vpop.permute.xlu1 %4110  ;;  %v4187_v22 = vpop.permute.xlu0 %4186 }
0x15ae   : > { %8584 = vmatpush3.xpose.msk.msra.mxu1 %vm1793_vm3, %v4111_v9 }
0x15af   : > { %8588 = vmatprep.subr.mxu1 %v8919_v27 }
0x15b1   : > { %8586 = vmatmul.mubr.msk.f32.vlgmr.msra.gmra.mxu1 %vm1793_vm3, %v10504_v6  ;;  %v4263_v10 = vpop.permute.xlu1 %4262 }
0x15b2   : > { %8589 = vmatpush3.xpose.msk.msra.mxu1 %vm1793_vm3, %v4187_v22  ;;  %8590 = vmatprep.mubr.msk.f32.mxu1 %vm8920_vm1, %v8919_v27 }
0x15b3   : > { %8593 = vmatprep.subr.mxu1 %v8919_v27 }
0x15b5   : > { %8591 = vmatmul.mubr.msk.f32.vlgmr.msra.gmra.mxu1 %vm1793_vm3, %v10502_v5 }
0x15b6   : > { %8594 = vmatpush3.xpose.msk.msra.mxu1 %vm1793_vm3, %v4263_v10  ;;  %8595 = vmatprep.mubr.msk.f32.mxu1 %vm8920_vm1, %v8919_v27 }
0x15b7   : > { %8598 = vmatprep.subr.mxu1 %v8919_v27 }
0x15b9   : > { %8596 = vmatmul.mubr.msk.f32.vlgmr.msra.gmra.mxu1 %vm1793_vm3, %v10510_v7 }
0x15ba   : > { %8600 = vmatprep.mubr.msk.f32.mxu1 %vm8920_vm1, %v8919_v27 }
0x1602   : > { %v4106_v11 = vpop.f32.mrf.mxu1 }
0x1603   : > { %v4338_v12 = vmul.f32 0.35355338, %v4106_v11 }
0x1604   : > { %v8582_v13 = vpop.f32.mrf.mxu1 }
0x1605   : > { %v4342_v14 = vsel %vm2100_vm4, %v4338_v12, -inf }
0x1606   : > { %4343 = vmax.xlane.f32.xlu0 %v4342_v14 }
0x1671   : > { %v4182_v15 = vpop.f32.mrf.mxu1 }
0x1672   : > { %v4339_v16 = vmul.f32 0.35355338, %v4182_v15 }
0x1673   : > { %v8587_v17 = vpop.f32.mrf.mxu1 }
0x1674   : > { %v4345_v18 = vsel %vm2100_vm4, %v4339_v16, -inf }
0x1675   : > { %4346 = vmax.xlane.f32.xlu1 %v4345_v18  ;;  %v4258_v19 = vpop.f32.mrf.mxu1 }
0x1676   : > { %v4340_v20 = vmul.f32 0.35355338, %v4258_v19  ;;  %v7759_v19 = vld [vmem:[%s12518_s8] ss:$0 sm:$0xff] }
0x1677   : > { %v8592_v21 = vpop.f32.mrf.mxu1 }
0x1678   : > { %v4348_v23 = vsel %vm2100_vm4, %v4340_v20, -inf }
0x1679   : > { %4349 = vmax.xlane.f32.xlu0 %v4348_v23  ;;  %v4334_v24 = vpop.f32.mrf.mxu1 }
0x167a   : > { %v4341_v25 = vmul.f32 0.35355338, %v4334_v24 }
0x167b   : > { %v8597_v26 = vpop.f32.mrf.mxu1 }
0x167c   : > { %v4351_v28 = vsel %vm2100_vm4, %v4341_v25, -inf }
0x167d   : > { %4352 = vmax.xlane.f32.xlu0 %v4351_v28 }
0x1686   : > { %4386 = vrot.lane.b32.xlu1 %v4024_v3, %s12592_s26 }
0x168f   : > { %v4344_v29 = vpop.xlane.xlu0 %4343 }
0x1690   : > { %v4354_v30 = vsub.f32 %v4338_v12, %v4344_v29  ;;  %v4828_v29 = vld [vmem:[%s12521_s11 + $0x18] sm:$0xff] }
0x1692   : > { %v4358_v31 = vmul.f32 1.442695, %v4354_v30  ;;  %v4827_v30 = vld [vmem:[%s12521_s11 + $0x10] sm:$0xff] }
0x1694   : > { %8859 = vpow2.f32 %v4358_v31  ;;  %v4825_v31 = vld [vmem:[%s12521_s11] sm:$0xff] }
0x16a1   : > { %v8860_v32 = vpop.eup %8859 }
0x16a2   : > { %v4366_v33 = vsel %vm2100_vm4, %v8860_v32, 0.0 }
0x16aa   : > { %4367 = vadd.xlane.f32.xlu1 %v4366_v33  ;;  %v4928_v33 = vld [vmem:[%s12523_s13 + $0x70] sm:$0xff] }
0x16fe   : > { %v4347_v34 = vpop.xlane.xlu1 %4346 }
0x16ff   : > { %v4355_v35 = vsub.f32 %v4339_v16, %v4347_v34  ;;  %v4927_v34 = vld [vmem:[%s12523_s13 + $0x68] sm:$0xff] }
0x1701   : > { %v4360_v36 = vmul.f32 1.442695, %v4355_v35  ;;  %v4926_v35 = vld [vmem:[%s12523_s13 + $0x60] sm:$0xff] }
0x1702   : > { %v4387_v37 = vpop.permute.xlu1 %4386  ;;  %v4350_v39 = vpop.xlane.xlu0 %4349 }
0x1703   : > { %8861 = vpow2.f32 %v4360_v36  ;;  %v4356_v38 = vsub.f32 %v4340_v20, %v4350_v39  ;;  %8599 = vmatpush3.msk.msra.mxu1 %vm2151_vm5, %v4387_v37 }
0x1704   : > { %8603 = vmatprep.subr.mxu1 %v8919_v27 }
0x1705   : > { %v4362_v40 = vmul.f32 1.442695, %v4356_v38 }
0x1706   : > { %v4353_v41 = vpop.xlane.xlu0 %4352 }
0x1707   : > { %8863 = vpow2.f32 %v4362_v40  ;;  %v4357_v42 = vsub.f32 %v4341_v25, %v4353_v41 }
0x1709   : > { %v4364_v56 = vmul.f32 1.442695, %v4357_v42 }
0x170b   : > { %8865 = vpow2.f32 %v4364_v56 }
0x1710   : > { %v8862_v44 = vpop.eup %8861 }
0x1711   : > { %v4369_v45 = vsel %vm2100_vm4, %v8862_v44, 0.0 }
0x1712   : > { %4370 = vadd.xlane.f32.xlu0 %v4369_v45  ;;  %v7761_v45 = vld [vmem:[%s12519_s9] ss:$0 sm:$0xff] }
0x1714   : > { %v8864_v46 = vpop.eup %8863 }
0x1715   : > { %v4372_v47 = vsel %vm2100_vm4, %v8864_v46, 0.0 }
0x1716   : > { %4373 = vadd.xlane.f32.xlu1 %v4372_v47  ;;  %v7762_v47 = vld [vmem:[%s12520_s10] ss:$0 sm:$0xff] }
0x1718   : > { %v8866_v48 = vpop.eup %8865 }
0x1719   : > { %v4375_v49 = vsel %vm2100_vm4, %v8866_v48, 0.0 }
0x171a   : > { %4376 = vadd.xlane.f32.xlu0 %v4375_v49 }
0x1727   : > { %4540 = vrot.lane.b32.xlu1 %v10502_v5, %s12592_s26  ;;  %v4711_v5 = vld [vmem:[%s12587_s28 + $0x10] sm:$0xff] }
0x172b   : > { %4617 = vrot.lane.b32.xlu1 %v10510_v7, %s12592_s26  ;;  %v4709_v7 = vld [vmem:[%s12587_s28] sm:$0xff] }
0x1730   : > { %4463 = vrot.lane.b32.xlu0 %v10504_v6, %s12592_s26  ;;  %v4710_v6 = vld [vmem:[%s12587_s28 + $0x8] sm:$0xff] }
0x1733   : > { %v4368_v50 = vpop.xlane.xlu1 %4367 }
0x1734   : > { %8867 = vrcp.f32 %v4368_v50  ;;  %v4925_v50 = vld [vmem:[%s12523_s13 + $0x58] sm:$0xff] }
0x1741   : > { %v8868_v51 = vpop.eup %8867 }
0x1742   : > { %v4379_v52 = vmul.f32 %v8868_v51, %v8860_v32  ;;  %v4929_v32 = vld [vmem:[%s12523_s13 + $0x78] sm:$0xff]  ;;  %v4924_v51 = vld [vmem:[%s12523_s13 + $0x50] sm:$0xff] }
0x1744   : > { %8601 = vmatmul.mubr.msk.f32.vlgmr.msra.gmra.mxu1 %vm2147_vm6, %v4379_v52  ;;  %v4923_v52 = vld [vmem:[%s12523_s13 + $0x48] sm:$0xff] }
0x1745   : > { %8605 = vmatprep.mubr.msk.f32.mxu1 %vm8920_vm1, %v8919_v27 }
0x179b   : > { %v4371_v53 = vpop.xlane.xlu0 %4370 }
0x179c   : > { %8869 = vrcp.f32 %v4371_v53  ;;  %v4922_v53 = vld [vmem:[%s12523_s13 + $0x40] sm:$0xff] }
0x179f   : > { %v4374_v54 = vpop.xlane.xlu1 %4373 }
0x17a0   : > { %8871 = vrcp.f32 %v4374_v54  ;;  %v4921_v54 = vld [vmem:[%s12523_s13 + $0x38] sm:$0xff] }
0x17a3   : > { %v4541_v55 = vpop.permute.xlu1 %4540  ;;  %v4377_v57 = vpop.xlane.xlu0 %4376 }
0x17a4   : > { %8873 = vrcp.f32 %v4377_v57  ;;  %8609 = vmatpush3.msk.msra.mxu0 %vm2151_vm5, %v4541_v55  ;;  %v4920_v55 = vld [vmem:[%s12523_s13 + $0x30] sm:$0xff]  ;;  %v4919_v57 = vld [vmem:[%s12523_s13 + $0x28] sm:$0xff] }
0x17a5   : > { %8618 = vmatprep.subr.mxu0 %v8919_v27 }
0x17a7   : > { %v4464_v58 = vpop.permute.xlu0 %4463  ;;  %v4618_v61 = vpop.permute.xlu1 %4617 }
0x17a8   : > { %8604 = vmatpush3.msk.msra.mxu1 %vm2151_vm5, %v4464_v58  ;;  %v4918_v58 = vld [vmem:[%s12523_s13 + $0x20] sm:$0xff] }
0x17a9   : > { %v8870_v59 = vpop.eup %8869  ;;  %8613 = vmatprep.subr.mxu1 %v8919_v27 }
0x17aa   : > { %v4381_v60 = vmul.f32 %v8870_v59, %v8862_v44  ;;  %v4917_v59 = vld [vmem:[%s12523_s13 + $0x18] sm:$0xff] }
0x17ac   : > { %8606 = vmatmul.mubr.msk.f32.vlgmr.msra.gmra.mxu1 %vm2147_vm6, %v4381_v60  ;;  %v4916_v60 = vld [vmem:[%s12523_s13 + $0x10] sm:$0xff] }
0x17ad   : > { %v8872_v62 = vpop.eup %8871  ;;  %8614 = vmatpush3.msk.msra.mxu1 %vm2151_vm5, %v4618_v61  ;;  %8615 = vmatprep.mubr.msk.f32.mxu1 %vm8920_vm1, %v8919_v27  ;;  %v4915_v61 = vld [vmem:[%s12523_s13 + $0x8] sm:$0xff] }
0x17ae   : > { %v4383_v63 = vmul.f32 %v8872_v62, %v8864_v46  ;;  %8629 = vmatprep.subr.mxu1 %v8919_v27  ;;  %v4914_v62 = vld [vmem:[%s12523_s13] sm:$0xff] }
0x17b0   : > { %8611 = vmatmul.mubr.msk.f32.vlgmr.msra.gmra.mxu0 %vm2147_vm6, %v4383_v63  ;;  %v7763_v63 = vld [vmem:[%s12522_s12] ss:$0 sm:$0xff] }
0x17b1   : > { %v8874_v0 = vpop.eup %8873  ;;  %8626 = vmatprep.mubr.msk.f32.mxu0 %vm8920_vm1, %v8919_v27  ;;  %8619 = vmatpush3.msra.mxu0 %v4712_v4 }
0x17b2   : > { %v4385_v1 = vmul.f32 %v8874_v0, %v8866_v48  ;;  %8620 = vmatprep.subr.mxu0 %v8919_v27 }
0x17b3   : > { %8621 = vmatpush3.msra.mxu0 %v4711_v5 }
0x17b4   : > { %8616 = vmatmul.mubr.msk.f32.vlgmr.msra.gmra.mxu1 %vm2147_vm6, %v4385_v1  ;;  %8622 = vmatprep.subr.mxu0 %v8919_v27 }
0x17b5   : > { %8637 = vmatprep.mubr.msk.f32.mxu1 %vm8920_vm1, %v8919_v27  ;;  %8623 = vmatpush3.msra.mxu0 %v4710_v6 }
0x17b6   : > { %8624 = vmatprep.subr.mxu0 %v8919_v27  ;;  %8630 = vmatpush3.msra.mxu1 %v4828_v29 }
0x17b7   : > { %8625 = vmatpush3.msra.mxu0 %v4709_v7  ;;  %8631 = vmatprep.subr.mxu1 %v8919_v27 }
0x17b8   : > { %8640 = vmatprep.subr.mxu0 %v8919_v27  ;;  %8632 = vmatpush3.msra.mxu1 %v4827_v30  ;;  %v7768_v30 = vld [vmem:[%s12584_s2 + $0x1] ss:$0 sm:$0xff] }
0x17b9   : > { %8633 = vmatprep.subr.mxu1 %v8919_v27 }
0x1804   : > { %v4459_v2 = vpop.f32.mrf.mxu1 }
0x1806   : > { %v8602_v3 = vpop.f32.mrf.mxu1 }
0x186c   : > { %v4536_v8 = vpop.f32.mrf.mxu1 }
0x186d   : > { %4695 = vrot.lane.b32.xlu0 %v4536_v8, %s12593_s4 }
0x186e   : > { %v8607_v9 = vpop.f32.mrf.mxu1 }
0x186f   : > { %v7765_v9 = vld [vmem:[%s12524_s14] ss:$0 sm:$0xff] }
0x1870   : > { %v4613_v22 = vpop.f32.mrf.mxu0 }
0x1871   : > { %4699 = vrot.lane.b32.xlu1 %v4613_v22, %s12594_s23 }
0x1872   : > { %v8612_v10 = vpop.f32.mrf.mxu0 }
0x1874   : > { %v4690_v11 = vpop.f32.mrf.mxu1 }
0x1875   : > { %4703 = vrot.lane.b32.xlu0 %v4690_v11, %s12595_s30 }
0x1876   : > { %v8617_v12 = vpop.f32.mrf.mxu1 }
0x18df   : > { %v4696_v13 = vpop.permute.xlu0 %4695 }
0x18e0   : > { %v4706_v15 = vsel %vm1793_vm3, %v4459_v2, %v4696_v13 }
0x18e3   : > { %v4700_v14 = vpop.permute.xlu1 %4699 }
0x18e4   : > { %v4707_v16 = vsel %vm2468_vm7, %v4706_v15, %v4700_v14  ;;  %v7773_v15 = vld [vmem:[%s12583_s7 + $0x38] sm:$0xff] }
0x18e7   : > { %v4704_v17 = vpop.permute.xlu0 %4703 }
0x18e8   : > { %v4708_v18 = vsel %vm2470_vm8, %v4707_v16, %v4704_v17  ;;  %v7772_v16 = vld [vmem:[%s12583_s7 + $0x30] sm:$0xff]  ;;  %v7771_v17 = vld [vmem:[%s12583_s7 + $0x28] sm:$0xff] }
0x18e9   : > { %8627 = vmatmul.mubr.msk.f32.vlgmr.msra.gmra.mxu0 %vm1710_vm2, %v4708_v18  ;;  %v7770_v18 = vld [vmem:[%s12583_s7 + $0x20] sm:$0xff] }
0x18ea   : > { %8672 = vmatprep.mubr.msk.f32.mxu0 %vm8920_vm1, %v8919_v27  ;;  %8641 = vmatpush3.msra.mxu0 %v4929_v32 }
0x18eb   : > { %8642 = vmatprep.subr.mxu0 %v8919_v27 }
0x18ec   : > { %8643 = vmatpush3.msra.mxu0 %v4928_v33 }
0x18ed   : > { %8644 = vmatprep.subr.mxu0 %v8919_v27 }
0x18ee   : > { %8645 = vmatpush3.msra.mxu0 %v4927_v34  ;;  %v7775_v34 = vld [vmem:[%s12586_s24 + $0x1] ss:$0 sm:$0xff] }
0x18ef   : > { %8646 = vmatprep.subr.mxu0 %v8919_v27 }
0x18f0   : > { %8647 = vmatpush3.msra.mxu0 %v4926_v35 }
0x18f1   : > { %8648 = vmatprep.subr.mxu0 %v8919_v27 }
0x18f2   : > { %8649 = vmatpush3.msra.mxu0 %v4925_v50 }
0x18f3   : > { %8650 = vmatprep.subr.mxu0 %v8919_v27 }
0x18f4   : > { %8651 = vmatpush3.msra.mxu0 %v4924_v51 }
0x18f5   : > { %8652 = vmatprep.subr.mxu0 %v8919_v27 }
0x18f6   : > { %8653 = vmatpush3.msra.mxu0 %v4923_v52 }
0x18f7   : > { %8654 = vmatprep.subr.mxu0 %v8919_v27 }
0x18f8   : > { %8655 = vmatpush3.msra.mxu0 %v4922_v53 }
0x18f9   : > { %8656 = vmatprep.subr.mxu0 %v8919_v27 }
0x18fa   : > { %8657 = vmatpush3.msra.mxu0 %v4921_v54 }
0x18fb   : > { %8658 = vmatprep.subr.mxu0 %v8919_v27 }
0x18fc   : > { %8659 = vmatpush3.msra.mxu0 %v4920_v55 }
0x18fd   : > { %8660 = vmatprep.subr.mxu0 %v8919_v27 }
0x18fe   : > { %8661 = vmatpush3.msra.mxu0 %v4919_v57 }
0x18ff   : > { %8662 = vmatprep.subr.mxu0 %v8919_v27 }
0x1900   : > { %8663 = vmatpush3.msra.mxu0 %v4918_v58 }
0x1901   : > { %8664 = vmatprep.subr.mxu0 %v8919_v27 }
0x1902   : > { %8665 = vmatpush3.msra.mxu0 %v4917_v59 }
0x1903   : > { %8666 = vmatprep.subr.mxu0 %v8919_v27 }
0x1904   : > { %8667 = vmatpush3.msra.mxu0 %v4916_v60 }
0x1905   : > { %8668 = vmatprep.subr.mxu0 %v8919_v27 }
0x1906   : > { %8669 = vmatpush3.msra.mxu0 %v4915_v61 }
0x1907   : > { %8670 = vmatprep.subr.mxu0 %v8919_v27 }
0x1908   : > { %8671 = vmatpush3.msra.mxu0 %v4914_v62 }
0x1909   : > { %8716 = vmatprep.subr.mxu0 %v8919_v27 }
0x19a9   : > { %v4789_v20 = vpop.f32.mrf.mxu0 }
0x19aa   : > { %v4790_v21 = vadd.f32 %v7759_v19, %v4789_v20 }
0x19ab   : > { %v8628_v23 = vpop.f32.mrf.mxu0 }
0x19ac   : > { %v10601_v24 = vadd.f32 %v4790_v21, %v10462_v43  ;;  %v4826_v43 = vld [vmem:[%s12521_s11 + $0x8] sm:$0xff] }
0x19ad   : > { %8634 = vmatpush3.msra.mxu1 %v4826_v43 }
0x19ae   : > { %v4796_v25 = vsel %vm1668_vm0, %v10601_v24, 0.0  ;;  %v4800_v26 = vmul.f32 %v10601_v24, %v10601_v24  ;;  %8635 = vmatprep.subr.mxu1 %v8919_v27 }
0x19af   : > { %4797 = vadd.xlane.f32.xlu1 %v4796_v25  ;;  %8636 = vmatpush3.msra.mxu1 %v4825_v31  ;;  %v7769_v31 = vld [vmem:[%s12585_s29 + $0x1] ss:$0 sm:$0xff] }
0x19b0   : > { %v4801_v28 = vsel %vm1668_vm0, %v4800_v26, 0.0  ;;  %8675 = vmatprep.subr.mxu1 %v8919_v27 }
0x19b1   : > { %4802 = vadd.xlane.f32.xlu0 %v4801_v28 }
0x1a38   : > { %v4798_v36 = vpop.xlane.xlu1 %4797 }
0x1a39   : > { %v4799_v37 = vmul.f32 0.03125, %v4798_v36 }
0x1a3a   : > { %v4803_v39 = vpop.xlane.xlu0 %4802 }
0x1a3b   : > { %v4805_v38 = vmul.f32 %v4799_v37, %v4799_v37  ;;  %v4804_v40 = vmul.f32 0.03125, %v4803_v39  ;;  %v4807_v56 = vsub.f32 %v10601_v24, %v4799_v37 }
0x1a3d   : > { %v4806_v41 = vsub.f32 %v4804_v40, %v4805_v38 }
0x1a3f   : > { %v4808_v42 = vadd.f32 1e-06, %v4806_v41 }
0x1a41   : > { %8875 = vrsqrt.f32 %v4808_v42 }
0x1a4e   : > { %v8876_v44 = vpop.eup %8875 }
0x1a4f   : > { %v4810_v46 = vmul.f32 %v8876_v44, %v4807_v56 }
0x1a51   : > { %v4817_v48 = vmul.f32 %v7761_v45, %v4810_v46 }
0x1a53   : > { %v4824_v49 = vadd.f32 %v7762_v47, %v4817_v48 }
0x1a55   : > { %8638 = vmatmul.mubr.msk.f32.vlgmr.msra.gmra.mxu1 %vm1710_vm2, %v4824_v49 }
0x1a56   : > { %8683 = vmatprep.mubr.msk.f32.mxu1 %vm8920_vm1, %v8919_v27  ;;  %8676 = vmatpush3.msra.mxu1 %v7773_v15 }
0x1a57   : > { %8677 = vmatprep.subr.mxu1 %v8919_v27 }
0x1a58   : > { %8678 = vmatpush3.msra.mxu1 %v7772_v16 }
0x1a59   : > { %8679 = vmatprep.subr.mxu1 %v8919_v27 }
0x1a5a   : > { %8680 = vmatpush3.msra.mxu1 %v7771_v17 }
0x1a5b   : > { %8681 = vmatprep.subr.mxu1 %v8919_v27 }
0x1a5c   : > { %8682 = vmatpush3.msra.mxu1 %v7770_v18 }
0x1a5d   : > { %8686 = vmatprep.subr.mxu1 %v8919_v27 }
0x1b15   : > { %v4905_v0 = vpop.f32.mrf.mxu1 }
0x1b16   : > { %v4906_v1 = vadd.f32 %v7763_v63, %v4905_v0 }
0x1b17   : > { %v8639_v2 = vpop.f32.mrf.mxu1 }
0x1b18   : > { %v4910_v3 = vmul.f32 0.70710677, %v4906_v1  ;;  %v4909_v5 = vmul.f32 0.5, %v4906_v1 }
0x1b1a   : > { %8877 = verf.f32 %v4910_v3 }
0x1b27   : > { %v8878_v4 = vpop.eup %8877 }
0x1b28   : > { %v4912_v6 = vadd.f32 1.0, %v8878_v4 }
0x1b2a   : > { %v4913_v7 = vmul.f32 %v4912_v6, %v4909_v5 }
0x1b2c   : > { %8673 = vmatmul.mubr.f32.vlgmr.msra.gmra.mxu0 %v4913_v7 }
0x1b2d   : > { %8718 = vmatprep.mubr.msk.f32.mxu0 %vm8920_vm1, %v8919_v27 }
0x1bec   : > { %v4996_v8 = vpop.f32.mrf.mxu0 }
0x1bed   : > { %v5000_v22 = vadd.f32 %v4996_v8, %v10601_v24 }
0x1bee   : > { %v8674_v10 = vpop.f32.mrf.mxu0 }
0x1bef   : > { %v10707_v11 = vadd.f32 %v7765_v9, %v5000_v22 }
0x1bf1   : > { %v5011_v12 = vsel %vm1668_vm0, %v10707_v11, 0.0  ;;  %v5015_v13 = vmul.f32 %v10707_v11, %v10707_v11 }
0x1bf2   : > { %5012 = vadd.xlane.f32.xlu0 %v5011_v12 }
0x1bf3   : > { %v5016_v14 = vsel %vm1668_vm0, %v5015_v13, 0.0 }
0x1bf4   : > { %5017 = vadd.xlane.f32.xlu1 %v5016_v14 }
0x1c7b   : > { %v5013_v19 = vpop.xlane.xlu0 %5012 }
0x1c7c   : > { %v5014_v20 = vmul.f32 0.03125, %v5013_v19 }
0x1c7d   : > { %v5018_v21 = vpop.xlane.xlu1 %5017 }
0x1c7e   : > { %v5020_v23 = vmul.f32 %v5014_v20, %v5014_v20  ;;  %v5019_v24 = vmul.f32 0.03125, %v5018_v21  ;;  %v5022_v28 = vsub.f32 %v10707_v11, %v5014_v20 }
0x1c80   : > { %v5021_v25 = vsub.f32 %v5019_v24, %v5020_v23 }
0x1c82   : > { %v5023_v26 = vadd.f32 1e-06, %v5021_v25 }
0x1c84   : > { %8879 = vrsqrt.f32 %v5023_v26 }
0x1c91   : > { %v8880_v29 = vpop.eup %8879 }
0x1c92   : > { %v5025_v43 = vmul.f32 %v8880_v29, %v5022_v28 }
0x1c94   : > { %v5032_v32 = vmul.f32 %v7768_v30, %v5025_v43 }
0x1c96   : > { %v5039_v33 = vadd.f32 %v7769_v31, %v5032_v32 }
0x1c98   : > { %8684 = vmatmul.mubr.msk.f32.vlgmr.msra.gmra.mxu1 %vm1710_vm2, %v5039_v33 }
0x1c99   : > { %8688 = vmatprep.mubr.msk.f32.mxu1 %vm8920_vm1, %v8919_v27 }
0x1d58   : > { %v5120_v35 = vpop.f32.mrf.mxu1 }
0x1d59   : > { %v5121_v36 = vadd.f32 %v7775_v34, %v5120_v35 }
0x1d5a   : > { %v8685_v37 = vpop.f32.mrf.mxu1 }
0x1d5b   : > { %5127 = vrot.lane.b32.xlu1 %v5121_v36, %s12588_s27  ;;  %5125 = vrot.lane.b32.xlu0 %v5121_v36, %s12589_s6  ;;  %v7796_v37 = vld [vmem:[%s12587_s28 + $0x38] sm:$0xff]  ;;  %s12603_s6 = sld [smem:[#allocation17_spill]] }
0x1d5f   : > { %5129 = vrot.lane.b32.xlu1 %v5121_v36, %s12590_s0  ;;  %5131 = vrot.lane.b32.xlu0 %v5121_v36, %s12591_s3 }
0x1d61   : > { %s12481_s0 = scalar_lea.vmem %s12603_s6, %s12602_s5 }
0x1dcd   : > { %v10747_v39 = vpop.permute.xlu1 %5127  ;;  %v10749_v38 = vpop.permute.xlu0 %5125 }
0x1dce   : > { %5283 = vrot.lane.b32.xlu0 %v10747_v39, %s12591_s3  ;;  %5207 = vrot.lane.b32.xlu1 %v10749_v38, %s12591_s3 }
0x1dd1   : > { %v10755_v40 = vpop.permute.xlu1 %5129  ;;  %v5132_v41 = vpop.permute.xlu0 %5131 }
0x1dd2   : > { %5359 = vrot.lane.b32.xlu1 %v10755_v40, %s12591_s3  ;;  %8687 = vmatpush3.xpose.msk.msra.mxu1 %vm1793_vm3, %v5132_v41 }
0x1dd3   : > { %8691 = vmatprep.subr.mxu1 %v8919_v27 }
0x1dd5   : > { %8689 = vmatmul.mubr.msk.f32.vlgmr.msra.gmra.mxu1 %vm1793_vm3, %v5121_v36 }
0x1dd6   : > { %8693 = vmatprep.mubr.msk.f32.mxu1 %vm8920_vm1, %v8919_v27 }
0x1e40   : > { %v5208_v42 = vpop.permute.xlu1 %5207  ;;  %v5284_v56 = vpop.permute.xlu0 %5283 }
0x1e41   : > { %8692 = vmatpush3.xpose.msk.msra.mxu1 %vm1793_vm3, %v5208_v42 }
0x1e42   : > { %8696 = vmatprep.subr.mxu1 %v8919_v27 }
0x1e44   : > { %8694 = vmatmul.mubr.msk.f32.vlgmr.msra.gmra.mxu1 %vm1793_vm3, %v10749_v38  ;;  %v5360_v44 = vpop.permute.xlu1 %5359 }
0x1e45   : > { %8697 = vmatpush3.xpose.msk.msra.mxu1 %vm1793_vm3, %v5284_v56  ;;  %8698 = vmatprep.mubr.msk.f32.mxu1 %vm8920_vm1, %v8919_v27 }
0x1e46   : > { %8701 = vmatprep.subr.mxu1 %v8919_v27 }
0x1e48   : > { %8699 = vmatmul.mubr.msk.f32.vlgmr.msra.gmra.mxu1 %vm1793_vm3, %v10747_v39 }
0x1e49   : > { %8702 = vmatpush3.xpose.msk.msra.mxu1 %vm1793_vm3, %v5360_v44  ;;  %8703 = vmatprep.mubr.msk.f32.mxu1 %vm8920_vm1, %v8919_v27 }
0x1e4a   : > { %8706 = vmatprep.subr.mxu1 %v8919_v27 }
0x1e4c   : > { %8704 = vmatmul.mubr.msk.f32.vlgmr.msra.gmra.mxu1 %vm1793_vm3, %v10755_v40 }
0x1e4d   : > { %8708 = vmatprep.mubr.msk.f32.mxu1 %vm8920_vm1, %v8919_v27 }
0x1e95   : > { %v5203_v45 = vpop.f32.mrf.mxu1 }
0x1e96   : > { %v5435_v46 = vmul.f32 0.35355338, %v5203_v45 }
0x1e97   : > { %v8690_v47 = vpop.f32.mrf.mxu1 }
0x1e98   : > { %v5439_v48 = vsel %vm2100_vm4, %v5435_v46, -inf }
0x1e99   : > { %5440 = vmax.xlane.f32.xlu0 %v5439_v48 }
0x1f04   : > { %v5279_v49 = vpop.f32.mrf.mxu1 }
0x1f05   : > { %v5436_v50 = vmul.f32 0.35355338, %v5279_v49 }
0x1f06   : > { %v8695_v51 = vpop.f32.mrf.mxu1 }
0x1f07   : > { %v5442_v52 = vsel %vm2100_vm4, %v5436_v50, -inf }
0x1f08   : > { %5443 = vmax.xlane.f32.xlu1 %v5442_v52  ;;  %v5355_v53 = vpop.f32.mrf.mxu1 }
0x1f09   : > { %v5437_v54 = vmul.f32 0.35355338, %v5355_v53  ;;  %v7798_v53 = vld [vmem:[%s12518_s8 + $0x1] ss:$0 sm:$0xff] }
0x1f0a   : > { %v8700_v55 = vpop.f32.mrf.mxu1 }
0x1f0b   : > { %v5445_v57 = vsel %vm2100_vm4, %v5437_v54, -inf }
0x1f0c   : > { %5446 = vmax.xlane.f32.xlu0 %v5445_v57  ;;  %v5431_v58 = vpop.f32.mrf.mxu1 }
0x1f0d   : > { %v5438_v59 = vmul.f32 0.35355338, %v5431_v58 }
0x1f0e   : > { %v8705_v60 = vpop.f32.mrf.mxu1 }
0x1f0f   : > { %v5448_v61 = vsel %vm2100_vm4, %v5438_v59, -inf }
0x1f10   : > { %5449 = vmax.xlane.f32.xlu0 %v5448_v61 }
0x1f19   : > { %5483 = vrot.lane.b32.xlu1 %v5121_v36, %s12592_s26 }
0x1f22   : > { %v5441_v62 = vpop.xlane.xlu0 %5440 }
0x1f23   : > { %v5451_v63 = vsub.f32 %v5435_v46, %v5441_v62  ;;  %v7807_v62 = vld [vmem:[%s12521_s11 + $0x38] sm:$0xff] }
0x1f25   : > { %v5455_v0 = vmul.f32 1.442695, %v5451_v63  ;;  %v7806_v63 = vld [vmem:[%s12521_s11 + $0x30] sm:$0xff] }
0x1f27   : > { %8881 = vpow2.f32 %v5455_v0  ;;  %v7804_v0 = vld [vmem:[%s12521_s11 + $0x20] sm:$0xff] }
0x1f34   : > { %v8882_v1 = vpop.eup %8881 }
0x1f35   : > { %v5463_v2 = vsel %vm2100_vm4, %v8882_v1, 0.0 }
0x1f3d   : > { %5464 = vadd.xlane.f32.xlu1 %v5463_v2  ;;  %v7825_v2 = vld [vmem:[%s12523_s13 + $0xf0] sm:$0xff] }
0x1f91   : > { %v5444_v3 = vpop.xlane.xlu1 %5443 }
0x1f92   : > { %v5452_v4 = vsub.f32 %v5436_v50, %v5444_v3  ;;  %v7824_v3 = vld [vmem:[%s12523_s13 + $0xe8] sm:$0xff] }
0x1f94   : > { %v5457_v5 = vmul.f32 1.442695, %v5452_v4  ;;  %v7823_v4 = vld [vmem:[%s12523_s13 + $0xe0] sm:$0xff] }
0x1f95   : > { %v5484_v6 = vpop.permute.xlu1 %5483  ;;  %v5447_v7 = vpop.xlane.xlu0 %5446 }
0x1f96   : > { %8883 = vpow2.f32 %v5457_v5  ;;  %v5453_v8 = vsub.f32 %v5437_v54, %v5447_v7  ;;  %8707 = vmatpush3.msk.msra.mxu1 %vm2151_vm5, %v5484_v6 }
0x1f97   : > { %8711 = vmatprep.subr.mxu1 %v8919_v27 }
0x1f98   : > { %v5459_v9 = vmul.f32 1.442695, %v5453_v8 }
0x1f99   : > { %v5450_v22 = vpop.xlane.xlu0 %5449 }
0x1f9a   : > { %8885 = vpow2.f32 %v5459_v9  ;;  %v5454_v10 = vsub.f32 %v5438_v59, %v5450_v22 }
0x1f9c   : > { %v5461_v12 = vmul.f32 1.442695, %v5454_v10 }
0x1f9e   : > { %8887 = vpow2.f32 %v5461_v12 }
0x1fa3   : > { %v8884_v13 = vpop.eup %8883 }
0x1fa4   : > { %v5466_v14 = vsel %vm2100_vm4, %v8884_v13, 0.0 }
0x1fa5   : > { %5467 = vadd.xlane.f32.xlu0 %v5466_v14  ;;  %v7802_v14 = vld [vmem:[%s12519_s9 + $0x1] ss:$0 sm:$0xff] }
0x1fa7   : > { %v8886_v15 = vpop.eup %8885 }
0x1fa8   : > { %v5469_v16 = vsel %vm2100_vm4, %v8886_v15, 0.0 }
0x1fa9   : > { %5470 = vadd.xlane.f32.xlu1 %v5469_v16  ;;  %v7803_v16 = vld [vmem:[%s12520_s10 + $0x1] ss:$0 sm:$0xff] }
0x1fab   : > { %v8888_v17 = vpop.eup %8887 }
0x1fac   : > { %v5472_v18 = vsel %vm2100_vm4, %v8888_v17, 0.0 }
0x1fad   : > { %5473 = vadd.xlane.f32.xlu0 %v5472_v18 }
0x1fba   : > { %5637 = vrot.lane.b32.xlu1 %v10747_v39, %s12592_s26  ;;  %v7795_v39 = vld [vmem:[%s12587_s28 + $0x30] sm:$0xff] }
0x1fbe   : > { %5714 = vrot.lane.b32.xlu1 %v10755_v40, %s12592_s26  ;;  %v7793_v40 = vld [vmem:[%s12587_s28 + $0x20] sm:$0xff] }
0x1fc3   : > { %5560 = vrot.lane.b32.xlu0 %v10749_v38, %s12592_s26  ;;  %v7794_v38 = vld [vmem:[%s12587_s28 + $0x28] sm:$0xff] }
0x1fc6   : > { %v5465_v19 = vpop.xlane.xlu1 %5464 }
0x1fc7   : > { %8889 = vrcp.f32 %v5465_v19  ;;  %v7822_v19 = vld [vmem:[%s12523_s13 + $0xd8] sm:$0xff] }
0x1fd4   : > { %v8890_v20 = vpop.eup %8889 }
0x1fd5   : > { %v5476_v21 = vmul.f32 %v8890_v20, %v8882_v1  ;;  %v7826_v1 = vld [vmem:[%s12523_s13 + $0xf8] sm:$0xff]  ;;  %v7821_v20 = vld [vmem:[%s12523_s13 + $0xd0] sm:$0xff] }
0x1fd7   : > { %8709 = vmatmul.mubr.msk.f32.vlgmr.msra.gmra.mxu1 %vm2147_vm6, %v5476_v21  ;;  %v7820_v21 = vld [vmem:[%s12523_s13 + $0xc8] sm:$0xff] }
0x1fd8   : > { %8713 = vmatprep.mubr.msk.f32.mxu1 %vm8920_vm1, %v8919_v27 }
0x202e   : > { %v5468_v23 = vpop.xlane.xlu0 %5467 }
0x202f   : > { %8891 = vrcp.f32 %v5468_v23  ;;  %v7819_v23 = vld [vmem:[%s12523_s13 + $0xc0] sm:$0xff] }
0x2032   : > { %v5471_v24 = vpop.xlane.xlu1 %5470 }
0x2033   : > { %8893 = vrcp.f32 %v5471_v24  ;;  %v7818_v24 = vld [vmem:[%s12523_s13 + $0xb8] sm:$0xff] }
0x2036   : > { %v5638_v25 = vpop.permute.xlu1 %5637  ;;  %v5474_v26 = vpop.xlane.xlu0 %5473 }
0x2037   : > { %8895 = vrcp.f32 %v5474_v26  ;;  %8717 = vmatpush3.msk.msra.mxu0 %vm2151_vm5, %v5638_v25  ;;  %v7817_v25 = vld [vmem:[%s12523_s13 + $0xb0] sm:$0xff]  ;;  %v7816_v26 = vld [vmem:[%s12523_s13 + $0xa8] sm:$0xff] }
0x2038   : > { %8726 = vmatprep.subr.mxu0 %v8919_v27 }
0x203a   : > { %v5561_v28 = vpop.permute.xlu0 %5560  ;;  %v5715_v43 = vpop.permute.xlu1 %5714 }
0x203b   : > { %8712 = vmatpush3.msk.msra.mxu1 %vm2151_vm5, %v5561_v28  ;;  %v7815_v28 = vld [vmem:[%s12523_s13 + $0xa0] sm:$0xff] }
0x203c   : > { %v8892_v29 = vpop.eup %8891  ;;  %8721 = vmatprep.subr.mxu1 %v8919_v27 }
0x203d   : > { %v5478_v30 = vmul.f32 %v8892_v29, %v8884_v13  ;;  %v7814_v29 = vld [vmem:[%s12523_s13 + $0x98] sm:$0xff] }
0x203f   : > { %8714 = vmatmul.mubr.msk.f32.vlgmr.msra.gmra.mxu1 %vm2147_vm6, %v5478_v30  ;;  %v7813_v30 = vld [vmem:[%s12523_s13 + $0x90] sm:$0xff] }
0x2040   : > { %v8894_v31 = vpop.eup %8893  ;;  %8722 = vmatpush3.msk.msra.mxu1 %vm2151_vm5, %v5715_v43  ;;  %8723 = vmatprep.mubr.msk.f32.mxu1 %vm8920_vm1, %v8919_v27  ;;  %v7812_v43 = vld [vmem:[%s12523_s13 + $0x88] sm:$0xff] }
0x2041   : > { %v5480_v32 = vmul.f32 %v8894_v31, %v8886_v15  ;;  %8737 = vmatprep.subr.mxu1 %v8919_v27  ;;  %v7811_v31 = vld [vmem:[%s12523_s13 + $0x80] sm:$0xff] }
0x2043   : > { %8719 = vmatmul.mubr.msk.f32.vlgmr.msra.gmra.mxu0 %vm2147_vm6, %v5480_v32  ;;  %v7809_v32 = vld [vmem:[%s12522_s12 + $0x1] ss:$0 sm:$0xff] }
0x2044   : > { %v8896_v33 = vpop.eup %8895  ;;  %8734 = vmatprep.mubr.msk.f32.mxu0 %vm8920_vm1, %v8919_v27  ;;  %8727 = vmatpush3.msra.mxu0 %v7796_v37 }
0x2045   : > { %v5482_v34 = vmul.f32 %v8896_v33, %v8888_v17  ;;  %8728 = vmatprep.subr.mxu0 %v8919_v27 }
0x2046   : > { %8729 = vmatpush3.msra.mxu0 %v7795_v39 }
0x2047   : > { %8724 = vmatmul.mubr.msk.f32.vlgmr.msra.gmra.mxu1 %vm2147_vm6, %v5482_v34  ;;  %8730 = vmatprep.subr.mxu0 %v8919_v27 }
0x2048   : > { %8745 = vmatprep.mubr.msk.f32.mxu1 %vm8920_vm1, %v8919_v27  ;;  %8731 = vmatpush3.msra.mxu0 %v7794_v38 }
0x2049   : > { %8732 = vmatprep.subr.mxu0 %v8919_v27  ;;  %8738 = vmatpush3.msra.mxu1 %v7807_v62 }
0x204a   : > { %8733 = vmatpush3.msra.mxu0 %v7793_v40  ;;  %8739 = vmatprep.subr.mxu1 %v8919_v27 }
0x204b   : > { %8748 = vmatprep.subr.mxu0 %v8919_v27  ;;  %8740 = vmatpush3.msra.mxu1 %v7806_v63 }
0x204c   : > { %8741 = vmatprep.subr.mxu1 %v8919_v27 }
0x2097   : > { %v5556_v35 = vpop.f32.mrf.mxu1 }
0x2099   : > { %v8710_v36 = vpop.f32.mrf.mxu1 }
0x20ff   : > { %v5633_v41 = vpop.f32.mrf.mxu1 }
0x2100   : > { %5792 = vrot.lane.b32.xlu0 %v5633_v41, %s12593_s4 }
0x2101   : > { %v8715_v42 = vpop.f32.mrf.mxu1 }
0x2103   : > { %v5710_v56 = vpop.f32.mrf.mxu0 }
0x2104   : > { %5796 = vrot.lane.b32.xlu1 %v5710_v56, %s12594_s23 }
0x2105   : > { %v8720_v44 = vpop.f32.mrf.mxu0 }
0x2107   : > { %v5787_v45 = vpop.f32.mrf.mxu1 }
0x2108   : > { %5800 = vrot.lane.b32.xlu0 %v5787_v45, %s12595_s30 }
0x2109   : > { %v8725_v46 = vpop.f32.mrf.mxu1 }
0x2172   : > { %v5793_v47 = vpop.permute.xlu0 %5792 }
0x2173   : > { %v5803_v49 = vsel %vm1793_vm3, %v5556_v35, %v5793_v47 }
0x2176   : > { %v5797_v48 = vpop.permute.xlu1 %5796 }
0x2177   : > { %v5804_v50 = vsel %vm2468_vm7, %v5803_v49, %v5797_v48  ;;  %v6144_v48 = vld [vmem:[%s12527_s17 + $0x38] sm:$0xff]  ;;  %v6143_v49 = vld [vmem:[%s12527_s17 + $0x30] sm:$0xff] }
0x217a   : > { %v5801_v51 = vpop.permute.xlu0 %5800 }
0x217b   : > { %v5805_v52 = vsel %vm2470_vm8, %v5804_v50, %v5801_v51  ;;  %v6142_v50 = vld [vmem:[%s12527_s17 + $0x28] sm:$0xff]  ;;  %v6141_v51 = vld [vmem:[%s12527_s17 + $0x20] sm:$0xff] }
0x217c   : > { %8735 = vmatmul.mubr.msk.f32.vlgmr.msra.gmra.mxu0 %vm1710_vm2, %v5805_v52  ;;  %v6140_v52 = vld [vmem:[%s12527_s17 + $0x18] sm:$0xff] }
0x217d   : > { %8780 = vmatprep.mubr.msk.f32.mxu0 %vm8920_vm1, %v8919_v27  ;;  %8749 = vmatpush3.msra.mxu0 %v7826_v1 }
0x217e   : > { %8750 = vmatprep.subr.mxu0 %v8919_v27 }
0x217f   : > { %8751 = vmatpush3.msra.mxu0 %v7825_v2  ;;  %v7829_v2 = vld [vmem:[%s12525_s15] ss:$0 sm:$0xff] }
0x2180   : > { %8752 = vmatprep.subr.mxu0 %v8919_v27 }
0x2181   : > { %8753 = vmatpush3.msra.mxu0 %v7824_v3 }
0x2182   : > { %8754 = vmatprep.subr.mxu0 %v8919_v27 }
0x2183   : > { %8755 = vmatpush3.msra.mxu0 %v7823_v4  ;;  %v7830_v4 = vld [vmem:[%s12526_s16] ss:$0 sm:$0xff] }
0x2184   : > { %8756 = vmatprep.subr.mxu0 %v8919_v27 }
0x2185   : > { %8757 = vmatpush3.msra.mxu0 %v7822_v19  ;;  %v6251_v19 = vld [vmem:[%s12596_s21 + $0x90] sm:$0xff] }
0x2186   : > { %8758 = vmatprep.subr.mxu0 %v8919_v27 }
0x2187   : > { %8759 = vmatpush3.msra.mxu0 %v7821_v20  ;;  %v6250_v20 = vld [vmem:[%s12596_s21 + $0x88] sm:$0xff] }
0x2188   : > { %8760 = vmatprep.subr.mxu0 %v8919_v27 }
0x2189   : > { %8761 = vmatpush3.msra.mxu0 %v7820_v21  ;;  %v6249_v21 = vld [vmem:[%s12596_s21 + $0x80] sm:$0xff] }
0x218a   : > { %8762 = vmatprep.subr.mxu0 %v8919_v27 }
0x218b   : > { %8763 = vmatpush3.msra.mxu0 %v7819_v23  ;;  %v6248_v23 = vld [vmem:[%s12596_s21 + $0x78] sm:$0xff] }
0x218c   : > { %8764 = vmatprep.subr.mxu0 %v8919_v27 }
0x218d   : > { %8765 = vmatpush3.msra.mxu0 %v7818_v24  ;;  %v6247_v24 = vld [vmem:[%s12596_s21 + $0x70] sm:$0xff] }
0x218e   : > { %8766 = vmatprep.subr.mxu0 %v8919_v27 }
0x218f   : > { %8767 = vmatpush3.msra.mxu0 %v7817_v25  ;;  %v6246_v25 = vld [vmem:[%s12596_s21 + $0x68] sm:$0xff] }
0x2190   : > { %8768 = vmatprep.subr.mxu0 %v8919_v27 }
0x2191   : > { %8769 = vmatpush3.msra.mxu0 %v7816_v26  ;;  %v6245_v26 = vld [vmem:[%s12596_s21 + $0x60] sm:$0xff] }
0x2192   : > { %8770 = vmatprep.subr.mxu0 %v8919_v27 }
0x2193   : > { %8771 = vmatpush3.msra.mxu0 %v7815_v28  ;;  %v6244_v28 = vld [vmem:[%s12596_s21 + $0x58] sm:$0xff] }
0x2194   : > { %8772 = vmatprep.subr.mxu0 %v8919_v27 }
0x2195   : > { %8773 = vmatpush3.msra.mxu0 %v7814_v29  ;;  %v6243_v29 = vld [vmem:[%s12596_s21 + $0x50] sm:$0xff] }
0x2196   : > { %8774 = vmatprep.subr.mxu0 %v8919_v27 }
0x2197   : > { %8775 = vmatpush3.msra.mxu0 %v7813_v30  ;;  %v6242_v30 = vld [vmem:[%s12596_s21 + $0x48] sm:$0xff] }
0x2198   : > { %8776 = vmatprep.subr.mxu0 %v8919_v27 }
0x2199   : > { %8777 = vmatpush3.msra.mxu0 %v7812_v43  ;;  %v6241_v43 = vld [vmem:[%s12596_s21 + $0x40] sm:$0xff] }
0x219a   : > { %8778 = vmatprep.subr.mxu0 %v8919_v27 }
0x219b   : > { %8779 = vmatpush3.msra.mxu0 %v7811_v31  ;;  %v6240_v31 = vld [vmem:[%s12596_s21 + $0x38] sm:$0xff] }
0x223c   : > { %v5886_v54 = vpop.f32.mrf.mxu0 }
0x223d   : > { %v5887_v55 = vadd.f32 %v7798_v53, %v5886_v54  ;;  %v6139_v53 = vld [vmem:[%s12527_s17 + $0x10] sm:$0xff]  ;;  %v6138_v54 = vld [vmem:[%s12527_s17 + $0x8] sm:$0xff] }
0x223e   : > { %v8736_v57 = vpop.f32.mrf.mxu0 }
0x223f   : > { %v10846_v58 = vadd.f32 %v5887_v55, %v10707_v11  ;;  %v7805_v11 = vld [vmem:[%s12521_s11 + $0x28] sm:$0xff]  ;;  %v6137_v55 = vld [vmem:[%s12527_s17] sm:$0xff]  ;;  %v6264_v57 = vld [vmem:[%s12596_s21 + $0xf8] sm:$0xff] }
0x2240   : > { %8742 = vmatpush3.msra.mxu1 %v7805_v11 }
0x2241   : > { %v5893_v59 = vsel %vm1668_vm0, %v10846_v58, 0.0  ;;  %v5897_v60 = vmul.f32 %v10846_v58, %v10846_v58  ;;  %8743 = vmatprep.subr.mxu1 %v8919_v27 }
0x2242   : > { %5894 = vadd.xlane.f32.xlu1 %v5893_v59  ;;  %8744 = vmatpush3.msra.mxu1 %v7804_v0 }
0x2243   : > { %v5898_v61 = vsel %vm1668_vm0, %v5897_v60, 0.0  ;;  %6184 = vmatprep.subr.mxu1 %v6144_v48  ;;  %v6270_v48 = vld [vmem:[%s12596_s21 + $0x128] sm:$0xff] }
0x2244   : > { %5899 = vadd.xlane.f32.xlu0 %v5898_v61 }
0x22cb   : > { %v5895_v5 = vpop.xlane.xlu1 %5894 }
0x22cc   : > { %v5896_v6 = vmul.f32 0.03125, %v5895_v5 }
0x22cd   : > { %v5900_v7 = vpop.xlane.xlu0 %5899 }
0x22ce   : > { %v5902_v8 = vmul.f32 %v5896_v6, %v5896_v6  ;;  %v5901_v9 = vmul.f32 0.03125, %v5900_v7  ;;  %v5904_v12 = vsub.f32 %v10846_v58, %v5896_v6  ;;  %v6263_v7 = vld [vmem:[%s12596_s21 + $0xf0] sm:$0xff] }
0x22d0   : > { %v5903_v22 = vsub.f32 %v5901_v9, %v5902_v8  ;;  %v6262_v8 = vld [vmem:[%s12596_s21 + $0xe8] sm:$0xff]  ;;  %v6261_v9 = vld [vmem:[%s12596_s21 + $0xe0] sm:$0xff] }
0x22d2   : > { %v5905_v10 = vadd.f32 1e-06, %v5903_v22  ;;  %v6260_v22 = vld [vmem:[%s12596_s21 + $0xd8] sm:$0xff] }
0x22d4   : > { %8897 = vrsqrt.f32 %v5905_v10  ;;  %v6259_v10 = vld [vmem:[%s12596_s21 + $0xd0] sm:$0xff] }
0x22e1   : > { %v8898_v13 = vpop.eup %8897 }
0x22e2   : > { %v5907_v15 = vmul.f32 %v8898_v13, %v5904_v12  ;;  %v6258_v12 = vld [vmem:[%s12596_s21 + $0xc8] sm:$0xff]  ;;  %v6257_v13 = vld [vmem:[%s12596_s21 + $0xc0] sm:$0xff] }
0x22e4   : > { %v5914_v17 = vmul.f32 %v7802_v14, %v5907_v15  ;;  %v6256_v14 = vld [vmem:[%s12596_s21 + $0xb8] sm:$0xff]  ;;  %v6255_v15 = vld [vmem:[%s12596_s21 + $0xb0] sm:$0xff] }
0x22e6   : > { %v5921_v18 = vadd.f32 %v7803_v16, %v5914_v17  ;;  %v6254_v16 = vld [vmem:[%s12596_s21 + $0xa8] sm:$0xff]  ;;  %v6253_v17 = vld [vmem:[%s12596_s21 + $0xa0] sm:$0xff] }
0x22e8   : > { %8746 = vmatmul.mubr.msk.f32.vlgmr.msra.gmra.mxu1 %vm1710_vm2, %v5921_v18  ;;  %v6252_v18 = vld [vmem:[%s12596_s21 + $0x98] sm:$0xff] }
0x22e9   : > { %6224 = vmatprep.mubr.f32.mxu1 %v8919_v27  ;;  %v7828_v27 = vld [vmem:[%s12524_s14 + $0x1] ss:$0 sm:$0xff]  ;;  %6185 = vmatpush1.msra.mxu1 %v6143_v49 }
0x22ea   : > { %6186 = vmatprep.subr.mxu1 %v6142_v50  ;;  %v6269_v49 = vld [vmem:[%s12596_s21 + $0x120] sm:$0xff]  ;;  %v6268_v50 = vld [vmem:[%s12596_s21 + $0x118] sm:$0xff] }
0x22eb   : > { %6187 = vmatpush1.msra.mxu1 %v6141_v51  ;;  %v6267_v51 = vld [vmem:[%s12596_s21 + $0x110] sm:$0xff] }
0x22ec   : > { %6188 = vmatprep.subr.mxu1 %v6140_v52  ;;  %v6266_v52 = vld [vmem:[%s12596_s21 + $0x108] sm:$0xff] }
0x22ed   : > { %6189 = vmatpush1.msra.mxu1 %v6139_v53  ;;  %v6265_v53 = vld [vmem:[%s12596_s21 + $0x100] sm:$0xff] }
0x22ee   : > { %6190 = vmatprep.subr.mxu1 %v6138_v54  ;;  %v6641_v54 = vld [vmem:[%s12597_s20 + $0x878] sm:$0xff] }
0x22ef   : > { %6191 = vmatpush1.msra.mxu1 %v6137_v55  ;;  %v6643_v55 = vld [vmem:[%s12597_s20 + $0x888] sm:$0xff]  ;;  %6901 = vmatprep.subr.mxu0 %v6641_v54  ;;  %v6445_v54 = vld [vmem:[%s12597_s20 + $0x258] sm:$0xff] }
0x22f0   : > { %6297 = vmatprep.subr.mxu1 %v6264_v57  ;;  %v6640_v57 = vld [vmem:[%s12597_s20 + $0x870] sm:$0xff] }
0x23a8   : > { %v6002_v33 = vpop.f32.mrf.mxu1 }
0x23a9   : > { %v6003_v34 = vadd.f32 %v7809_v32, %v6002_v33  ;;  %v6239_v32 = vld [vmem:[%s12596_s21 + $0x30] sm:$0xff]  ;;  %v6238_v33 = vld [vmem:[%s12596_s21 + $0x28] sm:$0xff] }
0x23aa   : > { %v8747_v35 = vpop.f32.mrf.mxu1 }
0x23ab   : > { %v6007_v36 = vmul.f32 0.70710677, %v6003_v34  ;;  %v6006_v39 = vmul.f32 0.5, %v6003_v34  ;;  %v6237_v34 = vld [vmem:[%s12596_s21 + $0x20] sm:$0xff]  ;;  %v6236_v35 = vld [vmem:[%s12596_s21 + $0x18] sm:$0xff] }
0x23ad   : > { %8899 = verf.f32 %v6007_v36  ;;  %v6235_v36 = vld [vmem:[%s12596_s21 + $0x10] sm:$0xff] }
0x23ba   : > { %v8900_v37 = vpop.eup %8899 }
0x23bb   : > { %v6009_v38 = vadd.f32 1.0, %v8900_v37  ;;  %v6234_v37 = vld [vmem:[%s12596_s21 + $0x8] sm:$0xff] }
0x23bd   : > { %v6010_v40 = vmul.f32 %v6009_v38, %v6006_v39  ;;  %v6233_v39 = vld [vmem:[%s12596_s21] sm:$0xff]  ;;  %v6280_v38 = vld [vmem:[%s12596_s21 + $0x178] sm:$0xff] }
0x23bf   : > { %8781 = vmatmul.mubr.f32.vlgmr.msra.gmra.mxu0 %v6010_v40  ;;  %v6279_v40 = vld [vmem:[%s12596_s21 + $0x170] sm:$0xff] }
0x23c0   : > { %6902 = vmatpush1.msra.mxu0 %v6640_v57  ;;  %v6427_v57 = vld [vmem:[%s12597_s20 + $0x1c8] sm:$0xff] }
0x247f   : > { %v6093_v41 = vpop.f32.mrf.mxu0 }
0x2480   : > { %v6097_v42 = vadd.f32 %v6093_v41, %v10846_v58  ;;  %v6278_v41 = vld [vmem:[%s12596_s21 + $0x168] sm:$0xff] }
0x2481   : > { %v8782_v56 = vpop.f32.mrf.mxu0 }
0x2482   : > { %v6105_v44 = vadd.f32 %v7828_v27, %v6097_v42  ;;  %v6277_v27 = vld [vmem:[%s12596_s21 + $0x160] sm:$0xff]  ;;  %v6276_v42 = vld [vmem:[%s12596_s21 + $0x158] sm:$0xff]  ;;  %v6275_v56 = vld [vmem:[%s12596_s21 + $0x150] sm:$0xff] }
0x2484   : > { %v6108_v45 = vsel %vm1668_vm0, %v6105_v44, 0.0  ;;  %v6112_v46 = vmul.f32 %v6105_v44, %v6105_v44 }
0x2485   : > { %6109 = vadd.xlane.f32.xlu0 %v6108_v45  ;;  %v6273_v45 = vld [vmem:[%s12596_s21 + $0x140] sm:$0xff] }
0x2486   : > { %v6113_v47 = vsel %vm1668_vm0, %v6112_v46, 0.0  ;;  %v6272_v46 = vld [vmem:[%s12596_s21 + $0x138] sm:$0xff] }
0x2487   : > { %6114 = vadd.xlane.f32.xlu1 %v6113_v47  ;;  %v6271_v47 = vld [vmem:[%s12596_s21 + $0x130] sm:$0xff] }
0x250e   : > { %v6110_v58 = vpop.xlane.xlu0 %6109 }
0x250f   : > { %v6111_v59 = vmul.f32 0.03125, %v6110_v58  ;;  %v6623_v58 = vld [vmem:[%s12597_s20 + $0x7e8] sm:$0xff] }
0x2510   : > { %v6115_v60 = vpop.xlane.xlu1 %6114  ;;  %6903 = vmatprep.subr.mxu0 %v6623_v58  ;;  %v6426_v58 = vld [vmem:[%s12597_s20 + $0x1c0] sm:$0xff] }
0x2511   : > { %v6117_v61 = vmul.f32 %v6111_v59, %v6111_v59  ;;  %v6116_v62 = vmul.f32 0.03125, %v6115_v60  ;;  %v6119_v0 = vsub.f32 %v6105_v44, %v6111_v59  ;;  %v6274_v44 = vld [vmem:[%s12596_s21 + $0x148] sm:$0xff]  ;;  %v6622_v59 = vld [vmem:[%s12597_s20 + $0x7e0] sm:$0xff]  ;;  %v6605_v60 = vld [vmem:[%s12597_s20 + $0x758] sm:$0xff] }
0x2512   : > { %6904 = vmatpush1.msra.mxu0 %v6622_v59  ;;  %v6409_v59 = vld [vmem:[%s12597_s20 + $0x138] sm:$0xff] }
0x2513   : > { %v6118_v63 = vsub.f32 %v6116_v62, %v6117_v61  ;;  %v6604_v61 = vld [vmem:[%s12597_s20 + $0x750] sm:$0xff]  ;;  %6905 = vmatprep.subr.mxu0 %v6605_v60  ;;  %v6587_v62 = vld [vmem:[%s12597_s20 + $0x6c8] sm:$0xff] }
0x2514   : > { %6906 = vmatpush1.msra.mxu0 %v6604_v61  ;;  %v6408_v60 = vld [vmem:[%s12597_s20 + $0x130] sm:$0xff]  ;;  %v6391_v61 = vld [vmem:[%s12597_s20 + $0xa8] sm:$0xff] }
0x2515   : > { %v6120_v11 = vadd.f32 1e-06, %v6118_v63  ;;  %v6586_v63 = vld [vmem:[%s12597_s20 + $0x6c0] sm:$0xff]  ;;  %6907 = vmatprep.subr.mxu0 %v6587_v62  ;;  %v6388_v62 = vld [vmem:[%s12597_s20 + $0x90] sm:$0xff] }
0x2516   : > { %6908 = vmatpush1.msra.mxu0 %v6586_v63  ;;  %v6390_v63 = vld [vmem:[%s12597_s20 + $0xa0] sm:$0xff] }
0x2517   : > { %8901 = vrsqrt.f32 %v6120_v11  ;;  %v6569_v11 = vld [vmem:[%s12597_s20 + $0x638] sm:$0xff] }
0x2518   : > { %6909 = vmatprep.subr.mxu0 %v6569_v11  ;;  %v6371_v11 = vld [vmem:[%s12597_s20 + $0x8] sm:$0xff] }
0x2524   : > { %v8902_v1 = vpop.eup %8901 }
0x2525   : > { %v6122_v3 = vmul.f32 %v8902_v1, %v6119_v0  ;;  %v6568_v0 = vld [vmem:[%s12597_s20 + $0x630] sm:$0xff]  ;;  %v6551_v1 = vld [vmem:[%s12597_s20 + $0x5a8] sm:$0xff] }
0x2526   : > { %6910 = vmatpush1.msra.mxu0 %v6568_v0  ;;  %v6373_v0 = vld [vmem:[%s12597_s20 + $0x18] sm:$0xff] }
0x2527   : > { %v6129_v5 = vmul.f32 %v7829_v2, %v6122_v3  ;;  %v6550_v2 = vld [vmem:[%s12597_s20 + $0x5a0] sm:$0xff]  ;;  %6911 = vmatprep.subr.mxu0 %v6551_v1  ;;  %v6533_v3 = vld [vmem:[%s12597_s20 + $0x518] sm:$0xff] }
0x2528   : > { %6912 = vmatpush1.msra.mxu0 %v6550_v2  ;;  %v6370_v1 = vld [vmem:[%s12597_s20] sm:$0xff]  ;;  %v6372_v2 = vld [vmem:[%s12597_s20 + $0x10] sm:$0xff] }
0x2529   : > { %v6136_v6 = vadd.f32 %v7830_v4, %v6129_v5  ;;  %v6532_v4 = vld [vmem:[%s12597_s20 + $0x510] sm:$0xff]  ;;  %6913 = vmatprep.subr.mxu0 %v6533_v3  ;;  %v6515_v5 = vld [vmem:[%s12597_s20 + $0x488] sm:$0xff]  ;;  %v6785_v3 = vld [vmem:[%s12597_s20 + $0xcf8] sm:$0xff] }
0x252a   : > { %6914 = vmatpush1.msra.mxu0 %v6532_v4  ;;  %v6787_v4 = vld [vmem:[%s12597_s20 + $0xd08] sm:$0xff] }
0x252b   : > { %7831 = vmatmul.mubr.msk.f32.vlgmr.msra.gmra.mxu1 %vm1710_vm2, %v6136_v6  ;;  %v6514_v6 = vld [vmem:[%s12597_s20 + $0x480] sm:$0xff]  ;;  %6915 = vmatprep.subr.mxu0 %v6515_v5  ;;  %v6784_v5 = vld [vmem:[%s12597_s20 + $0xcf0] sm:$0xff] }
0x252c   : > { %6298 = vmatpush1.msra.mxu1 %v6263_v7  ;;  %v6497_v7 = vld [vmem:[%s12597_s20 + $0x3f8] sm:$0xff]  ;;  %6916 = vmatpush1.msra.mxu0 %v6514_v6  ;;  %v6786_v6 = vld [vmem:[%s12597_s20 + $0xd00] sm:$0xff] }
0x252d   : > { %6299 = vmatprep.subr.mxu1 %v6262_v8  ;;  %v6496_v8 = vld [vmem:[%s12597_s20 + $0x3f0] sm:$0xff]  ;;  %6917 = vmatprep.subr.mxu0 %v6497_v7  ;;  %v6767_v7 = vld [vmem:[%s12597_s20 + $0xc68] sm:$0xff] }
0x252e   : > { %6300 = vmatpush1.msra.mxu1 %v6261_v9  ;;  %v6479_v9 = vld [vmem:[%s12597_s20 + $0x368] sm:$0xff]  ;;  %6918 = vmatpush1.msra.mxu0 %v6496_v8  ;;  %v6769_v8 = vld [vmem:[%s12597_s20 + $0xc78] sm:$0xff] }
0x252f   : > { %6301 = vmatprep.subr.mxu1 %v6260_v22  ;;  %v6478_v22 = vld [vmem:[%s12597_s20 + $0x360] sm:$0xff]  ;;  %6919 = vmatprep.subr.mxu0 %v6479_v9 }
0x2530   : > { %6302 = vmatpush1.msra.mxu1 %v6259_v10  ;;  %v6461_v10 = vld [vmem:[%s12597_s20 + $0x2d8] sm:$0xff]  ;;  %6920 = vmatpush1.msra.mxu0 %v6478_v22  ;;  %v6766_v9 = vld [vmem:[%s12597_s20 + $0xc60] sm:$0xff]  ;;  %v6768_v22 = vld [vmem:[%s12597_s20 + $0xc70] sm:$0xff] }
0x2531   : > { %6303 = vmatprep.subr.mxu1 %v6258_v12  ;;  %v6460_v12 = vld [vmem:[%s12597_s20 + $0x2d0] sm:$0xff]  ;;  %6921 = vmatprep.subr.mxu0 %v6461_v10  ;;  %v6749_v10 = vld [vmem:[%s12597_s20 + $0xbd8] sm:$0xff] }
0x2532   : > { %6304 = vmatpush1.msra.mxu1 %v6257_v13  ;;  %v6443_v13 = vld [vmem:[%s12597_s20 + $0x248] sm:$0xff]  ;;  %6922 = vmatpush1.msra.mxu0 %v6460_v12 }
0x2533   : > { %6305 = vmatprep.subr.mxu1 %v6256_v14  ;;  %v6442_v14 = vld [vmem:[%s12597_s20 + $0x240] sm:$0xff]  ;;  %6923 = vmatprep.subr.mxu0 %v6443_v13  ;;  %v6751_v12 = vld [vmem:[%s12597_s20 + $0xbe8] sm:$0xff]  ;;  %v6748_v13 = vld [vmem:[%s12597_s20 + $0xbd0] sm:$0xff] }
0x2534   : > { %6306 = vmatpush1.msra.mxu1 %v6255_v15  ;;  %v6425_v15 = vld [vmem:[%s12597_s20 + $0x1b8] sm:$0xff]  ;;  %6924 = vmatpush1.msra.mxu0 %v6442_v14  ;;  %v6750_v14 = vld [vmem:[%s12597_s20 + $0xbe0] sm:$0xff] }
0x2535   : > { %6307 = vmatprep.subr.mxu1 %v6254_v16  ;;  %v6424_v16 = vld [vmem:[%s12597_s20 + $0x1b0] sm:$0xff]  ;;  %6925 = vmatprep.subr.mxu0 %v6425_v15  ;;  %v6731_v15 = vld [vmem:[%s12597_s20 + $0xb48] sm:$0xff] }
0x2536   : > { %6308 = vmatpush1.msra.mxu1 %v6253_v17  ;;  %v6407_v17 = vld [vmem:[%s12597_s20 + $0x128] sm:$0xff]  ;;  %6926 = vmatpush1.msra.mxu0 %v6424_v16  ;;  %v6733_v16 = vld [vmem:[%s12597_s20 + $0xb58] sm:$0xff] }
0x2537   : > { %6309 = vmatprep.subr.mxu1 %v6252_v18  ;;  %v6406_v18 = vld [vmem:[%s12597_s20 + $0x120] sm:$0xff]  ;;  %6927 = vmatprep.subr.mxu0 %v6407_v17 }
0x2538   : > { %6310 = vmatpush1.msra.mxu1 %v6251_v19  ;;  %v6389_v19 = vld [vmem:[%s12597_s20 + $0x98] sm:$0xff]  ;;  %6928 = vmatpush1.msra.mxu0 %v6406_v18  ;;  %v6730_v17 = vld [vmem:[%s12597_s20 + $0xb40] sm:$0xff]  ;;  %v6732_v18 = vld [vmem:[%s12597_s20 + $0xb50] sm:$0xff] }
0x2539   : > { %6311 = vmatprep.subr.mxu1 %v6250_v20  ;;  %6929 = vmatprep.subr.mxu0 %v6389_v19  ;;  %v6147_v20 = vlaneseq  ;;  %v6713_v19 = vld [vmem:[%s12597_s20 + $0xab8] sm:$0xff] }
0x253a   : > { %6312 = vmatpush1.msra.mxu1 %v6249_v21  ;;  %6930 = vmatpush1.msra.mxu0 %v6388_v62  ;;  %v6590_v62 = vld [vmem:[%s12597_s20 + $0x6e0] sm:$0xff] }
0x253b   : > { %6313 = vmatprep.subr.mxu1 %v6248_v23  ;;  %v11214_v21 = vshrl.u32 %v6147_v20, 7  ;;  %6931 = vmatprep.subr.mxu0 %v6371_v11  ;;  %v6715_v20 = vld [vmem:[%s12597_s20 + $0xac8] sm:$0xff]  ;;  %v6573_v11 = vld [vmem:[%s12597_s20 + $0x658] sm:$0xff] }
0x253c   : > { %6314 = vmatpush1.msra.mxu1 %v6247_v24  ;;  %v6145_v24 = vld [vmem:[%s12598_s1] sm:$0x3]  ;;  %6932 = vmatpush1.msra.mxu0 %v6370_v1  ;;  %v6572_v1 = vld [vmem:[%s12597_s20 + $0x650] sm:$0xff]  ;;  %s12600_s1 = sld [smem:[#allocation16_spill]] }
0x253d   : > { %6315 = vmatprep.subr.mxu1 %v6246_v25  ;;  %v11217_v23 = vsub.s32 0, %v11214_v21  ;;  %v11223_v25 = vsub.s32 1, %v11214_v21  ;;  %6949 = vmatprep.subr.mxu0 %v6785_v3  ;;  %v6555_v3 = vld [vmem:[%s12597_s20 + $0x5c8] sm:$0xff] }
0x253e   : > { %6316 = vmatpush1.msra.mxu1 %v6245_v26  ;;  %6950 = vmatpush2.msra.mxu0 %v6784_v5  ;;  %v6554_v5 = vld [vmem:[%s12597_s20 + $0x5c0] sm:$0xff] }
0x253f   : > { %6317 = vmatprep.subr.mxu1 %v6244_v28  ;;  %v6150_v26 = vrot.slane %v6145_v24, %v11217_v23  ;;  %v6154_v28 = vrot.slane %v6145_v24, %v11223_v25  ;;  %6951 = vmatprep.subr.mxu0 %v6767_v7  ;;  %v6712_v24 = vld [vmem:[%s12597_s20 + $0xab0] sm:$0xff]  ;;  %v6537_v7 = vld [vmem:[%s12597_s20 + $0x538] sm:$0xff] }
0x2540   : > { %6318 = vmatpush1.msra.mxu1 %v6243_v29  ;;  %6952 = vmatpush2.msra.mxu0 %v6766_v9  ;;  %v6536_v9 = vld [vmem:[%s12597_s20 + $0x530] sm:$0xff] }
0x2541   : > { %6319 = vmatprep.subr.mxu1 %v6242_v30  ;;  %6953 = vmatprep.subr.mxu0 %v6749_v10  ;;  %v6519_v10 = vld [vmem:[%s12597_s20 + $0x4a8] sm:$0xff] }
0x2542   : > { %6320 = vmatpush1.msra.mxu1 %v6241_v43  ;;  %6954 = vmatpush2.msra.mxu0 %v6748_v13  ;;  %v6518_v13 = vld [vmem:[%s12597_s20 + $0x4a0] sm:$0xff] }
0x2543   : > { %6321 = vmatprep.subr.mxu1 %v6240_v31  ;;  %6955 = vmatprep.subr.mxu0 %v6731_v15  ;;  %v6501_v15 = vld [vmem:[%s12597_s20 + $0x418] sm:$0xff] }
0x2544   : > { %6322 = vmatpush1.msra.mxu1 %v6239_v32  ;;  %6956 = vmatpush2.msra.mxu0 %v6730_v17  ;;  %v6500_v17 = vld [vmem:[%s12597_s20 + $0x410] sm:$0xff] }
0x2545   : > { %6323 = vmatprep.subr.mxu1 %v6238_v33  ;;  %v6642_v33 = vld [vmem:[%s12597_s20 + $0x880] sm:$0xff]  ;;  %6957 = vmatprep.subr.mxu0 %v6713_v19  ;;  %v6483_v19 = vld [vmem:[%s12597_s20 + $0x388] sm:$0xff] }
0x2546   : > { %6324 = vmatpush1.msra.mxu1 %v6237_v34  ;;  %6958 = vmatpush2.msra.mxu0 %v6712_v24  ;;  %v6482_v24 = vld [vmem:[%s12597_s20 + $0x380] sm:$0xff] }
0x2547   : > { %6325 = vmatprep.subr.mxu1 %v6236_v35  ;;  %v6625_v35 = vld [vmem:[%s12597_s20 + $0x7f8] sm:$0xff] }
0x2548   : > { %6326 = vmatpush1.msra.mxu1 %v6235_v36  ;;  %v6624_v36 = vld [vmem:[%s12597_s20 + $0x7f0] sm:$0xff] }
0x2549   : > { %6327 = vmatprep.subr.mxu1 %v6234_v37  ;;  %v6607_v37 = vld [vmem:[%s12597_s20 + $0x768] sm:$0xff] }
0x254a   : > { %6328 = vmatpush1.msra.mxu1 %v6233_v39  ;;  %v6606_v39 = vld [vmem:[%s12597_s20 + $0x760] sm:$0xff] }
0x254b   : > { %6345 = vmatprep.subr.mxu1 %v6280_v38  ;;  %v6589_v38 = vld [vmem:[%s12597_s20 + $0x6d8] sm:$0xff] }
0x254c   : > { %6346 = vmatpush2.msra.mxu1 %v6279_v40  ;;  %v6588_v40 = vld [vmem:[%s12597_s20 + $0x6d0] sm:$0xff] }
0x254d   : > { %6347 = vmatprep.subr.mxu1 %v6278_v41  ;;  %v6571_v41 = vld [vmem:[%s12597_s20 + $0x648] sm:$0xff] }
0x254e   : > { %6348 = vmatpush2.msra.mxu1 %v6277_v27  ;;  %v6570_v27 = vld [vmem:[%s12597_s20 + $0x640] sm:$0xff] }
0x254f   : > { %6349 = vmatprep.subr.mxu1 %v6276_v42  ;;  %v6553_v42 = vld [vmem:[%s12597_s20 + $0x5b8] sm:$0xff] }
0x2550   : > { %6350 = vmatpush2.msra.mxu1 %v6275_v56  ;;  %v6552_v56 = vld [vmem:[%s12597_s20 + $0x5b0] sm:$0xff] }
0x2551   : > { %6351 = vmatprep.subr.mxu1 %v6274_v44  ;;  %v6535_v44 = vld [vmem:[%s12597_s20 + $0x528] sm:$0xff] }
0x2552   : > { %6352 = vmatpush2.msra.mxu1 %v6273_v45  ;;  %v6534_v45 = vld [vmem:[%s12597_s20 + $0x520] sm:$0xff] }
0x2553   : > { %6353 = vmatprep.subr.mxu1 %v6272_v46  ;;  %v6517_v46 = vld [vmem:[%s12597_s20 + $0x498] sm:$0xff] }
0x2554   : > { %6354 = vmatpush2.msra.mxu1 %v6271_v47  ;;  %v6516_v47 = vld [vmem:[%s12597_s20 + $0x490] sm:$0xff] }
0x2555   : > { %6355 = vmatprep.subr.mxu1 %v6270_v48  ;;  %v6499_v48 = vld [vmem:[%s12597_s20 + $0x408] sm:$0xff] }
0x2556   : > { %6356 = vmatpush2.msra.mxu1 %v6269_v49  ;;  %v6498_v49 = vld [vmem:[%s12597_s20 + $0x400] sm:$0xff] }
0x2557   : > { %6357 = vmatprep.subr.mxu1 %v6268_v50  ;;  %v6481_v50 = vld [vmem:[%s12597_s20 + $0x378] sm:$0xff] }
0x2558   : > { %6358 = vmatpush2.msra.mxu1 %v6267_v51  ;;  %v6480_v51 = vld [vmem:[%s12597_s20 + $0x370] sm:$0xff] }
0x2559   : > { %6359 = vmatprep.subr.mxu1 %v6266_v52  ;;  %v6463_v52 = vld [vmem:[%s12597_s20 + $0x2e8] sm:$0xff] }
0x255a   : > { %6360 = vmatpush2.msra.mxu1 %v6265_v53  ;;  %v6462_v53 = vld [vmem:[%s12597_s20 + $0x2e0] sm:$0xff] }
0x255b   : > { %6972 = vmatprep.subr.mxu1 %v6643_v55  ;;  %v6444_v55 = vld [vmem:[%s12597_s20 + $0x250] sm:$0xff] }
0x25eb   : > { %v6226_v29 = vpop.f32.mrf.mxu1 }
0x25ec   : > { %v6227_v30 = vadd.f32 %v6226_v29, %v6150_v26  ;;  %v6714_v26 = vld [vmem:[%s12597_s20 + $0xac0] sm:$0xff]  ;;  %v6697_v29 = vld [vmem:[%s12597_s20 + $0xa38] sm:$0xff] }
0x25ed   : > { %v6228_v43 = vpop.f32.mrf.mxu1 }
0x25ee   : > { %v6229_v31 = vadd.f32 %v6228_v43, %v6154_v28  ;;  %v6695_v28 = vld [vmem:[%s12597_s20 + $0xa28] sm:$0xff]  ;;  %v6696_v43 = vld [vmem:[%s12597_s20 + $0xa30] sm:$0xff] }
0x25ef   : > { %6959 = vmatprep.subr.mxu0 %v6695_v28  ;;  %v6465_v28 = vld [vmem:[%s12597_s20 + $0x2f8] sm:$0xff] }
0x25f0   : > { %8903 = vtanh.f32 %v6229_v31  ;;  %v6677_v31 = vld [vmem:[%s12597_s20 + $0x998] sm:$0xff] }
0x25f1   : > { %8905 = vtanh.f32 %v6227_v30  ;;  %v6694_v30 = vld [vmem:[%s12597_s20 + $0xa20] sm:$0xff] }
0x25f2   : > { %6960 = vmatpush2.msra.mxu0 %v6694_v30  ;;  %v6464_v30 = vld [vmem:[%s12597_s20 + $0x2f0] sm:$0xff] }
0x25f3   : > { %6961 = vmatprep.subr.mxu0 %v6677_v31  ;;  %v6447_v31 = vld [vmem:[%s12597_s20 + $0x268] sm:$0xff] }
0x25fd   : > { %v8904_v32 = vpop.eup %8903 }
0x25fe   : > { %v8906_v34 = vpop.eup %8905  ;;  %7832 = vmatprep.mubr.msk.f32.mxu1 %vm6293_vm9, %v8904_v32  ;;  %v6679_v32 = vld [vmem:[%s12597_s20 + $0x9a8] sm:$0xff] }
0x25ff   : > { %6362 = vmatmul.mubr.f32.vlgmr.msra.gmra.mxu1 %v8906_v34  ;;  %v6678_v34 = vld [vmem:[%s12597_s20 + $0x9a0] sm:$0xff] }
0x2600   : > { %6973 = vmatpush1.msra.mxu1 %v6642_v33  ;;  %v6676_v33 = vld [vmem:[%s12597_s20 + $0x990] sm:$0xff] }
0x2601   : > { %6974 = vmatprep.subr.mxu1 %v6625_v35  ;;  %v6659_v35 = vld [vmem:[%s12597_s20 + $0x908] sm:$0xff]  ;;  %6962 = vmatpush2.msra.mxu0 %v6676_v33  ;;  %v6446_v33 = vld [vmem:[%s12597_s20 + $0x260] sm:$0xff] }
0x2602   : > { %6975 = vmatpush1.msra.mxu1 %v6624_v36  ;;  %v6661_v36 = vld [vmem:[%s12597_s20 + $0x918] sm:$0xff]  ;;  %6963 = vmatprep.subr.mxu0 %v6659_v35 }
0x2603   : > { %6976 = vmatprep.subr.mxu1 %v6607_v37  ;;  %v6658_v37 = vld [vmem:[%s12597_s20 + $0x900] sm:$0xff]  ;;  %v6429_v35 = vld [vmem:[%s12597_s20 + $0x1d8] sm:$0xff] }
0x2604   : > { %6977 = vmatpush1.msra.mxu1 %v6606_v39  ;;  %v6660_v39 = vld [vmem:[%s12597_s20 + $0x910] sm:$0xff]  ;;  %6964 = vmatpush2.msra.mxu0 %v6658_v37 }
0x2605   : > { %6978 = vmatprep.subr.mxu1 %v6589_v38  ;;  %v6645_v38 = vld [vmem:[%s12597_s20 + $0x898] sm:$0xff]  ;;  %v6428_v37 = vld [vmem:[%s12597_s20 + $0x1d0] sm:$0xff] }
0x2606   : > { %6979 = vmatpush1.msra.mxu1 %v6588_v40  ;;  %v6647_v40 = vld [vmem:[%s12597_s20 + $0x8a8] sm:$0xff]  ;;  %7043 = vmatprep.subr.mxu0 %v6645_v38 }
0x2607   : > { %6980 = vmatprep.subr.mxu1 %v6571_v41  ;;  %v6281_v41 = vld [vmem:[%s12599_s19] sm:$0x3]  ;;  %v6411_v38 = vld [vmem:[%s12597_s20 + $0x148] sm:$0xff] }
0x2608   : > { %6981 = vmatpush1.msra.mxu1 %v6570_v27  ;;  %v6286_v27 = vrot.slane %v6281_v41, %v11217_v23 }
0x2609   : > { %6982 = vmatprep.subr.mxu1 %v6553_v42  ;;  %v6290_v42 = vrot.slane %v6281_v41, %v11223_v25  ;;  %v6410_v41 = vld [vmem:[%s12597_s20 + $0x140] sm:$0xff] }
0x260a   : > { %6983 = vmatpush1.msra.mxu1 %v6552_v56 }
0x260b   : > { %6984 = vmatprep.subr.mxu1 %v6535_v44 }
0x260c   : > { %6985 = vmatpush1.msra.mxu1 %v6534_v45 }
0x260d   : > { %6986 = vmatprep.subr.mxu1 %v6517_v46 }
0x260e   : > { %6987 = vmatpush1.msra.mxu1 %v6516_v47 }
0x260f   : > { %6988 = vmatprep.subr.mxu1 %v6499_v48  ;;  %v6644_v48 = vld [vmem:[%s12597_s20 + $0x890] sm:$0xff] }
0x2610   : > { %6989 = vmatpush1.msra.mxu1 %v6498_v49  ;;  %v6646_v49 = vld [vmem:[%s12597_s20 + $0x8a0] sm:$0xff] }
0x2611   : > { %6990 = vmatprep.subr.mxu1 %v6481_v50 }
0x2612   : > { %6991 = vmatpush1.msra.mxu1 %v6480_v51  ;;  %v6627_v51 = vld [vmem:[%s12597_s20 + $0x808] sm:$0xff] }
0x2613   : > { %6992 = vmatprep.subr.mxu1 %v6463_v52  ;;  %v6629_v52 = vld [vmem:[%s12597_s20 + $0x818] sm:$0xff] }
0x2614   : > { %6993 = vmatpush1.msra.mxu1 %v6462_v53  ;;  %v6626_v53 = vld [vmem:[%s12597_s20 + $0x800] sm:$0xff] }
0x2615   : > { %6994 = vmatprep.subr.mxu1 %v6445_v54  ;;  %v6628_v54 = vld [vmem:[%s12597_s20 + $0x810] sm:$0xff] }
0x2616   : > { %6995 = vmatpush1.msra.mxu1 %v6444_v55  ;;  %v6609_v55 = vld [vmem:[%s12597_s20 + $0x778] sm:$0xff] }
0x2617   : > { %6996 = vmatprep.subr.mxu1 %v6427_v57  ;;  %v6611_v57 = vld [vmem:[%s12597_s20 + $0x788] sm:$0xff] }
0x2618   : > { %6997 = vmatpush1.msra.mxu1 %v6426_v58  ;;  %v6608_v58 = vld [vmem:[%s12597_s20 + $0x770] sm:$0xff] }
0x2619   : > { %6998 = vmatprep.subr.mxu1 %v6409_v59  ;;  %v6610_v59 = vld [vmem:[%s12597_s20 + $0x780] sm:$0xff] }
0x261a   : > { %6999 = vmatpush1.msra.mxu1 %v6408_v60  ;;  %v6591_v60 = vld [vmem:[%s12597_s20 + $0x6e8] sm:$0xff] }
0x261b   : > { %7000 = vmatprep.subr.mxu1 %v6391_v61  ;;  %v6593_v61 = vld [vmem:[%s12597_s20 + $0x6f8] sm:$0xff] }
0x261c   : > { %7001 = vmatpush1.msra.mxu1 %v6390_v63  ;;  %v6592_v63 = vld [vmem:[%s12597_s20 + $0x6f0] sm:$0xff] }
0x261d   : > { %7002 = vmatprep.subr.mxu1 %v6373_v0  ;;  %v6575_v0 = vld [vmem:[%s12597_s20 + $0x668] sm:$0xff] }
0x261e   : > { %7003 = vmatpush1.msra.mxu1 %v6372_v2  ;;  %v6574_v2 = vld [vmem:[%s12597_s20 + $0x660] sm:$0xff] }
0x261f   : > { %7020 = vmatprep.subr.mxu1 %v6787_v4  ;;  %v6557_v4 = vld [vmem:[%s12597_s20 + $0x5d8] sm:$0xff] }
0x2620   : > { %7021 = vmatpush2.msra.mxu1 %v6786_v6  ;;  %v6556_v6 = vld [vmem:[%s12597_s20 + $0x5d0] sm:$0xff] }
0x2621   : > { %7022 = vmatprep.subr.mxu1 %v6769_v8  ;;  %v6539_v8 = vld [vmem:[%s12597_s20 + $0x548] sm:$0xff] }
0x2622   : > { %7023 = vmatpush2.msra.mxu1 %v6768_v22  ;;  %v6538_v22 = vld [vmem:[%s12597_s20 + $0x540] sm:$0xff] }
0x2623   : > { %7024 = vmatprep.subr.mxu1 %v6751_v12  ;;  %v6521_v12 = vld [vmem:[%s12597_s20 + $0x4b8] sm:$0xff] }
0x2624   : > { %7025 = vmatpush2.msra.mxu1 %v6750_v14  ;;  %v6520_v14 = vld [vmem:[%s12597_s20 + $0x4b0] sm:$0xff] }
0x2625   : > { %7026 = vmatprep.subr.mxu1 %v6733_v16  ;;  %v6503_v16 = vld [vmem:[%s12597_s20 + $0x428] sm:$0xff] }
0x2626   : > { %7027 = vmatpush2.msra.mxu1 %v6732_v18  ;;  %v6502_v18 = vld [vmem:[%s12597_s20 + $0x420] sm:$0xff] }
0x2627   : > { %7028 = vmatprep.subr.mxu1 %v6715_v20  ;;  %v6485_v20 = vld [vmem:[%s12597_s20 + $0x398] sm:$0xff] }
0x2628   : > { %7029 = vmatpush2.msra.mxu1 %v6714_v26  ;;  %v6484_v26 = vld [vmem:[%s12597_s20 + $0x390] sm:$0xff] }
0x2629   : > { %7030 = vmatprep.subr.mxu1 %v6697_v29  ;;  %v6467_v29 = vld [vmem:[%s12597_s20 + $0x308] sm:$0xff] }
0x262a   : > { %7031 = vmatpush2.msra.mxu1 %v6696_v43  ;;  %v6466_v43 = vld [vmem:[%s12597_s20 + $0x300] sm:$0xff] }
0x262b   : > { %7032 = vmatprep.subr.mxu1 %v6679_v32  ;;  %v6449_v32 = vld [vmem:[%s12597_s20 + $0x278] sm:$0xff] }
0x262c   : > { %7033 = vmatpush2.msra.mxu1 %v6678_v34  ;;  %v6448_v34 = vld [vmem:[%s12597_s20 + $0x270] sm:$0xff] }
0x262d   : > { %7034 = vmatprep.subr.mxu1 %v6661_v36  ;;  %v6431_v36 = vld [vmem:[%s12597_s20 + $0x1e8] sm:$0xff] }
0x262e   : > { %7035 = vmatpush2.msra.mxu1 %v6660_v39  ;;  %v6430_v39 = vld [vmem:[%s12597_s20 + $0x1e0] sm:$0xff] }
0x262f   : > { %7114 = vmatprep.subr.mxu1 %v6647_v40  ;;  %v6413_v40 = vld [vmem:[%s12597_s20 + $0x158] sm:$0xff] }
0x26bf   : > { %v6363_v56 = vpop.f32.mrf.mxu1 }
0x26c0   : > { %v6364_v44 = vadd.f32 %v6363_v56, %v6286_v27  ;;  %v6412_v27 = vld [vmem:[%s12597_s20 + $0x150] sm:$0xff]  ;;  %v6395_v56 = vld [vmem:[%s12597_s20 + $0xc8] sm:$0xff] }
0x26c1   : > { %v6365_v45 = vpop.f32.mrf.mxu1 }
0x26c2   : > { %v6366_v46 = vadd.f32 %v6365_v45, %v6290_v42  ;;  %v6393_v42 = vld [vmem:[%s12597_s20 + $0xb8] sm:$0xff]  ;;  %v6394_v45 = vld [vmem:[%s12597_s20 + $0xc0] sm:$0xff] }
0x26c4   : > { %8907 = vtanh.f32 %v6366_v46  ;;  %v6375_v46 = vld [vmem:[%s12597_s20 + $0x28] sm:$0xff] }
0x26c5   : > { %8909 = vtanh.f32 %v6364_v44  ;;  %v6392_v44 = vld [vmem:[%s12597_s20 + $0xb0] sm:$0xff] }
0x26d1   : > { %v11437_v47 = vpop.eup %8907 }
0x26d2   : > { %v11445_v50 = vpop.eup %8909  ;;  %7833 = vmatprep.mubr.msk.f32.mxu0 %vm6293_vm9, %v11437_v47  ;;  %7834 = vmatprep.mubr.msk.f32.mxu1 %vm6293_vm9, %v11437_v47 }
0x26d3   : > { %6966 = vmatmul.mubr.f32.vlgmr.msra.gmra.mxu0 %v11445_v50  ;;  %7037 = vmatmul.mubr.f32.vlgmr.msra.gmra.mxu1 %v11445_v50 }
0x26d4   : > { %7044 = vmatpush1.msra.mxu0 %v6644_v48  ;;  %7115 = vmatpush1.msra.mxu1 %v6646_v49  ;;  %v6377_v48 = vld [vmem:[%s12597_s20 + $0x38] sm:$0xff]  ;;  %v6374_v49 = vld [vmem:[%s12597_s20 + $0x20] sm:$0xff] }
0x26d5   : > { %7045 = vmatprep.subr.mxu0 %v6627_v51  ;;  %7835 = vmatprep.mubr.msk.f32.mxu0 %vm6293_vm9, %v11437_v47  ;;  %v6376_v51 = vld [vmem:[%s12597_s20 + $0x30] sm:$0xff] }
0x26d6   : > { %7116 = vmatprep.subr.mxu1 %v6629_v52  ;;  %7836 = vmatprep.mubr.msk.f32.mxu1 %vm6293_vm9, %v11437_v47  ;;  %v6789_v52 = vld [vmem:[%s12597_s20 + $0xd18] sm:$0xff] }
0x26d7   : > { %7046 = vmatpush1.msra.mxu0 %v6626_v53  ;;  %7117 = vmatpush1.msra.mxu1 %v6628_v54  ;;  %v6791_v53 = vld [vmem:[%s12597_s20 + $0xd28] sm:$0xff]  ;;  %v6788_v54 = vld [vmem:[%s12597_s20 + $0xd10] sm:$0xff] }
0x26d8   : > { %7047 = vmatprep.subr.mxu0 %v6609_v55  ;;  %7118 = vmatprep.subr.mxu1 %v6611_v57  ;;  %v6790_v55 = vld [vmem:[%s12597_s20 + $0xd20] sm:$0xff]  ;;  %v6771_v57 = vld [vmem:[%s12597_s20 + $0xc88] sm:$0xff] }
0x26d9   : > { %7048 = vmatpush1.msra.mxu0 %v6608_v58  ;;  %7119 = vmatpush1.msra.mxu1 %v6610_v59  ;;  %v6773_v58 = vld [vmem:[%s12597_s20 + $0xc98] sm:$0xff]  ;;  %v6770_v59 = vld [vmem:[%s12597_s20 + $0xc80] sm:$0xff] }
0x26da   : > { %7049 = vmatprep.subr.mxu0 %v6591_v60  ;;  %7120 = vmatprep.subr.mxu1 %v6593_v61  ;;  %v6772_v60 = vld [vmem:[%s12597_s20 + $0xc90] sm:$0xff]  ;;  %v6753_v61 = vld [vmem:[%s12597_s20 + $0xbf8] sm:$0xff] }
0x26db   : > { %7050 = vmatpush1.msra.mxu0 %v6590_v62  ;;  %7121 = vmatpush1.msra.mxu1 %v6592_v63  ;;  %v6755_v62 = vld [vmem:[%s12597_s20 + $0xc08] sm:$0xff]  ;;  %v6752_v63 = vld [vmem:[%s12597_s20 + $0xbf0] sm:$0xff] }
0x26dc   : > { %7051 = vmatprep.subr.mxu0 %v6573_v11  ;;  %7122 = vmatprep.subr.mxu1 %v6575_v0  ;;  %v6754_v11 = vld [vmem:[%s12597_s20 + $0xc00] sm:$0xff]  ;;  %v6735_v0 = vld [vmem:[%s12597_s20 + $0xb68] sm:$0xff] }
0x26dd   : > { %7052 = vmatpush1.msra.mxu0 %v6572_v1  ;;  %7123 = vmatpush1.msra.mxu1 %v6574_v2  ;;  %v6737_v1 = vld [vmem:[%s12597_s20 + $0xb78] sm:$0xff]  ;;  %v6734_v2 = vld [vmem:[%s12597_s20 + $0xb60] sm:$0xff] }
0x26de   : > { %7053 = vmatprep.subr.mxu0 %v6555_v3  ;;  %7124 = vmatprep.subr.mxu1 %v6557_v4  ;;  %v6736_v3 = vld [vmem:[%s12597_s20 + $0xb70] sm:$0xff]  ;;  %v6717_v4 = vld [vmem:[%s12597_s20 + $0xad8] sm:$0xff] }
0x26df   : > { %7054 = vmatpush1.msra.mxu0 %v6554_v5  ;;  %7125 = vmatpush1.msra.mxu1 %v6556_v6  ;;  %v6719_v5 = vld [vmem:[%s12597_s20 + $0xae8] sm:$0xff]  ;;  %v6716_v6 = vld [vmem:[%s12597_s20 + $0xad0] sm:$0xff] }
0x26e0   : > { %7055 = vmatprep.subr.mxu0 %v6537_v7  ;;  %7126 = vmatprep.subr.mxu1 %v6539_v8  ;;  %v6718_v7 = vld [vmem:[%s12597_s20 + $0xae0] sm:$0xff]  ;;  %v6699_v8 = vld [vmem:[%s12597_s20 + $0xa48] sm:$0xff] }
0x26e1   : > { %7056 = vmatpush1.msra.mxu0 %v6536_v9  ;;  %7127 = vmatpush1.msra.mxu1 %v6538_v22  ;;  %v6701_v9 = vld [vmem:[%s12597_s20 + $0xa58] sm:$0xff]  ;;  %v6698_v22 = vld [vmem:[%s12597_s20 + $0xa40] sm:$0xff] }
0x26e2   : > { %7057 = vmatprep.subr.mxu0 %v6519_v10  ;;  %7128 = vmatprep.subr.mxu1 %v6521_v12  ;;  %v6700_v10 = vld [vmem:[%s12597_s20 + $0xa50] sm:$0xff]  ;;  %v6681_v12 = vld [vmem:[%s12597_s20 + $0x9b8] sm:$0xff] }
0x26e3   : > { %7058 = vmatpush1.msra.mxu0 %v6518_v13  ;;  %7129 = vmatpush1.msra.mxu1 %v6520_v14  ;;  %v6683_v13 = vld [vmem:[%s12597_s20 + $0x9c8] sm:$0xff]  ;;  %v6680_v14 = vld [vmem:[%s12597_s20 + $0x9b0] sm:$0xff] }
0x26e4   : > { %7059 = vmatprep.subr.mxu0 %v6501_v15  ;;  %7130 = vmatprep.subr.mxu1 %v6503_v16  ;;  %v6682_v15 = vld [vmem:[%s12597_s20 + $0x9c0] sm:$0xff]  ;;  %v6663_v16 = vld [vmem:[%s12597_s20 + $0x928] sm:$0xff] }
0x26e5   : > { %7060 = vmatpush1.msra.mxu0 %v6500_v17  ;;  %7131 = vmatpush1.msra.mxu1 %v6502_v18  ;;  %v6665_v17 = vld [vmem:[%s12597_s20 + $0x938] sm:$0xff]  ;;  %v6662_v18 = vld [vmem:[%s12597_s20 + $0x920] sm:$0xff] }
0x26e6   : > { %7061 = vmatprep.subr.mxu0 %v6483_v19  ;;  %7132 = vmatprep.subr.mxu1 %v6485_v20  ;;  %v6664_v19 = vld [vmem:[%s12597_s20 + $0x930] sm:$0xff]  ;;  %v6649_v20 = vld [vmem:[%s12597_s20 + $0x8b8] sm:$0xff] }
0x26e7   : > { %7062 = vmatpush1.msra.mxu0 %v6482_v24  ;;  %7133 = vmatpush1.msra.mxu1 %v6484_v26  ;;  %v6651_v24 = vld [vmem:[%s12597_s20 + $0x8c8] sm:$0xff]  ;;  %v6648_v26 = vld [vmem:[%s12597_s20 + $0x8b0] sm:$0xff] }
0x26e8   : > { %7063 = vmatprep.subr.mxu0 %v6465_v28  ;;  %7134 = vmatprep.subr.mxu1 %v6467_v29  ;;  %v6650_v28 = vld [vmem:[%s12597_s20 + $0x8c0] sm:$0xff]  ;;  %v6631_v29 = vld [vmem:[%s12597_s20 + $0x828] sm:$0xff] }
0x26e9   : > { %7064 = vmatpush1.msra.mxu0 %v6464_v30  ;;  %7135 = vmatpush1.msra.mxu1 %v6466_v43  ;;  %v6633_v30 = vld [vmem:[%s12597_s20 + $0x838] sm:$0xff]  ;;  %v6630_v43 = vld [vmem:[%s12597_s20 + $0x820] sm:$0xff] }
0x26ea   : > { %7065 = vmatprep.subr.mxu0 %v6447_v31  ;;  %7136 = vmatprep.subr.mxu1 %v6449_v32  ;;  %v6632_v31 = vld [vmem:[%s12597_s20 + $0x830] sm:$0xff]  ;;  %v6613_v32 = vld [vmem:[%s12597_s20 + $0x798] sm:$0xff] }
0x26eb   : > { %7066 = vmatpush1.msra.mxu0 %v6446_v33  ;;  %7137 = vmatpush1.msra.mxu1 %v6448_v34  ;;  %v6615_v33 = vld [vmem:[%s12597_s20 + $0x7a8] sm:$0xff]  ;;  %v6612_v34 = vld [vmem:[%s12597_s20 + $0x790] sm:$0xff] }
0x26ec   : > { %7067 = vmatprep.subr.mxu0 %v6429_v35  ;;  %7138 = vmatprep.subr.mxu1 %v6431_v36  ;;  %v6614_v35 = vld [vmem:[%s12597_s20 + $0x7a0] sm:$0xff]  ;;  %v6595_v36 = vld [vmem:[%s12597_s20 + $0x708] sm:$0xff] }
0x26ed   : > { %7068 = vmatpush1.msra.mxu0 %v6428_v37  ;;  %7139 = vmatpush1.msra.mxu1 %v6430_v39  ;;  %v6597_v37 = vld [vmem:[%s12597_s20 + $0x718] sm:$0xff]  ;;  %v6594_v39 = vld [vmem:[%s12597_s20 + $0x700] sm:$0xff] }
0x26ee   : > { %7069 = vmatprep.subr.mxu0 %v6411_v38  ;;  %7140 = vmatprep.subr.mxu1 %v6413_v40  ;;  %v6596_v38 = vld [vmem:[%s12597_s20 + $0x710] sm:$0xff]  ;;  %v6577_v40 = vld [vmem:[%s12597_s20 + $0x678] sm:$0xff] }
0x26ef   : > { %7070 = vmatpush1.msra.mxu0 %v6410_v41  ;;  %7141 = vmatpush1.msra.mxu1 %v6412_v27  ;;  %v6579_v41 = vld [vmem:[%s12597_s20 + $0x688] sm:$0xff]  ;;  %v6576_v27 = vld [vmem:[%s12597_s20 + $0x670] sm:$0xff] }
0x26f0   : > { %7071 = vmatprep.subr.mxu0 %v6393_v42  ;;  %7142 = vmatprep.subr.mxu1 %v6395_v56  ;;  %v6578_v42 = vld [vmem:[%s12597_s20 + $0x680] sm:$0xff]  ;;  %v6559_v56 = vld [vmem:[%s12597_s20 + $0x5e8] sm:$0xff] }
0x26f1   : > { %7072 = vmatpush1.msra.mxu0 %v6392_v44  ;;  %7143 = vmatpush1.msra.mxu1 %v6394_v45  ;;  %v6561_v44 = vld [vmem:[%s12597_s20 + $0x5f8] sm:$0xff]  ;;  %v6558_v45 = vld [vmem:[%s12597_s20 + $0x5e0] sm:$0xff] }
0x26f2   : > { %7073 = vmatprep.subr.mxu0 %v6375_v46  ;;  %7144 = vmatprep.subr.mxu1 %v6377_v48  ;;  %v6560_v46 = vld [vmem:[%s12597_s20 + $0x5f0] sm:$0xff]  ;;  %v6541_v48 = vld [vmem:[%s12597_s20 + $0x558] sm:$0xff] }
0x26f3   : > { %7074 = vmatpush1.msra.mxu0 %v6374_v49  ;;  %7145 = vmatpush1.msra.mxu1 %v6376_v51  ;;  %v6543_v49 = vld [vmem:[%s12597_s20 + $0x568] sm:$0xff]  ;;  %v6540_v51 = vld [vmem:[%s12597_s20 + $0x550] sm:$0xff] }
0x26f4   : > { %7091 = vmatprep.subr.mxu0 %v6789_v52  ;;  %7162 = vmatprep.subr.mxu1 %v6791_v53  ;;  %v6542_v52 = vld [vmem:[%s12597_s20 + $0x560] sm:$0xff]  ;;  %v6523_v53 = vld [vmem:[%s12597_s20 + $0x4c8] sm:$0xff] }
0x26f5   : > { %7092 = vmatpush2.msra.mxu0 %v6788_v54  ;;  %7163 = vmatpush2.msra.mxu1 %v6790_v55  ;;  %v6525_v54 = vld [vmem:[%s12597_s20 + $0x4d8] sm:$0xff]  ;;  %v6522_v55 = vld [vmem:[%s12597_s20 + $0x4c0] sm:$0xff] }
0x26f6   : > { %7093 = vmatprep.subr.mxu0 %v6771_v57  ;;  %7164 = vmatprep.subr.mxu1 %v6773_v58  ;;  %v6524_v57 = vld [vmem:[%s12597_s20 + $0x4d0] sm:$0xff]  ;;  %v6505_v58 = vld [vmem:[%s12597_s20 + $0x438] sm:$0xff] }
0x26f7   : > { %7094 = vmatpush2.msra.mxu0 %v6770_v59  ;;  %7165 = vmatpush2.msra.mxu1 %v6772_v60  ;;  %v6507_v59 = vld [vmem:[%s12597_s20 + $0x448] sm:$0xff]  ;;  %v6504_v60 = vld [vmem:[%s12597_s20 + $0x430] sm:$0xff] }
0x26f8   : > { %7095 = vmatprep.subr.mxu0 %v6753_v61  ;;  %7166 = vmatprep.subr.mxu1 %v6755_v62  ;;  %v6506_v61 = vld [vmem:[%s12597_s20 + $0x440] sm:$0xff]  ;;  %v6487_v62 = vld [vmem:[%s12597_s20 + $0x3a8] sm:$0xff] }
0x26f9   : > { %7096 = vmatpush2.msra.mxu0 %v6752_v63  ;;  %7167 = vmatpush2.msra.mxu1 %v6754_v11  ;;  %v6489_v63 = vld [vmem:[%s12597_s20 + $0x3b8] sm:$0xff]  ;;  %v6486_v11 = vld [vmem:[%s12597_s20 + $0x3a0] sm:$0xff] }
0x26fa   : > { %7097 = vmatprep.subr.mxu0 %v6735_v0  ;;  %7168 = vmatprep.subr.mxu1 %v6737_v1  ;;  %v6488_v0 = vld [vmem:[%s12597_s20 + $0x3b0] sm:$0xff]  ;;  %v6469_v1 = vld [vmem:[%s12597_s20 + $0x318] sm:$0xff] }
0x26fb   : > { %7098 = vmatpush2.msra.mxu0 %v6734_v2  ;;  %7169 = vmatpush2.msra.mxu1 %v6736_v3  ;;  %v6471_v2 = vld [vmem:[%s12597_s20 + $0x328] sm:$0xff]  ;;  %v6468_v3 = vld [vmem:[%s12597_s20 + $0x310] sm:$0xff] }
0x26fc   : > { %7099 = vmatprep.subr.mxu0 %v6717_v4  ;;  %7170 = vmatprep.subr.mxu1 %v6719_v5  ;;  %v6470_v4 = vld [vmem:[%s12597_s20 + $0x320] sm:$0xff]  ;;  %v6451_v5 = vld [vmem:[%s12597_s20 + $0x288] sm:$0xff] }
0x26fd   : > { %7100 = vmatpush2.msra.mxu0 %v6716_v6  ;;  %7171 = vmatpush2.msra.mxu1 %v6718_v7  ;;  %v6453_v6 = vld [vmem:[%s12597_s20 + $0x298] sm:$0xff]  ;;  %v6450_v7 = vld [vmem:[%s12597_s20 + $0x280] sm:$0xff] }
0x26fe   : > { %7101 = vmatprep.subr.mxu0 %v6699_v8  ;;  %7172 = vmatprep.subr.mxu1 %v6701_v9  ;;  %v6452_v8 = vld [vmem:[%s12597_s20 + $0x290] sm:$0xff]  ;;  %v6433_v9 = vld [vmem:[%s12597_s20 + $0x1f8] sm:$0xff] }
0x26ff   : > { %7102 = vmatpush2.msra.mxu0 %v6698_v22  ;;  %7173 = vmatpush2.msra.mxu1 %v6700_v10  ;;  %v6435_v22 = vld [vmem:[%s12597_s20 + $0x208] sm:$0xff]  ;;  %v6432_v10 = vld [vmem:[%s12597_s20 + $0x1f0] sm:$0xff] }
0x2700   : > { %7103 = vmatprep.subr.mxu0 %v6681_v12  ;;  %7174 = vmatprep.subr.mxu1 %v6683_v13  ;;  %v6434_v12 = vld [vmem:[%s12597_s20 + $0x200] sm:$0xff]  ;;  %v6415_v13 = vld [vmem:[%s12597_s20 + $0x168] sm:$0xff] }
0x2701   : > { %7104 = vmatpush2.msra.mxu0 %v6680_v14  ;;  %7175 = vmatpush2.msra.mxu1 %v6682_v15  ;;  %v6417_v14 = vld [vmem:[%s12597_s20 + $0x178] sm:$0xff]  ;;  %v6414_v15 = vld [vmem:[%s12597_s20 + $0x160] sm:$0xff] }
0x2702   : > { %7105 = vmatprep.subr.mxu0 %v6663_v16  ;;  %7176 = vmatprep.subr.mxu1 %v6665_v17  ;;  %v6416_v16 = vld [vmem:[%s12597_s20 + $0x170] sm:$0xff]  ;;  %v6397_v17 = vld [vmem:[%s12597_s20 + $0xd8] sm:$0xff] }
0x2703   : > { %7106 = vmatpush2.msra.mxu0 %v6662_v18  ;;  %7177 = vmatpush2.msra.mxu1 %v6664_v19  ;;  %v6399_v18 = vld [vmem:[%s12597_s20 + $0xe8] sm:$0xff]  ;;  %v6396_v19 = vld [vmem:[%s12597_s20 + $0xd0] sm:$0xff] }
0x2704   : > { %7108 = vmatmul.mubr.f32.vlgmr.msra.gmra.mxu0 %v11445_v50  ;;  %7179 = vmatmul.mubr.f32.vlgmr.msra.gmra.mxu1 %v11445_v50 }
0x2705   : > { %7185 = vmatprep.subr.mxu0 %v6649_v20  ;;  %7256 = vmatprep.subr.mxu1 %v6651_v24  ;;  %v6398_v20 = vld [vmem:[%s12597_s20 + $0xe0] sm:$0xff]  ;;  %v6379_v24 = vld [vmem:[%s12597_s20 + $0x48] sm:$0xff] }
0x2706   : > { %7186 = vmatpush1.msra.mxu0 %v6648_v26  ;;  %7837 = vmatprep.mubr.msk.f32.mxu0 %vm6293_vm9, %v11437_v47  ;;  %v6381_v26 = vld [vmem:[%s12597_s20 + $0x58] sm:$0xff] }
0x2707   : > { %7257 = vmatpush1.msra.mxu1 %v6650_v28  ;;  %7838 = vmatprep.mubr.msk.f32.mxu1 %vm6293_vm9, %v11437_v47  ;;  %v6378_v28 = vld [vmem:[%s12597_s20 + $0x40] sm:$0xff] }
0x2708   : > { %7187 = vmatprep.subr.mxu0 %v6631_v29  ;;  %7258 = vmatprep.subr.mxu1 %v6633_v30  ;;  %v6380_v29 = vld [vmem:[%s12597_s20 + $0x50] sm:$0xff]  ;;  %v6793_v30 = vld [vmem:[%s12597_s20 + $0xd38] sm:$0xff] }
0x2709   : > { %7188 = vmatpush1.msra.mxu0 %v6630_v43  ;;  %7259 = vmatpush1.msra.mxu1 %v6632_v31  ;;  %v6795_v43 = vld [vmem:[%s12597_s20 + $0xd48] sm:$0xff]  ;;  %v6792_v31 = vld [vmem:[%s12597_s20 + $0xd30] sm:$0xff] }
0x270a   : > { %7189 = vmatprep.subr.mxu0 %v6613_v32  ;;  %7260 = vmatprep.subr.mxu1 %v6615_v33  ;;  %v6794_v32 = vld [vmem:[%s12597_s20 + $0xd40] sm:$0xff]  ;;  %v6775_v33 = vld [vmem:[%s12597_s20 + $0xca8] sm:$0xff] }
0x270b   : > { %7190 = vmatpush1.msra.mxu0 %v6612_v34  ;;  %7261 = vmatpush1.msra.mxu1 %v6614_v35  ;;  %v6777_v34 = vld [vmem:[%s12597_s20 + $0xcb8] sm:$0xff]  ;;  %v6774_v35 = vld [vmem:[%s12597_s20 + $0xca0] sm:$0xff] }
0x270c   : > { %7191 = vmatprep.subr.mxu0 %v6595_v36  ;;  %7262 = vmatprep.subr.mxu1 %v6597_v37  ;;  %v6776_v36 = vld [vmem:[%s12597_s20 + $0xcb0] sm:$0xff]  ;;  %v6757_v37 = vld [vmem:[%s12597_s20 + $0xc18] sm:$0xff] }
0x270d   : > { %7192 = vmatpush1.msra.mxu0 %v6594_v39  ;;  %7263 = vmatpush1.msra.mxu1 %v6596_v38  ;;  %v6759_v39 = vld [vmem:[%s12597_s20 + $0xc28] sm:$0xff]  ;;  %v6756_v38 = vld [vmem:[%s12597_s20 + $0xc10] sm:$0xff] }
0x270e   : > { %7193 = vmatprep.subr.mxu0 %v6577_v40  ;;  %7264 = vmatprep.subr.mxu1 %v6579_v41  ;;  %v6758_v40 = vld [vmem:[%s12597_s20 + $0xc20] sm:$0xff]  ;;  %v6739_v41 = vld [vmem:[%s12597_s20 + $0xb88] sm:$0xff] }
0x270f   : > { %7194 = vmatpush1.msra.mxu0 %v6576_v27  ;;  %7265 = vmatpush1.msra.mxu1 %v6578_v42  ;;  %v6741_v27 = vld [vmem:[%s12597_s20 + $0xb98] sm:$0xff]  ;;  %v6738_v42 = vld [vmem:[%s12597_s20 + $0xb80] sm:$0xff] }
0x2710   : > { %7195 = vmatprep.subr.mxu0 %v6559_v56  ;;  %7266 = vmatprep.subr.mxu1 %v6561_v44  ;;  %v6740_v56 = vld [vmem:[%s12597_s20 + $0xb90] sm:$0xff]  ;;  %v6721_v44 = vld [vmem:[%s12597_s20 + $0xaf8] sm:$0xff] }
0x2711   : > { %7196 = vmatpush1.msra.mxu0 %v6558_v45  ;;  %7267 = vmatpush1.msra.mxu1 %v6560_v46  ;;  %v6723_v45 = vld [vmem:[%s12597_s20 + $0xb08] sm:$0xff]  ;;  %v6720_v46 = vld [vmem:[%s12597_s20 + $0xaf0] sm:$0xff] }
0x2712   : > { %7197 = vmatprep.subr.mxu0 %v6541_v48  ;;  %7268 = vmatprep.subr.mxu1 %v6543_v49  ;;  %v6722_v48 = vld [vmem:[%s12597_s20 + $0xb00] sm:$0xff]  ;;  %v6703_v49 = vld [vmem:[%s12597_s20 + $0xa68] sm:$0xff] }
0x2713   : > { %7198 = vmatpush1.msra.mxu0 %v6540_v51  ;;  %7269 = vmatpush1.msra.mxu1 %v6542_v52  ;;  %v6705_v51 = vld [vmem:[%s12597_s20 + $0xa78] sm:$0xff]  ;;  %v6702_v52 = vld [vmem:[%s12597_s20 + $0xa60] sm:$0xff] }
0x2714   : > { %7199 = vmatprep.subr.mxu0 %v6523_v53  ;;  %7270 = vmatprep.subr.mxu1 %v6525_v54  ;;  %v6704_v53 = vld [vmem:[%s12597_s20 + $0xa70] sm:$0xff]  ;;  %v6685_v54 = vld [vmem:[%s12597_s20 + $0x9d8] sm:$0xff] }
0x2715   : > { %7200 = vmatpush1.msra.mxu0 %v6522_v55  ;;  %7271 = vmatpush1.msra.mxu1 %v6524_v57  ;;  %v6687_v55 = vld [vmem:[%s12597_s20 + $0x9e8] sm:$0xff]  ;;  %v6684_v57 = vld [vmem:[%s12597_s20 + $0x9d0] sm:$0xff] }
0x2716   : > { %7201 = vmatprep.subr.mxu0 %v6505_v58  ;;  %7272 = vmatprep.subr.mxu1 %v6507_v59  ;;  %v6686_v58 = vld [vmem:[%s12597_s20 + $0x9e0] sm:$0xff]  ;;  %v6667_v59 = vld [vmem:[%s12597_s20 + $0x948] sm:$0xff] }
0x2717   : > { %7202 = vmatpush1.msra.mxu0 %v6504_v60  ;;  %7273 = vmatpush1.msra.mxu1 %v6506_v61  ;;  %v6669_v60 = vld [vmem:[%s12597_s20 + $0x958] sm:$0xff]  ;;  %v6666_v61 = vld [vmem:[%s12597_s20 + $0x940] sm:$0xff] }
0x2718   : > { %7203 = vmatprep.subr.mxu0 %v6487_v62  ;;  %7274 = vmatprep.subr.mxu1 %v6489_v63  ;;  %v6668_v62 = vld [vmem:[%s12597_s20 + $0x950] sm:$0xff]  ;;  %v6653_v63 = vld [vmem:[%s12597_s20 + $0x8d8] sm:$0xff] }
0x2719   : > { %7204 = vmatpush1.msra.mxu0 %v6486_v11  ;;  %7275 = vmatpush1.msra.mxu1 %v6488_v0  ;;  %v6655_v11 = vld [vmem:[%s12597_s20 + $0x8e8] sm:$0xff]  ;;  %v6652_v0 = vld [vmem:[%s12597_s20 + $0x8d0] sm:$0xff] }
0x271a   : > { %7205 = vmatprep.subr.mxu0 %v6469_v1  ;;  %7276 = vmatprep.subr.mxu1 %v6471_v2  ;;  %v6654_v1 = vld [vmem:[%s12597_s20 + $0x8e0] sm:$0xff]  ;;  %v6635_v2 = vld [vmem:[%s12597_s20 + $0x848] sm:$0xff] }
0x271b   : > { %7206 = vmatpush1.msra.mxu0 %v6468_v3  ;;  %7277 = vmatpush1.msra.mxu1 %v6470_v4  ;;  %v6637_v3 = vld [vmem:[%s12597_s20 + $0x858] sm:$0xff]  ;;  %v6634_v4 = vld [vmem:[%s12597_s20 + $0x840] sm:$0xff] }
0x271c   : > { %7207 = vmatprep.subr.mxu0 %v6451_v5  ;;  %7278 = vmatprep.subr.mxu1 %v6453_v6  ;;  %v6636_v5 = vld [vmem:[%s12597_s20 + $0x850] sm:$0xff]  ;;  %v6617_v6 = vld [vmem:[%s12597_s20 + $0x7b8] sm:$0xff] }
0x271d   : > { %7208 = vmatpush1.msra.mxu0 %v6450_v7  ;;  %7279 = vmatpush1.msra.mxu1 %v6452_v8  ;;  %v6619_v7 = vld [vmem:[%s12597_s20 + $0x7c8] sm:$0xff]  ;;  %v6616_v8 = vld [vmem:[%s12597_s20 + $0x7b0] sm:$0xff] }
0x271e   : > { %7209 = vmatprep.subr.mxu0 %v6433_v9  ;;  %7280 = vmatprep.subr.mxu1 %v6435_v22  ;;  %v6618_v9 = vld [vmem:[%s12597_s20 + $0x7c0] sm:$0xff]  ;;  %v6599_v22 = vld [vmem:[%s12597_s20 + $0x728] sm:$0xff] }
0x271f   : > { %7210 = vmatpush1.msra.mxu0 %v6432_v10  ;;  %7281 = vmatpush1.msra.mxu1 %v6434_v12  ;;  %v6601_v10 = vld [vmem:[%s12597_s20 + $0x738] sm:$0xff]  ;;  %v6598_v12 = vld [vmem:[%s12597_s20 + $0x720] sm:$0xff] }
0x2720   : > { %7211 = vmatprep.subr.mxu0 %v6415_v13  ;;  %7282 = vmatprep.subr.mxu1 %v6417_v14  ;;  %v6600_v13 = vld [vmem:[%s12597_s20 + $0x730] sm:$0xff]  ;;  %v6581_v14 = vld [vmem:[%s12597_s20 + $0x698] sm:$0xff] }
0x2721   : > { %7212 = vmatpush1.msra.mxu0 %v6414_v15  ;;  %7283 = vmatpush1.msra.mxu1 %v6416_v16  ;;  %v6583_v15 = vld [vmem:[%s12597_s20 + $0x6a8] sm:$0xff]  ;;  %v6580_v16 = vld [vmem:[%s12597_s20 + $0x690] sm:$0xff] }
0x2722   : > { %7213 = vmatprep.subr.mxu0 %v6397_v17  ;;  %7284 = vmatprep.subr.mxu1 %v6399_v18  ;;  %v6582_v17 = vld [vmem:[%s12597_s20 + $0x6a0] sm:$0xff]  ;;  %v6563_v18 = vld [vmem:[%s12597_s20 + $0x608] sm:$0xff] }
0x2723   : > { %7214 = vmatpush1.msra.mxu0 %v6396_v19  ;;  %7285 = vmatpush1.msra.mxu1 %v6398_v20  ;;  %v6565_v19 = vld [vmem:[%s12597_s20 + $0x618] sm:$0xff]  ;;  %v6562_v20 = vld [vmem:[%s12597_s20 + $0x600] sm:$0xff] }
0x2724   : > { %7215 = vmatprep.subr.mxu0 %v6379_v24  ;;  %7286 = vmatprep.subr.mxu1 %v6381_v26  ;;  %v6564_v24 = vld [vmem:[%s12597_s20 + $0x610] sm:$0xff]  ;;  %v6545_v26 = vld [vmem:[%s12597_s20 + $0x578] sm:$0xff] }
0x2725   : > { %7216 = vmatpush1.msra.mxu0 %v6378_v28  ;;  %7287 = vmatpush1.msra.mxu1 %v6380_v29  ;;  %v6547_v28 = vld [vmem:[%s12597_s20 + $0x588] sm:$0xff]  ;;  %v6544_v29 = vld [vmem:[%s12597_s20 + $0x570] sm:$0xff] }
0x2726   : > { %7233 = vmatprep.subr.mxu0 %v6793_v30  ;;  %7304 = vmatprep.subr.mxu1 %v6795_v43  ;;  %v6546_v30 = vld [vmem:[%s12597_s20 + $0x580] sm:$0xff]  ;;  %v6527_v43 = vld [vmem:[%s12597_s20 + $0x4e8] sm:$0xff] }
0x2727   : > { %7234 = vmatpush2.msra.mxu0 %v6792_v31  ;;  %7305 = vmatpush2.msra.mxu1 %v6794_v32  ;;  %v6529_v31 = vld [vmem:[%s12597_s20 + $0x4f8] sm:$0xff]  ;;  %v6526_v32 = vld [vmem:[%s12597_s20 + $0x4e0] sm:$0xff] }
0x2728   : > { %7235 = vmatprep.subr.mxu0 %v6775_v33  ;;  %7306 = vmatprep.subr.mxu1 %v6777_v34  ;;  %v6528_v33 = vld [vmem:[%s12597_s20 + $0x4f0] sm:$0xff]  ;;  %v6509_v34 = vld [vmem:[%s12597_s20 + $0x458] sm:$0xff] }
0x2729   : > { %7236 = vmatpush2.msra.mxu0 %v6774_v35  ;;  %7307 = vmatpush2.msra.mxu1 %v6776_v36  ;;  %v6511_v35 = vld [vmem:[%s12597_s20 + $0x468] sm:$0xff]  ;;  %v6508_v36 = vld [vmem:[%s12597_s20 + $0x450] sm:$0xff] }
0x272a   : > { %7237 = vmatprep.subr.mxu0 %v6757_v37  ;;  %7308 = vmatprep.subr.mxu1 %v6759_v39  ;;  %v6510_v37 = vld [vmem:[%s12597_s20 + $0x460] sm:$0xff]  ;;  %v6491_v39 = vld [vmem:[%s12597_s20 + $0x3c8] sm:$0xff] }
0x272b   : > { %7238 = vmatpush2.msra.mxu0 %v6756_v38  ;;  %7309 = vmatpush2.msra.mxu1 %v6758_v40  ;;  %v6493_v38 = vld [vmem:[%s12597_s20 + $0x3d8] sm:$0xff]  ;;  %v6490_v40 = vld [vmem:[%s12597_s20 + $0x3c0] sm:$0xff] }
0x272c   : > { %7239 = vmatprep.subr.mxu0 %v6739_v41  ;;  %7310 = vmatprep.subr.mxu1 %v6741_v27  ;;  %v6492_v41 = vld [vmem:[%s12597_s20 + $0x3d0] sm:$0xff]  ;;  %v6473_v27 = vld [vmem:[%s12597_s20 + $0x338] sm:$0xff] }
0x272d   : > { %7240 = vmatpush2.msra.mxu0 %v6738_v42  ;;  %7311 = vmatpush2.msra.mxu1 %v6740_v56  ;;  %v6475_v42 = vld [vmem:[%s12597_s20 + $0x348] sm:$0xff]  ;;  %v6472_v56 = vld [vmem:[%s12597_s20 + $0x330] sm:$0xff] }
0x272e   : > { %7241 = vmatprep.subr.mxu0 %v6721_v44  ;;  %7312 = vmatprep.subr.mxu1 %v6723_v45  ;;  %v6474_v44 = vld [vmem:[%s12597_s20 + $0x340] sm:$0xff]  ;;  %v6455_v45 = vld [vmem:[%s12597_s20 + $0x2a8] sm:$0xff] }
0x272f   : > { %7242 = vmatpush2.msra.mxu0 %v6720_v46  ;;  %7313 = vmatpush2.msra.mxu1 %v6722_v48  ;;  %v6457_v46 = vld [vmem:[%s12597_s20 + $0x2b8] sm:$0xff]  ;;  %v6454_v48 = vld [vmem:[%s12597_s20 + $0x2a0] sm:$0xff] }
0x2730   : > { %7243 = vmatprep.subr.mxu0 %v6703_v49  ;;  %7314 = vmatprep.subr.mxu1 %v6705_v51  ;;  %v6456_v49 = vld [vmem:[%s12597_s20 + $0x2b0] sm:$0xff]  ;;  %v6437_v51 = vld [vmem:[%s12597_s20 + $0x218] sm:$0xff] }
0x2731   : > { %7244 = vmatpush2.msra.mxu0 %v6702_v52  ;;  %7315 = vmatpush2.msra.mxu1 %v6704_v53  ;;  %v6439_v52 = vld [vmem:[%s12597_s20 + $0x228] sm:$0xff]  ;;  %v6436_v53 = vld [vmem:[%s12597_s20 + $0x210] sm:$0xff] }
0x2732   : > { %7245 = vmatprep.subr.mxu0 %v6685_v54  ;;  %7316 = vmatprep.subr.mxu1 %v6687_v55  ;;  %v6438_v54 = vld [vmem:[%s12597_s20 + $0x220] sm:$0xff]  ;;  %v6419_v55 = vld [vmem:[%s12597_s20 + $0x188] sm:$0xff] }
0x2733   : > { %7246 = vmatpush2.msra.mxu0 %v6684_v57  ;;  %7317 = vmatpush2.msra.mxu1 %v6686_v58  ;;  %v6421_v57 = vld [vmem:[%s12597_s20 + $0x198] sm:$0xff]  ;;  %v6418_v58 = vld [vmem:[%s12597_s20 + $0x180] sm:$0xff] }
0x2734   : > { %7247 = vmatprep.subr.mxu0 %v6667_v59  ;;  %7318 = vmatprep.subr.mxu1 %v6669_v60  ;;  %v6420_v59 = vld [vmem:[%s12597_s20 + $0x190] sm:$0xff]  ;;  %v6401_v60 = vld [vmem:[%s12597_s20 + $0xf8] sm:$0xff] }
0x2735   : > { %7248 = vmatpush2.msra.mxu0 %v6666_v61  ;;  %7319 = vmatpush2.msra.mxu1 %v6668_v62  ;;  %v6403_v61 = vld [vmem:[%s12597_s20 + $0x108] sm:$0xff]  ;;  %v6400_v62 = vld [vmem:[%s12597_s20 + $0xf0] sm:$0xff] }
0x2736   : > { %7250 = vmatmul.mubr.f32.vlgmr.msra.gmra.mxu0 %v11445_v50  ;;  %7321 = vmatmul.mubr.f32.vlgmr.msra.gmra.mxu1 %v11445_v50 }
0x2737   : > { %7327 = vmatprep.subr.mxu0 %v6653_v63  ;;  %7398 = vmatprep.subr.mxu1 %v6655_v11  ;;  %v6402_v63 = vld [vmem:[%s12597_s20 + $0x100] sm:$0xff]  ;;  %v6383_v11 = vld [vmem:[%s12597_s20 + $0x68] sm:$0xff] }
0x2738   : > { %7328 = vmatpush1.msra.mxu0 %v6652_v0  ;;  %7839 = vmatprep.mubr.msk.f32.mxu0 %vm6293_vm9, %v11437_v47  ;;  %v6385_v0 = vld [vmem:[%s12597_s20 + $0x78] sm:$0xff] }
0x2739   : > { %7399 = vmatpush1.msra.mxu1 %v6654_v1  ;;  %7840 = vmatprep.mubr.msk.f32.mxu1 %vm6293_vm9, %v11437_v47  ;;  %v6382_v1 = vld [vmem:[%s12597_s20 + $0x60] sm:$0xff] }
0x273a   : > { %7329 = vmatprep.subr.mxu0 %v6635_v2  ;;  %7400 = vmatprep.subr.mxu1 %v6637_v3  ;;  %v6384_v2 = vld [vmem:[%s12597_s20 + $0x70] sm:$0xff]  ;;  %v6797_v3 = vld [vmem:[%s12597_s20 + $0xd58] sm:$0xff] }
0x273b   : > { %7330 = vmatpush1.msra.mxu0 %v6634_v4  ;;  %7401 = vmatpush1.msra.mxu1 %v6636_v5  ;;  %v6799_v4 = vld [vmem:[%s12597_s20 + $0xd68] sm:$0xff]  ;;  %v6796_v5 = vld [vmem:[%s12597_s20 + $0xd50] sm:$0xff] }
0x273c   : > { %7331 = vmatprep.subr.mxu0 %v6617_v6  ;;  %7402 = vmatprep.subr.mxu1 %v6619_v7  ;;  %v6798_v6 = vld [vmem:[%s12597_s20 + $0xd60] sm:$0xff]  ;;  %v6779_v7 = vld [vmem:[%s12597_s20 + $0xcc8] sm:$0xff] }
0x273d   : > { %7332 = vmatpush1.msra.mxu0 %v6616_v8  ;;  %7403 = vmatpush1.msra.mxu1 %v6618_v9  ;;  %v6781_v8 = vld [vmem:[%s12597_s20 + $0xcd8] sm:$0xff]  ;;  %v6778_v9 = vld [vmem:[%s12597_s20 + $0xcc0] sm:$0xff] }
0x273e   : > { %7333 = vmatprep.subr.mxu0 %v6599_v22  ;;  %7404 = vmatprep.subr.mxu1 %v6601_v10  ;;  %v6780_v22 = vld [vmem:[%s12597_s20 + $0xcd0] sm:$0xff]  ;;  %v6761_v10 = vld [vmem:[%s12597_s20 + $0xc38] sm:$0xff] }
0x273f   : > { %7334 = vmatpush1.msra.mxu0 %v6598_v12  ;;  %7405 = vmatpush1.msra.mxu1 %v6600_v13  ;;  %v6763_v12 = vld [vmem:[%s12597_s20 + $0xc48] sm:$0xff]  ;;  %v6760_v13 = vld [vmem:[%s12597_s20 + $0xc30] sm:$0xff] }
0x2740   : > { %7335 = vmatprep.subr.mxu0 %v6581_v14  ;;  %7406 = vmatprep.subr.mxu1 %v6583_v15  ;;  %v6762_v14 = vld [vmem:[%s12597_s20 + $0xc40] sm:$0xff]  ;;  %v6743_v15 = vld [vmem:[%s12597_s20 + $0xba8] sm:$0xff] }
0x2741   : > { %7336 = vmatpush1.msra.mxu0 %v6580_v16  ;;  %7407 = vmatpush1.msra.mxu1 %v6582_v17  ;;  %v6745_v16 = vld [vmem:[%s12597_s20 + $0xbb8] sm:$0xff]  ;;  %v6742_v17 = vld [vmem:[%s12597_s20 + $0xba0] sm:$0xff] }
0x2742   : > { %7337 = vmatprep.subr.mxu0 %v6563_v18  ;;  %7408 = vmatprep.subr.mxu1 %v6565_v19  ;;  %v6744_v18 = vld [vmem:[%s12597_s20 + $0xbb0] sm:$0xff]  ;;  %v6725_v19 = vld [vmem:[%s12597_s20 + $0xb18] sm:$0xff] }
0x2743   : > { %7338 = vmatpush1.msra.mxu0 %v6562_v20  ;;  %7409 = vmatpush1.msra.mxu1 %v6564_v24  ;;  %v6727_v20 = vld [vmem:[%s12597_s20 + $0xb28] sm:$0xff]  ;;  %v6724_v24 = vld [vmem:[%s12597_s20 + $0xb10] sm:$0xff] }
0x2744   : > { %7339 = vmatprep.subr.mxu0 %v6545_v26  ;;  %7410 = vmatprep.subr.mxu1 %v6547_v28  ;;  %v6726_v26 = vld [vmem:[%s12597_s20 + $0xb20] sm:$0xff]  ;;  %v6707_v28 = vld [vmem:[%s12597_s20 + $0xa88] sm:$0xff] }
0x2745   : > { %7340 = vmatpush1.msra.mxu0 %v6544_v29  ;;  %7411 = vmatpush1.msra.mxu1 %v6546_v30  ;;  %v6709_v29 = vld [vmem:[%s12597_s20 + $0xa98] sm:$0xff]  ;;  %v6706_v30 = vld [vmem:[%s12597_s20 + $0xa80] sm:$0xff] }
0x2746   : > { %7341 = vmatprep.subr.mxu0 %v6527_v43  ;;  %7412 = vmatprep.subr.mxu1 %v6529_v31  ;;  %v6708_v43 = vld [vmem:[%s12597_s20 + $0xa90] sm:$0xff]  ;;  %v6689_v31 = vld [vmem:[%s12597_s20 + $0x9f8] sm:$0xff] }
0x2747   : > { %7342 = vmatpush1.msra.mxu0 %v6526_v32  ;;  %7413 = vmatpush1.msra.mxu1 %v6528_v33  ;;  %v6691_v32 = vld [vmem:[%s12597_s20 + $0xa08] sm:$0xff]  ;;  %v6688_v33 = vld [vmem:[%s12597_s20 + $0x9f0] sm:$0xff] }
0x2748   : > { %7343 = vmatprep.subr.mxu0 %v6509_v34  ;;  %7414 = vmatprep.subr.mxu1 %v6511_v35  ;;  %v6690_v34 = vld [vmem:[%s12597_s20 + $0xa00] sm:$0xff]  ;;  %v6671_v35 = vld [vmem:[%s12597_s20 + $0x968] sm:$0xff] }
0x2749   : > { %7344 = vmatpush1.msra.mxu0 %v6508_v36  ;;  %7415 = vmatpush1.msra.mxu1 %v6510_v37  ;;  %v6673_v36 = vld [vmem:[%s12597_s20 + $0x978] sm:$0xff]  ;;  %v6670_v37 = vld [vmem:[%s12597_s20 + $0x960] sm:$0xff] }
0x274a   : > { %7345 = vmatprep.subr.mxu0 %v6491_v39  ;;  %7416 = vmatprep.subr.mxu1 %v6493_v38  ;;  %v6672_v39 = vld [vmem:[%s12597_s20 + $0x970] sm:$0xff]  ;;  %v6657_v38 = vld [vmem:[%s12597_s20 + $0x8f8] sm:$0xff] }
0x274b   : > { %7346 = vmatpush1.msra.mxu0 %v6490_v40  ;;  %7417 = vmatpush1.msra.mxu1 %v6492_v41  ;;  %v6656_v40 = vld [vmem:[%s12597_s20 + $0x8f0] sm:$0xff]  ;;  %v6639_v41 = vld [vmem:[%s12597_s20 + $0x868] sm:$0xff] }
0x274c   : > { %7347 = vmatprep.subr.mxu0 %v6473_v27  ;;  %7418 = vmatprep.subr.mxu1 %v6475_v42  ;;  %v6638_v27 = vld [vmem:[%s12597_s20 + $0x860] sm:$0xff]  ;;  %v6621_v42 = vld [vmem:[%s12597_s20 + $0x7d8] sm:$0xff] }
0x274d   : > { %7348 = vmatpush1.msra.mxu0 %v6472_v56  ;;  %7419 = vmatpush1.msra.mxu1 %v6474_v44  ;;  %v6620_v56 = vld [vmem:[%s12597_s20 + $0x7d0] sm:$0xff]  ;;  %v6603_v44 = vld [vmem:[%s12597_s20 + $0x748] sm:$0xff] }
0x274e   : > { %7349 = vmatprep.subr.mxu0 %v6455_v45  ;;  %7420 = vmatprep.subr.mxu1 %v6457_v46  ;;  %v6585_v45 = vld [vmem:[%s12597_s20 + $0x6b8] sm:$0xff]  ;;  %v6584_v46 = vld [vmem:[%s12597_s20 + $0x6b0] sm:$0xff] }
0x274f   : > { %7350 = vmatpush1.msra.mxu0 %v6454_v48  ;;  %7421 = vmatpush1.msra.mxu1 %v6456_v49  ;;  %v6567_v48 = vld [vmem:[%s12597_s20 + $0x628] sm:$0xff]  ;;  %v6566_v49 = vld [vmem:[%s12597_s20 + $0x620] sm:$0xff] }
0x2750   : > { %7351 = vmatprep.subr.mxu0 %v6437_v51  ;;  %7422 = vmatprep.subr.mxu1 %v6439_v52  ;;  %v6549_v51 = vld [vmem:[%s12597_s20 + $0x598] sm:$0xff]  ;;  %v6548_v52 = vld [vmem:[%s12597_s20 + $0x590] sm:$0xff] }
0x2751   : > { %7352 = vmatpush1.msra.mxu0 %v6436_v53  ;;  %7423 = vmatpush1.msra.mxu1 %v6438_v54  ;;  %v6531_v53 = vld [vmem:[%s12597_s20 + $0x508] sm:$0xff]  ;;  %v6530_v54 = vld [vmem:[%s12597_s20 + $0x500] sm:$0xff] }
0x2752   : > { %7353 = vmatprep.subr.mxu0 %v6419_v55  ;;  %7424 = vmatprep.subr.mxu1 %v6421_v57  ;;  %v6513_v55 = vld [vmem:[%s12597_s20 + $0x478] sm:$0xff]  ;;  %v6512_v57 = vld [vmem:[%s12597_s20 + $0x470] sm:$0xff] }
0x2753   : > { %7354 = vmatpush1.msra.mxu0 %v6418_v58  ;;  %7425 = vmatpush1.msra.mxu1 %v6420_v59  ;;  %v6495_v58 = vld [vmem:[%s12597_s20 + $0x3e8] sm:$0xff]  ;;  %v6494_v59 = vld [vmem:[%s12597_s20 + $0x3e0] sm:$0xff] }
0x2754   : > { %7355 = vmatprep.subr.mxu0 %v6401_v60  ;;  %7426 = vmatprep.subr.mxu1 %v6403_v61  ;;  %v6477_v60 = vld [vmem:[%s12597_s20 + $0x358] sm:$0xff]  ;;  %v6476_v61 = vld [vmem:[%s12597_s20 + $0x350] sm:$0xff] }
0x2755   : > { %7356 = vmatpush1.msra.mxu0 %v6400_v62  ;;  %7427 = vmatpush1.msra.mxu1 %v6402_v63  ;;  %v6459_v62 = vld [vmem:[%s12597_s20 + $0x2c8] sm:$0xff]  ;;  %v6458_v63 = vld [vmem:[%s12597_s20 + $0x2c0] sm:$0xff] }
0x2756   : > { %7357 = vmatprep.subr.mxu0 %v6383_v11  ;;  %7428 = vmatprep.subr.mxu1 %v6385_v0  ;;  %v6441_v11 = vld [vmem:[%s12597_s20 + $0x238] sm:$0xff]  ;;  %v6440_v0 = vld [vmem:[%s12597_s20 + $0x230] sm:$0xff] }
0x2757   : > { %7358 = vmatpush1.msra.mxu0 %v6382_v1  ;;  %7429 = vmatpush1.msra.mxu1 %v6384_v2  ;;  %v6423_v1 = vld [vmem:[%s12597_s20 + $0x1a8] sm:$0xff]  ;;  %v6422_v2 = vld [vmem:[%s12597_s20 + $0x1a0] sm:$0xff] }
0x2758   : > { %7375 = vmatprep.subr.mxu0 %v6797_v3  ;;  %7446 = vmatprep.subr.mxu1 %v6799_v4  ;;  %v6405_v3 = vld [vmem:[%s12597_s20 + $0x118] sm:$0xff]  ;;  %v6404_v4 = vld [vmem:[%s12597_s20 + $0x110] sm:$0xff] }
0x2759   : > { %7376 = vmatpush2.msra.mxu0 %v6796_v5  ;;  %7447 = vmatpush2.msra.mxu1 %v6798_v6  ;;  %v6387_v5 = vld [vmem:[%s12597_s20 + $0x88] sm:$0xff]  ;;  %v6386_v6 = vld [vmem:[%s12597_s20 + $0x80] sm:$0xff] }
0x275a   : > { %7377 = vmatprep.subr.mxu0 %v6779_v7  ;;  %7448 = vmatprep.subr.mxu1 %v6781_v8  ;;  %v6801_v7 = vld [vmem:[%s12597_s20 + $0xd78] sm:$0xff]  ;;  %v6800_v8 = vld [vmem:[%s12597_s20 + $0xd70] sm:$0xff] }
0x275b   : > { %7378 = vmatpush2.msra.mxu0 %v6778_v9  ;;  %7449 = vmatpush2.msra.mxu1 %v6780_v22  ;;  %v6783_v9 = vld [vmem:[%s12597_s20 + $0xce8] sm:$0xff]  ;;  %v6782_v22 = vld [vmem:[%s12597_s20 + $0xce0] sm:$0xff] }
0x275c   : > { %7379 = vmatprep.subr.mxu0 %v6761_v10  ;;  %7450 = vmatprep.subr.mxu1 %v6763_v12  ;;  %v6765_v10 = vld [vmem:[%s12597_s20 + $0xc58] sm:$0xff]  ;;  %v6764_v12 = vld [vmem:[%s12597_s20 + $0xc50] sm:$0xff] }
0x275d   : > { %7380 = vmatpush2.msra.mxu0 %v6760_v13  ;;  %7451 = vmatpush2.msra.mxu1 %v6762_v14  ;;  %v6747_v13 = vld [vmem:[%s12597_s20 + $0xbc8] sm:$0xff]  ;;  %v6746_v14 = vld [vmem:[%s12597_s20 + $0xbc0] sm:$0xff] }
0x275e   : > { %7381 = vmatprep.subr.mxu0 %v6743_v15  ;;  %7452 = vmatprep.subr.mxu1 %v6745_v16  ;;  %v6729_v15 = vld [vmem:[%s12597_s20 + $0xb38] sm:$0xff]  ;;  %v6818_v16 = vsub.s32 2, %v11214_v21 }
0x275f   : > { %7382 = vmatpush2.msra.mxu0 %v6742_v17  ;;  %7453 = vmatpush2.msra.mxu1 %v6744_v18  ;;  %v6822_v17 = vsub.s32 3, %v11214_v21  ;;  %v6728_v18 = vld [vmem:[%s12597_s20 + $0xb30] sm:$0xff] }
0x2760   : > { %7383 = vmatprep.subr.mxu0 %v6725_v19  ;;  %7454 = vmatprep.subr.mxu1 %v6727_v20  ;;  %v6802_v19 = vld [vmem:[%s12600_s1] sm:$0xff]  ;;  %v6711_v20 = vld [vmem:[%s12597_s20 + $0xaa8] sm:$0xff] }
0x2761   : > { %7384 = vmatpush2.msra.mxu0 %v6724_v24  ;;  %7455 = vmatpush2.msra.mxu1 %v6726_v26  ;;  %v6710_v24 = vld [vmem:[%s12597_s20 + $0xaa0] sm:$0xff]  ;;  %v6693_v26 = vld [vmem:[%s12597_s20 + $0xa18] sm:$0xff] }
0x2762   : > { %7385 = vmatprep.subr.mxu0 %v6707_v28  ;;  %7456 = vmatprep.subr.mxu1 %v6709_v29  ;;  %v6811_v28 = vrot.slane %v6802_v19, %v11217_v23  ;;  %v6819_v29 = vrot.slane %v6802_v19, %v6818_v16 }
0x2763   : > { %7386 = vmatpush2.msra.mxu0 %v6706_v30  ;;  %7457 = vmatpush2.msra.mxu1 %v6708_v43  ;;  %v6815_v30 = vrot.slane %v6802_v19, %v11223_v25  ;;  %v6823_v43 = vrot.slane %v6802_v19, %v6822_v17 }
0x2764   : > { %7387 = vmatprep.subr.mxu0 %v6689_v31  ;;  %7458 = vmatprep.subr.mxu1 %v6691_v32  ;;  %v6692_v31 = vld [vmem:[%s12597_s20 + $0xa10] sm:$0xff] }
0x2765   : > { %7388 = vmatpush2.msra.mxu0 %v6688_v33  ;;  %7459 = vmatpush2.msra.mxu1 %v6690_v34  ;;  %v6675_v34 = vld [vmem:[%s12597_s20 + $0x988] sm:$0xff] }
0x2766   : > { %7389 = vmatprep.subr.mxu0 %v6671_v35  ;;  %7460 = vmatprep.subr.mxu1 %v6673_v36  ;;  %v6674_v35 = vld [vmem:[%s12597_s20 + $0x980] sm:$0xff] }
0x2767   : > { %7390 = vmatpush2.msra.mxu0 %v6670_v37  ;;  %7461 = vmatpush2.msra.mxu1 %v6672_v39 }
0x2768   : > { %7392 = vmatmul.mubr.f32.vlgmr.msra.gmra.mxu0 %v11445_v50  ;;  %7463 = vmatmul.mubr.f32.vlgmr.msra.gmra.mxu1 %v11445_v50 }
0x2769   : > { %7469 = vmatprep.subr.mxu0 %v6657_v38  ;;  %7841 = vmatprep.mubr.msk.f32.mxu0 %vm6293_vm9, %v11437_v47  ;;  %v6602_v47 = vld [vmem:[%s12597_s20 + $0x740] sm:$0xff] }
0x276a   : > { %7470 = vmatpush1.msra.mxu0 %v6656_v40 }
0x276b   : > { %7471 = vmatprep.subr.mxu0 %v6639_v41 }
0x276c   : > { %7472 = vmatpush1.msra.mxu0 %v6638_v27 }
0x276d   : > { %7473 = vmatprep.subr.mxu0 %v6621_v42 }
0x276e   : > { %7474 = vmatpush1.msra.mxu0 %v6620_v56  ;;  %v6826_v56 = vsub.s32 4, %v11214_v21 }
0x276f   : > { %7475 = vmatprep.subr.mxu0 %v6603_v44  ;;  %v6834_v44 = vsub.s32 6, %v11214_v21 }
0x2770   : > { %7476 = vmatpush1.msra.mxu0 %v6602_v47  ;;  %v6830_v47 = vsub.s32 5, %v11214_v21 }
0x2771   : > { %7477 = vmatprep.subr.mxu0 %v6585_v45  ;;  %v6838_v45 = vsub.s32 7, %v11214_v21  ;;  %v6803_v21 = vld [vmem:[%s12600_s1 + $0x8] sm:$0xff] }
0x2772   : > { %7478 = vmatpush1.msra.mxu0 %v6584_v46  ;;  %v6827_v46 = vrot.slane %v6802_v19, %v6826_v56 }
0x2773   : > { %7479 = vmatprep.subr.mxu0 %v6567_v48  ;;  %v6835_v48 = vrot.slane %v6802_v19, %v6834_v44 }
0x2774   : > { %7480 = vmatpush1.msra.mxu0 %v6566_v49  ;;  %v6831_v49 = vrot.slane %v6802_v19, %v6830_v47 }
0x2775   : > { %7481 = vmatprep.subr.mxu0 %v6549_v51  ;;  %v6839_v51 = vrot.slane %v6802_v19, %v6838_v45 }
0x2776   : > { %7482 = vmatpush1.msra.mxu0 %v6548_v52 }
0x2777   : > { %7483 = vmatprep.subr.mxu0 %v6531_v53 }
0x2778   : > { %7484 = vmatpush1.msra.mxu0 %v6530_v54 }
0x2779   : > { %7485 = vmatprep.subr.mxu0 %v6513_v55 }
0x277a   : > { %7486 = vmatpush1.msra.mxu0 %v6512_v57 }
0x277b   : > { %7487 = vmatprep.subr.mxu0 %v6495_v58 }
0x277c   : > { %7488 = vmatpush1.msra.mxu0 %v6494_v59 }
0x277d   : > { %7489 = vmatprep.subr.mxu0 %v6477_v60 }
0x277e   : > { %7490 = vmatpush1.msra.mxu0 %v6476_v61 }
0x277f   : > { %7491 = vmatprep.subr.mxu0 %v6459_v62  ;;  %v6843_v62 = vrot.slane %v6803_v21, %v11217_v23 }
0x2780   : > { %7492 = vmatpush1.msra.mxu0 %v6458_v63  ;;  %v6851_v63 = vrot.slane %v6803_v21, %v6818_v16 }
0x2781   : > { %7493 = vmatprep.subr.mxu0 %v6441_v11  ;;  %v6847_v11 = vrot.slane %v6803_v21, %v11223_v25 }
0x2782   : > { %7494 = vmatpush1.msra.mxu0 %v6440_v0  ;;  %v6855_v0 = vrot.slane %v6803_v21, %v6822_v17 }
0x2783   : > { %7495 = vmatprep.subr.mxu0 %v6423_v1 }
0x2784   : > { %7496 = vmatpush1.msra.mxu0 %v6422_v2 }
0x2785   : > { %7497 = vmatprep.subr.mxu0 %v6405_v3 }
0x2786   : > { %7498 = vmatpush1.msra.mxu0 %v6404_v4 }
0x2787   : > { %7499 = vmatprep.subr.mxu0 %v6387_v5 }
0x2788   : > { %7500 = vmatpush1.msra.mxu0 %v6386_v6 }
0x2789   : > { %7517 = vmatprep.subr.mxu0 %v6801_v7 }
0x278a   : > { %7518 = vmatpush2.msra.mxu0 %v6800_v8 }
0x278b   : > { %7519 = vmatprep.subr.mxu0 %v6783_v9 }
0x278c   : > { %7520 = vmatpush2.msra.mxu0 %v6782_v22 }
0x278d   : > { %7521 = vmatprep.subr.mxu0 %v6765_v10  ;;  %v6859_v10 = vrot.slane %v6803_v21, %v6826_v56 }
0x278e   : > { %7522 = vmatpush2.msra.mxu0 %v6764_v12  ;;  %v6867_v12 = vrot.slane %v6803_v21, %v6834_v44 }
0x278f   : > { %7523 = vmatprep.subr.mxu0 %v6747_v13  ;;  %v6863_v13 = vrot.slane %v6803_v21, %v6830_v47 }
0x2790   : > { %7524 = vmatpush2.msra.mxu0 %v6746_v14  ;;  %v6871_v14 = vrot.slane %v6803_v21, %v6838_v45 }
0x2791   : > { %7525 = vmatprep.subr.mxu0 %v6729_v15 }
0x2792   : > { %7526 = vmatpush2.msra.mxu0 %v6728_v18 }
0x2793   : > { %7527 = vmatprep.subr.mxu0 %v6711_v20  ;;  %v6967_v32 = vpop.f32.mrf.mxu0  ;;  %v7038_v33 = vpop.f32.mrf.mxu1 }
0x2794   : > { %7528 = vmatpush2.msra.mxu0 %v6710_v24  ;;  %v6968_v39 = vadd.f32 %v6967_v32, %v6811_v28  ;;  %v7039_v38 = vadd.f32 %v7038_v33, %v6819_v29 }
0x2795   : > { %7529 = vmatprep.subr.mxu0 %v6693_v26  ;;  %v6969_v36 = vpop.f32.mrf.mxu0  ;;  %v7040_v37 = vpop.f32.mrf.mxu1 }
0x2796   : > { %7530 = vmatpush2.msra.mxu0 %v6692_v31  ;;  %v6970_v40 = vadd.f32 %v6969_v36, %v6815_v30  ;;  %v7041_v41 = vadd.f32 %v7040_v37, %v6823_v43  ;;  %v6804_v30 = vld [vmem:[%s12600_s1 + $0x10] sm:$0x3] }
0x2797   : > { %7531 = vmatprep.subr.mxu0 %v6675_v34  ;;  %v6875_v43 = vrot.slane %v6804_v30, %v11217_v23  ;;  %v6879_v31 = vrot.slane %v6804_v30, %v11223_v25 }
0x2798   : > { %7532 = vmatpush2.msra.mxu0 %v6674_v35  ;;  %v7558_v27 = vcombine.low %v6968_v39, %v6970_v40  ;;  %v7559_v42 = vcombine.low %v7039_v38, %v7041_v41 }
0x2799   : > { %7534 = vmatmul.mubr.f32.vlgmr.msra.gmra.mxu0 %v11445_v50 }
0x279a   : > { %7576 = vst [vmem:[%s12481_s0] sm:$0xff] %v7558_v27  ;;  %7577 = vst [vmem:[%s12481_s0 + $0x8] sm:$0xff] %v7559_v42 }
0x27c4   : > { %v7109_v52 = vpop.f32.mrf.mxu0  ;;  %v7180_v53 = vpop.f32.mrf.mxu1 }
0x27c5   : > { %v7110_v55 = vadd.f32 %v7109_v52, %v6827_v46  ;;  %v7181_v57 = vadd.f32 %v7180_v53, %v6835_v48 }
0x27c6   : > { %v7111_v54 = vpop.f32.mrf.mxu0  ;;  %v7182_v50 = vpop.f32.mrf.mxu1 }
0x27c7   : > { %v7112_v58 = vadd.f32 %v7111_v54, %v6831_v49  ;;  %v7183_v59 = vadd.f32 %v7182_v50, %v6839_v51 }
0x27c9   : > { %v7560_v60 = vcombine.low %v7110_v55, %v7112_v58  ;;  %v7561_v61 = vcombine.low %v7181_v57, %v7183_v59 }
0x27cb   : > { %7578 = vst [vmem:[%s12481_s0 + $0x10] sm:$0xff] %v7560_v60  ;;  %7579 = vst [vmem:[%s12481_s0 + $0x18] sm:$0xff] %v7561_v61 }
0x27f6   : > { %v7251_v1 = vpop.f32.mrf.mxu0  ;;  %v7322_v2 = vpop.f32.mrf.mxu1 }
0x27f7   : > { %v7252_v5 = vadd.f32 %v7251_v1, %v6843_v62  ;;  %v7323_v6 = vadd.f32 %v7322_v2, %v6851_v63 }
0x27f8   : > { %v7253_v3 = vpop.f32.mrf.mxu0  ;;  %v7324_v4 = vpop.f32.mrf.mxu1 }
0x27f9   : > { %v7254_v7 = vadd.f32 %v7253_v3, %v6847_v11  ;;  %v7325_v8 = vadd.f32 %v7324_v4, %v6855_v0 }
0x27fb   : > { %v7562_v9 = vcombine.low %v7252_v5, %v7254_v7  ;;  %v7563_v22 = vcombine.low %v7323_v6, %v7325_v8 }
0x27fd   : > { %7580 = vst [vmem:[%s12481_s0 + $0x20] sm:$0xff] %v7562_v9  ;;  %7581 = vst [vmem:[%s12481_s0 + $0x28] sm:$0xff] %v7563_v22 }
0x2828   : > { %v7393_v15 = vpop.f32.mrf.mxu0  ;;  %v7464_v16 = vpop.f32.mrf.mxu1 }
0x2829   : > { %v7394_v19 = vadd.f32 %v7393_v15, %v6859_v10  ;;  %v7465_v20 = vadd.f32 %v7464_v16, %v6867_v12 }
0x282a   : > { %v7395_v17 = vpop.f32.mrf.mxu0  ;;  %v7466_v18 = vpop.f32.mrf.mxu1 }
0x282b   : > { %v7396_v24 = vadd.f32 %v7395_v17, %v6863_v13  ;;  %v7467_v26 = vadd.f32 %v7466_v18, %v6871_v14 }
0x282d   : > { %v7564_v28 = vcombine.low %v7394_v19, %v7396_v24  ;;  %v7565_v29 = vcombine.low %v7465_v20, %v7467_v26 }
0x282f   : > { %7582 = vst [vmem:[%s12481_s0 + $0x30] sm:$0xff] %v7564_v28  ;;  %7583 = vst [vmem:[%s12481_s0 + $0x38] sm:$0xff] %v7565_v29 }
0x2859   : > { %v7535_v32 = vpop.f32.mrf.mxu0 }
0x285a   : > { %v7536_v34 = vadd.f32 %v7535_v32, %v6875_v43 }
0x285b   : > { %v7537_v33 = vpop.f32.mrf.mxu0 }
0x285c   : > { %v7538_v35 = vadd.f32 %v7537_v33, %v6879_v31 }
0x285e   : > { %v7566_v36 = vcombine.low %v7536_v34, %v7538_v35 }
0x2860   : > { %7584 = vst [vmem:[%s12481_s0 + $0x40] sm:$0xff] %v7566_v36 }
0x2861 PF: > { %s12604_s4 = sld [smem:[#allocation2_spill]] }
0x2867   : > { %s33_s4 = sadd.s32 1, %s12604_s4  }
0x2868   : > { %p30_p4 = scmp.ge.s32.totalorder %s33_s4, 4  }
0x286a   :  { %32 = sbr.rel (!%p30_p4) target bundleno = 15 (0xf), region = 154 }

</bundles_post_ra>
